<compile_context>
chip_gen: v7x
topology: tpu7x:2x2x1
jax: 0.10.0
libtpu: 0.0.40
codegen_flags: <defaults>
</compile_context>

<pallas_src>
import functools

import numpy as np
import jax
import jax.numpy as jnp
from jax.experimental import pallas as pl
from jax.experimental.pallas import tpu as pltpu

# ----------------------------------------------------------------------------
# Static model geometry
# ----------------------------------------------------------------------------
H_IN, W_IN = 40, 28            # input image (B, 1, 40, 28)
H1, W1 = H_IN // 2, W_IN // 2  # 20, 14  after pool1
H2, W2 = H1 // 2, W1 // 2      # 10, 7   after pool2
C1, C2 = 32, 64                # conv channel counts
S1 = W1 + 2                    # 16: conv2-input W slots (zero pad | 14 cols | zero pad)
S2 = 8                         # conv2-output pooled W slots (7 real + 1 zero)
N1 = 2 * S1 * C1               # 1024: conv1 banded output lanes (parity, slot, c)
K2 = S1 * C1                   # 512 : conv2 contraction lanes (slot, cin)
N2 = 2 * S2 * C2               # 1024: conv2 banded output lanes (parity, slot, c)
M2 = S2 * C2                   # 512 : fc1 image contraction lanes per row (slot, c)
NFC = 128                      # fc1 width; also lane-padded class dimension


# ----------------------------------------------------------------------------
# Fused kernel (one batch element per grid step)
# ----------------------------------------------------------------------------
def _hybrid_cnn_kernel(img_ref, feat_ref, w1b_ref, b1b_ref, w2b_ref, b2b_ref,
                       wf1i_ref, wf1f_ref, bf1_ref, wf2_ref, bf2_ref,
                       out_ref, h1pad_ref):
    f32 = jnp.float32
    bf16 = jnp.bfloat16

    # ---- conv1 + bias + ReLU as 3 banded MXU matmuls over the padded W axis --
    acc1 = jnp.dot(img_ref[0, 0:H_IN, :], w1b_ref[0], preferred_element_type=f32)
    acc1 += jnp.dot(img_ref[0, 1:H_IN + 1, :], w1b_ref[1], preferred_element_type=f32)
    acc1 += jnp.dot(img_ref[0, 2:H_IN + 2, :], w1b_ref[2], preferred_element_type=f32)
    acc1 = jnp.maximum(acc1 + b1b_ref[...], 0.0)          # (40, 1024) f32
    # W-half of the 2x2 max pool: lanes are (parity, slot, c) -> max of halves.
    p1 = jnp.maximum(acc1[:, :K2], acc1[:, K2:])          # (40, 512)

    # H-half of the pool, written into the zero-padded conv2 input scratch.
    zero_row = jnp.zeros((1, K2), bf16)
    h1pad_ref[0:1, :] = zero_row                          # top H padding
    h1pad_ref[H1 + 1:H1 + 2, :] = zero_row                # bottom H padding
    for u in range(H1):
        row = jnp.maximum(p1[2 * u:2 * u + 1, :], p1[2 * u + 1:2 * u + 2, :])
        h1pad_ref[u + 1:u + 2, :] = row.astype(bf16)

    # ---- conv2 + bias + ReLU as 3 banded MXU matmuls over (W slot, cin) ------
    acc2 = jnp.dot(h1pad_ref[0:H1, :], w2b_ref[0], preferred_element_type=f32)
    acc2 += jnp.dot(h1pad_ref[1:H1 + 1, :], w2b_ref[1], preferred_element_type=f32)
    acc2 += jnp.dot(h1pad_ref[2:H1 + 2, :], w2b_ref[2], preferred_element_type=f32)
    acc2 = jnp.maximum(acc2 + b2b_ref[...], 0.0)          # (20, 1024) f32
    p2 = jnp.maximum(acc2[:, :M2], acc2[:, M2:])          # (20, 512)  W-pooled

    # ---- fc1: features part + 10 (H-pooled) image row matmuls, then ReLU -----
    y = bf1_ref[...] + jnp.dot(feat_ref[0], wf1f_ref[...], preferred_element_type=f32)
    for hh in range(H2):
        a = jnp.maximum(p2[2 * hh:2 * hh + 1, :],
                        p2[2 * hh + 1:2 * hh + 2, :]).astype(bf16)   # (1, 512)
        y += jnp.dot(a, wf1i_ref[hh], preferred_element_type=f32)
    y = jnp.maximum(y, 0.0).astype(bf16)                  # (1, 128)

    # ---- fc2 (class dim lane-padded to 128 for a dense store) ----------------
    out = jnp.dot(y, wf2_ref[...], preferred_element_type=f32) + bf2_ref[...]
    out_ref[0] = out                                      # (1, 128)


# ----------------------------------------------------------------------------
# Wrapper
# ----------------------------------------------------------------------------
@functools.partial(jax.jit, static_argnames=("num_classes",))
def hybrid_cnn_forward(kparams, x_img, x_feat, *, num_classes):
    """x_img: (B, 1, 40, 28) NCHW, x_feat: (B, num_features). Returns (B, num_classes)."""
    B = x_img.shape[0]
    assert x_img.shape[1:] == (1, H_IN, W_IN), x_img.shape
    F = x_feat.shape[1]

    img = jnp.pad(x_img[:, 0], ((0, 0), (1, 1), (1, 1))).astype(jnp.bfloat16)  # (B, 42, 30)
    feat = x_feat.astype(jnp.bfloat16)[:, None, :]                              # (B, 1, F)

    def full(shape):
        return pl.BlockSpec(shape, lambda b, _s=shape: (0,) * len(_s))

    grid_spec = pltpu.PrefetchScalarGridSpec(
        num_scalar_prefetch=0,
        grid=(B,),
        in_specs=[
            pl.BlockSpec((1, H_IN + 2, W_IN + 2), lambda b: (b, 0, 0)),  # padded image
            pl.BlockSpec((1, 1, F), lambda b: (b, 0, 0)),                # features
            full((3, W_IN + 2, N1)),    # conv1 band
            full((1, N1)),              # conv1 bias band
            full((3, K2, N2)),          # conv2 band
            full((1, N2)),              # conv2 bias band
            full((H2, M2, NFC)),        # fc1 image weights (h, (slot, c), n)
            full((F, NFC)),             # fc1 feature weights
            full((1, NFC)),             # fc1 bias
            full((NFC, NFC)),           # fc2 weights (classes lane-padded)
            full((1, NFC)),             # fc2 bias   (classes lane-padded)
        ],
        out_specs=pl.BlockSpec((1, 1, NFC), lambda b: (b, 0, 0)),
        scratch_shapes=[pltpu.VMEM((H1 + 2, K2), jnp.bfloat16)],  # padded conv2 input
    )

    out = pl.pallas_call(
        _hybrid_cnn_kernel,
        out_shape=jax.ShapeDtypeStruct((B, 1, NFC), jnp.float32),
        grid_spec=grid_spec,
        compiler_params=pltpu.CompilerParams(
            dimension_semantics=("parallel",),          # batch axis -> v7x megacore
            vmem_limit_bytes=32 * 1024 * 1024,
        ),
    )(img, feat, kparams["w1_band"], kparams["b1_band"],
      kparams["w2_band"], kparams["b2_band"],
      kparams["wfc1_img"], kparams["wfc1_feat"], kparams["bfc1"],
      kparams["wfc2"], kparams["bfc2"])

    return out[:, 0, :num_classes]


# ----------------------------------------------------------------------------
# One-time host-side packing: torch-layout params -> banded / lane-padded params
# ----------------------------------------------------------------------------
def pack_params(params, num_classes, num_features):
    w1 = np.asarray(params["conv1_w"], np.float32)   # (32, 1, 3, 3)  [cout, cin, kh, kw]
    b1 = np.asarray(params["conv1_b"], np.float32)
    w2 = np.asarray(params["conv2_w"], np.float32)   # (64, 32, 3, 3)
    b2 = np.asarray(params["conv2_b"], np.float32)
    wf1 = np.asarray(params["fc1_w"], np.float32)    # (128, 4480 + F)
    bf1 = np.asarray(params["fc1_b"], np.float32)
    wf2 = np.asarray(params["fc2_w"], np.float32)    # (num_classes, 128)
    bf2 = np.asarray(params["fc2_b"], np.float32)
    assert wf1.shape[1] == C2 * H2 * W2 + num_features

    # conv1 band: input lane = padded W column; output lane = r*512 + s*32 + c.
    # Slot s holds pooled column s-1; slots 0 and 15 stay zero (conv2 W padding).
    w1_band = np.zeros((3, W_IN + 2, 2, S1, C1), np.float32)
    b1_band = np.zeros((2, S1, C1), np.float32)
    for r in range(2):
        for s in range(1, W1 + 1):
            j = 2 * (s - 1) + r                      # conv1 output column (0..27)
            for dw in range(3):                      # padded input column j + dw
                w1_band[:, j + dw, r, s, :] = w1[:, 0, :, dw].T     # [kh, cout]
            b1_band[r, s, :] = b1
    w1_band = w1_band.reshape(3, W_IN + 2, N1)
    b1_band = b1_band.reshape(1, N1)

    # conv2 band: input lane = s*32 + cin; output lane = r*512 + s2*64 + cout.
    w2_band = np.zeros((3, S1, C1, 2, S2, C2), np.float32)
    b2_band = np.zeros((2, S2, C2), np.float32)
    for r in range(2):
        for s2 in range(W2):
            j = 2 * s2 + r                           # conv2 output column (0..13)
            for dw in range(3):                      # input slot j + dw
                w2_band[:, j + dw, :, r, s2, :] = np.transpose(
                    w2[:, :, :, dw], (2, 1, 0))      # [kh, cin, cout]
            b2_band[r, s2, :] = b2
    w2_band = w2_band.reshape(3, K2, N2)
    b2_band = b2_band.reshape(1, N2)

    # fc1 image weights, pre-permuted from torch's (c, h, w) flatten to the
    # kernel's native (h, (slot, c)) layout (zero rows for the padding slot).
    wf1_img = wf1[:, :C2 * H2 * W2].reshape(NFC, C2, H2, W2)        # (n, c, h, w)
    wfc1_img = np.zeros((H2, S2, C2, NFC), np.float32)
    wfc1_img[:, :W2, :, :] = np.transpose(wf1_img, (2, 3, 1, 0))    # (h, w, c, n)
    wfc1_img = wfc1_img.reshape(H2, M2, NFC)
    wfc1_feat = np.ascontiguousarray(wf1[:, C2 * H2 * W2:].T)       # (F, 128)
    bfc1 = bf1.reshape(1, NFC)

    # fc2: lane-pad the class dimension to 128 for dense stores.
    wfc2 = np.zeros((NFC, NFC), np.float32)
    wfc2[:, :num_classes] = wf2.T
    bfc2 = np.zeros((1, NFC), np.float32)
    bfc2[0, :num_classes] = bf2

    tob = lambda a: jnp.asarray(a, jnp.bfloat16)
    tof = lambda a: jnp.asarray(a, jnp.float32)
    return {
        "w1_band": tob(w1_band), "b1_band": tof(b1_band),
        "w2_band": tob(w2_band), "b2_band": tof(b2_band),
        "wfc1_img": tob(wfc1_img), "wfc1_feat": tob(wfc1_feat), "bfc1": tof(bfc1),
        "wfc2": tob(wfc2), "bfc2": tof(bfc2),
    }


# ----------------------------------------------------------------------------
# Torch-style init and pure-JAX reference (for a correctness smoke test)
# ----------------------------------------------------------------------------
def init_params(key, num_classes, num_features):
    ks = jax.random.split(key, 8)

    def u(k, shape, fan_in):
        bound = 1.0 / float(np.sqrt(fan_in))
        return jax.random.uniform(k, shape, jnp.float32, -bound, bound)

    fc1_in = C2 * H2 * W2 + num_features
    return {
        "conv1_w": u(ks[0], (C1, 1, 3, 3), 9), "conv1_b": u(ks[1], (C1,), 9),
        "conv2_w": u(ks[2], (C2, C1, 3, 3), C1 * 9), "conv2_b": u(ks[3], (C2,), C1 * 9),
        "fc1_w": u(ks[4], (NFC, fc1_in), fc1_in), "fc1_b": u(ks[5], (NFC,), fc1_in),
        "fc2_w": u(ks[6], (num_classes, NFC), NFC), "fc2_b": u(ks[7], (num_classes,), NFC),
    }


def reference_forward(params, x_img, x_feat):
    def conv(x, w, b):
        y = jax.lax.conv_general_dilated(
            x, w, window_strides=(1, 1), padding=((1, 1), (1, 1)),
            dimension_numbers=("NCHW", "OIHW", "NCHW"))
        return jax.nn.relu(y + b[None, :, None, None])

    def pool(x):
        b, c, h, w = x.shape
        return x.reshape(b, c, h // 2, 2, w // 2, 2).max(axis=(3, 5))

    x = pool(conv(x_img, params["conv1_w"], params["conv1_b"]))
    x = pool(conv(x, params["conv2_w"], params["conv2_b"]))
    x = x.reshape(x.shape[0], -1)
    xc = jnp.concatenate([x, x_feat], axis=1)
    y = jax.nn.relu(xc @ params["fc1_w"].T + params["fc1_b"])
    return y @ params["fc2_w"].T + params["fc2_b"]


# ----------------------------------------------------------------------------
if __name__ == "__main__":
    num_classes, num_features, batch = 10, 8, 2

    key = jax.random.PRNGKey(0)
    k_img, k_feat, k_param = jax.random.split(key, 3)
    x_img = jax.random.normal(k_img, (batch, 1, H_IN, W_IN), jnp.float32)
    x_feat = jax.random.normal(k_feat, (batch, num_features), jnp.float32)

    params = init_params(k_param, num_classes, num_features)
    kparams = pack_params(params, num_classes, num_features)

    out = hybrid_cnn_forward(kparams, x_img, x_feat, num_classes=num_classes)
    out = jax.block_until_ready(out)
    assert out.shape == (batch, num_classes), out.shape
    assert bool(jnp.all(jnp.isfinite(out)))

    # Smoke-check against a pure-JAX reference (loose tol: bf16 matmul operands).
    ref = reference_forward(params, x_img, x_feat)
    max_err = float(jnp.max(jnp.abs(out - ref)))
    assert max_err < 0.05, f"kernel/reference mismatch: {max_err}"

    print("KERNEL_OK")
</pallas_src>

<mosaic_0001>
module attributes {stable_mosaic.version = 11 : i64} {
  func.func @_hybrid_cnn_kernel(%arg0: i32, %arg1: memref<1x42x30xbf16, #tpu.memory_space<vmem>>, %arg2: memref<1x1x8xbf16, #tpu.memory_space<vmem>>, %arg3: memref<3x30x1024xbf16, #tpu.memory_space<vmem>>, %arg4: memref<1x1024xf32, #tpu.memory_space<vmem>>, %arg5: memref<3x512x1024xbf16, #tpu.memory_space<vmem>>, %arg6: memref<1x1024xf32, #tpu.memory_space<vmem>>, %arg7: memref<10x512x128xbf16, #tpu.memory_space<vmem>>, %arg8: memref<8x128xbf16, #tpu.memory_space<vmem>>, %arg9: memref<1x128xf32, #tpu.memory_space<vmem>>, %arg10: memref<128x128xbf16, #tpu.memory_space<vmem>>, %arg11: memref<1x128xf32, #tpu.memory_space<vmem>>, %arg12: memref<1x1x128xf32, #tpu.memory_space<vmem>>, %arg13: memref<22x512xbf16, #tpu.memory_space<vmem>>) attributes {dimension_semantics = [#tpu.dimension_semantics<parallel>], iteration_bounds = array<i64: 2>, scalar_prefetch = 0 : i64, scratch_operands = 1 : i64, tpu.core_type = #tpu.core_type<tc>, window_params = [{transform_indices = @transform_0, window_bounds = array<i64: 1, 42, 30>}, {transform_indices = @transform_1, window_bounds = array<i64: 1, 1, 8>}, {pipeline_mode = #tpu.pipeline_mode<synchronous>, transform_indices = @transform_2, window_bounds = array<i64: 3, 30, 1024>}, {pipeline_mode = #tpu.pipeline_mode<synchronous>, transform_indices = @transform_3, window_bounds = array<i64: 1, 1024>}, {pipeline_mode = #tpu.pipeline_mode<synchronous>, transform_indices = @transform_4, window_bounds = array<i64: 3, 512, 1024>}, {pipeline_mode = #tpu.pipeline_mode<synchronous>, transform_indices = @transform_5, window_bounds = array<i64: 1, 1024>}, {pipeline_mode = #tpu.pipeline_mode<synchronous>, transform_indices = @transform_6, window_bounds = array<i64: 10, 512, 128>}, {pipeline_mode = #tpu.pipeline_mode<synchronous>, transform_indices = @transform_7, window_bounds = array<i64: 8, 128>}, {pipeline_mode = #tpu.pipeline_mode<synchronous>, transform_indices = @transform_8, window_bounds = array<i64: 1, 128>}, {pipeline_mode = #tpu.pipeline_mode<synchronous>, transform_indices = @transform_9, window_bounds = array<i64: 128, 128>}, {pipeline_mode = #tpu.pipeline_mode<synchronous>, transform_indices = @transform_10, window_bounds = array<i64: 1, 128>}, {transform_indices = @transform_11, window_bounds = array<i64: 1, 1, 128>}]} {
    %c0 = arith.constant 0 : index
    %c0_0 = arith.constant 0 : index
    %c0_1 = arith.constant 0 : index
    %0 = vector.load %arg1[%c0, %c0_0, %c0_1] : memref<1x42x30xbf16, #tpu.memory_space<vmem>>, vector<1x40x30xbf16>
    %1 = vector.shape_cast %0 : vector<1x40x30xbf16> to vector<40x30xbf16>
    %c0_2 = arith.constant 0 : index
    %c0_3 = arith.constant 0 : index
    %c0_4 = arith.constant 0 : index
    %2 = vector.load %arg3[%c0_2, %c0_3, %c0_4] : memref<3x30x1024xbf16, #tpu.memory_space<vmem>>, vector<1x30x1024xbf16>
    %3 = vector.shape_cast %2 : vector<1x30x1024xbf16> to vector<30x1024xbf16>
    %cst = arith.constant dense<0.000000e+00> : vector<40x1024xf32>
    %4 = tpu.matmul %1, %3, %cst {dimension_numbers = #tpu.dot_dimension_numbers<[1], [0], [0], [1], [0, 0, 1, 1], [], []>} : vector<40x30xbf16>, vector<30x1024xbf16>, vector<40x1024xf32> -> vector<40x1024xf32>
    %c0_5 = arith.constant 0 : index
    %c1 = arith.constant 1 : index
    %c0_6 = arith.constant 0 : index
    %5 = vector.load %arg1[%c0_5, %c1, %c0_6] : memref<1x42x30xbf16, #tpu.memory_space<vmem>>, vector<1x40x30xbf16>
    %6 = vector.shape_cast %5 : vector<1x40x30xbf16> to vector<40x30xbf16>
    %c1_7 = arith.constant 1 : index
    %c0_8 = arith.constant 0 : index
    %c0_9 = arith.constant 0 : index
    %7 = vector.load %arg3[%c1_7, %c0_8, %c0_9] : memref<3x30x1024xbf16, #tpu.memory_space<vmem>>, vector<1x30x1024xbf16>
    %8 = vector.shape_cast %7 : vector<1x30x1024xbf16> to vector<30x1024xbf16>
    %cst_10 = arith.constant dense<0.000000e+00> : vector<40x1024xf32>
    %9 = tpu.matmul %6, %8, %cst_10 {dimension_numbers = #tpu.dot_dimension_numbers<[1], [0], [0], [1], [0, 0, 1, 1], [], []>} : vector<40x30xbf16>, vector<30x1024xbf16>, vector<40x1024xf32> -> vector<40x1024xf32>
    %10 = arith.addf %4, %9 : vector<40x1024xf32>
    %c0_11 = arith.constant 0 : index
    %c2 = arith.constant 2 : index
    %c0_12 = arith.constant 0 : index
    %11 = vector.load %arg1[%c0_11, %c2, %c0_12] : memref<1x42x30xbf16, #tpu.memory_space<vmem>>, vector<1x40x30xbf16>
    %12 = vector.shape_cast %11 : vector<1x40x30xbf16> to vector<40x30xbf16>
    %c2_13 = arith.constant 2 : index
    %c0_14 = arith.constant 0 : index
    %c0_15 = arith.constant 0 : index
    %13 = vector.load %arg3[%c2_13, %c0_14, %c0_15] : memref<3x30x1024xbf16, #tpu.memory_space<vmem>>, vector<1x30x1024xbf16>
    %14 = vector.shape_cast %13 : vector<1x30x1024xbf16> to vector<30x1024xbf16>
    %cst_16 = arith.constant dense<0.000000e+00> : vector<40x1024xf32>
    %15 = tpu.matmul %12, %14, %cst_16 {dimension_numbers = #tpu.dot_dimension_numbers<[1], [0], [0], [1], [0, 0, 1, 1], [], []>} : vector<40x30xbf16>, vector<30x1024xbf16>, vector<40x1024xf32> -> vector<40x1024xf32>
    %16 = arith.addf %10, %15 : vector<40x1024xf32>
    %c0_17 = arith.constant 0 : index
    %c0_18 = arith.constant 0 : index
    %17 = vector.load %arg4[%c0_17, %c0_18] : memref<1x1024xf32, #tpu.memory_space<vmem>>, vector<1x1024xf32>
    %18 = vector.broadcast %17 : vector<1x1024xf32> to vector<40x1024xf32>
    %19 = arith.addf %16, %18 : vector<40x1024xf32>
    %cst_19 = arith.constant 0.000000e+00 : f32
    %20 = vector.broadcast %cst_19 : f32 to vector<40x1024xf32>
    %21 = arith.maximumf %19, %20 : vector<40x1024xf32>
    %22 = vector.extract_strided_slice %21 {offsets = [0, 0], sizes = [40, 512], strides = [1, 1]} : vector<40x1024xf32> to vector<40x512xf32>
    %23 = vector.extract_strided_slice %21 {offsets = [0, 512], sizes = [40, 512], strides = [1, 1]} : vector<40x1024xf32> to vector<40x512xf32>
    %24 = arith.maximumf %22, %23 : vector<40x512xf32>
    %cst_20 = arith.constant 0.000000e+00 : bf16
    %25 = vector.broadcast %cst_20 : bf16 to vector<1x512xbf16>
    %c0_21 = arith.constant 0 : index
    %c0_22 = arith.constant 0 : index
    %26 = vector.load %arg13[%c0_21, %c0_22] : memref<22x512xbf16, #tpu.memory_space<vmem>>, vector<1x512xbf16>
    tpu.vector_store %arg13[%c0_21, %c0_22], %25 {strides = array<i32>} : memref<22x512xbf16, #tpu.memory_space<vmem>>, vector<1x512xbf16>,
    %c21 = arith.constant 21 : index
    %c0_23 = arith.constant 0 : index
    %27 = vector.load %arg13[%c21, %c0_23] : memref<22x512xbf16, #tpu.memory_space<vmem>>, vector<1x512xbf16>
    tpu.vector_store %arg13[%c21, %c0_23], %25 {strides = array<i32>} : memref<22x512xbf16, #tpu.memory_space<vmem>>, vector<1x512xbf16>,
    %28 = vector.extract_strided_slice %24 {offsets = [0, 0], sizes = [1, 512], strides = [1, 1]} : vector<40x512xf32> to vector<1x512xf32>
    %29 = vector.extract_strided_slice %24 {offsets = [1, 0], sizes = [1, 512], strides = [1, 1]} : vector<40x512xf32> to vector<1x512xf32>
    %30 = arith.maximumf %28, %29 : vector<1x512xf32>
    %31 = arith.truncf %30 : vector<1x512xf32> to vector<1x512xbf16>
    %c1_24 = arith.constant 1 : index
    %c0_25 = arith.constant 0 : index
    %32 = vector.load %arg13[%c1_24, %c0_25] : memref<22x512xbf16, #tpu.memory_space<vmem>>, vector<1x512xbf16>
    tpu.vector_store %arg13[%c1_24, %c0_25], %31 {strides = array<i32>} : memref<22x512xbf16, #tpu.memory_space<vmem>>, vector<1x512xbf16>,
    %33 = vector.extract_strided_slice %24 {offsets = [2, 0], sizes = [1, 512], strides = [1, 1]} : vector<40x512xf32> to vector<1x512xf32>
    %34 = vector.extract_strided_slice %24 {offsets = [3, 0], sizes = [1, 512], strides = [1, 1]} : vector<40x512xf32> to vector<1x512xf32>
    %35 = arith.maximumf %33, %34 : vector<1x512xf32>
    %36 = arith.truncf %35 : vector<1x512xf32> to vector<1x512xbf16>
    %c2_26 = arith.constant 2 : index
    %c0_27 = arith.constant 0 : index
    %37 = vector.load %arg13[%c2_26, %c0_27] : memref<22x512xbf16, #tpu.memory_space<vmem>>, vector<1x512xbf16>
    tpu.vector_store %arg13[%c2_26, %c0_27], %36 {strides = array<i32>} : memref<22x512xbf16, #tpu.memory_space<vmem>>, vector<1x512xbf16>,
    %38 = vector.extract_strided_slice %24 {offsets = [4, 0], sizes = [1, 512], strides = [1, 1]} : vector<40x512xf32> to vector<1x512xf32>
    %39 = vector.extract_strided_slice %24 {offsets = [5, 0], sizes = [1, 512], strides = [1, 1]} : vector<40x512xf32> to vector<1x512xf32>
    %40 = arith.maximumf %38, %39 : vector<1x512xf32>
    %41 = arith.truncf %40 : vector<1x512xf32> to vector<1x512xbf16>
    %c3 = arith.constant 3 : index
    %c0_28 = arith.constant 0 : index
    %42 = vector.load %arg13[%c3, %c0_28] : memref<22x512xbf16, #tpu.memory_space<vmem>>, vector<1x512xbf16>
    tpu.vector_store %arg13[%c3, %c0_28], %41 {strides = array<i32>} : memref<22x512xbf16, #tpu.memory_space<vmem>>, vector<1x512xbf16>,
    %43 = vector.extract_strided_slice %24 {offsets = [6, 0], sizes = [1, 512], strides = [1, 1]} : vector<40x512xf32> to vector<1x512xf32>
    %44 = vector.extract_strided_slice %24 {offsets = [7, 0], sizes = [1, 512], strides = [1, 1]} : vector<40x512xf32> to vector<1x512xf32>
    %45 = arith.maximumf %43, %44 : vector<1x512xf32>
    %46 = arith.truncf %45 : vector<1x512xf32> to vector<1x512xbf16>
    %c4 = arith.constant 4 : index
    %c0_29 = arith.constant 0 : index
    %47 = vector.load %arg13[%c4, %c0_29] : memref<22x512xbf16, #tpu.memory_space<vmem>>, vector<1x512xbf16>
    tpu.vector_store %arg13[%c4, %c0_29], %46 {strides = array<i32>} : memref<22x512xbf16, #tpu.memory_space<vmem>>, vector<1x512xbf16>,
    %48 = vector.extract_strided_slice %24 {offsets = [8, 0], sizes = [1, 512], strides = [1, 1]} : vector<40x512xf32> to vector<1x512xf32>
    %49 = vector.extract_strided_slice %24 {offsets = [9, 0], sizes = [1, 512], strides = [1, 1]} : vector<40x512xf32> to vector<1x512xf32>
    %50 = arith.maximumf %48, %49 : vector<1x512xf32>
    %51 = arith.truncf %50 : vector<1x512xf32> to vector<1x512xbf16>
    %c5 = arith.constant 5 : index
    %c0_30 = arith.constant 0 : index
    %52 = vector.load %arg13[%c5, %c0_30] : memref<22x512xbf16, #tpu.memory_space<vmem>>, vector<1x512xbf16>
    tpu.vector_store %arg13[%c5, %c0_30], %51 {strides = array<i32>} : memref<22x512xbf16, #tpu.memory_space<vmem>>, vector<1x512xbf16>,
    %53 = vector.extract_strided_slice %24 {offsets = [10, 0], sizes = [1, 512], strides = [1, 1]} : vector<40x512xf32> to vector<1x512xf32>
    %54 = vector.extract_strided_slice %24 {offsets = [11, 0], sizes = [1, 512], strides = [1, 1]} : vector<40x512xf32> to vector<1x512xf32>
    %55 = arith.maximumf %53, %54 : vector<1x512xf32>
    %56 = arith.truncf %55 : vector<1x512xf32> to vector<1x512xbf16>
    %c6 = arith.constant 6 : index
    %c0_31 = arith.constant 0 : index
    %57 = vector.load %arg13[%c6, %c0_31] : memref<22x512xbf16, #tpu.memory_space<vmem>>, vector<1x512xbf16>
    tpu.vector_store %arg13[%c6, %c0_31], %56 {strides = array<i32>} : memref<22x512xbf16, #tpu.memory_space<vmem>>, vector<1x512xbf16>,
    %58 = vector.extract_strided_slice %24 {offsets = [12, 0], sizes = [1, 512], strides = [1, 1]} : vector<40x512xf32> to vector<1x512xf32>
    %59 = vector.extract_strided_slice %24 {offsets = [13, 0], sizes = [1, 512], strides = [1, 1]} : vector<40x512xf32> to vector<1x512xf32>
    %60 = arith.maximumf %58, %59 : vector<1x512xf32>
    %61 = arith.truncf %60 : vector<1x512xf32> to vector<1x512xbf16>
    %c7 = arith.constant 7 : index
    %c0_32 = arith.constant 0 : index
    %62 = vector.load %arg13[%c7, %c0_32] : memref<22x512xbf16, #tpu.memory_space<vmem>>, vector<1x512xbf16>
    tpu.vector_store %arg13[%c7, %c0_32], %61 {strides = array<i32>} : memref<22x512xbf16, #tpu.memory_space<vmem>>, vector<1x512xbf16>,
    %63 = vector.extract_strided_slice %24 {offsets = [14, 0], sizes = [1, 512], strides = [1, 1]} : vector<40x512xf32> to vector<1x512xf32>
    %64 = vector.extract_strided_slice %24 {offsets = [15, 0], sizes = [1, 512], strides = [1, 1]} : vector<40x512xf32> to vector<1x512xf32>
    %65 = arith.maximumf %63, %64 : vector<1x512xf32>
    %66 = arith.truncf %65 : vector<1x512xf32> to vector<1x512xbf16>
    %c8 = arith.constant 8 : index
    %c0_33 = arith.constant 0 : index
    %67 = vector.load %arg13[%c8, %c0_33] : memref<22x512xbf16, #tpu.memory_space<vmem>>, vector<1x512xbf16>
    tpu.vector_store %arg13[%c8, %c0_33], %66 {strides = array<i32>} : memref<22x512xbf16, #tpu.memory_space<vmem>>, vector<1x512xbf16>,
    %68 = vector.extract_strided_slice %24 {offsets = [16, 0], sizes = [1, 512], strides = [1, 1]} : vector<40x512xf32> to vector<1x512xf32>
    %69 = vector.extract_strided_slice %24 {offsets = [17, 0], sizes = [1, 512], strides = [1, 1]} : vector<40x512xf32> to vector<1x512xf32>
    %70 = arith.maximumf %68, %69 : vector<1x512xf32>
    %71 = arith.truncf %70 : vector<1x512xf32> to vector<1x512xbf16>
    %c9 = arith.constant 9 : index
    %c0_34 = arith.constant 0 : index
    %72 = vector.load %arg13[%c9, %c0_34] : memref<22x512xbf16, #tpu.memory_space<vmem>>, vector<1x512xbf16>
    tpu.vector_store %arg13[%c9, %c0_34], %71 {strides = array<i32>} : memref<22x512xbf16, #tpu.memory_space<vmem>>, vector<1x512xbf16>,
    %73 = vector.extract_strided_slice %24 {offsets = [18, 0], sizes = [1, 512], strides = [1, 1]} : vector<40x512xf32> to vector<1x512xf32>
    %74 = vector.extract_strided_slice %24 {offsets = [19, 0], sizes = [1, 512], strides = [1, 1]} : vector<40x512xf32> to vector<1x512xf32>
    %75 = arith.maximumf %73, %74 : vector<1x512xf32>
    %76 = arith.truncf %75 : vector<1x512xf32> to vector<1x512xbf16>
    %c10 = arith.constant 10 : index
    %c0_35 = arith.constant 0 : index
    %77 = vector.load %arg13[%c10, %c0_35] : memref<22x512xbf16, #tpu.memory_space<vmem>>, vector<1x512xbf16>
    tpu.vector_store %arg13[%c10, %c0_35], %76 {strides = array<i32>} : memref<22x512xbf16, #tpu.memory_space<vmem>>, vector<1x512xbf16>,
    %78 = vector.extract_strided_slice %24 {offsets = [20, 0], sizes = [1, 512], strides = [1, 1]} : vector<40x512xf32> to vector<1x512xf32>
    %79 = vector.extract_strided_slice %24 {offsets = [21, 0], sizes = [1, 512], strides = [1, 1]} : vector<40x512xf32> to vector<1x512xf32>
    %80 = arith.maximumf %78, %79 : vector<1x512xf32>
    %81 = arith.truncf %80 : vector<1x512xf32> to vector<1x512xbf16>
    %c11 = arith.constant 11 : index
    %c0_36 = arith.constant 0 : index
    %82 = vector.load %arg13[%c11, %c0_36] : memref<22x512xbf16, #tpu.memory_space<vmem>>, vector<1x512xbf16>
    tpu.vector_store %arg13[%c11, %c0_36], %81 {strides = array<i32>} : memref<22x512xbf16, #tpu.memory_space<vmem>>, vector<1x512xbf16>,
    %83 = vector.extract_strided_slice %24 {offsets = [22, 0], sizes = [1, 512], strides = [1, 1]} : vector<40x512xf32> to vector<1x512xf32>
    %84 = vector.extract_strided_slice %24 {offsets = [23, 0], sizes = [1, 512], strides = [1, 1]} : vector<40x512xf32> to vector<1x512xf32>
    %85 = arith.maximumf %83, %84 : vector<1x512xf32>
    %86 = arith.truncf %85 : vector<1x512xf32> to vector<1x512xbf16>
    %c12 = arith.constant 12 : index
    %c0_37 = arith.constant 0 : index
    %87 = vector.load %arg13[%c12, %c0_37] : memref<22x512xbf16, #tpu.memory_space<vmem>>, vector<1x512xbf16>
    tpu.vector_store %arg13[%c12, %c0_37], %86 {strides = array<i32>} : memref<22x512xbf16, #tpu.memory_space<vmem>>, vector<1x512xbf16>,
    %88 = vector.extract_strided_slice %24 {offsets = [24, 0], sizes = [1, 512], strides = [1, 1]} : vector<40x512xf32> to vector<1x512xf32>
    %89 = vector.extract_strided_slice %24 {offsets = [25, 0], sizes = [1, 512], strides = [1, 1]} : vector<40x512xf32> to vector<1x512xf32>
    %90 = arith.maximumf %88, %89 : vector<1x512xf32>
    %91 = arith.truncf %90 : vector<1x512xf32> to vector<1x512xbf16>
    %c13 = arith.constant 13 : index
    %c0_38 = arith.constant 0 : index
    %92 = vector.load %arg13[%c13, %c0_38] : memref<22x512xbf16, #tpu.memory_space<vmem>>, vector<1x512xbf16>
    tpu.vector_store %arg13[%c13, %c0_38], %91 {strides = array<i32>} : memref<22x512xbf16, #tpu.memory_space<vmem>>, vector<1x512xbf16>,
    %93 = vector.extract_strided_slice %24 {offsets = [26, 0], sizes = [1, 512], strides = [1, 1]} : vector<40x512xf32> to vector<1x512xf32>
    %94 = vector.extract_strided_slice %24 {offsets = [27, 0], sizes = [1, 512], strides = [1, 1]} : vector<40x512xf32> to vector<1x512xf32>
    %95 = arith.maximumf %93, %94 : vector<1x512xf32>
    %96 = arith.truncf %95 : vector<1x512xf32> to vector<1x512xbf16>
    %c14 = arith.constant 14 : index
    %c0_39 = arith.constant 0 : index
    %97 = vector.load %arg13[%c14, %c0_39] : memref<22x512xbf16, #tpu.memory_space<vmem>>, vector<1x512xbf16>
    tpu.vector_store %arg13[%c14, %c0_39], %96 {strides = array<i32>} : memref<22x512xbf16, #tpu.memory_space<vmem>>, vector<1x512xbf16>,
    %98 = vector.extract_strided_slice %24 {offsets = [28, 0], sizes = [1, 512], strides = [1, 1]} : vector<40x512xf32> to vector<1x512xf32>
    %99 = vector.extract_strided_slice %24 {offsets = [29, 0], sizes = [1, 512], strides = [1, 1]} : vector<40x512xf32> to vector<1x512xf32>
    %100 = arith.maximumf %98, %99 : vector<1x512xf32>
    %101 = arith.truncf %100 : vector<1x512xf32> to vector<1x512xbf16>
    %c15 = arith.constant 15 : index
    %c0_40 = arith.constant 0 : index
    %102 = vector.load %arg13[%c15, %c0_40] : memref<22x512xbf16, #tpu.memory_space<vmem>>, vector<1x512xbf16>
    tpu.vector_store %arg13[%c15, %c0_40], %101 {strides = array<i32>} : memref<22x512xbf16, #tpu.memory_space<vmem>>, vector<1x512xbf16>,
    %103 = vector.extract_strided_slice %24 {offsets = [30, 0], sizes = [1, 512], strides = [1, 1]} : vector<40x512xf32> to vector<1x512xf32>
    %104 = vector.extract_strided_slice %24 {offsets = [31, 0], sizes = [1, 512], strides = [1, 1]} : vector<40x512xf32> to vector<1x512xf32>
    %105 = arith.maximumf %103, %104 : vector<1x512xf32>
    %106 = arith.truncf %105 : vector<1x512xf32> to vector<1x512xbf16>
    %c16 = arith.constant 16 : index
    %c0_41 = arith.constant 0 : index
    %107 = vector.load %arg13[%c16, %c0_41] : memref<22x512xbf16, #tpu.memory_space<vmem>>, vector<1x512xbf16>
    tpu.vector_store %arg13[%c16, %c0_41], %106 {strides = array<i32>} : memref<22x512xbf16, #tpu.memory_space<vmem>>, vector<1x512xbf16>,
    %108 = vector.extract_strided_slice %24 {offsets = [32, 0], sizes = [1, 512], strides = [1, 1]} : vector<40x512xf32> to vector<1x512xf32>
    %109 = vector.extract_strided_slice %24 {offsets = [33, 0], sizes = [1, 512], strides = [1, 1]} : vector<40x512xf32> to vector<1x512xf32>
    %110 = arith.maximumf %108, %109 : vector<1x512xf32>
    %111 = arith.truncf %110 : vector<1x512xf32> to vector<1x512xbf16>
    %c17 = arith.constant 17 : index
    %c0_42 = arith.constant 0 : index
    %112 = vector.load %arg13[%c17, %c0_42] : memref<22x512xbf16, #tpu.memory_space<vmem>>, vector<1x512xbf16>
    tpu.vector_store %arg13[%c17, %c0_42], %111 {strides = array<i32>} : memref<22x512xbf16, #tpu.memory_space<vmem>>, vector<1x512xbf16>,
    %113 = vector.extract_strided_slice %24 {offsets = [34, 0], sizes = [1, 512], strides = [1, 1]} : vector<40x512xf32> to vector<1x512xf32>
    %114 = vector.extract_strided_slice %24 {offsets = [35, 0], sizes = [1, 512], strides = [1, 1]} : vector<40x512xf32> to vector<1x512xf32>
    %115 = arith.maximumf %113, %114 : vector<1x512xf32>
    %116 = arith.truncf %115 : vector<1x512xf32> to vector<1x512xbf16>
    %c18 = arith.constant 18 : index
    %c0_43 = arith.constant 0 : index
    %117 = vector.load %arg13[%c18, %c0_43] : memref<22x512xbf16, #tpu.memory_space<vmem>>, vector<1x512xbf16>
    tpu.vector_store %arg13[%c18, %c0_43], %116 {strides = array<i32>} : memref<22x512xbf16, #tpu.memory_space<vmem>>, vector<1x512xbf16>,
    %118 = vector.extract_strided_slice %24 {offsets = [36, 0], sizes = [1, 512], strides = [1, 1]} : vector<40x512xf32> to vector<1x512xf32>
    %119 = vector.extract_strided_slice %24 {offsets = [37, 0], sizes = [1, 512], strides = [1, 1]} : vector<40x512xf32> to vector<1x512xf32>
    %120 = arith.maximumf %118, %119 : vector<1x512xf32>
    %121 = arith.truncf %120 : vector<1x512xf32> to vector<1x512xbf16>
    %c19 = arith.constant 19 : index
    %c0_44 = arith.constant 0 : index
    %122 = vector.load %arg13[%c19, %c0_44] : memref<22x512xbf16, #tpu.memory_space<vmem>>, vector<1x512xbf16>
    tpu.vector_store %arg13[%c19, %c0_44], %121 {strides = array<i32>} : memref<22x512xbf16, #tpu.memory_space<vmem>>, vector<1x512xbf16>,
    %123 = vector.extract_strided_slice %24 {offsets = [38, 0], sizes = [1, 512], strides = [1, 1]} : vector<40x512xf32> to vector<1x512xf32>
    %124 = vector.extract_strided_slice %24 {offsets = [39, 0], sizes = [1, 512], strides = [1, 1]} : vector<40x512xf32> to vector<1x512xf32>
    %125 = arith.maximumf %123, %124 : vector<1x512xf32>
    %126 = arith.truncf %125 : vector<1x512xf32> to vector<1x512xbf16>
    %c20 = arith.constant 20 : index
    %c0_45 = arith.constant 0 : index
    %127 = vector.load %arg13[%c20, %c0_45] : memref<22x512xbf16, #tpu.memory_space<vmem>>, vector<1x512xbf16>
    tpu.vector_store %arg13[%c20, %c0_45], %126 {strides = array<i32>} : memref<22x512xbf16, #tpu.memory_space<vmem>>, vector<1x512xbf16>,
    %c0_46 = arith.constant 0 : index
    %c0_47 = arith.constant 0 : index
    %128 = vector.load %arg13[%c0_46, %c0_47] : memref<22x512xbf16, #tpu.memory_space<vmem>>, vector<20x512xbf16>
    %c0_48 = arith.constant 0 : index
    %c0_49 = arith.constant 0 : index
    %c0_50 = arith.constant 0 : index
    %129 = vector.load %arg5[%c0_48, %c0_49, %c0_50] : memref<3x512x1024xbf16, #tpu.memory_space<vmem>>, vector<1x512x1024xbf16>
    %130 = vector.shape_cast %129 : vector<1x512x1024xbf16> to vector<512x1024xbf16>
    %cst_51 = arith.constant dense<0.000000e+00> : vector<20x1024xf32>
    %131 = tpu.matmul %128, %130, %cst_51 {dimension_numbers = #tpu.dot_dimension_numbers<[1], [0], [0], [1], [0, 0, 1, 1], [], []>} : vector<20x512xbf16>, vector<512x1024xbf16>, vector<20x1024xf32> -> vector<20x1024xf32>
    %c1_52 = arith.constant 1 : index
    %c0_53 = arith.constant 0 : index
    %132 = vector.load %arg13[%c1_52, %c0_53] : memref<22x512xbf16, #tpu.memory_space<vmem>>, vector<20x512xbf16>
    %c1_54 = arith.constant 1 : index
    %c0_55 = arith.constant 0 : index
    %c0_56 = arith.constant 0 : index
    %133 = vector.load %arg5[%c1_54, %c0_55, %c0_56] : memref<3x512x1024xbf16, #tpu.memory_space<vmem>>, vector<1x512x1024xbf16>
    %134 = vector.shape_cast %133 : vector<1x512x1024xbf16> to vector<512x1024xbf16>
    %cst_57 = arith.constant dense<0.000000e+00> : vector<20x1024xf32>
    %135 = tpu.matmul %132, %134, %cst_57 {dimension_numbers = #tpu.dot_dimension_numbers<[1], [0], [0], [1], [0, 0, 1, 1], [], []>} : vector<20x512xbf16>, vector<512x1024xbf16>, vector<20x1024xf32> -> vector<20x1024xf32>
    %136 = arith.addf %131, %135 : vector<20x1024xf32>
    %c2_58 = arith.constant 2 : index
    %c0_59 = arith.constant 0 : index
    %137 = vector.load %arg13[%c2_58, %c0_59] : memref<22x512xbf16, #tpu.memory_space<vmem>>, vector<20x512xbf16>
    %c2_60 = arith.constant 2 : index
    %c0_61 = arith.constant 0 : index
    %c0_62 = arith.constant 0 : index
    %138 = vector.load %arg5[%c2_60, %c0_61, %c0_62] : memref<3x512x1024xbf16, #tpu.memory_space<vmem>>, vector<1x512x1024xbf16>
    %139 = vector.shape_cast %138 : vector<1x512x1024xbf16> to vector<512x1024xbf16>
    %cst_63 = arith.constant dense<0.000000e+00> : vector<20x1024xf32>
    %140 = tpu.matmul %137, %139, %cst_63 {dimension_numbers = #tpu.dot_dimension_numbers<[1], [0], [0], [1], [0, 0, 1, 1], [], []>} : vector<20x512xbf16>, vector<512x1024xbf16>, vector<20x1024xf32> -> vector<20x1024xf32>
    %141 = arith.addf %136, %140 : vector<20x1024xf32>
    %c0_64 = arith.constant 0 : index
    %c0_65 = arith.constant 0 : index
    %142 = vector.load %arg6[%c0_64, %c0_65] : memref<1x1024xf32, #tpu.memory_space<vmem>>, vector<1x1024xf32>
    %143 = vector.broadcast %142 : vector<1x1024xf32> to vector<20x1024xf32>
    %144 = arith.addf %141, %143 : vector<20x1024xf32>
    %cst_66 = arith.constant 0.000000e+00 : f32
    %145 = vector.broadcast %cst_66 : f32 to vector<20x1024xf32>
    %146 = arith.maximumf %144, %145 : vector<20x1024xf32>
    %147 = vector.extract_strided_slice %146 {offsets = [0, 0], sizes = [20, 512], strides = [1, 1]} : vector<20x1024xf32> to vector<20x512xf32>
    %148 = vector.extract_strided_slice %146 {offsets = [0, 512], sizes = [20, 512], strides = [1, 1]} : vector<20x1024xf32> to vector<20x512xf32>
    %149 = arith.maximumf %147, %148 : vector<20x512xf32>
    %c0_67 = arith.constant 0 : index
    %c0_68 = arith.constant 0 : index
    %150 = vector.load %arg9[%c0_67, %c0_68] : memref<1x128xf32, #tpu.memory_space<vmem>>, vector<1x128xf32>
    %c0_69 = arith.constant 0 : index
    %c0_70 = arith.constant 0 : index
    %c0_71 = arith.constant 0 : index
    %151 = vector.load %arg2[%c0_69, %c0_70, %c0_71] : memref<1x1x8xbf16, #tpu.memory_space<vmem>>, vector<1x1x8xbf16>
    %152 = vector.shape_cast %151 : vector<1x1x8xbf16> to vector<1x8xbf16>
    %c0_72 = arith.constant 0 : index
    %c0_73 = arith.constant 0 : index
    %153 = vector.load %arg8[%c0_72, %c0_73] : memref<8x128xbf16, #tpu.memory_space<vmem>>, vector<8x128xbf16>
    %cst_74 = arith.constant dense<0.000000e+00> : vector<1x128xf32>
    %154 = tpu.matmul %152, %153, %cst_74 {dimension_numbers = #tpu.dot_dimension_numbers<[1], [0], [0], [1], [0, 0, 1, 1], [], []>} : vector<1x8xbf16>, vector<8x128xbf16>, vector<1x128xf32> -> vector<1x128xf32>
    %155 = arith.addf %150, %154 : vector<1x128xf32>
    %156 = vector.extract_strided_slice %149 {offsets = [0, 0], sizes = [1, 512], strides = [1, 1]} : vector<20x512xf32> to vector<1x512xf32>
    %157 = vector.extract_strided_slice %149 {offsets = [1, 0], sizes = [1, 512], strides = [1, 1]} : vector<20x512xf32> to vector<1x512xf32>
    %158 = arith.maximumf %156, %157 : vector<1x512xf32>
    %159 = arith.truncf %158 : vector<1x512xf32> to vector<1x512xbf16>
    %c0_75 = arith.constant 0 : index
    %c0_76 = arith.constant 0 : index
    %c0_77 = arith.constant 0 : index
    %160 = vector.load %arg7[%c0_75, %c0_76, %c0_77] : memref<10x512x128xbf16, #tpu.memory_space<vmem>>, vector<1x512x128xbf16>
    %161 = vector.shape_cast %160 : vector<1x512x128xbf16> to vector<512x128xbf16>
    %cst_78 = arith.constant dense<0.000000e+00> : vector<1x128xf32>
    %162 = tpu.matmul %159, %161, %cst_78 {dimension_numbers = #tpu.dot_dimension_numbers<[1], [0], [0], [1], [0, 0, 1, 1], [], []>} : vector<1x512xbf16>, vector<512x128xbf16>, vector<1x128xf32> -> vector<1x128xf32>
    %163 = arith.addf %155, %162 : vector<1x128xf32>
    %164 = vector.extract_strided_slice %149 {offsets = [2, 0], sizes = [1, 512], strides = [1, 1]} : vector<20x512xf32> to vector<1x512xf32>
    %165 = vector.extract_strided_slice %149 {offsets = [3, 0], sizes = [1, 512], strides = [1, 1]} : vector<20x512xf32> to vector<1x512xf32>
    %166 = arith.maximumf %164, %165 : vector<1x512xf32>
    %167 = arith.truncf %166 : vector<1x512xf32> to vector<1x512xbf16>
    %c1_79 = arith.constant 1 : index
    %c0_80 = arith.constant 0 : index
    %c0_81 = arith.constant 0 : index
    %168 = vector.load %arg7[%c1_79, %c0_80, %c0_81] : memref<10x512x128xbf16, #tpu.memory_space<vmem>>, vector<1x512x128xbf16>
    %169 = vector.shape_cast %168 : vector<1x512x128xbf16> to vector<512x128xbf16>
    %cst_82 = arith.constant dense<0.000000e+00> : vector<1x128xf32>
    %170 = tpu.matmul %167, %169, %cst_82 {dimension_numbers = #tpu.dot_dimension_numbers<[1], [0], [0], [1], [0, 0, 1, 1], [], []>} : vector<1x512xbf16>, vector<512x128xbf16>, vector<1x128xf32> -> vector<1x128xf32>
    %171 = arith.addf %163, %170 : vector<1x128xf32>
    %172 = vector.extract_strided_slice %149 {offsets = [4, 0], sizes = [1, 512], strides = [1, 1]} : vector<20x512xf32> to vector<1x512xf32>
    %173 = vector.extract_strided_slice %149 {offsets = [5, 0], sizes = [1, 512], strides = [1, 1]} : vector<20x512xf32> to vector<1x512xf32>
    %174 = arith.maximumf %172, %173 : vector<1x512xf32>
    %175 = arith.truncf %174 : vector<1x512xf32> to vector<1x512xbf16>
    %c2_83 = arith.constant 2 : index
    %c0_84 = arith.constant 0 : index
    %c0_85 = arith.constant 0 : index
    %176 = vector.load %arg7[%c2_83, %c0_84, %c0_85] : memref<10x512x128xbf16, #tpu.memory_space<vmem>>, vector<1x512x128xbf16>
    %177 = vector.shape_cast %176 : vector<1x512x128xbf16> to vector<512x128xbf16>
    %cst_86 = arith.constant dense<0.000000e+00> : vector<1x128xf32>
    %178 = tpu.matmul %175, %177, %cst_86 {dimension_numbers = #tpu.dot_dimension_numbers<[1], [0], [0], [1], [0, 0, 1, 1], [], []>} : vector<1x512xbf16>, vector<512x128xbf16>, vector<1x128xf32> -> vector<1x128xf32>
    %179 = arith.addf %171, %178 : vector<1x128xf32>
    %180 = vector.extract_strided_slice %149 {offsets = [6, 0], sizes = [1, 512], strides = [1, 1]} : vector<20x512xf32> to vector<1x512xf32>
    %181 = vector.extract_strided_slice %149 {offsets = [7, 0], sizes = [1, 512], strides = [1, 1]} : vector<20x512xf32> to vector<1x512xf32>
    %182 = arith.maximumf %180, %181 : vector<1x512xf32>
    %183 = arith.truncf %182 : vector<1x512xf32> to vector<1x512xbf16>
    %c3_87 = arith.constant 3 : index
    %c0_88 = arith.constant 0 : index
    %c0_89 = arith.constant 0 : index
    %184 = vector.load %arg7[%c3_87, %c0_88, %c0_89] : memref<10x512x128xbf16, #tpu.memory_space<vmem>>, vector<1x512x128xbf16>
    %185 = vector.shape_cast %184 : vector<1x512x128xbf16> to vector<512x128xbf16>
    %cst_90 = arith.constant dense<0.000000e+00> : vector<1x128xf32>
    %186 = tpu.matmul %183, %185, %cst_90 {dimension_numbers = #tpu.dot_dimension_numbers<[1], [0], [0], [1], [0, 0, 1, 1], [], []>} : vector<1x512xbf16>, vector<512x128xbf16>, vector<1x128xf32> -> vector<1x128xf32>
    %187 = arith.addf %179, %186 : vector<1x128xf32>
    %188 = vector.extract_strided_slice %149 {offsets = [8, 0], sizes = [1, 512], strides = [1, 1]} : vector<20x512xf32> to vector<1x512xf32>
    %189 = vector.extract_strided_slice %149 {offsets = [9, 0], sizes = [1, 512], strides = [1, 1]} : vector<20x512xf32> to vector<1x512xf32>
    %190 = arith.maximumf %188, %189 : vector<1x512xf32>
    %191 = arith.truncf %190 : vector<1x512xf32> to vector<1x512xbf16>
    %c4_91 = arith.constant 4 : index
    %c0_92 = arith.constant 0 : index
    %c0_93 = arith.constant 0 : index
    %192 = vector.load %arg7[%c4_91, %c0_92, %c0_93] : memref<10x512x128xbf16, #tpu.memory_space<vmem>>, vector<1x512x128xbf16>
    %193 = vector.shape_cast %192 : vector<1x512x128xbf16> to vector<512x128xbf16>
    %cst_94 = arith.constant dense<0.000000e+00> : vector<1x128xf32>
    %194 = tpu.matmul %191, %193, %cst_94 {dimension_numbers = #tpu.dot_dimension_numbers<[1], [0], [0], [1], [0, 0, 1, 1], [], []>} : vector<1x512xbf16>, vector<512x128xbf16>, vector<1x128xf32> -> vector<1x128xf32>
    %195 = arith.addf %187, %194 : vector<1x128xf32>
    %196 = vector.extract_strided_slice %149 {offsets = [10, 0], sizes = [1, 512], strides = [1, 1]} : vector<20x512xf32> to vector<1x512xf32>
    %197 = vector.extract_strided_slice %149 {offsets = [11, 0], sizes = [1, 512], strides = [1, 1]} : vector<20x512xf32> to vector<1x512xf32>
    %198 = arith.maximumf %196, %197 : vector<1x512xf32>
    %199 = arith.truncf %198 : vector<1x512xf32> to vector<1x512xbf16>
    %c5_95 = arith.constant 5 : index
    %c0_96 = arith.constant 0 : index
    %c0_97 = arith.constant 0 : index
    %200 = vector.load %arg7[%c5_95, %c0_96, %c0_97] : memref<10x512x128xbf16, #tpu.memory_space<vmem>>, vector<1x512x128xbf16>
    %201 = vector.shape_cast %200 : vector<1x512x128xbf16> to vector<512x128xbf16>
    %cst_98 = arith.constant dense<0.000000e+00> : vector<1x128xf32>
    %202 = tpu.matmul %199, %201, %cst_98 {dimension_numbers = #tpu.dot_dimension_numbers<[1], [0], [0], [1], [0, 0, 1, 1], [], []>} : vector<1x512xbf16>, vector<512x128xbf16>, vector<1x128xf32> -> vector<1x128xf32>
    %203 = arith.addf %195, %202 : vector<1x128xf32>
    %204 = vector.extract_strided_slice %149 {offsets = [12, 0], sizes = [1, 512], strides = [1, 1]} : vector<20x512xf32> to vector<1x512xf32>
    %205 = vector.extract_strided_slice %149 {offsets = [13, 0], sizes = [1, 512], strides = [1, 1]} : vector<20x512xf32> to vector<1x512xf32>
    %206 = arith.maximumf %204, %205 : vector<1x512xf32>
    %207 = arith.truncf %206 : vector<1x512xf32> to vector<1x512xbf16>
    %c6_99 = arith.constant 6 : index
    %c0_100 = arith.constant 0 : index
    %c0_101 = arith.constant 0 : index
    %208 = vector.load %arg7[%c6_99, %c0_100, %c0_101] : memref<10x512x128xbf16, #tpu.memory_space<vmem>>, vector<1x512x128xbf16>
    %209 = vector.shape_cast %208 : vector<1x512x128xbf16> to vector<512x128xbf16>
    %cst_102 = arith.constant dense<0.000000e+00> : vector<1x128xf32>
    %210 = tpu.matmul %207, %209, %cst_102 {dimension_numbers = #tpu.dot_dimension_numbers<[1], [0], [0], [1], [0, 0, 1, 1], [], []>} : vector<1x512xbf16>, vector<512x128xbf16>, vector<1x128xf32> -> vector<1x128xf32>
    %211 = arith.addf %203, %210 : vector<1x128xf32>
    %212 = vector.extract_strided_slice %149 {offsets = [14, 0], sizes = [1, 512], strides = [1, 1]} : vector<20x512xf32> to vector<1x512xf32>
    %213 = vector.extract_strided_slice %149 {offsets = [15, 0], sizes = [1, 512], strides = [1, 1]} : vector<20x512xf32> to vector<1x512xf32>
    %214 = arith.maximumf %212, %213 : vector<1x512xf32>
    %215 = arith.truncf %214 : vector<1x512xf32> to vector<1x512xbf16>
    %c7_103 = arith.constant 7 : index
    %c0_104 = arith.constant 0 : index
    %c0_105 = arith.constant 0 : index
    %216 = vector.load %arg7[%c7_103, %c0_104, %c0_105] : memref<10x512x128xbf16, #tpu.memory_space<vmem>>, vector<1x512x128xbf16>
    %217 = vector.shape_cast %216 : vector<1x512x128xbf16> to vector<512x128xbf16>
    %cst_106 = arith.constant dense<0.000000e+00> : vector<1x128xf32>
    %218 = tpu.matmul %215, %217, %cst_106 {dimension_numbers = #tpu.dot_dimension_numbers<[1], [0], [0], [1], [0, 0, 1, 1], [], []>} : vector<1x512xbf16>, vector<512x128xbf16>, vector<1x128xf32> -> vector<1x128xf32>
    %219 = arith.addf %211, %218 : vector<1x128xf32>
    %220 = vector.extract_strided_slice %149 {offsets = [16, 0], sizes = [1, 512], strides = [1, 1]} : vector<20x512xf32> to vector<1x512xf32>
    %221 = vector.extract_strided_slice %149 {offsets = [17, 0], sizes = [1, 512], strides = [1, 1]} : vector<20x512xf32> to vector<1x512xf32>
    %222 = arith.maximumf %220, %221 : vector<1x512xf32>
    %223 = arith.truncf %222 : vector<1x512xf32> to vector<1x512xbf16>
    %c8_107 = arith.constant 8 : index
    %c0_108 = arith.constant 0 : index
    %c0_109 = arith.constant 0 : index
    %224 = vector.load %arg7[%c8_107, %c0_108, %c0_109] : memref<10x512x128xbf16, #tpu.memory_space<vmem>>, vector<1x512x128xbf16>
    %225 = vector.shape_cast %224 : vector<1x512x128xbf16> to vector<512x128xbf16>
    %cst_110 = arith.constant dense<0.000000e+00> : vector<1x128xf32>
    %226 = tpu.matmul %223, %225, %cst_110 {dimension_numbers = #tpu.dot_dimension_numbers<[1], [0], [0], [1], [0, 0, 1, 1], [], []>} : vector<1x512xbf16>, vector<512x128xbf16>, vector<1x128xf32> -> vector<1x128xf32>
    %227 = arith.addf %219, %226 : vector<1x128xf32>
    %228 = vector.extract_strided_slice %149 {offsets = [18, 0], sizes = [1, 512], strides = [1, 1]} : vector<20x512xf32> to vector<1x512xf32>
    %229 = vector.extract_strided_slice %149 {offsets = [19, 0], sizes = [1, 512], strides = [1, 1]} : vector<20x512xf32> to vector<1x512xf32>
    %230 = arith.maximumf %228, %229 : vector<1x512xf32>
    %231 = arith.truncf %230 : vector<1x512xf32> to vector<1x512xbf16>
    %c9_111 = arith.constant 9 : index
    %c0_112 = arith.constant 0 : index
    %c0_113 = arith.constant 0 : index
    %232 = vector.load %arg7[%c9_111, %c0_112, %c0_113] : memref<10x512x128xbf16, #tpu.memory_space<vmem>>, vector<1x512x128xbf16>
    %233 = vector.shape_cast %232 : vector<1x512x128xbf16> to vector<512x128xbf16>
    %cst_114 = arith.constant dense<0.000000e+00> : vector<1x128xf32>
    %234 = tpu.matmul %231, %233, %cst_114 {dimension_numbers = #tpu.dot_dimension_numbers<[1], [0], [0], [1], [0, 0, 1, 1], [], []>} : vector<1x512xbf16>, vector<512x128xbf16>, vector<1x128xf32> -> vector<1x128xf32>
    %235 = arith.addf %227, %234 : vector<1x128xf32>
    %cst_115 = arith.constant 0.000000e+00 : f32
    %236 = vector.broadcast %cst_115 : f32 to vector<1x128xf32>
    %237 = arith.maximumf %235, %236 : vector<1x128xf32>
    %238 = arith.truncf %237 : vector<1x128xf32> to vector<1x128xbf16>
    %c0_116 = arith.constant 0 : index
    %c0_117 = arith.constant 0 : index
    %239 = vector.load %arg10[%c0_116, %c0_117] : memref<128x128xbf16, #tpu.memory_space<vmem>>, vector<128x128xbf16>
    %cst_118 = arith.constant dense<0.000000e+00> : vector<1x128xf32>
    %240 = tpu.matmul %238, %239, %cst_118 {dimension_numbers = #tpu.dot_dimension_numbers<[1], [0], [0], [1], [0, 0, 1, 1], [], []>} : vector<1x128xbf16>, vector<128x128xbf16>, vector<1x128xf32> -> vector<1x128xf32>
    %c0_119 = arith.constant 0 : index
    %c0_120 = arith.constant 0 : index
    %241 = vector.load %arg11[%c0_119, %c0_120] : memref<1x128xf32, #tpu.memory_space<vmem>>, vector<1x128xf32>
    %242 = arith.addf %240, %241 : vector<1x128xf32>
    %c0_121 = arith.constant 0 : index
    %c0_122 = arith.constant 0 : index
    %c0_123 = arith.constant 0 : index
    %243 = vector.load %arg12[%c0_121, %c0_122, %c0_123] : memref<1x1x128xf32, #tpu.memory_space<vmem>>, vector<1x1x128xf32>
    %244 = vector.shape_cast %243 : vector<1x1x128xf32> to vector<1x128xf32>
    %245 = vector.shape_cast %242 : vector<1x128xf32> to vector<1x1x128xf32>
    tpu.vector_store %arg12[%c0_121, %c0_122, %c0_123], %245 {strides = array<i32>} : memref<1x1x128xf32, #tpu.memory_space<vmem>>, vector<1x1x128xf32>,
    return
  }
  func.func @transform_0(%arg0: i32) -> (i32, i32, i32) {
    %c0_i32 = arith.constant 0 : i32
    %c0_i32_0 = arith.constant 0 : i32
    %c0_i32_1 = arith.constant 0 : i32
    return %arg0, %c0_i32, %c0_i32_0 : i32, i32, i32
  }
  func.func @transform_1(%arg0: i32) -> (i32, i32, i32) {
    %c0_i32 = arith.constant 0 : i32
    %c0_i32_0 = arith.constant 0 : i32
    %c0_i32_1 = arith.constant 0 : i32
    return %arg0, %c0_i32, %c0_i32_0 : i32, i32, i32
  }
  func.func @transform_2(%arg0: i32) -> (i32, i32, i32) {
    %c0_i32 = arith.constant 0 : i32
    %c0_i32_0 = arith.constant 0 : i32
    %c0_i32_1 = arith.constant 0 : i32
    %c0_i32_2 = arith.constant 0 : i32
    return %c0_i32, %c0_i32_0, %c0_i32_1 : i32, i32, i32
  }
  func.func @transform_3(%arg0: i32) -> (i32, i32) {
    %c0_i32 = arith.constant 0 : i32
    %c0_i32_0 = arith.constant 0 : i32
    %c0_i32_1 = arith.constant 0 : i32
    return %c0_i32, %c0_i32_0 : i32, i32
  }
  func.func @transform_4(%arg0: i32) -> (i32, i32, i32) {
    %c0_i32 = arith.constant 0 : i32
    %c0_i32_0 = arith.constant 0 : i32
    %c0_i32_1 = arith.constant 0 : i32
    %c0_i32_2 = arith.constant 0 : i32
    return %c0_i32, %c0_i32_0, %c0_i32_1 : i32, i32, i32
  }
  func.func @transform_5(%arg0: i32) -> (i32, i32) {
    %c0_i32 = arith.constant 0 : i32
    %c0_i32_0 = arith.constant 0 : i32
    %c0_i32_1 = arith.constant 0 : i32
    return %c0_i32, %c0_i32_0 : i32, i32
  }
  func.func @transform_6(%arg0: i32) -> (i32, i32, i32) {
    %c0_i32 = arith.constant 0 : i32
    %c0_i32_0 = arith.constant 0 : i32
    %c0_i32_1 = arith.constant 0 : i32
    %c0_i32_2 = arith.constant 0 : i32
    return %c0_i32, %c0_i32_0, %c0_i32_1 : i32, i32, i32
  }
  func.func @transform_7(%arg0: i32) -> (i32, i32) {
    %c0_i32 = arith.constant 0 : i32
    %c0_i32_0 = arith.constant 0 : i32
    %c0_i32_1 = arith.constant 0 : i32
    return %c0_i32, %c0_i32_0 : i32, i32
  }
  func.func @transform_8(%arg0: i32) -> (i32, i32) {
    %c0_i32 = arith.constant 0 : i32
    %c0_i32_0 = arith.constant 0 : i32
    %c0_i32_1 = arith.constant 0 : i32
    return %c0_i32, %c0_i32_0 : i32, i32
  }
  func.func @transform_9(%arg0: i32) -> (i32, i32) {
    %c0_i32 = arith.constant 0 : i32
    %c0_i32_0 = arith.constant 0 : i32
    %c0_i32_1 = arith.constant 0 : i32
    return %c0_i32, %c0_i32_0 : i32, i32
  }
  func.func @transform_10(%arg0: i32) -> (i32, i32) {
    %c0_i32 = arith.constant 0 : i32
    %c0_i32_0 = arith.constant 0 : i32
    %c0_i32_1 = arith.constant 0 : i32
    return %c0_i32, %c0_i32_0 : i32, i32
  }
  func.func @transform_11(%arg0: i32) -> (i32, i32, i32) {
    %c0_i32 = arith.constant 0 : i32
    %c0_i32_0 = arith.constant 0 : i32
    %c0_i32_1 = arith.constant 0 : i32
    return %arg0, %c0_i32, %c0_i32_0 : i32, i32, i32
  }
}

</mosaic_0001>

<bundles_post_ra>
// kernel: hybrid_cnn_forward.1
= control target key start
LH: loop header
LB: loop body
LE: loop exit
PB: predicated region body
PF: predicated region fallthrough
CT: control target
= control target key end

     0   :  { %s16648_s0 = inlined_call_operand.vmem [shape: bf16[2,42,30], index: 0, kind: input, shape index: {}]   ;;  %s16649_s1 = inlined_call_operand.vmem [shape: bf16[2,1,8], index: 1, kind: input, shape index: {}]   ;;  %s16650_s2 = inlined_call_operand.hbm [shape: bf16[3,30,1024], index: 2, kind: input, shape index: {}]   ;;  %s16651_s3 = inlined_call_operand.hbm [shape: f32[1,1024], index: 3, kind: input, shape index: {}]   ;;  %s16652_s4 = inlined_call_operand.hbm [shape: bf16[3,512,1024], index: 4, kind: input, shape index: {}]   ;;  %s16653_s5 = inlined_call_operand.hbm [shape: f32[1,1024], index: 5, kind: input, shape index: {}]   ;;  %s16654_s6 = inlined_call_operand.hbm [shape: bf16[10,512,128], index: 6, kind: input, shape index: {}]   ;;  %s16655_s7 = inlined_call_operand.hbm [shape: bf16[8,128], index: 7, kind: input, shape index: {}]   ;;  %s16656_s8 = inlined_call_operand.hbm [shape: f32[1,128], index: 8, kind: input, shape index: {}]   ;;  %s16657_s9 = inlined_call_operand.hbm [shape: bf16[128,128], index: 9, kind: input, shape index: {}]   ;;  %s16658_s10 = inlined_call_operand.hbm [shape: f32[1,128], index: 10, kind: input, shape index: {}]   ;;  %s16659_s11 = inlined_call_operand.hbm [shape: f32[2,1,128], index: 11, kind: output, shape index: {}]  }
   0x1   :  { %16680 = sst [smem:[#allocation30_spill]] %s16651_s3 }
   0x2   :  { %16681 = sst [smem:[#allocation31_spill]] %s16653_s5 }
   0x3   :  { %16682 = sst [smem:[#allocation32_spill]] %s16655_s7 }
   0x4   :  { %16683 = sst [smem:[#allocation33_spill]] %s16657_s9 }
   0x5   :  { %16 = vsyncpa [#allocation4], 0 }
   0x6   :  { %17 = vsyncpa [#allocation7], 0 }
   0x7   :  { %18 = vsyncpa [#allocation10], 0 }
   0x8   :  { %19 = vsyncpa [#allocation13], 0 }
   0x9   :  { %20 = vsyncpa [#allocation16], 0 }
   0xa   :  { %21 = vsyncpa [#allocation5], 0 }
   0xb   :  { %23 = vsyncpa [#allocation5 + $0x1], 0  ;;  %s15045_s17 = smov 0   ;;  %s15047_s18 = smov 0  }
   0xc   :  { %s15049_s19 = smov 0   ;;  %s15051_s20 = smov 0  }
   0xd LB: > { %16684 = sst [smem:[#allocation25_spill]] %s14954_s17  ;;  %s15066_s21 = sadd.s32 4294967295, %s14966_s20   ;;  %s14966_s20 = sphi %s15051_s20, %s16774_s20   ;;  %s14962_s19 = sphi %s15049_s19, %s16776_s19   ;;  %s14958_s18 = sphi %s15047_s18, %s16778_s18   ;;  %s14954_s17 = sphi %s15045_s17, %s16777_s17  }
   0xe   : > { %16685 = sst [smem:[#allocation26_spill]] %s14962_s19  ;;  %s12242_s22 = sadd.s32 4294967294, %s14966_s20  }
   0xf   : > { %s15070_s23 = sadd.s32 1, %s14966_s20   ;;  %s277_s24 = sadd.s32 1, %s14962_s19 }
  0x10   : > { %16686 = sst [smem:[#allocation27_spill]] %s15070_s23  ;;  %s274_s25 = ssub.s32 %s14966_s20, %s15070_s23 }
  0x11   : > { %p287_p0 = scmp.ne.s32.totalorder %s14962_s19, %s14958_s18  ;;  %p275_p1 = scmp.eq.s32.totalorder %s274_s25, 0 }
  0x12   : > { %p288_p2 = scmp.eq.s32.totalorder %s15066_s21, 1  ;;  %p293_p3 = scmp.ne.s32.totalorder %s14958_s18, %s14954_s17 }
  0x13   : > { %p294_p4 = scmp.eq.s32.totalorder %s12242_s22, 1  ;;  %p12243_p7 = scmp.ge.s32.totalorder %s14966_s20, 1 }
  0x14   : > { %s15081_s26 = scalar_select %p275_p1, %s14962_s19, %s277_s24  }
  0x15   : > { %p15083_p5 = por %p288_p2, %p287_p0  ;;  %p15087_p6 = por %p294_p4, %p293_p3 }
  0x16   : > { %16687 = sst [smem:[#allocation28_spill]] %s15081_s26  ;;  %p301_p8 = scmp.lt.s32.totalorder %s14966_s20, 3 }
  0x17   : > { %s16688_s27 = scalar_select %p15083_p5, 1, 0 }
  0x18   : > { %s16689_s28 = scalar_select %p15087_p6, 1, 0 }
  0x19   : > { %p16663_p9 = scmp.eq.s32.totalorder %s15066_s21, 0  ;;  %p15094_p10 = pnand %p12243_p7, %p301_p8 }
  0x1a   : > { %16690 = sst [smem:[#allocation29_spill]] %s16689_s28  ;;  %s14968_s30 = smov [#allocation6]  }
  0x1b   : > { %s16691_s29 = scalar_select %p15094_p10, 1, 0 }
  0x1c   : > { %s327_s12 = sshll.u32 %s14968_s30, 4  ;;  %p14182_p11 = pneg %p15094_p10  ;;  %s328_s12 = int_to_ptr.vmem [resolvable:$true] %s327_s12 }
  0x1d   : > { %s14969_s13 = smov [#allocation9]   ;;  %s14970_s16 = smov [#allocation12]  }
  0x1e   : > { %s351_s14 = sshll.u32 %s14969_s13, 4  ;;  %p15102_p12 = pnand %p16663_p9, %p14182_p11  ;;  %s15106_s14 = int_to_ptr.vmem [resolvable:$true] %s351_s14 }
  0x1f   : > { %s375_s22 = sshll.u32 %s14970_s16, 4  ;;  %s16693_s3 = sld [smem:[#allocation30_spill]]  ;;  %s15108_s22 = int_to_ptr.vmem [resolvable:$true] %s375_s22 }
  0x20   : > { %p15118_p0 = pneg %p15102_p12 }
  0x25   : > { %s14632_s30 = scalar_lea.hbm %s16693_s3, 128 }
  0x26   : > { %p14633_p13 = scmp.ne.s32.totalorder %s16693_s3, %s14632_s30  ;;  %p14639_p3 = scmp.lt.u32.totalorder %s14632_s30, %s16693_s3 }
  0x28   : > { %p14635_p1 = pnand %p15118_p0, %p14633_p13 }
  0x2a   : > { %p14636_p2 = pneg %p14635_p1 }
  0x2c   : > { %p14641_p4 = pnand %p14639_p3, %p14636_p2 }
  0x2e   : > { %14644 = shalt.err (!%p14641_p4)
}
  0x2f   : > { %s14645_s24 = scalar_lea.vmem %s328_s12, 128  ;;  %p14653_p9 = scmp.lt.s32.totalorder %s328_s12, %s328_s12 }
  0x30   : > { %p14646_p7 = scmp.ne.s32.totalorder %s328_s12, %s14645_s24  ;;  %p14654_p6 = scmp.lt.s32.totalorder %s14645_s24, %s14645_s24 }
  0x32   : > { %p14648_p8 = pnand %p14646_p7, %p15118_p0  ;;  %p14655_p5 = por %p14654_p6, %p14653_p9 }
  0x34   : > { %p14649_p11 = pneg %p14648_p8 }
  0x36   : > { %p14656_p10 = pnand %p14655_p5, %p14649_p11 }
  0x38   : > { %14659 = shalt.err (!%p14656_p10)
}
  0x39   : > { %14188 = dma.hbm_to_vmem [thread:$0]  (!%p15102_p12), %s16693_s3, 128, %s328_s12, [#allocation7]  }
  0x3a   : > { %s16695_s5 = sld [smem:[#allocation31_spill]] }
  0x40   : > { %s14660_s30 = scalar_lea.hbm %s16695_s5, 128 }
  0x41   : > { %p14661_p13 = scmp.ne.s32.totalorder %s16695_s5, %s14660_s30  ;;  %p14667_p5 = scmp.lt.u32.totalorder %s14660_s30, %s16695_s5 }
  0x43   : > { %p14663_p1 = pnand %p14661_p13, %p15118_p0 }
  0x45   : > { %p14664_p6 = pneg %p14663_p1 }
  0x47   : > { %p14669_p9 = pnand %p14667_p5, %p14664_p6 }
  0x49   : > { %14672 = shalt.err (!%p14669_p9)
}
  0x4a   : > { %s14673_s12 = scalar_lea.vmem %s15106_s14, 128  ;;  %p14681_p4 = scmp.lt.s32.totalorder %s15106_s14, %s15106_s14 }
  0x4b   : > { %p14674_p10 = scmp.ne.s32.totalorder %s15106_s14, %s14673_s12  ;;  %p14682_p7 = scmp.lt.s32.totalorder %s14673_s12, %s14673_s12 }
  0x4d   : > { %p14676_p2 = pnand %p14674_p10, %p15118_p0  ;;  %p14683_p8 = por %p14682_p7, %p14681_p4 }
  0x4f   : > { %p14677_p3 = pneg %p14676_p2 }
  0x51   : > { %p14684_p11 = pnand %p14683_p8, %p14677_p3 }
  0x53   : > { %14687 = shalt.err (!%p14684_p11)
}
  0x54   : > { %14194 = dma.hbm_to_vmem [thread:$0]  (!%p15102_p12), %s16695_s5, 128, %s15106_s14, [#allocation10]  }
  0x55   : > { %s16696_s7 = sld [smem:[#allocation32_spill]] }
  0x5b   : > { %s14688_s23 = scalar_lea.hbm %s16696_s7, 64 }
  0x5c   : > { %p14689_p13 = scmp.ne.s32.totalorder %s16696_s7, %s14688_s23  ;;  %p14695_p5 = scmp.lt.u32.totalorder %s14688_s23, %s16696_s7 }
  0x5e   : > { %p14691_p1 = pnand %p14689_p13, %p15118_p0 }
  0x60   : > { %p14692_p6 = pneg %p14691_p1 }
  0x62   : > { %p14697_p9 = pnand %p14695_p5, %p14692_p6 }
  0x64   : > { %14700 = shalt.err (!%p14697_p9)
}
  0x65   : > { %s14701_s14 = scalar_lea.vmem %s15108_s22, 64  ;;  %p14709_p4 = scmp.lt.s32.totalorder %s15108_s22, %s15108_s22 }
  0x66   : > { %p14702_p10 = scmp.ne.s32.totalorder %s15108_s22, %s14701_s14  ;;  %p14710_p7 = scmp.lt.s32.totalorder %s14701_s14, %s14701_s14 }
  0x68   : > { %p14704_p2 = pnand %p14702_p10, %p15118_p0  ;;  %p14711_p8 = por %p14710_p7, %p14709_p4 }
  0x6a   : > { %p14705_p3 = pneg %p14704_p2 }
  0x6c   : > { %p14712_p11 = pnand %p14711_p8, %p14705_p3 }
  0x6e   : > { %14715 = shalt.err (!%p14712_p11)
}
  0x6f   : > { %14200 = dma.hbm_to_vmem [thread:$0]  (!%p15102_p12), %s16696_s7, 64, %s15108_s22, [#allocation13]  }
  0x70   : > { %s14971_s28 = smov [#allocation15]   ;;  %s14972_s26 = smov [#allocation3]  }
  0x71   : > { %s396_s19 = sshll.u32 %s14971_s28, 4  ;;  %s313_s23 = sshll.u32 %s14972_s26, 4  ;;  %s397_s19 = int_to_ptr.vmem [resolvable:$true] %s396_s19  ;;  %s314_s23 = int_to_ptr.vmem [resolvable:$true] %s313_s23 }
  0x72   : > { %s16697_s9 = sld [smem:[#allocation33_spill]] }
  0x78   : > { %s14716_s16 = scalar_lea.hbm %s16697_s9, 1024 }
  0x79   : > { %p14717_p13 = scmp.ne.s32.totalorder %s16697_s9, %s14716_s16  ;;  %p14723_p5 = scmp.lt.u32.totalorder %s14716_s16, %s16697_s9 }
  0x7b   : > { %p14719_p1 = pnand %p14717_p13, %p15118_p0 }
  0x7d   : > { %p14720_p6 = pneg %p14719_p1 }
  0x7f   : > { %p14725_p9 = pnand %p14723_p5, %p14720_p6 }
  0x81   : > { %14728 = shalt.err (!%p14725_p9)
}
  0x82   : > { %s14729_s22 = scalar_lea.vmem %s397_s19, 1024  ;;  %p14737_p4 = scmp.lt.s32.totalorder %s397_s19, %s397_s19 }
  0x83   : > { %p14730_p10 = scmp.ne.s32.totalorder %s397_s19, %s14729_s22  ;;  %p14738_p7 = scmp.lt.s32.totalorder %s14729_s22, %s14729_s22 }
  0x85   : > { %p14732_p2 = pnand %p14730_p10, %p15118_p0  ;;  %p14739_p8 = por %p14738_p7, %p14737_p4 }
  0x87   : > { %p14733_p3 = pneg %p14732_p2 }
  0x89   : > { %p14740_p11 = pnand %p14739_p8, %p14733_p3 }
  0x8b   : > { %14743 = shalt.err (!%p14740_p11)
}
  0x8c   : > { %s16668_s17 = smov 64   ;;  %s16669_s28 = smov 4  }
  0x8d   : > { %14206 = dma.hbm_to_vmem [thread:$0]  (!%p15102_p12), %s16697_s9, 1024, %s397_s19, [#allocation16], %s16668_s17, %s16668_s17, %s16669_s28  }
  0x8e   : > { %s14744_s16 = scalar_lea.hbm %s16650_s2, 6144 }
  0x8f   : > { %p14745_p13 = scmp.ne.s32.totalorder %s16650_s2, %s14744_s16  ;;  %p14751_p5 = scmp.lt.u32.totalorder %s14744_s16, %s16650_s2 }
  0x91   : > { %p14747_p1 = pnand %p14745_p13, %p15118_p0 }
  0x93   : > { %p14748_p6 = pneg %p14747_p1 }
  0x95   : > { %p14753_p9 = pnand %p14751_p5, %p14748_p6 }
  0x97   : > { %14756 = shalt.err (!%p14753_p9)
}
  0x98   : > { %s14757_s3 = scalar_lea.vmem %s314_s23, 6144  ;;  %p14765_p4 = scmp.lt.s32.totalorder %s314_s23, %s314_s23 }
  0x99   : > { %p14758_p10 = scmp.ne.s32.totalorder %s314_s23, %s14757_s3  ;;  %p14766_p7 = scmp.lt.s32.totalorder %s14757_s3, %s14757_s3 }
  0x9b   : > { %p14760_p2 = pnand %p14758_p10, %p15118_p0  ;;  %p14767_p8 = por %p14766_p7, %p14765_p4 }
  0x9d   : > { %p14761_p3 = pneg %p14760_p2 }
  0x9f   : > { %p14768_p11 = pnand %p14767_p8, %p14761_p3 }
  0xa1   : > { %14771 = shalt.err (!%p14768_p11)
}
  0xa2   : > { %s14975_s19 = smov 512   ;;  %s14976_s26 = smov 32  }
  0xa3   : > { %14185 = dma.hbm_to_vmem [thread:$0]  (!%p15102_p12), %s16650_s2, 6144, %s314_s23, [#allocation4], %s14975_s19, %s14975_s19, %s14976_s26  }
  0xa4   : > { %s14977_s16 = smov [#allocation8]   ;;  %s14978_s14 = smov [#allocation11]  }
  0xa5   : > { %s337_s24 = sshll.u32 %s14977_s16, 4  ;;  %s361_s12 = sshll.u32 %s14978_s14, 4  ;;  %s338_s24 = int_to_ptr.vmem [resolvable:$true] %s337_s24  ;;  %s362_s12 = int_to_ptr.vmem [resolvable:$true] %s361_s12 }
  0xa6   : > { %s14772_s3 = scalar_lea.hbm %s16652_s4, 98304 }
  0xa7   : > { %p14773_p13 = scmp.ne.s32.totalorder %s16652_s4, %s14772_s3  ;;  %p14779_p5 = scmp.lt.u32.totalorder %s14772_s3, %s16652_s4 }
  0xa9   : > { %p14775_p1 = pnand %p14773_p13, %p15118_p0 }
  0xab   : > { %p14776_p6 = pneg %p14775_p1 }
  0xad   : > { %p14781_p9 = pnand %p14779_p5, %p14776_p6 }
  0xaf   : > { %14784 = shalt.err (!%p14781_p9)
}
  0xb0   : > { %s14785_s23 = scalar_lea.vmem %s338_s24, 98304  ;;  %p14793_p4 = scmp.lt.s32.totalorder %s338_s24, %s338_s24 }
  0xb1   : > { %p14786_p10 = scmp.ne.s32.totalorder %s338_s24, %s14785_s23  ;;  %p14794_p7 = scmp.lt.s32.totalorder %s14785_s23, %s14785_s23 }
  0xb3   : > { %p14788_p2 = pnand %p14786_p10, %p15118_p0  ;;  %p14795_p8 = por %p14794_p7, %p14793_p4 }
  0xb5   : > { %p14789_p3 = pneg %p14788_p2 }
  0xb7   : > { %p14796_p11 = pnand %p14795_p8, %p14789_p3 }
  0xb9   : > { %14799 = shalt.err (!%p14796_p11)
}
  0xba   : > { %14191 = dma.hbm_to_vmem [thread:$0]  (!%p15102_p12), %s16652_s4, 98304, %s338_s24, [#allocation7], %s14975_s19, %s14975_s19, %s14976_s26  }
  0xbb   : > { %s14800_s28 = scalar_lea.hbm %s16654_s6, 40960 }
  0xbc   : > { %p14801_p13 = scmp.ne.s32.totalorder %s16654_s6, %s14800_s28  ;;  %p14807_p5 = scmp.lt.u32.totalorder %s14800_s28, %s16654_s6 }
  0xbe   : > { %p14803_p1 = pnand %p14801_p13, %p15118_p0 }
  0xc0   : > { %p14804_p6 = pneg %p14803_p1 }
  0xc2   : > { %p14809_p9 = pnand %p14807_p5, %p14804_p6 }
  0xc4   : > { %14812 = shalt.err (!%p14809_p9)
}
  0xc5   : > { %s14813_s22 = scalar_lea.vmem %s362_s12, 40960  ;;  %p14821_p4 = scmp.lt.s32.totalorder %s362_s12, %s362_s12 }
  0xc6   : > { %p14814_p10 = scmp.ne.s32.totalorder %s362_s12, %s14813_s22  ;;  %p14822_p7 = scmp.lt.s32.totalorder %s14813_s22, %s14813_s22 }
  0xc8   : > { %p14816_p2 = pnand %p14814_p10, %p15118_p0  ;;  %p14823_p8 = por %p14822_p7, %p14821_p4 }
  0xca   : > { %p14817_p3 = pneg %p14816_p2 }
  0xcc   : > { %p14824_p11 = pnand %p14823_p8, %p14817_p3 }
  0xce   : > { %14827 = shalt.err (!%p14824_p11)
}
  0xcf   : > { %s16698_s19 = smov 4   ;;  %s16699_s26 = smov 64  }
  0xd0   : > { %14197 = dma.hbm_to_vmem [thread:$0]  (!%p15102_p12), %s16654_s6, 40960, %s362_s12, [#allocation10], %s16699_s26, %s16699_s26, %s16698_s19  }
  0xd1   : > { %s14979_s23 = smov [#allocation14]   ;;  %s14980_s17 = smov [#allocation17]  }
  0xd2   : > { %s386_s5 = sshll.u32 %s14979_s23, 4  ;;  %s410_s7 = sshll.u32 %s14980_s17, 4  ;;  %s387_s5 = int_to_ptr.vmem [resolvable:$true] %s386_s5  ;;  %s411_s7 = int_to_ptr.vmem [resolvable:$true] %s410_s7 }
  0xd3   : > { %s14828_s25 = scalar_lea.hbm %s16656_s8, 16 }
  0xd4   : > { %p14829_p13 = scmp.ne.s32.totalorder %s16656_s8, %s14828_s25  ;;  %p14835_p5 = scmp.lt.u32.totalorder %s14828_s25, %s16656_s8 }
  0xd6   : > { %p14831_p1 = pnand %p14829_p13, %p15118_p0 }
  0xd8   : > { %p14832_p6 = pneg %p14831_p1 }
  0xda   : > { %p14837_p9 = pnand %p14835_p5, %p14832_p6 }
  0xdc   : > { %14840 = shalt.err (!%p14837_p9)
}
  0xdd   : > { %s14841_s12 = scalar_lea.vmem %s387_s5, 16  ;;  %s14848_s19 = scalar_lea.vmem %s387_s5, 32 }
  0xde   : > { %p14842_p10 = scmp.ne.s32.totalorder %s387_s5, %s14841_s12  ;;  %p14849_p4 = scmp.lt.s32.totalorder %s387_s5, %s387_s5 }
  0xdf   : > { %p14850_p7 = scmp.lt.s32.totalorder %s14848_s19, %s14841_s12 }
  0xe0   : > { %p14844_p2 = pnand %p14842_p10, %p15118_p0 }
  0xe1   : > { %p14851_p8 = por %p14850_p7, %p14849_p4 }
  0xe2   : > { %p14845_p3 = pneg %p14844_p2 }
  0xe4   : > { %p14852_p11 = pnand %p14851_p8, %p14845_p3 }
  0xe6   : > { %14855 = shalt.err (!%p14852_p11)
}
  0xe7   : > { %14203 = dma.hbm_to_vmem [thread:$0]  (!%p15102_p12), %s16656_s8, 16, %s387_s5, [#allocation13]  }
  0xe8   : > { %s14856_s17 = scalar_lea.hbm %s16658_s10, 16 }
  0xe9   : > { %p14857_p13 = scmp.ne.s32.totalorder %s16658_s10, %s14856_s17  ;;  %p14863_p5 = scmp.lt.u32.totalorder %s14856_s17, %s16658_s10 }
  0xeb   : > { %p14859_p1 = pnand %p14857_p13, %p15118_p0 }
  0xed   : > { %p14860_p6 = pneg %p14859_p1 }
  0xef   : > { %p14865_p9 = pnand %p14863_p5, %p14860_p6 }
  0xf1   : > { %14868 = shalt.err (!%p14865_p9)
}
  0xf2   : > { %s14869_s16 = scalar_lea.vmem %s411_s7, 16  ;;  %s14876_s5 = scalar_lea.vmem %s411_s7, 32 }
  0xf3   : > { %p14870_p10 = scmp.ne.s32.totalorder %s411_s7, %s14869_s16  ;;  %p14877_p4 = scmp.lt.s32.totalorder %s411_s7, %s411_s7 }
  0xf4   : > { %p14878_p7 = scmp.lt.s32.totalorder %s14876_s5, %s14869_s16 }
  0xf5   : > { %p14872_p2 = pnand %p14870_p10, %p15118_p0 }
  0xf6   : > { %p14879_p8 = por %p14878_p7, %p14877_p4 }
  0xf7   : > { %p14873_p3 = pneg %p14872_p2 }
  0xf9   : > { %p14880_p11 = pnand %p14879_p8, %p14873_p3 }
  0xfb   : > { %14883 = shalt.err (!%p14880_p11)
}
  0xfc   : > { %14209 = dma.hbm_to_vmem [thread:$0]  (!%p15102_p12), %s16658_s10, 16, %s411_s7, [#allocation16]  }
  0xfd   : > { %p16700_p13 = scmp.ne.s32.totalorder %s16691_s29, 0 }
  0xfe   : > { %p16701_p1 = scmp.eq.s32.totalorder (!%p16700_p13), %s15066_s21, 0 }
  0xff   : > { %437 = sbr.rel (%p16700_p13) target bundleno = 2381 (0x94d), region = 64 }
 0x106   : > { %14929 = dma.done.wait (%p16701_p1), [#allocation4], 6144   ;;  %p16702_p0 = pmov %p16701_p1 }
 0x108   : > { %14931 = vsyncadd (%p16702_p0), [#allocation4], 4294961152  ;;  %p16703_p6 = pmov %p16702_p0 }
 0x109   : > { %p16704_p5 = pmov %p16702_p0 }
 0x10a   : > { %14933 = dma.done.wait (%p16703_p6), [#allocation7], 98432  }
 0x10b   : > { %14935 = vsyncadd (%p16704_p5), [#allocation7], 4294868864  ;;  %p16705_p9 = pmov %p16702_p0 }
 0x10c   : > { %p16706_p12 = pmov %p16702_p0 }
 0x10d   : > { %14937 = dma.done.wait (%p16705_p9), [#allocation10], 41088  }
 0x10e   : > { %14939 = vsyncadd (%p16706_p12), [#allocation10], 4294926208  ;;  %p16707_p10 = pmov %p16702_p0 }
 0x10f   : > { %p16708_p2 = pmov %p16702_p0 }
 0x110   : > { %14941 = dma.done.wait (%p16707_p10), [#allocation13], 80  }
 0x111   : > { %14943 = vsyncadd (%p16708_p2), [#allocation13], 4294967216  ;;  %p16709_p3 = pmov %p16702_p0 }
 0x112   : > { %p16710_p4 = pmov %p16702_p0 }
 0x113   : > { %14945 = dma.done.wait (%p16709_p3), [#allocation16], 1040  }
 0x114   : > { %14947 = vsyncadd (%p16710_p4), [#allocation16], 4294966256  ;;  %p511_p7 = scmp.lt.s32.totalorder %s15066_s21, 1  ;;  %v14981_v0 = vmov 0   ;;  %v543_v1 = vld [vmem:[#allocation3 + $0x80] sm:$0xff]  ;;  %v544_v3 = vld [vmem:[#allocation3 + $0x88] sm:$0xff] }
 0x115   : > { %737 = vmatprep.mubr.bf16.mxu0 %v14981_v0  ;;  %808 = vmatprep.mubr.bf16.mxu1 %v14981_v0  ;;  %v547_v2 = vld [vmem:[#allocation3 + $0xa0] sm:$0xff]  ;;  %v548_v5 = vld [vmem:[#allocation3 + $0xa8] sm:$0xff]  ;;  %vm16676_vm0 = vcmask 1046528   ;;  %v546_v26 = vld [vmem:[#allocation3 + $0x98] sm:$0xff]  ;;  %vm574_vm1 = vsmask.f32 7424 }
 0x116   : > { %s15320_s29 = scalar_select %p511_p7, %s15066_s21, 1  ;;  %v12269_v4 = vcombine.high %v543_v1, %v547_v2  ;;  %v12268_v6 = vcombine.low %v543_v1, %v547_v2  ;;  %v551_v7 = vld [vmem:[#allocation3 + $0xc0] sm:$0xff]  ;;  %v12271_v9 = vcombine.high %v544_v3, %v548_v5  ;;  %v15328_v10 = vcombine.low %v544_v3, %v548_v5  ;;  %v552_v12 = vld [vmem:[#allocation3 + $0xc8] sm:$0xff]  ;;  %v550_v27 = vld [vmem:[#allocation3 + $0xb8] sm:$0xff] }
 0x117   : > { %v555_v8 = vld [vmem:[#allocation3 + $0xe0] sm:$0x77]  ;;  %v556_v13 = vld [vmem:[#allocation3 + $0xe8] sm:$0x77]  ;;  %v12275_v33 = vcombine.high %v546_v26, %v550_v27  ;;  %v554_v37 = vld [vmem:[#allocation3 + $0xd8] sm:$0xff]  ;;  %vm670_vm2 = vcmask 244736   ;;  %v12274_v44 = vcombine.low %v546_v26, %v550_v27 }
 0x118   : > { %s14143_s15 = smul.u32 24, %s15320_s29  ;;  %v12277_v11 = vcombine.high %v551_v7, %v555_v8  ;;  %v12276_v14 = vcombine.low %v551_v7, %v555_v8  ;;  %705 = vmatprep.subr.bf16.mxu0 %v12269_v4  ;;  %v15331_v16 = vcombine.high %v552_v12, %v556_v13  ;;  %v12278_v17 = vcombine.low %v552_v12, %v556_v13  ;;  %v558_v38 = vld [vmem:[#allocation3 + $0xf8] sm:$0x77]  ;;  %v15363_v41 = vld [vmem:[#allocation3 + $0xd0] sm:$0xff]  ;;  %v15367_v43 = vld [vmem:[#allocation3 + $0x48] sm:$0xff]  ;;  %s518_s24 = scalar_lea.vmem %s16649_s1, %s15320_s29 }
 0x119   : > { %13995 = vmatprep.subr.bf16.mxu1 %v12271_v9  ;;  %706 = vmatpush1.bf16.msra.mxu0 %v12268_v6  ;;  %v15365_v42 = vld [vmem:[#allocation3 + $0xf0] sm:$0x77]  ;;  %v15369_v45 = vld [vmem:[#allocation3 + $0x68] sm:$0x77]  ;;  %v15371_v46 = vld [vmem:[#allocation3 + $0x40] sm:$0xff]  ;;  %v12283_v50 = vcombine.high %v554_v37, %v558_v38  ;;  %v12282_v51 = vcombine.low %v554_v37, %v558_v38  ;;  %vm1855_vm3 = vcmask 1040384  }
 0x11a   : > { %s15326_s12 = scalar_lea.vmem %s16648_s0, %s14143_s15  ;;  %13997 = vmatpush1.bf16.msra.mxu1 %v15328_v10  ;;  %12284 = vmatprep.subr.msk.bf16.mxu0 %vm16676_vm0, %v12277_v11  ;;  %v682_v23 = vsel %vm16676_vm0, %v12276_v14, 0  ;;  %v15350_v24 = vsel %vm16676_vm0, %v12278_v17, 0  ;;  %v15373_v47 = vld [vmem:[#allocation3 + $0x60] sm:$0x77]  ;;  %v15381_v52 = vld [vmem:[#allocation3 + $0x90] sm:$0xff]  ;;  %v15385_v54 = vld [vmem:[#allocation3 + $0x8] sm:$0xff]  ;;  %v12280_v56 = vcombine.low %v15363_v41, %v15365_v42  ;;  %v12311_v60 = vcombine.low %v15367_v43, %v15369_v45 }
 0x11b   : > { %v520_v15 = vld [vmem:[%s15326_s12] sm:$0xf]  ;;  %v15334_v18 = vld [vmem:[%s15326_s12 + $0x4] sm:$0xf]  ;;  %v15340_v20 = vld [vmem:[%s15326_s12 + $0x8] sm:$0xff]   ;;  %13996 = vmatprep.subr.msk.bf16.mxu1 %vm16676_vm0, %v15331_v16  ;;  %v12309_v61 = vcombine.low %v15371_v46, %v15373_v47  ;;  %v700_v4 = vsel %vm16676_vm0, %v12282_v51, 0 }
 0x11c   : > { %v15337_v19 = vcombine.low %v520_v15, %v15334_v18  ;;  %v15343_v21 = vld [vmem:[%s15326_s12 + $0x10] sm:$0xf]  ;;  %v541_v22 = vld [vmem:[%s15326_s12 + $0x14] sm:$0x1]  ;;  %v583_v30 = vshll.u32 %v15340_v20, 16  ;;  %v587_v31 = vshrl.u32 %v15340_v20, 16 }
 0x11d   : > { %v15353_v25 = vcombine.low %v15343_v21, %v541_v22  ;;  %708 = vmatpush1.bf16.msra.mxu0 %v682_v23  ;;  %v15383_v53 = vld [vmem:[#allocation3 + $0xb0] sm:$0xff]  ;;  %v530_v57 = vld [vmem:[#allocation3 + $0x28] sm:$0xff]  ;;  %v15394_v58 = vld [vmem:[#allocation3 + $0x58] sm:$0xff]  ;;  %v1320_v11 = vrot.slane %v15340_v20, 1  ;;  %v1036_v14 = vsel %vm16676_vm0, %v12311_v60, 0  ;;  %v1030_v15 = vsel %vm16676_vm0, %v12309_v61, 0 }
 0x11e   : > { %v576_v28 = vshrl.u32 %v15337_v19, 16  ;;  %v578_v29 = vshll.u32 %v15337_v19, 16  ;;  %v585_v35 = vrot.slane %v583_v30, 1  ;;  %13998 = vmatpush1.bf16.msra.mxu1 %v15350_v24  ;;  %766 = vmatprep.subr.bf16.mxu0 %v12271_v9  ;;  %v15396_v59 = vld [vmem:[#allocation3 + $0x78] sm:$0x77]  ;;  %v15404_v62 = vld [vmem:[#allocation3 + $0x50] sm:$0xff]  ;;  %v12273_v1 = vcombine.high %v15381_v52, %v15383_v53 }
 0x11f   : > { %v591_v32 = vshll.u32 %v15353_v25, 16  ;;  %888 = vmatprep.subr.bf16.mxu1 %v12275_v33  ;;  %v595_v55 = vshrl.u32 %v15353_v25, 16  ;;  %v15406_v63 = vld [vmem:[#allocation3 + $0x70] sm:$0x77]  ;;  %v15411_v2 = vld [vmem:[#allocation3 + $0x148] sm:$0xff]  ;;  %v12304_v5 = vcombine.high %v15385_v54, %v530_v57  ;;  %v12315_v6 = vcombine.low %v15394_v58, %v15396_v59  ;;  %v15429_v12 = vld [vmem:[#allocation3 + $0x140] sm:$0xff] }
 0x120   : > { %v580_v34 = vrot.slane %v578_v29, 1  ;;  %v589_v40 = vor.u32 %v587_v31, %v585_v35  ;;  %v15413_v3 = vld [vmem:[#allocation3 + $0x168] sm:$0x77]  ;;  %v1297_v7 = vld [vmem:[%s15326_s12] sm:$0xe]  ;;  %v694_v9 = vsel %vm16676_vm0, %v12280_v56, 0  ;;  %v12314_v60 = vcombine.high %v15404_v62, %v15406_v63 }
 0x121   : > { %v593_v36 = vrot.slane %v591_v32, 1  ;;  %v15431_v13 = vld [vmem:[#allocation3 + $0x160] sm:$0x77]  ;;  %v15439_v17 = vrot.slane %v15353_v25, 1  ;;  %v15441_v22 = vld [vmem:[#allocation3 + $0x158] sm:$0xff]  ;;  %v15446_v26 = vsel %vm16676_vm0, %v12315_v6, 0 }
 0x122   : > { %v581_v39 = vor.u32 %v580_v34, %v576_v28  ;;  %v15443_v23 = vld [vmem:[#allocation3 + $0x178] sm:$0x77]  ;;  %v15449_v27 = vld [vmem:[#allocation3 + $0x150] sm:$0xff]  ;;  %v12342_v28 = vcombine.low %v15429_v12, %v15431_v13  ;;  %v529_v51 = vld [vmem:[#allocation3 + $0x20] sm:$0xff]  ;;  %v12343_v6 = vcombine.high %v15429_v12, %v15431_v13  ;;  %vm1856_vm4 = vsmask.f32 256 }
 0x123   : > { %v15379_v49 = vsel %vm574_vm1, %v589_v40, %v593_v36  ;;  %v15423_v8 = vor.u32 %v595_v55, %v593_v36  ;;  %v15453_v29 = vld [vmem:[#allocation3 + $0x170] sm:$0x77]  ;;  %v12303_v36 = vcombine.low %v15385_v54, %v530_v57  ;;  %v528_v37 = vld [vmem:[#allocation3 + $0x18] sm:$0xff]  ;;  %v1300_v56 = vld [vmem:[#allocation3 + $0x108] sm:$0xff]  ;;  %vm1858_vm5 = vcmask 1044484   ;;  %s509_s3 = sand.u32 1, %s14958_s18  }
 0x124   : > { %v15376_v48 = vsel %vm574_vm1, %v581_v39, %v585_v35  ;;  %12290 = vmatmul.mubr.msk.bf16.vlgmr.msra.gmra.mrb[0].mxu1 %vm670_vm2, %v15379_v49  ;;  %v12346_v31 = vcombine.low %v15449_v27, %v15453_v29  ;;  %v15474_v33 = vsel %vm16676_vm0, %v12342_v28, 0  ;;  %v532_v38 = vld [vmem:[#allocation3 + $0x38] sm:$0xff]  ;;  %v12312_v39 = vcombine.high %v15367_v43, %v15369_v45  ;;  %v1304_v57 = vld [vmem:[#allocation3 + $0x128] sm:$0xff]  ;;  %vm1857_vm7 = vmand %vm1855_vm3, %vm1856_vm4  ;;  %s13505_s23 = sshll.u32 %s15066_s21, 4  ;;  %s510_s17 = scalar_lea.vmem [#allocation18], %s509_s3 }
 0x125   : > { %12285 = vmatmul.mubr.msk.bf16.vlgmr.msra.gmra.mrb[0].mxu0 %vm670_vm2, %v15376_v48  ;;  %818 = vmatprep.mubr.bf16.mxu1 %v14981_v0  ;;  %v12308_v40 = vcombine.high %v528_v37, %v532_v38  ;;  %v12281_v43 = vcombine.high %v15363_v41, %v15365_v42  ;;  %v531_v41 = vld [vmem:[#allocation3 + $0x30] sm:$0xff]  ;;  %v12310_v42 = vcombine.high %v15371_v46, %v15373_v47  ;;  %vm1859_vm6 = vsmask.f32 4352  ;;  %s12090_s9 = sshll.u32 %s510_s17, 4  ;;  %s16606_s30 = scalar_lea.hbm %s16659_s11, %s13505_s23  ;;  %s16608_s9 = int_to_ptr.vmem [resolvable:$true] %s12090_s9 }
 0x126   : > { %767 = vmatpush1.bf16.msra.mxu0 %v15328_v10  ;;  %747 = vmatprep.mubr.bf16.mxu0 %v14981_v0  ;;  %v12313_v10 = vcombine.low %v15404_v62, %v15406_v63  ;;  %v15480_v35 = vsel %vm16676_vm0, %v12346_v31, 0  ;;  %v12307_v55 = vcombine.low %v528_v37, %v532_v38  ;;  %v12316_v46 = vcombine.high %v15394_v58, %v15396_v59  ;;  %v1299_v58 = vld [vmem:[#allocation3 + $0x100] sm:$0xff]  ;;  %vm1860_vm8 = vmand %vm1858_vm5, %vm1859_vm6  ;;  %v2576_v31 = vld [vmem:[#allocation8 + $0x868] sm:$0xff]  ;;  %s12078_s16 = scalar_lea.sflag [#allocation5], %s509_s3  ;;  %s14884_s21 = scalar_lea.vmem %s16608_s9, 16 }
 0x127   : > { %889 = vmatpush1.bf16.msra.mxu1 %v12274_v44  ;;  %12288 = vmatprep.subr.msk.bf16.mxu0 %vm16676_vm0, %v15331_v16  ;;  %v12344_v16 = vcombine.low %v15411_v2, %v15413_v3  ;;  %v12272_v44 = vcombine.low %v15381_v52, %v15383_v53  ;;  %v527_v53 = vld [vmem:[#allocation3 + $0x10] sm:$0xff]  ;;  %v12337_v47 = vcombine.high %v1300_v56, %v1304_v57  ;;  %v1303_v59 = vld [vmem:[#allocation3 + $0x120] sm:$0xff]  ;;  %vm15612_vm9 = vmor %vm1860_vm8, %vm1857_vm7  ;;  %vm1919_vm10 = vsmask.f32 7938  ;;  %p14885_p8 = scmp.ne.s32.totalorder %s16608_s9, %s14884_s21  ;;  %p16770_p11 = scmp.ne.s32.totalorder %s16688_s27, 0 }
 0x128   : > { %12296 = vmatprep.subr.msk.bf16.mxu1 %vm16676_vm0, %v12283_v50  ;;  %v15460_v25 = vsel %vm16676_vm0, %v12313_v10, 0  ;;  %v525_v50 = vld [vmem:[#allocation3] sm:$0xff]  ;;  %v12306_v54 = vcombine.high %v527_v53, %v531_v41  ;;  %v12335_v61 = vcombine.high %v1299_v58, %v1303_v59  ;;  %v12345_v62 = vcombine.high %v15411_v2, %v15413_v3  ;;  %v1301_v3 = vld [vmem:[#allocation3 + $0x110] sm:$0xff]  ;;  %vm1920_vm12 = vmand %vm1855_vm3, %vm1919_vm10  ;;  %s14984_s5 = smov [#allocation18]  }
 0x129   : > { %v15463_v30 = vsel %vm16676_vm0, %v12344_v16, 0  ;;  %v12302_v45 = vcombine.high %v525_v50, %v529_v51  ;;  %v12301_v52 = vcombine.low %v525_v50, %v529_v51  ;;  %v12334_v2 = vcombine.low %v1299_v58, %v1303_v59  ;;  %v2580_v37 = vld [vmem:[#allocation8 + $0x888] sm:$0xff]  ;;  %p14886_p13 = pnand %p14885_p8, %p16770_p11  ;;  %s14888_s14 = sshll.u32 %s14984_s5, 4  ;;  %s14889_s14 = int_to_ptr.vmem [resolvable:$false] %s14888_s14 }
 0x12a   : > { %769 = vmatpush1.bf16.msra.mxu0 %v15350_v24  ;;  %v12333_v24 = vcombine.low %v1297_v7, %v15334_v18  ;;  %v12348_v18 = vcombine.low %v15441_v22, %v15443_v23  ;;  %v1323_v10 = vsel %vm16676_vm0, %v1320_v11, %v15439_v17  ;;  %v12347_v13 = vcombine.high %v15449_v27, %v15453_v29  ;;  %v2571_v27 = vld [vmem:[#allocation8 + $0x840] sm:$0xff]  ;;  %v2584_v38 = vld [vmem:[#allocation8 + $0x8a8] sm:$0xff]  ;;  %s14890_s22 = scalar_lea.vmem %s14889_s14, 32  ;;  %p14891_p0 = scmp.lt.s32.totalorder %s16608_s9, %s14889_s14 }
 0x12b   : > { %891 = vmatpush1.bf16.msra.mxu1 %v700_v4  ;;  %827 = vmatprep.subr.bf16.mxu0 %v12273_v1  ;;  %v1302_v1 = vld [vmem:[#allocation3 + $0x118] sm:$0xff]  ;;  %vm1921_vm11 = vsmask.f32 7954  ;;  %v2575_v29 = vld [vmem:[#allocation8 + $0x860] sm:$0xff]  ;;  %vm1868_vm15 = vcmask 1042434   ;;  %vm1871_vm4 = vcmask 1046534   ;;  %v12419_v50 = vcombine.high %v2580_v37, %v2584_v38  ;;  %p14887_p1 = pneg %p14886_p13  ;;  %p14892_p6 = scmp.lt.s32.totalorder %s14890_s22, %s14884_s21 }
 0x12c   : > { %1114 = vmatprep.subr.bf16.mxu1 %v12304_v5  ;;  %12291 = vmatmul.mubr.msk.bf16.gmra.mrb[4].mxu1 %vm670_vm2, %v15423_v8  ;;  %v15471_v32 = vrot.slane %v12333_v24, 1  ;;  %v15477_v34 = vsel %vm16676_vm0, %v12348_v18, 0  ;;  %v1306_v4 = vld [vmem:[#allocation3 + $0x138] sm:$0xff]  ;;  %v1305_v5 = vld [vmem:[#allocation3 + $0x130] sm:$0xff]  ;;  %vm1922_vm13 = vmand %vm1858_vm5, %vm1921_vm11  ;;  %v12409_v18 = vcombine.high %v2571_v27, %v2575_v29  ;;  %vm1970_vm6 = vsmask.f32 6400 }
 0x12d   : > { %12286 = vmatmul.mubr.msk.bf16.gmra.mrb[4].mxu0 %vm670_vm2, %v15379_v49  ;;  %920 = vmatprep.mubr.bf16.mxu1 %v14981_v0  ;;  %v12341_v63 = vcombine.high %v1302_v1, %v1306_v4  ;;  %v12339_v7 = vcombine.high %v1301_v3, %v1305_v5  ;;  %v12338_v12 = vcombine.low %v1301_v3, %v1305_v5  ;;  %vm15620_vm14 = vmor %vm1922_vm13, %vm1920_vm12  ;;  %vm1869_vm7 = vsmask.f32 7946  ;;  %p14893_p5 = por %p14892_p6, %p14891_p0 }
 0x12e   : > { %757 = vmatprep.mubr.bf16.mxu0 %v14981_v0  ;;  %vm1971_vm5 = vmand %vm1871_vm4, %vm1970_vm6  ;;  %vm1872_vm8 = vsmask.f32 7962  ;;  %vm1936_vm6 = vsmask.f32 5376 }
 0x12f   : > { %vm1870_vm11 = vmand %vm1868_vm15, %vm1869_vm7  ;;  %vm2032_vm7 = vcmask 1047559   ;;  %p14894_p9 = pnand %p14893_p5, %p14887_p1 }
 0x130   : > { %vm1873_vm12 = vmand %vm1871_vm4, %vm1872_vm8  ;;  %vm16679_vm4 = vcmask 1045509   ;;  %vm1951_vm8 = vsmask.f32 7942 }
 0x131   : > { %vm15636_vm13 = vmor %vm1873_vm12, %vm1870_vm11  ;;  %vm1953_vm11 = vsmask.f32 7958 }
 0x134   : > { %12297 = vmatmul.mubr.msk.bf16.vlgmr.msra.gmra.mrb[8].mxu1 %vm670_vm2, %v15376_v48 }
 0x135   : > { %12287 = vmatmul.mubr.msk.bf16.gmra.mrb[8].mxu0 %vm670_vm2, %v15423_v8  ;;  %930 = vmatprep.mubr.bf16.mxu1 %v14981_v0 }
 0x136   : > { %798 = vmatprep.mubr.bf16.mxu0 %v14981_v0  ;;  %1115 = vmatpush1.bf16.msra.mxu1 %v12303_v36 }
 0x137   : > { %12321 = vmatprep.subr.msk.bf16.mxu1 %vm16676_vm0, %v12312_v39 }
 0x13a   : > { %1117 = vmatpush1.bf16.msra.mxu1 %v1036_v14  ;;  %v2563_v14 = vld [vmem:[#allocation8 + $0x800] sm:$0xff] }
 0x13b   : > { %1236 = vmatprep.subr.bf16.mxu1 %v12308_v40 }
 0x13c   : > { %12298 = vmatmul.mubr.msk.bf16.gmra.mrb[12].mxu1 %vm670_vm2, %v15379_v49 }
 0x13d   : > { %12289 = vmatmul.mubr.msk.bf16.vlgmr.msra.gmra.mrb[12].mxu0 %vm670_vm2, %v15376_v48  ;;  %940 = vmatprep.mubr.bf16.mxu1 %v14981_v0 }
 0x13e   : > { %828 = vmatpush1.bf16.msra.mxu0 %v12272_v44  ;;  %859 = vmatprep.mubr.bf16.mxu0 %v14981_v0  ;;  %v12418_v44 = vcombine.low %v2580_v37, %v2584_v38 }
 0x13f   : > { %12292 = vmatprep.subr.msk.bf16.mxu0 %vm16676_vm0, %v12281_v43 }
 0x142   : > { %830 = vmatpush1.bf16.msra.mxu0 %v694_v9  ;;  %v12340_v9 = vcombine.low %v1302_v1, %v1306_v4 }
 0x143   : > { %1053 = vmatprep.subr.bf16.mxu0 %v12302_v45 }
 0x144   : > { %12299 = vmatmul.mubr.msk.bf16.gmra.mrb[16].mxu1 %vm670_vm2, %v15423_v8 }
 0x145   : > { %12293 = vmatmul.mubr.msk.bf16.vlgmr.msra.gmra.mrb[16].mxu0 %vm670_vm2, %v15376_v48  ;;  %1146 = vmatprep.mubr.bf16.mxu1 %v14981_v0  ;;  %v12300_v48 = vcombine.low %v15343_v21, %v15343_v21  ;;  %v12336_v21 = vcombine.low %v1300_v56, %v1304_v57  ;;  %v2588_v57 = vld [vmem:[#allocation8 + $0x8c8] sm:$0xff] }
 0x146   : > { %1054 = vmatpush1.bf16.msra.mxu0 %v12301_v52  ;;  %869 = vmatprep.mubr.bf16.mxu0 %v14981_v0 }
 0x147   : > { %12317 = vmatprep.subr.msk.bf16.mxu0 %vm16676_vm0, %v12310_v42 }
 0x14a   : > { %1056 = vmatpush1.bf16.msra.mxu0 %v1030_v15  ;;  %v2567_v15 = vld [vmem:[#allocation8 + $0x820] sm:$0xff] }
 0x14b   : > { %1175 = vmatprep.subr.bf16.mxu0 %v12306_v54  ;;  %v12401_v16 = vcombine.high %v2563_v14, %v2567_v15  ;;  %v2587_v54 = vld [vmem:[#allocation8 + $0x8c0] sm:$0xff] }
 0x14c   : > { %12322 = vmatmul.mubr.msk.bf16.vlgmr.msra.gmra.mrb[20].mxu1 %vm670_vm2, %v15337_v19 }
 0x14d   : > { %12294 = vmatmul.mubr.msk.bf16.gmra.mrb[20].mxu0 %vm670_vm2, %v15379_v49  ;;  %1156 = vmatprep.mubr.bf16.mxu1 %v14981_v0  ;;  %v12305_v49 = vcombine.low %v527_v53, %v531_v41  ;;  %v1862_v53 = vld [vmem:[#allocation2] sm:$0x11] }
 0x14e   : > { %879 = vmatprep.mubr.bf16.mxu0 %v14981_v0  ;;  %1237 = vmatpush1.bf16.msra.mxu1 %v12307_v55  ;;  %v1863_v42 = vsel %vm15612_vm9, 0, %v1862_v53  ;;  %v2591_v55 = vld [vmem:[#allocation8 + $0x8e0] sm:$0xff]  ;;  %v2628_v53 = vld [vmem:[#allocation8 + $0xa08] sm:$0xff] }
 0x14f   : > { %12329 = vmatprep.subr.msk.bf16.mxu1 %vm16676_vm0, %v12316_v46  ;;  %1864 = vst [vmem:[#allocation2] sm:$0x11] %v1863_v42  ;;  %v12425_v56 = vcombine.high %v2587_v54, %v2591_v55  ;;  %v1878_v46 = vld [vmem:[#allocation2 + $0x28] sm:$0x44] }
 0x152   : > { %1239 = vmatpush1.bf16.msra.mxu1 %v15446_v26 }
 0x153   : > { %1490 = vmatprep.subr.bf16.mxu1 %v12337_v47  ;;  %v12424_v47 = vcombine.low %v2587_v54, %v2591_v55  ;;  %v2632_v54 = vld [vmem:[#allocation8 + $0xa28] sm:$0xff] }
 0x154   : > { %12323 = vmatmul.mubr.msk.bf16.gmra.mrb[0].mxu1 %vm670_vm2, %v15340_v20  ;;  %v1875_v55 = vld [vmem:[#allocation2 + $0x20] sm:$0x44] }
 0x155   : > { %12295 = vmatmul.mubr.msk.bf16.gmra.mrb[24].mxu0 %vm670_vm2, %v15423_v8  ;;  %1166 = vmatprep.mubr.bf16.mxu1 %v14981_v0  ;;  %v1321_v8 = vsel %vm16676_vm0, %v15471_v32, %v1320_v11 }
 0x156   : > { %1085 = vmatprep.mubr.bf16.mxu0 %v14981_v0 }
 0x15c   : > { %12324 = vmatmul.mubr.msk.bf16.gmra.mrb[24].mxu1 %vm670_vm2, %v12300_v48 }
 0x15d   : > { %12318 = vmatmul.mubr.msk.bf16.vlgmr.msra.gmra.mrb[0].mxu0 %vm670_vm2, %v15337_v19  ;;  %1268 = vmatprep.mubr.bf16.mxu1 %v14981_v0 }
 0x15e   : > { %1176 = vmatpush1.bf16.msra.mxu0 %v12305_v49  ;;  %1095 = vmatprep.mubr.bf16.mxu0 %v14981_v0  ;;  %v2592_v49 = vld [vmem:[#allocation8 + $0x8e8] sm:$0xff] }
 0x15f   : > { %12325 = vmatprep.subr.msk.bf16.mxu0 %vm16676_vm0, %v12314_v60  ;;  %v12426_v59 = vcombine.low %v2588_v57, %v2592_v49  ;;  %v12427_v60 = vcombine.high %v2588_v57, %v2592_v49  ;;  %v12466_v57 = vcombine.low %v2628_v53, %v2632_v54  ;;  %v2639_v49 = vld [vmem:[#allocation8 + $0xa60] sm:$0xff] }
 0x162   : > { %1178 = vmatpush1.bf16.msra.mxu0 %v15460_v25  ;;  %v2572_v25 = vld [vmem:[#allocation8 + $0x848] sm:$0xff] }
 0x163   : > { %1429 = vmatprep.subr.bf16.mxu0 %v12335_v61  ;;  %v12410_v32 = vcombine.low %v2572_v25, %v2576_v31  ;;  %v2595_v61 = vld [vmem:[#allocation8 + $0x900] sm:$0xff] }
 0x164   : > { %12330 = vmatmul.mubr.msk.bf16.vlgmr.msra.gmra.mrb[8].mxu1 %vm670_vm2, %v15337_v19 }
 0x165   : > { %12319 = vmatmul.mubr.msk.bf16.gmra.mrb[4].mxu0 %vm670_vm2, %v15340_v20  ;;  %1278 = vmatprep.mubr.bf16.mxu1 %v14981_v0 }
 0x166   : > { %1105 = vmatprep.mubr.bf16.mxu0 %v14981_v0  ;;  %1491 = vmatpush1.bf16.msra.mxu1 %v12336_v21  ;;  %v2599_v21 = vld [vmem:[#allocation8 + $0x920] sm:$0xff] }
 0x167   : > { %12354 = vmatprep.subr.msk.bf16.mxu1 %vm16676_vm0, %v12345_v62  ;;  %v12433_v4 = vcombine.high %v2595_v61, %v2599_v21  ;;  %v2596_v62 = vld [vmem:[#allocation8 + $0x908] sm:$0xff]  ;;  %v12432_v3 = vcombine.low %v2595_v61, %v2599_v21 }
 0x168   : > { %v2640_v61 = vld [vmem:[#allocation8 + $0xa68] sm:$0xff] }
 0x16a   : > { %1493 = vmatpush1.bf16.msra.mxu1 %v15463_v30  ;;  %v12408_v30 = vcombine.low %v2571_v27, %v2575_v29 }
 0x16b   : > { %1612 = vmatprep.subr.bf16.mxu1 %v12341_v63  ;;  %v2600_v63 = vld [vmem:[#allocation8 + $0x928] sm:$0xff] }
 0x16c   : > { %12331 = vmatmul.mubr.msk.bf16.gmra.mrb[12].mxu1 %vm670_vm2, %v15340_v20  ;;  %v12435_v5 = vcombine.high %v2596_v62, %v2600_v63 }
 0x16d   : > { %12320 = vmatmul.mubr.msk.bf16.gmra.mrb[28].mxu0 %vm670_vm2, %v12300_v48  ;;  %1288 = vmatprep.mubr.bf16.mxu1 %v14981_v0 }
 0x16e   : > { %1207 = vmatprep.mubr.bf16.mxu0 %v14981_v0 }
 0x174   : > { %12332 = vmatmul.mubr.msk.bf16.gmra.mrb[28].mxu1 %vm670_vm2, %v12300_v48 }
 0x175   : > { %12326 = vmatmul.mubr.msk.bf16.vlgmr.msra.gmra.mrb[16].mxu0 %vm670_vm2, %v15337_v19  ;;  %1522 = vmatprep.mubr.bf16.mxu1 %v14981_v0  ;;  %v12349_v19 = vcombine.high %v15441_v22, %v15443_v23  ;;  %v2568_v22 = vld [vmem:[#allocation8 + $0x828] sm:$0xff]  ;;  %v12400_v23 = vcombine.low %v2563_v14, %v2567_v15 }
 0x176   : > { %1430 = vmatpush1.bf16.msra.mxu0 %v12334_v2  ;;  %1217 = vmatprep.mubr.bf16.mxu0 %v14981_v0 }
 0x177   : > { %12350 = vmatprep.subr.msk.bf16.mxu0 %vm16676_vm0, %v12343_v6 }
 0x17a   : > { %1432 = vmatpush1.bf16.msra.mxu0 %v15474_v33  ;;  %v12411_v33 = vcombine.high %v2572_v25, %v2576_v31  ;;  %v2623_v31 = vld [vmem:[#allocation8 + $0x9e0] sm:$0xff] }
 0x17b   : > { %1551 = vmatprep.subr.bf16.mxu0 %v12339_v7  ;;  %v12434_v7 = vcombine.low %v2596_v62, %v2600_v63  ;;  %v2643_v63 = vld [vmem:[#allocation8 + $0xa80] sm:$0xff] }
 0x17c   : > { %12355 = vmatmul.mubr.msk.bf16.vlgmr.msra.gmra.mrb[20].mxu1 %vm670_vm2, %v1321_v8 }
 0x17d   : > { %12327 = vmatmul.mubr.msk.bf16.gmra.mrb[20].mxu0 %vm670_vm2, %v15340_v20  ;;  %1532 = vmatprep.mubr.bf16.mxu1 %v14981_v0  ;;  %v1865_v20 = vld [vmem:[#allocation2 + $0x8] sm:$0x11] }
 0x17e   : > { %1227 = vmatprep.mubr.bf16.mxu0 %v14981_v0  ;;  %1613 = vmatpush1.bf16.msra.mxu1 %v12340_v9  ;;  %v2607_v9 = vld [vmem:[#allocation8 + $0x960] sm:$0xff] }
 0x17f   : > { %12362 = vmatprep.subr.msk.bf16.mxu1 %vm16676_vm0, %v12349_v19 }
 0x182   : > { %1615 = vmatpush1.bf16.msra.mxu1 %v15477_v34  ;;  %v2579_v34 = vld [vmem:[#allocation8 + $0x880] sm:$0xff] }
 0x184   : > { %12356 = vmatmul.mubr.msk.bf16.gmra.mrb[0].mxu1 %vm670_vm2, %v1323_v10 }
 0x185   : > { %12328 = vmatmul.mubr.msk.bf16.gmra.mrb[32].mxu0 %vm670_vm2, %v12300_v48  ;;  %1542 = vmatprep.mubr.bf16.mxu1 %v14981_v0  ;;  %v1879_v48 = vsel %vm15636_vm13, 0, %v1878_v46  ;;  %v12467_v46 = vcombine.high %v2628_v53, %v2632_v54  ;;  %v2679_v53 = vld [vmem:[#allocation8 + $0xba0] sm:$0xff]  ;;  %v2676_v54 = vld [vmem:[#allocation8 + $0xb88] sm:$0xff] }
 0x186   : > { %1461 = vmatprep.mubr.bf16.mxu0 %v14981_v0  ;;  %1880 = vst [vmem:[#allocation2 + $0x28] sm:$0x44] %v1879_v48  ;;  %v2635_v48 = vld [vmem:[#allocation8 + $0xa40] sm:$0xff] }
 0x187   : > { %v12472_v21 = vcombine.low %v2635_v48, %v2639_v49 }
 0x18c   : > { %12357 = vmatmul.mubr.msk.bf16.gmra.mrb[32].mxu1 %vm670_vm2, %v15439_v17 }
 0x18d   : > { %12351 = vmatmul.mubr.msk.bf16.vlgmr.msra.gmra.mrb[0].mxu0 %vm670_vm2, %v1321_v8  ;;  %1644 = vmatprep.mubr.bf16.mxu1 %v14981_v0 }
 0x18e   : > { %1552 = vmatpush1.bf16.msra.mxu0 %v12338_v12  ;;  %1471 = vmatprep.mubr.bf16.mxu0 %v14981_v0  ;;  %v2604_v12 = vld [vmem:[#allocation8 + $0x948] sm:$0xff] }
 0x18f   : > { %12358 = vmatprep.subr.msk.bf16.mxu0 %vm16676_vm0, %v12347_v13  ;;  %v2608_v13 = vld [vmem:[#allocation8 + $0x968] sm:$0xff]  ;;  %vm15810_vm0 = vmand %vm16679_vm4, %vm1936_vm6 }
 0x190   : > { %v12442_v15 = vcombine.low %v2604_v12, %v2608_v13 }
 0x192   : > { %1554 = vmatpush1.bf16.msra.mxu0 %v15480_v35  ;;  %v2583_v35 = vld [vmem:[#allocation8 + $0x8a0] sm:$0xff] }
 0x193   : > { %4193 = vmatprep.subr.bf16.mxu0 %v12401_v16  ;;  %v12417_v36 = vcombine.high %v2579_v34, %v2583_v35  ;;  %v12416_v39 = vcombine.low %v2579_v34, %v2583_v35  ;;  %v2620_v34 = vld [vmem:[#allocation8 + $0x9c8] sm:$0xff] }
 0x194   : > { %12363 = vmatmul.mubr.msk.bf16.vlgmr.msra.gmra.mrb[8].mxu1 %vm670_vm2, %v1321_v8  ;;  %v2624_v35 = vld [vmem:[#allocation8 + $0x9e8] sm:$0xff] }
 0x195   : > { %12352 = vmatmul.mubr.msk.bf16.gmra.mrb[4].mxu0 %vm670_vm2, %v1323_v10  ;;  %1654 = vmatprep.mubr.bf16.mxu1 %v14981_v0  ;;  %v12458_v38 = vcombine.low %v2620_v34, %v2624_v35 }
 0x196   : > { %1481 = vmatprep.mubr.bf16.mxu0 %v14981_v0 }
 0x19c   : > { %12364 = vmatmul.mubr.msk.bf16.gmra.mrb[12].mxu1 %vm670_vm2, %v1323_v10 }
 0x19d   : > { %12353 = vmatmul.mubr.msk.bf16.gmra.mrb[36].mxu0 %vm670_vm2, %v15439_v17  ;;  %1664 = vmatprep.mubr.bf16.mxu1 %v14981_v0 }
 0x19e   : > { %1583 = vmatprep.mubr.bf16.mxu0 %v14981_v0 }
 0x1a4   : > { %12365 = vmatmul.mubr.msk.bf16.gmra.mrb[36].mxu1 %vm670_vm2, %v15439_v17 }
 0x1a5   : > { %12359 = vmatmul.mubr.msk.bf16.vlgmr.msra.gmra.mrb[16].mxu0 %vm670_vm2, %v1321_v8  ;;  %v2603_v8 = vld [vmem:[#allocation8 + $0x940] sm:$0xff] }
 0x1a6   : > { %1593 = vmatprep.mubr.bf16.mxu0 %v14981_v0  ;;  %4194 = vmatpush1.bf16.msra.mxu0 %v12400_v23  ;;  %v12440_v14 = vcombine.low %v2603_v8, %v2607_v9  ;;  %v2615_v23 = vld [vmem:[#allocation8 + $0x9a0] sm:$0xff] }
 0x1a7   : > { %4195 = vmatprep.subr.bf16.mxu0 %v12409_v18  ;;  %v2619_v18 = vld [vmem:[#allocation8 + $0x9c0] sm:$0xff] }
 0x1a8   : > { %v12456_v37 = vcombine.low %v2619_v18, %v2623_v31 }
 0x1aa   : > { %4196 = vmatpush1.bf16.msra.mxu0 %v12408_v30 }
 0x1ab   : > { %4197 = vmatprep.subr.bf16.mxu0 %v12417_v36 }
 0x1ad   : > { %12360 = vmatmul.mubr.msk.bf16.gmra.mrb[20].mxu0 %vm670_vm2, %v1323_v10  ;;  %v12441_v10 = vcombine.high %v2603_v8, %v2607_v9 }
 0x1ae   : > { %1603 = vmatprep.mubr.bf16.mxu0 %v14981_v0  ;;  %v1866_v0 = vsel %vm15612_vm9, 0, %v1865_v20  ;;  %4198 = vmatpush1.bf16.msra.mxu0 %v12416_v39  ;;  %v12459_v39 = vcombine.high %v2620_v34, %v2624_v35 }
 0x1af   : > { %1867 = vst [vmem:[#allocation2 + $0x8] sm:$0x11] %v1866_v0  ;;  %4199 = vmatprep.subr.bf16.mxu0 %v12425_v56  ;;  %v12443_v0 = vcombine.high %v2604_v12, %v2608_v13  ;;  %v2655_v12 = vld [vmem:[#allocation8 + $0xae0] sm:$0xff]  ;;  %v2652_v13 = vld [vmem:[#allocation8 + $0xac8] sm:$0xff] }
 0x1b2   : > { %4200 = vmatpush1.bf16.msra.mxu0 %v12424_v47  ;;  %v1876_v47 = vsel %vm15636_vm13, 0, %v1875_v55  ;;  %v2680_v55 = vld [vmem:[#allocation8 + $0xba8] sm:$0xff] }
 0x1b3   : > { %4201 = vmatprep.subr.bf16.mxu0 %v12433_v4  ;;  %1877 = vst [vmem:[#allocation2 + $0x20] sm:$0x44] %v1876_v47  ;;  %v2683_v47 = vld [vmem:[#allocation8 + $0xbc0] sm:$0xff] }
 0x1b5   : > { %12361 = vmatmul.mubr.msk.bf16.gmra.mrb[40].mxu0 %vm670_vm2, %v15439_v17  ;;  %v2564_v17 = vld [vmem:[#allocation8 + $0x808] sm:$0xff]  ;;  %vm1968_vm2 = vsmask.f32 2304 }
 0x1b6   : > { %v12402_v26 = vcombine.low %v2564_v17, %v2568_v22  ;;  %v12403_v24 = vcombine.high %v2564_v17, %v2568_v22  ;;  %vm1969_vm3 = vmand %vm1868_vm15, %vm1968_vm2  ;;  %4202 = vmatpush1.bf16.msra.mxu0 %v12432_v3  ;;  %v2611_v22 = vld [vmem:[#allocation8 + $0x980] sm:$0xff]  ;;  %v2644_v3 = vld [vmem:[#allocation8 + $0xa88] sm:$0xff]  ;;  %vm1932_vm15 = vcmask 1041409   ;;  %vm1933_vm2 = vsmask.f32 1280 }
 0x1b7   : > { %vm15626_vm10 = vmor %vm1971_vm5, %vm1969_vm3  ;;  %4203 = vmatprep.subr.bf16.mxu0 %v12441_v10  ;;  %v12448_v27 = vcombine.low %v2611_v22, %v2615_v23  ;;  %v12449_v29 = vcombine.high %v2611_v22, %v2615_v23  ;;  %v2651_v10 = vld [vmem:[#allocation8 + $0xac0] sm:$0xff]  ;;  %vm2029_vm3 = vcmask 1043459   ;;  %vm2030_vm5 = vsmask.f32 3328 }
 0x1b8   : > { %4295 = vmatprep.subr.bf16.mxu1 %v12403_v24  ;;  %v2616_v24 = vld [vmem:[#allocation8 + $0x9a8] sm:$0xff]  ;;  %v12488_v23 = vcombine.low %v2651_v10, %v2655_v12  ;;  %vm15803_vm12 = vmand %vm1932_vm15, %vm1933_vm2  ;;  %vm2047_vm2 = vsmask.f32 7966 }
 0x1b9   : > { %4296 = vmatpush1.bf16.msra.mxu1 %v12402_v26  ;;  %v2612_v26 = vld [vmem:[#allocation8 + $0x988] sm:$0xff]  ;;  %vm15827_vm6 = vmor %vm15810_vm0, %vm15803_vm12 }
 0x1ba   : > { %4297 = vmatprep.subr.bf16.mxu1 %v12411_v33  ;;  %4204 = vmatpush1.bf16.msra.mxu0 %v12440_v14  ;;  %v12450_v25 = vcombine.low %v2612_v26, %v2616_v24  ;;  %v12451_v30 = vcombine.high %v2612_v26, %v2616_v24  ;;  %v12457_v33 = vcombine.high %v2619_v18, %v2623_v31  ;;  %v2660_v18 = vld [vmem:[#allocation8 + $0xb08] sm:$0xff]  ;;  %vm15837_vm4 = vmand %vm2029_vm3, %vm2030_vm5 }
 0x1bb   : > { %4205 = vmatprep.subr.bf16.mxu0 %v12449_v29  ;;  %vm15847_vm0 = vmand %vm2032_vm7, %vm574_vm1 }
 0x1bc   : > { %vm15858_vm5 = vmand %vm1932_vm15, %vm1951_vm8  ;;  %vm16733_vm8 = vcmask 1045509  }
 0x1bd   : > { %4298 = vmatpush1.bf16.msra.mxu1 %v12410_v32  ;;  %vm15875_vm15 = vmor %vm15847_vm0, %vm15837_vm4 }
 0x1be   : > { %4299 = vmatprep.subr.bf16.mxu1 %v12419_v50  ;;  %4206 = vmatpush1.bf16.msra.mxu0 %v12448_v27  ;;  %vm15882_vm12 = vmand %vm16733_vm8, %vm1953_vm11  ;;  %vm16738_vm11 = vsmask.f32 7950 }
 0x1bf   : > { %4207 = vmatprep.subr.bf16.mxu0 %v12457_v33  ;;  %v2664_v33 = vld [vmem:[#allocation8 + $0xb28] sm:$0xff]  ;;  %vm15895_vm4 = vmor %vm15882_vm12, %vm15858_vm5 }
 0x1c0   : > { %v12498_v35 = vcombine.low %v2660_v18, %v2664_v33  ;;  %vm15905_vm0 = vmand %vm2029_vm3, %vm16738_vm11 }
 0x1c1   : > { %4300 = vmatpush1.bf16.msra.mxu1 %v12418_v44  ;;  %vm15912_vm5 = vmand %vm2032_vm7, %vm2047_vm2  ;;  %vm14983_vm7 = vmmov 0   ;;  %vm8413_vm2 = vcmask 64512  }
 0x1c2   : > { %4301 = vmatprep.subr.bf16.mxu1 %v12427_v60  ;;  %4208 = vmatpush1.bf16.msra.mxu0 %v12456_v37  ;;  %v12473_v60 = vcombine.high %v2635_v48, %v2639_v49  ;;  %v12499_v37 = vcombine.high %v2660_v18, %v2664_v33  ;;  %v2687_v48 = vld [vmem:[#allocation8 + $0xbe0] sm:$0xff]  ;;  %vm15932_vm3 = vmor %vm15912_vm5, %vm15905_vm0 }
 0x1c5   : > { %4302 = vmatpush1.bf16.msra.mxu1 %v12426_v59  ;;  %v2636_v59 = vld [vmem:[#allocation8 + $0xa48] sm:$0xff] }
 0x1c6   : > { %4303 = vmatprep.subr.bf16.mxu1 %v12435_v5  ;;  %v12474_v4 = vcombine.low %v2636_v59, %v2640_v61  ;;  %v12475_v62 = vcombine.high %v2636_v59, %v2640_v61  ;;  %v12515_v61 = vcombine.high %v2676_v54, %v2680_v55 }
 0x1c9   : > { %4304 = vmatpush1.bf16.msra.mxu1 %v12434_v7 }
 0x1ca   : > { %4305 = vmatprep.subr.bf16.mxu1 %v12443_v0  ;;  %v2656_v0 = vld [vmem:[#allocation8 + $0xae8] sm:$0xff] }
 0x1cb   : > { %v12490_v26 = vcombine.low %v2652_v13, %v2656_v0  ;;  %v12491_v24 = vcombine.high %v2652_v13, %v2656_v0 }
 0x1cd   : > { %4306 = vmatpush1.bf16.msra.mxu1 %v12442_v15  ;;  %v12489_v15 = vcombine.high %v2651_v10, %v2655_v12  ;;  %v15676_v10 = vld [vmem:[#allocation8 + $0xc08] sm:$0xff] }
 0x1ce   : > { %4307 = vmatprep.subr.bf16.mxu1 %v12451_v30  ;;  %v2663_v30 = vld [vmem:[#allocation8 + $0xb20] sm:$0xff] }
 0x1d1   : > { %4308 = vmatpush1.bf16.msra.mxu1 %v12450_v25  ;;  %v2659_v25 = vld [vmem:[#allocation8 + $0xb00] sm:$0xff] }
 0x1d2   : > { %4309 = vmatprep.subr.bf16.mxu1 %v12459_v39  ;;  %v12497_v31 = vcombine.high %v2659_v25, %v2663_v30  ;;  %v12496_v34 = vcombine.low %v2659_v25, %v2663_v30  ;;  %v2671_v39 = vld [vmem:[#allocation8 + $0xb60] sm:$0xff] }
 0x1d5   : > { %4310 = vmatpush1.bf16.msra.mxu1 %v12458_v38  ;;  %v2667_v38 = vld [vmem:[#allocation8 + $0xb40] sm:$0xff] }
 0x1d6   : > { %4311 = vmatprep.subr.bf16.mxu1 %v12467_v46 }
 0x1d9   : > { %4312 = vmatpush1.bf16.msra.mxu1 %v12466_v57  ;;  %v12504_v57 = vcombine.low %v2667_v38, %v2671_v39 }
 0x1da   : > { %4313 = vmatprep.subr.bf16.mxu1 %v12475_v62 }
 0x1dd   : > { %4314 = vmatpush1.bf16.msra.mxu1 %v12474_v4 }
 0x1ff   : > { %v15630_v51 = vpop.f32.mrb[4].mxu1 }
 0x200   : > { %v15633_v43 = vpop.f32.mrb[5].mxu1 }
 0x201   : > { %v824_v45 = vpop.f32.mrb[6].mxu1 }
 0x202   : > { %v825_v52 = vpop.f32.mrb[7].mxu1  ;;  %v2627_v45 = vld [vmem:[#allocation8 + $0xa00] sm:$0xff] }
 0x203   : > { %v2631_v52 = vld [vmem:[#allocation8 + $0xa20] sm:$0xff] }
 0x204   : > { %v12465_v42 = vcombine.high %v2627_v45, %v2631_v52  ;;  %v12464_v56 = vcombine.low %v2627_v45, %v2631_v52  ;;  %v2672_v45 = vld [vmem:[#allocation8 + $0xb68] sm:$0xff]  ;;  %v2675_v52 = vld [vmem:[#allocation8 + $0xb80] sm:$0xff] }
 0x206   : > { %4209 = vmatprep.subr.bf16.mxu0 %v12465_v42 }
 0x207   : > { %4210 = vmatpush1.bf16.msra.mxu0 %v12464_v56 }
 0x208   : > { %v15644_v58 = vpop.f32.mrb[8].mxu0  ;;  %4211 = vmatprep.subr.bf16.mxu0 %v12473_v60  ;;  %v12513_v60 = vcombine.high %v2675_v52, %v2679_v53 }
 0x209   : > { %v15646_v1 = vpop.f32.mrb[9].mxu0 }
 0x20a   : > { %v763_v2 = vpop.f32.mrb[10].mxu0 }
 0x20b   : > { %v764_v6 = vpop.f32.mrb[11].mxu0  ;;  %v2647_v2 = vld [vmem:[#allocation8 + $0xaa0] sm:$0xff]  ;;  %4212 = vmatpush1.bf16.msra.mxu0 %v12472_v21  ;;  %v2684_v21 = vld [vmem:[#allocation8 + $0xbc8] sm:$0xff] }
 0x20c   : > { %v12481_v5 = vcombine.high %v2643_v63, %v2647_v2  ;;  %v2648_v6 = vld [vmem:[#allocation8 + $0xaa8] sm:$0xff]  ;;  %v12480_v7 = vcombine.low %v2643_v63, %v2647_v2 }
 0x20d   : > { %v12482_v8 = vcombine.low %v2644_v3, %v2648_v6  ;;  %v12483_v9 = vcombine.high %v2644_v3, %v2648_v6  ;;  %v2688_v63 = vld [vmem:[#allocation8 + $0xbe8] sm:$0xff]  ;;  %v12512_v3 = vcombine.low %v2675_v52, %v2679_v53 }
 0x20e   : > { %4213 = vmatprep.subr.bf16.mxu0 %v12481_v5  ;;  %v12514_v5 = vcombine.low %v2676_v54, %v2680_v55  ;;  %v12523_v6 = vcombine.high %v2684_v21, %v2688_v63 }
 0x20f   : > { %4315 = vmatprep.subr.bf16.mxu1 %v12483_v9  ;;  %4214 = vmatpush1.bf16.msra.mxu0 %v12480_v7  ;;  %v12520_v7 = vcombine.low %v2683_v47, %v2687_v48  ;;  %v15672_v9 = vld [vmem:[#allocation8 + $0xc00] sm:$0xff] }
 0x210   : > { %v15648_v19 = vpop.f32.mrb[12].mxu0  ;;  %4316 = vmatpush1.bf16.msra.mxu1 %v12482_v8  ;;  %4215 = vmatprep.subr.bf16.mxu0 %v12489_v15  ;;  %v12522_v8 = vcombine.low %v2684_v21, %v2688_v63  ;;  %v15682_v15 = vld [vmem:[#allocation8 + $0xc28] sm:$0xff] }
 0x211   : > { %v15650_v20 = vpop.f32.mrb[13].mxu0  ;;  %4317 = vmatprep.subr.bf16.mxu1 %v12491_v24 }
 0x212   : > { %v15652_v16 = vpop.f32.mrb[14].mxu0 }
 0x213   : > { %v15654_v17 = vpop.f32.mrb[15].mxu0  ;;  %4216 = vmatpush1.bf16.msra.mxu0 %v12488_v23  ;;  %v12531_v23 = vcombine.high %v15676_v10, %v15682_v15 }
 0x214   : > { %4318 = vmatpush1.bf16.msra.mxu1 %v12490_v26  ;;  %4217 = vmatprep.subr.bf16.mxu0 %v12497_v31 }
 0x215   : > { %4319 = vmatprep.subr.bf16.mxu1 %v12499_v37 }
 0x217   : > { %v15656_v32 = vpop.f32.mrb[16].mxu1  ;;  %4218 = vmatpush1.bf16.msra.mxu0 %v12496_v34 }
 0x218   : > { %v15658_v36 = vpop.f32.mrb[17].mxu1  ;;  %4320 = vmatpush1.bf16.msra.mxu1 %v12498_v35 }
 0x219   : > { %v946_v44 = vpop.f32.mrb[18].mxu1 }
 0x21a   : > { %v947_v50 = vpop.f32.mrb[19].mxu1  ;;  %v2668_v44 = vld [vmem:[#allocation8 + $0xb48] sm:$0xff] }
 0x21b   : > { %v12505_v50 = vcombine.high %v2667_v38, %v2671_v39  ;;  %v12507_v42 = vcombine.high %v2668_v44, %v2672_v45  ;;  %v12506_v46 = vcombine.low %v2668_v44, %v2672_v45 }
 0x21d   : > { %4219 = vmatprep.subr.bf16.mxu0 %v12505_v50  ;;  %4321 = vmatprep.subr.bf16.mxu1 %v12507_v42  ;;  %v1715_v50 = vlaneseq }
 0x21e   : > { %4220 = vmatpush1.bf16.msra.mxu0 %v12504_v57  ;;  %4322 = vmatpush1.bf16.msra.mxu1 %v12506_v46 }
 0x21f   : > { %4221 = vmatprep.subr.bf16.mxu0 %v12513_v60  ;;  %4323 = vmatprep.subr.bf16.mxu1 %v12515_v61  ;;  %v15704_v53 = vshrl.u32 %v1715_v50, 7 }
 0x221   : > { %v16677_v46 = vsub.s32 2, %v15704_v53  ;;  %v16675_v60 = vsub.s32 1, %v15704_v53 }
 0x222   : > { %4222 = vmatpush1.bf16.msra.mxu0 %v12512_v3  ;;  %4324 = vmatpush1.bf16.msra.mxu1 %v12514_v5  ;;  %v16670_v5 = vsub.s32 7, %v15704_v53 }
 0x223   : > { %4325 = vmatprep.subr.bf16.mxu1 %v12523_v6 }
 0x226   : > { %4326 = vmatpush1.bf16.msra.mxu1 %v12522_v8 }
 0x227   : > { %4346 = vmatprep.subr.bf16.mxu1 %v12531_v23  ;;  %v16673_v23 = vsub.s32 4, %v15704_v53 }
 0x228   : > { %v15662_v14 = vpop.f32.mrb[24].mxu0 }
 0x229   : > { %v15664_v22 = vpop.f32.mrb[25].mxu0 }
 0x22a   : > { %v885_v27 = vpop.f32.mrb[26].mxu0 }
 0x22b   : > { %v886_v29 = vpop.f32.mrb[27].mxu0 }
 0x22f   : > { %v1168_v56 = vpop.f32.mrb[24].mxu1 }
 0x230   : > { %v15667_v49 = vadd.f32 %v1168_v56, %v15630_v51  ;;  %v1170_v59 = vpop.f32.mrb[25].mxu1  ;;  %v12521_v51 = vcombine.high %v2683_v47, %v2687_v48  ;;  %v1713_v48 = vld [vmem:[#allocation6] sm:$0xff] }
 0x231   : > { %v15670_v4 = vadd.f32 %v1170_v59, %v15633_v43  ;;  %v1172_v62 = vpop.f32.mrb[26].mxu1  ;;  %v15674_v43 = vld [vmem:[#allocation8 + $0xc20] sm:$0xff]  ;;  %v16678_v59 = vsub.s32 0, %v15704_v53  ;;  %v15729_v6 = vrot.slane %v1713_v48, %v16675_v60 }
 0x232   : > { %v1173_v2 = vpop.f32.mrb[27].mxu1  ;;  %4223 = vmatprep.subr.bf16.mxu0 %v12521_v51  ;;  %v12529_v13 = vcombine.high %v15672_v9, %v15674_v43  ;;  %v16672_v62 = vsub.s32 6, %v15704_v53 }
 0x233   : > { %4224 = vmatpush1.bf16.msra.mxu0 %v12520_v7  ;;  %v15725_v51 = vrot.slane %v1713_v48, %v16678_v59 }
 0x234   : > { %4244 = vmatprep.subr.bf16.mxu0 %v12529_v13 }
 0x240   : > { %v1107_v26 = vpop.f32.mrb[28].mxu0 }
 0x241   : > { %v15689_v24 = vadd.f32 %v1107_v26, %v15644_v58  ;;  %v1109_v27 = vpop.f32.mrb[29].mxu0 }
 0x242   : > { %v15692_v29 = vadd.f32 %v1109_v27, %v15646_v1  ;;  %v1111_v25 = vpop.f32.mrb[30].mxu0 }
 0x243   : > { %v1112_v30 = vpop.f32.mrb[31].mxu0 }
 0x247   : > { %v1290_v18 = vpop.f32.mrb[28].mxu1 }
 0x248   : > { %v15695_v31 = vadd.f32 %v1290_v18, %v15656_v32  ;;  %v1292_v33 = vpop.f32.mrb[29].mxu1  ;;  %v16671_v18 = vsub.s32 5, %v15704_v53 }
 0x249   : > { %v15698_v34 = vadd.f32 %v1292_v33, %v15658_v36  ;;  %v1294_v35 = vpop.f32.mrb[30].mxu1 }
 0x24a   : > { %v1295_v37 = vpop.f32.mrb[31].mxu1 }
 0x24f   : > { %v1524_v38 = vpop.f32.mrb[20].mxu1 }
 0x250   : > { %v13999_v58 = vadd.f32 %v1524_v38, %v15648_v19  ;;  %v1526_v39 = vpop.f32.mrb[21].mxu1 }
 0x251   : > { %v14000_v44 = vadd.f32 %v1526_v39, %v15650_v20  ;;  %v1528_v1 = vpop.f32.mrb[22].mxu1 }
 0x252   : > { %v14001_v45 = vadd.f32 %v1528_v1, %v15652_v16  ;;  %v1530_v52 = vpop.f32.mrb[23].mxu1  ;;  %v16674_v16 = vsub.s32 3, %v15704_v53 }
 0x253   : > { %v14002_v32 = vadd.f32 %v1530_v52, %v15654_v17  ;;  %v15761_v52 = vrot.slane %v1713_v48, %v16671_v18 }
 0x257   : > { %v1534_v36 = vpop.f32.mrb[0].mxu1 }
 0x258   : > { %v1229_v42 = vpop.f32.mrb[32].mxu0  ;;  %v1536_v56 = vpop.f32.mrb[1].mxu1 }
 0x259   : > { %v15707_v54 = vadd.f32 %v1229_v42, %v15662_v14  ;;  %v1231_v55 = vpop.f32.mrb[33].mxu0  ;;  %v1538_v57 = vpop.f32.mrb[2].mxu1  ;;  %v1726_v14 = vrot.slane %v1713_v48, %v16677_v46 }
 0x25a   : > { %v15710_v19 = vadd.f32 %v1231_v55, %v15664_v22  ;;  %v1233_v20 = vpop.f32.mrb[34].mxu0  ;;  %v1540_v17 = vpop.f32.mrb[3].mxu1  ;;  %v1730_v22 = vrot.slane %v1713_v48, %v16674_v16 }
 0x25b   : > { %v1234_v47 = vpop.f32.mrb[35].mxu0  ;;  %v1757_v26 = vadd.f32 %v13999_v58, %v1726_v14  ;;  %v15733_v27 = vadd.f32 %v14001_v45, %v1726_v14  ;;  %v15738_v35 = vadd.f32 %v1726_v14, %v1534_v36  ;;  %v15746_v38 = vadd.f32 %v1726_v14, %v1538_v57 }
 0x25c   : > { %v15736_v33 = vadd.f32 %v14002_v32, %v1730_v22  ;;  %v15740_v37 = vadd.f32 %v1730_v22, %v1536_v56  ;;  %v15750_v58 = vrot.slane %v1713_v48, %v16670_v5  ;;  %v15752_v39 = vadd.f32 %v1730_v22, %v1540_v17 }
 0x25d   : > { %v1797_v1 = vmax.f32 %v1757_v26, 0.0  ;;  %v1805_v45 = vmax.f32 %v15733_v27, 0.0  ;;  %v1813_v42 = vmax.f32 %v15738_v35, 0.0  ;;  %v1821_v57 = vmax.f32 %v15746_v38, 0.0  ;;  %v2038_v35 = vld [vmem:[#allocation2 + $0x8] sm:$0x88] }
 0x25e   : > { %v1806_v32 = vmax.f32 %v15736_v33, 0.0  ;;  %v1814_v36 = vmax.f32 %v15740_v37, 0.0  ;;  %v2065_v37 = vld [vmem:[#allocation2 + $0x18] sm:$0x11] }
 0x25f   : > { %v1544_v21 = vpop.f32.mrb[32].mxu1 }
 0x260   : > { %v1463_v61 = vpop.f32.mrb[0].mxu0  ;;  %v1707_v63 = vadd.f32 %v1544_v21, %v15667_v49  ;;  %v1546_v3 = vpop.f32.mrb[33].mxu1  ;;  %v1758_v49 = vadd.f32 %v14000_v44, %v1730_v22  ;;  %v15756_v44 = vrot.slane %v1713_v48, %v16673_v23 }
 0x261   : > { %v1465_v2 = vpop.f32.mrb[1].mxu0  ;;  %v1708_v7 = vadd.f32 %v1546_v3, %v15670_v4  ;;  %v1548_v13 = vpop.f32.mrb[34].mxu1  ;;  %v15744_v4 = vrot.slane %v1713_v48, %v16672_v62  ;;  %v15767_v55 = vadd.f32 %v15725_v51, %v1463_v61 }
 0x262   : > { %v1467_v8 = vpop.f32.mrb[2].mxu0  ;;  %v1549_v30 = vpop.f32.mrb[35].mxu1  ;;  %v1798_v50 = vmax.f32 %v1758_v49, 0.0  ;;  %v15770_v47 = vadd.f32 %v1726_v14, %v1707_v63  ;;  %v15773_v17 = vadd.f32 %v15729_v6, %v1465_v2  ;;  %v1822_v13 = vmax.f32 %v15752_v39, 0.0 }
 0x263   : > { %v1469_v25 = vpop.f32.mrb[3].mxu0  ;;  %v15777_v26 = vadd.f32 %v1730_v22, %v1708_v7  ;;  %v15780_v61 = vadd.f32 %v15725_v51, %v1467_v8 }
 0x264   : > { %v15784_v2 = vadd.f32 %v15729_v6, %v1469_v25 }
 0x267   : > { %v1646_v20 = vpop.f32.mrb[8].mxu1 }
 0x268   : > { %v1473_v56 = vpop.f32.mrb[4].mxu0  ;;  %v1761_v48 = vadd.f32 %v15744_v4, %v1646_v20  ;;  %v1648_v3 = vpop.f32.mrb[9].mxu1 }
 0x269   : > { %v1475_v21 = vpop.f32.mrb[5].mxu0  ;;  %v1762_v49 = vadd.f32 %v15750_v58, %v1648_v3  ;;  %v1650_v63 = vpop.f32.mrb[10].mxu1  ;;  %v15787_v27 = vadd.f32 %v15725_v51, %v1473_v56 }
 0x26a   : > { %v1477_v14 = vpop.f32.mrb[6].mxu0  ;;  %v1801_v30 = vmax.f32 %v1761_v48, 0.0  ;;  %v1769_v33 = vadd.f32 %v15744_v4, %v1650_v63  ;;  %v1652_v22 = vpop.f32.mrb[11].mxu1  ;;  %v15792_v8 = vadd.f32 %v15729_v6, %v1475_v21 }
 0x26b   : > { %v1479_v20 = vpop.f32.mrb[7].mxu0  ;;  %v1802_v3 = vmax.f32 %v1762_v49, 0.0  ;;  %v1770_v5 = vadd.f32 %v15750_v58, %v1652_v22 }
 0x26c   : > { %v1837_v56 = vmax.f32 %v1797_v1, %v1801_v30  ;;  %v1809_v62 = vmax.f32 %v1769_v33, 0.0 }
 0x26d   : > { %v1838_v23 = vmax.f32 %v1798_v50, %v1802_v3  ;;  %v1810_v16 = vmax.f32 %v1770_v5, 0.0  ;;  %v15815_v5 = vadd.f32 %v15725_v51, %v1477_v14 }
 0x26e   : > { %v1887_v60 = vrot.slane %v1837_v56, 1  ;;  %v1841_v1 = vmax.f32 %v1805_v45, %v1809_v62 }
 0x26f   : > { %v1888_v33 = vrot.slane %v1838_v23, 1  ;;  %v1842_v3 = vmax.f32 %v1806_v32, %v1810_v16  ;;  %v1656_v59 = vpop.f32.mrb[12].mxu1 }
 0x270   : > { %v1483_v46 = vpop.f32.mrb[36].mxu0  ;;  %v1895_v0 = vmax.f32 %v1837_v56, %v1887_v60  ;;  %v1985_v12 = vrot.slane %v1841_v1, 1  ;;  %v1777_v62 = vadd.f32 %v15744_v4, %v1656_v59  ;;  %v1658_v30 = vpop.f32.mrb[13].mxu1  ;;  %v15832_v60 = vadd.f32 %v15729_v6, %v1479_v20  ;;  %v1927_v20 = vld [vmem:[#allocation2 + $0x8] sm:$0x11] }
 0x271   : > { %v1705_v49 = vadd.f32 %v1483_v46, %v15689_v24  ;;  %v1485_v45 = vpop.f32.mrb[37].mxu0  ;;  %v1896_v21 = vmax.f32 %v1838_v23, %v1888_v33  ;;  %v1986_v63 = vrot.slane %v1842_v3, 1  ;;  %v1778_v14 = vadd.f32 %v15750_v58, %v1658_v30  ;;  %v1660_v16 = vpop.f32.mrb[14].mxu1  ;;  %v1942_v46 = vld [vmem:[#allocation2 + $0x8] sm:$0x22] }
 0x272   : > { %v15820_v48 = vadd.f32 %v1485_v45, %v15692_v29  ;;  %v1487_v25 = vpop.f32.mrb[38].mxu0  ;;  %v1993_v59 = vmax.f32 %v1841_v1, %v1985_v12  ;;  %v1817_v29 = vmax.f32 %v1777_v62, 0.0  ;;  %v1785_v23 = vadd.f32 %v15744_v4, %v1660_v16  ;;  %v1976_v1 = vld [vmem:[#allocation2 + $0x8] sm:$0x44] }
 0x273   : > { %v1488_v32 = vpop.f32.mrb[39].mxu0  ;;  %v1662_v25 = vpop.f32.mrb[15].mxu1  ;;  %v13509_v56 = vpack.c.bf16 %v1896_v21, %v1895_v0  ;;  %v1994_v30 = vmax.f32 %v1842_v3, %v1986_v63  ;;  %v15842_v33 = vadd.f32 %v15725_v51, %v1705_v49  ;;  %v1818_v12 = vmax.f32 %v1778_v14, 0.0 }
 0x274   : > { %v1845_v0 = vmax.f32 %v1813_v42, %v1817_v29  ;;  %v1825_v63 = vmax.f32 %v1785_v23, 0.0  ;;  %v1786_v21 = vadd.f32 %v15750_v58, %v1662_v25  ;;  %v2292_v25 = vld [vmem:[#allocation2 + $0x20] sm:$0x44] }
 0x275   : > { %v1915_v3 = vshll.u32 %v13509_v56, 16  ;;  %v1943_v51 = vsel %vm15827_vm6, %v13509_v56, %v1942_v46  ;;  %v12371_v49 = vrot.slane %v13509_v56, 9  ;;  %v13511_v45 = vpack.c.bf16 %v1994_v30, %v1993_v59 }
 0x276   : > { %1944 = vst [vmem:[#allocation2 + $0x8] sm:$0x22] %v1943_v51  ;;  %v2074_v42 = vrot.slane %v1845_v0, 1  ;;  %v1846_v29 = vmax.f32 %v1814_v36, %v1818_v12  ;;  %v1849_v23 = vmax.f32 %v1821_v57, %v1825_v63  ;;  %v1826_v36 = vmax.f32 %v1786_v21, 0.0  ;;  %v2117_v21 = vld [vmem:[#allocation2 + $0x18] sm:$0x22] }
 0x277   : > { %v1928_v46 = vsel %vm15620_vm14, %v1915_v3, %v1927_v20  ;;  %v1977_v59 = vsel %vm15626_vm10, %v12371_v49, %v1976_v1  ;;  %v2014_v32 = vshll.u32 %v13511_v45, 16  ;;  %v1666_v57 = vpop.f32.mrb[36].mxu1  ;;  %v2026_v30 = vrot.slane %v13511_v45, 6 }
 0x278   : > { %v1585_v38 = vpop.f32.mrb[16].mxu0  ;;  %1929 = vst [vmem:[#allocation2 + $0x8] sm:$0x11] %v1928_v46  ;;  %1978 = vst [vmem:[#allocation2 + $0x8] sm:$0x44] %v1977_v59  ;;  %v12375_v22 = vrot.slane %v13511_v45, 11  ;;  %v2082_v12 = vmax.f32 %v1845_v0, %v2074_v42  ;;  %v1711_v42 = vadd.f32 %v1666_v57, %v15695_v31 }
 0x279   : > { %v2075_v20 = vrot.slane %v1846_v29, 1  ;;  %v1587_v1 = vpop.f32.mrb[17].mxu0  ;;  %v1668_v62 = vpop.f32.mrb[37].mxu1  ;;  %v12369_v63 = vrot.slane %v1915_v3, 9  ;;  %v2016_v51 = vrot.slane %v2014_v32, 6  ;;  %v2150_v49 = vrot.slane %v1849_v23, 1 }
 0x27a   : > { %v1589_v16 = vpop.f32.mrb[18].mxu0  ;;  %v1670_v50 = vpop.f32.mrb[38].mxu1  ;;  %v2039_v46 = vsel %vm15875_vm15, %v2026_v30, %v2038_v35  ;;  %v2066_v18 = vsel %vm15612_vm9, %v12375_v22, %v2065_v37  ;;  %v1759_v59 = vadd.f32 %v15756_v44, %v1585_v38  ;;  %v1850_v35 = vmax.f32 %v1822_v13, %v1826_v36  ;;  %v2141_v31 = vld [vmem:[#allocation2 + $0x18] sm:$0x44] }
 0x27b   : > { %v2083_v7 = vmax.f32 %v1846_v29, %v2075_v20  ;;  %v1591_v45 = vpop.f32.mrb[19].mxu0  ;;  %v1671_v0 = vpop.f32.mrb[39].mxu1  ;;  %2040 = vst [vmem:[#allocation2 + $0x8] sm:$0x88] %v2039_v46  ;;  %v2042_v50 = vrot.slane %v2014_v32, 7  ;;  %v1760_v29 = vadd.f32 %v15761_v52, %v1587_v1  ;;  %v2158_v38 = vmax.f32 %v1849_v23, %v2150_v49 }
 0x27c   : > { %2067 = vst [vmem:[#allocation2 + $0x18] sm:$0x11] %v2066_v18  ;;  %v1799_v56 = vmax.f32 %v1759_v59, 0.0  ;;  %v1712_v32 = vadd.f32 %v1668_v62, %v15698_v34  ;;  %v2151_v13 = vrot.slane %v1850_v35, 1  ;;  %v1793_v36 = vadd.f32 %v15744_v4, %v1711_v42  ;;  %v2197_v42 = vld [vmem:[#allocation2 + $0x18] sm:$0x88] }
 0x27d   : > { %v13513_v37 = vpack.c.bf16 %v2083_v7, %v2082_v12  ;;  %v1959_v18 = vld [vmem:[#allocation2 + $0x8] sm:$0x22]  ;;  %v1800_v57 = vmax.f32 %v1760_v29, 0.0  ;;  %v1767_v30 = vadd.f32 %v15756_v44, %v1589_v16  ;;  %v16743_v1 = vmax.f32 %v15767_v55, 0.0 }
 0x27e   : > { %v1960_v7 = vsel %vm15895_vm4, %v12369_v63, %v1959_v18  ;;  %v2159_v20 = vmax.f32 %v1850_v35, %v2151_v13  ;;  %v1833_v49 = vmax.f32 %v1793_v36, 0.0  ;;  %v16744_v4 = vmax.f32 %v15773_v17, 0.0 }
 0x27f   : > { %v2102_v23 = vshll.u32 %v13513_v37, 16  ;;  %v2118_v34 = vsel %vm15827_vm6, %v13513_v37, %v2117_v21  ;;  %v12381_v22 = vrot.slane %v13513_v37, 9  ;;  %1961 = vst [vmem:[#allocation2 + $0x8] sm:$0x22] %v1960_v7  ;;  %v2022_v12 = vld [vmem:[#allocation2 + $0x8] sm:$0x44]  ;;  %v1835_v62 = vmax.f32 %v16743_v1, %v1799_v56 }
 0x280   : > { %2119 = vst [vmem:[#allocation2 + $0x18] sm:$0x22] %v2118_v34  ;;  %v1836_v46 = vmax.f32 %v16744_v4, %v1800_v57  ;;  %v1595_v16 = vpop.f32.mrb[20].mxu0  ;;  %v2023_v63 = vsel %vm15636_vm13, %v2016_v51, %v2022_v12  ;;  %v1794_v21 = vadd.f32 %v15750_v58, %v1712_v32  ;;  %v13515_v35 = vpack.c.bf16 %v2159_v20, %v2158_v38  ;;  %v2219_v7 = vld [vmem:[#allocation2 + $0x28] sm:$0x11] }
 0x281   : > { %v12379_v0 = vrot.slane %v2102_v23, 9  ;;  %v2142_v55 = vsel %vm15626_vm10, %v12381_v22, %v2141_v31  ;;  %v1597_v17 = vpop.f32.mrb[21].mxu0  ;;  %2024 = vst [vmem:[#allocation2 + $0x8] sm:$0x44] %v2023_v63  ;;  %v1885_v51 = vrot.slane %v1835_v62, 1  ;;  %v16747_v29 = vmax.f32 %v15770_v47, 0.0 }
 0x282   : > { %2143 = vst [vmem:[#allocation2 + $0x18] sm:$0x44] %v2142_v55  ;;  %v1886_v37 = vrot.slane %v1836_v46, 1  ;;  %v15941_v56 = vpop.f32.mrb[22].mxu0  ;;  %v2053_v18 = vld [vmem:[#allocation2 + $0x8] sm:$0x88]  ;;  %v1768_v31 = vadd.f32 %v15761_v52, %v1591_v45  ;;  %v1775_v58 = vadd.f32 %v15756_v44, %v1595_v16 }
 0x283   : > { %v1853_v14 = vmax.f32 %v16747_v29, %v1833_v49  ;;  %v2109_v39 = vld [vmem:[#allocation2 + $0x18] sm:$0x11]  ;;  %v1834_v13 = vmax.f32 %v1794_v21, 0.0  ;;  %v1807_v36 = vmax.f32 %v1767_v30, 0.0  ;;  %v2054_v32 = vsel %vm15932_vm3, %v2042_v50, %v2053_v18  ;;  %v1601_v34 = vpop.f32.mrb[23].mxu0 }
 0x284   : > { %v2110_v38 = vsel %vm15620_vm14, %v2102_v23, %v2109_v39  ;;  %v2179_v57 = vshll.u32 %v13515_v35, 16  ;;  %v2191_v47 = vrot.slane %v13515_v35, 6  ;;  %2055 = vst [vmem:[#allocation2 + $0x8] sm:$0x88] %v2054_v32  ;;  %v12385_v22 = vrot.slane %v13515_v35, 11 }
 0x285   : > { %2111 = vst [vmem:[#allocation2 + $0x18] sm:$0x11] %v2110_v38  ;;  %v1893_v12 = vmax.f32 %v1835_v62, %v1885_v51  ;;  %v2228_v20 = vrot.slane %v1853_v14, 1  ;;  %v1894_v30 = vmax.f32 %v1836_v46, %v1886_v37  ;;  %v1939_v49 = vld [vmem:[#allocation2] sm:$0x22]  ;;  %v16748_v50 = vmax.f32 %v15777_v26, 0.0 }
 0x286   : > { %v2181_v1 = vrot.slane %v2179_v57, 6  ;;  %v2198_v45 = vsel %vm15875_vm15, %v2191_v47, %v2197_v42  ;;  %v1776_v23 = vadd.f32 %v15761_v52, %v1597_v17  ;;  %v2220_v63 = vsel %vm15612_vm9, %v12385_v22, %v2219_v7  ;;  %v1924_v62 = vld [vmem:[#allocation2] sm:$0x11]  ;;  %v1973_v51 = vld [vmem:[#allocation2] sm:$0x44] }
 0x287   : > { %v1854_v4 = vmax.f32 %v16748_v50, %v1834_v13  ;;  %v2129_v16 = vld [vmem:[#allocation2 + $0x18] sm:$0x22]  ;;  %2199 = vst [vmem:[#allocation2 + $0x18] sm:$0x88] %v2198_v45  ;;  %v2236_v55 = vmax.f32 %v1853_v14, %v2228_v20  ;;  %v13508_v21 = vpack.c.bf16 %v1894_v30, %v1893_v12  ;;  %v16749_v46 = vmax.f32 %v15780_v61, 0.0 }
 0x288   : > { %v2130_v42 = vsel %vm15895_vm4, %v12379_v0, %v2129_v16  ;;  %2221 = vst [vmem:[#allocation2 + $0x28] sm:$0x11] %v2220_v63  ;;  %v1808_v29 = vmax.f32 %v1768_v31, 0.0  ;;  %v1815_v37 = vmax.f32 %v1775_v58, 0.0  ;;  %v1605_v17 = vpop.f32.mrb[40].mxu0  ;;  %v16751_v31 = vmax.f32 %v15787_v27, 0.0 }
 0x289   : > { %v1839_v35 = vmax.f32 %v16749_v46, %v1807_v36  ;;  %v2229_v26 = vrot.slane %v1854_v4, 1  ;;  %2131 = vst [vmem:[#allocation2 + $0x18] sm:$0x22] %v2130_v42  ;;  %v2187_v18 = vld [vmem:[#allocation2 + $0x18] sm:$0x44]  ;;  %v1912_v39 = vshll.u32 %v13508_v21, 16  ;;  %v1940_v14 = vsel %vm15827_vm6, %v13508_v21, %v1939_v49 }
 0x28a   : > { %v12370_v13 = vrot.slane %v13508_v21, 9  ;;  %v1607_v38 = vpop.f32.mrb[41].mxu0  ;;  %v2188_v61 = vsel %vm15636_vm13, %v2181_v1, %v2187_v18  ;;  %1941 = vst [vmem:[#allocation2] sm:$0x22] %v1940_v14  ;;  %v16750_v36 = vmax.f32 %v15784_v2, 0.0  ;;  %v1843_v58 = vmax.f32 %v16751_v31, %v1815_v37 }
 0x28b   : > { %v1983_v32 = vrot.slane %v1839_v35, 1  ;;  %v2237_v0 = vmax.f32 %v1854_v4, %v2229_v26  ;;  %v1609_v7 = vpop.f32.mrb[42].mxu0  ;;  %2189 = vst [vmem:[#allocation2 + $0x18] sm:$0x44] %v2188_v61  ;;  %v2201_v22 = vrot.slane %v2179_v57, 7  ;;  %v1925_v12 = vsel %vm15620_vm14, %v1912_v39, %v1924_v62 }
 0x28c   : > { %v1840_v47 = vmax.f32 %v16750_v36, %v1808_v29  ;;  %v1974_v20 = vsel %vm15626_vm10, %v12370_v13, %v1973_v51  ;;  %v2271_v30 = vld [vmem:[#allocation2 + $0x28] sm:$0x22]  ;;  %v1610_v1 = vpop.f32.mrb[43].mxu0  ;;  %1926 = vst [vmem:[#allocation2] sm:$0x11] %v1925_v12  ;;  %v2072_v50 = vrot.slane %v1843_v58, 1  ;;  %v1783_v16 = vadd.f32 %v15756_v44, %v15941_v56 }
 0x28d   : > { %v1991_v45 = vmax.f32 %v1839_v35, %v1983_v32  ;;  %1975 = vst [vmem:[#allocation2] sm:$0x44] %v1974_v20  ;;  %v13517_v49 = vpack.c.bf16 %v2237_v0, %v2236_v55  ;;  %v1816_v4 = vmax.f32 %v1776_v23, 0.0  ;;  %v2295_v27 = vld [vmem:[#allocation2 + $0x28] sm:$0x44]  ;;  %v1784_v57 = vadd.f32 %v15761_v52, %v1601_v34 }
 0x28e   : > { %v1984_v2 = vrot.slane %v1840_v47, 1  ;;  %v1709_v63 = vadd.f32 %v1605_v17, %v15707_v54  ;;  %v1710_v21 = vadd.f32 %v1607_v38, %v15710_v19  ;;  %v2207_v62 = vld [vmem:[#allocation2 + $0x18] sm:$0x88]  ;;  %v12368_v51 = vrot.slane %v1912_v39, 9  ;;  %v2035_v17 = vld [vmem:[#allocation2] sm:$0x88] }
 0x28f   : > { %v2256_v46 = vshll.u32 %v13517_v49, 16  ;;  %v2272_v35 = vsel %vm15827_vm6, %v13517_v49, %v2271_v30  ;;  %v12391_v42 = vrot.slane %v13517_v49, 9  ;;  %v2208_v23 = vsel %vm15932_vm3, %v2201_v22, %v2207_v62  ;;  %v2263_v26 = vld [vmem:[#allocation2 + $0x28] sm:$0x11]  ;;  %v2062_v39 = vld [vmem:[#allocation2 + $0x10] sm:$0x11] }
 0x290   : > { %v1992_v55 = vmax.f32 %v1840_v47, %v1984_v2  ;;  %2273 = vst [vmem:[#allocation2 + $0x28] sm:$0x22] %v2272_v35  ;;  %v16752_v56 = vmax.f32 %v15792_v8, 0.0  ;;  %v1823_v29 = vmax.f32 %v1783_v16, 0.0  ;;  %2209 = vst [vmem:[#allocation2 + $0x18] sm:$0x88] %v2208_v23  ;;  %v2080_v18 = vmax.f32 %v1843_v58, %v2072_v50 }
 0x291   : > { %v2264_v54 = vsel %vm15620_vm14, %v2256_v46, %v2263_v26  ;;  %v2296_v19 = vsel %vm15626_vm10, %v12391_v42, %v2295_v27  ;;  %v1956_v14 = vld [vmem:[#allocation2] sm:$0x22]  ;;  %v16753_v32 = vmax.f32 %v15815_v5, 0.0  ;;  %v1824_v38 = vmax.f32 %v1784_v57, 0.0  ;;  %v2114_v49 = vld [vmem:[#allocation2 + $0x10] sm:$0x22] }
 0x292   : > { %v1844_v34 = vmax.f32 %v16752_v56, %v1816_v4  ;;  %v13510_v37 = vpack.c.bf16 %v1992_v55, %v1991_v45  ;;  %2265 = vst [vmem:[#allocation2 + $0x28] sm:$0x11] %v2264_v54  ;;  %2297 = vst [vmem:[#allocation2 + $0x28] sm:$0x44] %v2296_v19  ;;  %v1791_v61 = vadd.f32 %v15756_v44, %v1709_v63  ;;  %v16754_v12 = vmax.f32 %v15832_v60, 0.0 }
 0x293   : > { %v1847_v8 = vmax.f32 %v16753_v32, %v1823_v29  ;;  %v1957_v0 = vsel %vm15895_vm4, %v12368_v51, %v1956_v14  ;;  %v1788_v5 = vadd.f32 %v15729_v6, %v15820_v48  ;;  %v12389_v2 = vrot.slane %v2256_v46, 9  ;;  %v2138_v48 = vld [vmem:[#allocation2 + $0x10] sm:$0x44]  ;;  %v2216_v29 = vld [vmem:[#allocation2 + $0x20] sm:$0x11] }
 0x294   : > { %v2073_v13 = vrot.slane %v1844_v34, 1  ;;  %v2010_v36 = vshll.u32 %v13510_v37, 16  ;;  %v2025_v47 = vrot.slane %v13510_v37, 6  ;;  %v12374_v31 = vrot.slane %v13510_v37, 11  ;;  %1958 = vst [vmem:[#allocation2] sm:$0x22] %v1957_v0 }
 0x295   : > { %v2019_v7 = vld [vmem:[#allocation2] sm:$0x44]  ;;  %v2148_v22 = vrot.slane %v1847_v8, 1  ;;  %v1848_v20 = vmax.f32 %v16754_v12, %v1824_v38  ;;  %v1831_v30 = vmax.f32 %v1791_v61, 0.0  ;;  %v16755_v60 = vmax.f32 %v15842_v33, 0.0 }
 0x296   : > { %v2081_v58 = vmax.f32 %v1844_v34, %v2073_v13  ;;  %v2012_v45 = vrot.slane %v2010_v36, 6  ;;  %v2036_v44 = vsel %vm15875_vm15, %v2025_v47, %v2035_v17  ;;  %v2063_v1 = vsel %vm15612_vm9, %v12374_v31, %v2062_v39  ;;  %v2194_v34 = vld [vmem:[#allocation2 + $0x10] sm:$0x88] }
 0x297   : > { %2037 = vst [vmem:[#allocation2] sm:$0x88] %v2036_v44  ;;  %2064 = vst [vmem:[#allocation2 + $0x10] sm:$0x11] %v2063_v1  ;;  %v2149_v4 = vrot.slane %v1848_v20, 1  ;;  %v1851_v27 = vmax.f32 %v16755_v60, %v1831_v30  ;;  %v2156_v57 = vmax.f32 %v1847_v8, %v2148_v22  ;;  %v1792_v63 = vadd.f32 %v15761_v52, %v1710_v21  ;;  %v16043_v3 = vld [vmem:[#allocation2 + $0x18] sm:$0xff] }
 0x298   : > { %v13512_v50 = vpack.c.bf16 %v2081_v58, %v2080_v18  ;;  %v2283_v16 = vld [vmem:[#allocation2 + $0x28] sm:$0x22]  ;;  %v2020_v6 = vsel %vm15636_vm13, %v2012_v45, %v2019_v7  ;;  %v1828_v42 = vmax.f32 %v1788_v5, 0.0  ;;  %v2041_v56 = vrot.slane %v2010_v36, 7  ;;  %v2268_v7 = vld [vmem:[#allocation2 + $0x20] sm:$0x22] }
 0x299   : > { %v2284_v62 = vsel %vm15895_vm4, %v12389_v2, %v2283_v16  ;;  %2021 = vst [vmem:[#allocation2] sm:$0x44] %v2020_v6  ;;  %v2157_v33 = vmax.f32 %v1848_v20, %v2149_v4  ;;  %v2226_v55 = vrot.slane %v1851_v27, 1  ;;  %v1832_v23 = vmax.f32 %v1792_v63, 0.0 }
 0x29a   : > { %v2115_v46 = vsel %vm15827_vm6, %v13512_v50, %v2114_v49  ;;  %v12380_v35 = vrot.slane %v13512_v50, 9  ;;  %2285 = vst [vmem:[#allocation2 + $0x28] sm:$0x22] %v2284_v62  ;;  %v2099_v26 = vshll.u32 %v13512_v50, 16 }
 0x29b   : > { %2116 = vst [vmem:[#allocation2 + $0x10] sm:$0x22] %v2115_v46  ;;  %v13514_v52 = vpack.c.bf16 %v2157_v33, %v2156_v57  ;;  %v1852_v21 = vmax.f32 %v1828_v42, %v1832_v23  ;;  %v2234_v18 = vmax.f32 %v1851_v27, %v2226_v55  ;;  %v16049_v33 = vld [vmem:[#allocation2 + $0x8] sm:$0xff] }
 0x29c   : > { %v2139_v51 = vsel %vm15626_vm10, %v12380_v35, %v2138_v48  ;;  %v12378_v8 = vrot.slane %v2099_v26, 9 }
 0x29d   : > { %2140 = vst [vmem:[#allocation2 + $0x10] sm:$0x44] %v2139_v51  ;;  %v2175_v37 = vshll.u32 %v13514_v52, 16  ;;  %v2190_v17 = vrot.slane %v13514_v52, 6  ;;  %v12384_v13 = vrot.slane %v13514_v52, 11  ;;  %v2227_v32 = vrot.slane %v1852_v21, 1 }
 0x29e   : > { %v2050_v54 = vld [vmem:[#allocation2] sm:$0x88]  ;;  %v2106_v19 = vld [vmem:[#allocation2 + $0x10] sm:$0x11]  ;;  %v2699_v51 = vld [vmem:[#allocation8 + $0xc40] sm:$0xff] }
 0x29f   : > { %v2051_v14 = vsel %vm15932_vm3, %v2041_v56, %v2050_v54  ;;  %v2107_v39 = vsel %vm15620_vm14, %v2099_v26, %v2106_v19  ;;  %v2195_v38 = vsel %vm15875_vm15, %v2190_v17, %v2194_v34  ;;  %v2217_v0 = vsel %vm15612_vm9, %v12384_v13, %v2216_v29  ;;  %v2703_v29 = vld [vmem:[#allocation8 + $0xc60] sm:$0xff]  ;;  %v2700_v54 = vld [vmem:[#allocation8 + $0xc48] sm:$0xff] }
 0x2a0   : > { %2052 = vst [vmem:[#allocation2] sm:$0x88] %v2051_v14  ;;  %2108 = vst [vmem:[#allocation2 + $0x10] sm:$0x11] %v2107_v39  ;;  %v2235_v36 = vmax.f32 %v1852_v21, %v2227_v32  ;;  %v2177_v31 = vrot.slane %v2175_v37, 6  ;;  %v2200_v5 = vrot.slane %v2175_v37, 7  ;;  %v16055_v26 = vcombine.high %v16049_v33, %v16043_v3 }
 0x2a1   : > { %2196 = vst [vmem:[#allocation2 + $0x10] sm:$0x88] %v2195_v38  ;;  %2218 = vst [vmem:[#allocation2 + $0x20] sm:$0x11] %v2217_v0  ;;  %v16051_v55 = vld [vmem:[#allocation2 + $0x28] sm:$0x77]  ;;  %v12537_v13 = vcombine.high %v2699_v51, %v2703_v29 }
 0x2a2   : > { %v2126_v61 = vld [vmem:[#allocation2 + $0x10] sm:$0x22]  ;;  %v13516_v22 = vpack.c.bf16 %v2235_v36, %v2234_v18  ;;  %v2704_v19 = vld [vmem:[#allocation8 + $0xc68] sm:$0xff]  ;;  %v16060_v37 = vcombine.high %v16051_v55, %v16051_v55  ;;  %v2707_v39 = vld [vmem:[#allocation8 + $0xc80] sm:$0xff]  ;;  %v2884_v0 = vshll.u32 %v16055_v26, 16  ;;  %v16756_v36 = vcombine.low %v15672_v9, %v15674_v43 }
 0x2a3   : > { %v2127_v47 = vsel %vm15895_vm4, %v12378_v8, %v2126_v61  ;;  %v12539_v32 = vcombine.high %v2700_v54, %v2704_v19  ;;  %v2711_v8 = vld [vmem:[#allocation8 + $0xca0] sm:$0xff]  ;;  %v2708_v38 = vld [vmem:[#allocation8 + $0xc88] sm:$0xff] }
 0x2a4   : > { %2128 = vst [vmem:[#allocation2 + $0x10] sm:$0x22] %v2127_v47  ;;  %v2184_v58 = vld [vmem:[#allocation2 + $0x10] sm:$0x44]  ;;  %v2269_v20 = vsel %vm15827_vm6, %v13516_v22, %v2268_v7  ;;  %v12390_v11 = vrot.slane %v13516_v22, 9  ;;  %v2253_v30 = vshll.u32 %v13516_v22, 16  ;;  %v16757_v47 = vcombine.low %v15676_v10, %v15682_v15 }
 0x2a5   : > { %v2185_v12 = vsel %vm15636_vm13, %v2177_v31, %v2184_v58  ;;  %2270 = vst [vmem:[#allocation2 + $0x20] sm:$0x22] %v2269_v20  ;;  %v2712_v61 = vld [vmem:[#allocation8 + $0xca8] sm:$0xff]  ;;  %v12536_v31 = vcombine.low %v2699_v51, %v2703_v29  ;;  %v12538_v7 = vcombine.low %v2700_v54, %v2704_v19  ;;  %v2889_v58 = vshll.u32 %v16060_v37, 16  ;;  %v2715_v20 = vld [vmem:[#allocation8 + $0xcc0] sm:$0xff] }
 0x2a6   : > { %2186 = vst [vmem:[#allocation2 + $0x10] sm:$0x44] %v2185_v12  ;;  %v2293_v45 = vsel %vm15626_vm10, %v12390_v11, %v2292_v25  ;;  %v12388_v24 = vrot.slane %v2253_v30, 9  ;;  %v12545_v22 = vcombine.high %v2707_v39, %v2711_v8  ;;  %v12547_v12 = vcombine.high %v2708_v38, %v2712_v61  ;;  %v2719_v43 = vld [vmem:[#allocation8 + $0xce0] sm:$0xff]  ;;  %v2716_v11 = vld [vmem:[#allocation8 + $0xcc8] sm:$0xff] }
 0x2a7   : > { %2294 = vst [vmem:[#allocation2 + $0x20] sm:$0x44] %v2293_v45  ;;  %v2298_v4 = vld [vmem:[#allocation2] sm:$0xff]  ;;  %v2886_v25 = vrot.slane %v2884_v0, 1  ;;  %v12544_v15 = vcombine.low %v2707_v39, %v2711_v8  ;;  %v16086_v45 = vrot.slane %v2889_v58, 1  ;;  %v2751_v8 = vld [vmem:[#allocation8 + $0xde0] sm:$0xff] }
 0x2a8   : > { %v2204_v44 = vld [vmem:[#allocation2 + $0x10] sm:$0x88]  ;;  %v2260_v49 = vld [vmem:[#allocation2 + $0x20] sm:$0x11]  ;;  %v2759_v58 = vld [vmem:[#allocation8 + $0xe20] sm:$0xff]  ;;  %vm8417_vm13 = vcmask 1043456  }
 0x2a9   : > { %v2205_v1 = vsel %vm15932_vm3, %v2200_v5, %v2204_v44  ;;  %v2261_v41 = vsel %vm15620_vm14, %v2253_v30, %v2260_v49  ;;  %v2720_v10 = vld [vmem:[#allocation8 + $0xce8] sm:$0xff]  ;;  %v12546_v30 = vcombine.low %v2708_v38, %v2712_v61  ;;  %v2882_v5 = vshrl.u32 %v16055_v26, 16 }
 0x2aa   : > { %2206 = vst [vmem:[#allocation2 + $0x10] sm:$0x88] %v2205_v1  ;;  %2262 = vst [vmem:[#allocation2 + $0x20] sm:$0x11] %v2261_v41  ;;  %v2723_v1 = vld [vmem:[#allocation8 + $0xd00] sm:$0xff]  ;;  %v12553_v41 = vcombine.high %v2715_v20, %v2719_v43  ;;  %v2744_v29 = vld [vmem:[#allocation8 + $0xda8] sm:$0xff] }
 0x2ab   : > { %v2887_v49 = vor.u32 %v2886_v25, %v2882_v5  ;;  %v2748_v38 = vld [vmem:[#allocation8 + $0xdc8] sm:$0xff] }
 0x2ac   : > { %v2280_v2 = vld [vmem:[#allocation2 + $0x20] sm:$0x22] }
 0x2ad   : > { %v2281_v50 = vsel %vm15895_vm4, %v12388_v24, %v2280_v2  ;;  %v12555_v24 = vcombine.high %v2716_v11, %v2720_v10  ;;  %v2727_v2 = vld [vmem:[#allocation8 + $0xd20] sm:$0xff]  ;;  %v2752_v61 = vld [vmem:[#allocation8 + $0xde8] sm:$0xff] }
 0x2ae   : > { %2282 = vst [vmem:[#allocation2 + $0x20] sm:$0x22] %v2281_v50  ;;  %v2724_v50 = vld [vmem:[#allocation8 + $0xd08] sm:$0xff] }
 0x2b1   : > { %v2300_v40 = vld [vmem:[#allocation2 + $0x10] sm:$0xff] }
 0x2b2   : > { %v16033_v60 = vcombine.low %v2298_v4, %v2300_v40  ;;  %v16035_v27 = vcombine.high %v2298_v4, %v2300_v40  ;;  %v2728_v4 = vld [vmem:[#allocation8 + $0xd28] sm:$0xff]  ;;  %v16094_v40 = vsel %vm574_vm1, %v2887_v49, %v16086_v45 }
 0x2b4   : > { %v2860_v59 = vshll.u32 %v16035_v27, 16  ;;  %v2848_v16 = vshll.u32 %v16033_v60, 16  ;;  %v2858_v62 = vshrl.u32 %v16035_v27, 16  ;;  %v2846_v35 = vshrl.u32 %v16033_v60, 16 }
 0x2b5   : > { %v2560_v6 = vld [vmem:[#allocation2 + $0x20] sm:$0x77] }
 0x2b6   : > { %v2862_v28 = vrot.slane %v2860_v59, 1  ;;  %v16039_v48 = vcombine.low %v2560_v6, %v2560_v6  ;;  %v16041_v57 = vcombine.high %v2560_v6, %v2560_v6  ;;  %v2850_v63 = vrot.slane %v2848_v16, 1 }
 0x2b7   : > { %v12552_v59 = vcombine.low %v2715_v20, %v2719_v43  ;;  %v12554_v16 = vcombine.low %v2716_v11, %v2720_v10  ;;  %v12561_v6 = vcombine.high %v2723_v1, %v2727_v2  ;;  %v12586_v20 = vcombine.low %v2748_v38, %v2752_v61  ;;  %v2763_v11 = vld [vmem:[#allocation8 + $0xe40] sm:$0xff] }
 0x2b8   : > { %v2865_v46 = vshll.u32 %v16041_v57, 16  ;;  %v2853_v42 = vshll.u32 %v16039_v48, 16  ;;  %v2863_v23 = vor.u32 %v2862_v28, %v2858_v62  ;;  %v2851_v21 = vor.u32 %v2850_v63, %v2846_v35  ;;  %v2731_v63 = vld [vmem:[#allocation8 + $0xd40] sm:$0xff]  ;;  %v2736_v35 = vld [vmem:[#allocation8 + $0xd68] sm:$0xff] }
 0x2b9   : > { %v2896_v34 = vshrl.u32 %v16041_v57, 16  ;;  %v2893_v9 = vshrl.u32 %v16039_v48, 16  ;;  %v12563_v28 = vcombine.high %v2724_v50, %v2728_v4  ;;  %v2735_v62 = vld [vmem:[#allocation8 + $0xd60] sm:$0xff] }
 0x2ba   : > { %v2867_v52 = vrot.slane %v2865_v46, 1  ;;  %v2855_v56 = vrot.slane %v2853_v42, 1  ;;  %v2732_v46 = vld [vmem:[#allocation8 + $0xd48] sm:$0xff]  ;;  %v12560_v42 = vcombine.low %v2723_v1, %v2727_v2  ;;  %v12569_v51 = vcombine.high %v2731_v63, %v2735_v62  ;;  %v2767_v10 = vld [vmem:[#allocation8 + $0xe60] sm:$0xff] }
 0x2bb   : > { %v12568_v54 = vcombine.low %v2731_v63, %v2735_v62  ;;  %v12570_v19 = vcombine.low %v2732_v46, %v2736_v35  ;;  %v12601_v49 = vcombine.high %v2763_v11, %v2767_v10  ;;  %v2775_v2 = vld [vmem:[#allocation8 + $0xea0] sm:$0xff] }
 0x2bc   : > { %v16063_v17 = vsel %vm574_vm1, %v2863_v23, %v2867_v52  ;;  %v16066_v18 = vsel %vm574_vm1, %v2851_v21, %v2855_v56  ;;  %v16068_v14 = vor.u32 %v2896_v34, %v2867_v52  ;;  %v16088_v44 = vor.u32 %v2893_v9, %v2855_v56  ;;  %v2739_v21 = vld [vmem:[#allocation8 + $0xd80] sm:$0xff]  ;;  %v2740_v34 = vld [vmem:[#allocation8 + $0xd88] sm:$0xff] }
 0x2bd   : > { %4225 = vmatprep.mubr.bf16.mxu0 %v16063_v17  ;;  %4327 = vmatprep.mubr.bf16.mxu1 %v16063_v17  ;;  %v12562_v23 = vcombine.low %v2724_v50, %v2728_v4  ;;  %v12571_v52 = vcombine.high %v2732_v46, %v2736_v35  ;;  %v2743_v56 = vld [vmem:[#allocation8 + $0xda0] sm:$0xff]  ;;  %v2772_v50 = vld [vmem:[#allocation8 + $0xe88] sm:$0xff] }
 0x2be   : > { %4226 = vmatmul.mubr.bf16.vlgmr.msra.gmra.mrb[44].mxu0 %v16066_v18  ;;  %4328 = vmatmul.mubr.bf16.vlgmr.msra.gmra.mrb[40].mxu1 %v16066_v18  ;;  %v12577_v39 = vcombine.high %v2739_v21, %v2743_v56  ;;  %v12576_v0 = vcombine.low %v2739_v21, %v2743_v56  ;;  %v2776_v4 = vld [vmem:[#allocation8 + $0xea8] sm:$0xff]  ;;  %v2779_v63 = vld [vmem:[#allocation8 + $0xec0] sm:$0xff] }
 0x2bf   : > { %4245 = vmatpush1.bf16.msra.mxu0 %v16756_v36  ;;  %4347 = vmatpush1.bf16.msra.mxu1 %v16757_v47  ;;  %v12578_v36 = vcombine.low %v2740_v34, %v2744_v29  ;;  %v2783_v62 = vld [vmem:[#allocation8 + $0xee0] sm:$0xff]  ;;  %v2780_v46 = vld [vmem:[#allocation8 + $0xec8] sm:$0xff] }
 0x2c0   : > { %4235 = vmatprep.mubr.bf16.mxu0 %v16068_v14  ;;  %4337 = vmatprep.mubr.bf16.mxu1 %v16068_v14  ;;  %v2784_v35 = vld [vmem:[#allocation8 + $0xee8] sm:$0xff]  ;;  %v2787_v21 = vld [vmem:[#allocation8 + $0xf00] sm:$0xff] }
 0x2c1   : > { %4246 = vmatprep.subr.bf16.mxu0 %v12537_v13  ;;  %4348 = vmatprep.subr.bf16.mxu1 %v12539_v32  ;;  %v12579_v13 = vcombine.high %v2740_v34, %v2744_v29  ;;  %v2747_v32 = vld [vmem:[#allocation8 + $0xdc0] sm:$0xff]  ;;  %v2788_v34 = vld [vmem:[#allocation8 + $0xf08] sm:$0xff] }
 0x2c2   : > { %v12585_v47 = vcombine.high %v2747_v32, %v2751_v8  ;;  %v12584_v25 = vcombine.low %v2747_v32, %v2751_v8  ;;  %v2791_v56 = vld [vmem:[#allocation8 + $0xf20] sm:$0xff]  ;;  %v2792_v29 = vld [vmem:[#allocation8 + $0xf28] sm:$0xff] }
 0x2c3   : > { %4247 = vmatpush1.bf16.msra.mxu0 %v12536_v31  ;;  %4349 = vmatpush1.bf16.msra.mxu1 %v12538_v7  ;;  %v12587_v31 = vcombine.high %v2748_v38, %v2752_v61  ;;  %v2755_v7 = vld [vmem:[#allocation8 + $0xe00] sm:$0xff]  ;;  %v2796_v38 = vld [vmem:[#allocation8 + $0xf48] sm:$0xff] }
 0x2c4   : > { %4248 = vmatprep.subr.bf16.mxu0 %v12545_v22  ;;  %4350 = vmatprep.subr.bf16.mxu1 %v12547_v12  ;;  %v2756_v22 = vld [vmem:[#allocation8 + $0xe08] sm:$0xff]  ;;  %v12593_v9 = vcombine.high %v2755_v7, %v2759_v58  ;;  %v12592_v5 = vcombine.low %v2755_v7, %v2759_v58  ;;  %v2795_v32 = vld [vmem:[#allocation8 + $0xf40] sm:$0xff] }
 0x2c5   : > { %v2760_v12 = vld [vmem:[#allocation8 + $0xe28] sm:$0xff]  ;;  %v2799_v8 = vld [vmem:[#allocation8 + $0xf60] sm:$0xff] }
 0x2c6   : > { %4236 = vmatmul.mubr.bf16.gmra.mrb[48].mxu0 %v16088_v44  ;;  %4338 = vmatmul.mubr.bf16.gmra.mrb[44].mxu1 %v16088_v44  ;;  %v12595_v43 = vcombine.high %v2756_v22, %v2760_v12  ;;  %v12594_v1 = vcombine.low %v2756_v22, %v2760_v12  ;;  %v2800_v61 = vld [vmem:[#allocation8 + $0xf68] sm:$0xff]  ;;  %v2803_v7 = vld [vmem:[#allocation8 + $0xf80] sm:$0xff] }
 0x2c7   : > { %4249 = vmatpush1.bf16.msra.mxu0 %v12544_v15  ;;  %4351 = vmatpush1.bf16.msra.mxu1 %v12546_v30  ;;  %v2764_v15 = vld [vmem:[#allocation8 + $0xe48] sm:$0xff]  ;;  %v2807_v58 = vld [vmem:[#allocation8 + $0xfa0] sm:$0xff] }
 0x2c8   : > { %4276 = vmatprep.mubr.bf16.mxu0 %v16094_v40  ;;  %4378 = vmatprep.mubr.bf16.mxu1 %v16094_v40  ;;  %v2768_v30 = vld [vmem:[#allocation8 + $0xe68] sm:$0xff] }
 0x2c9   : > { %4250 = vmatprep.subr.bf16.mxu0 %v12553_v41  ;;  %4352 = vmatprep.subr.bf16.mxu1 %v12555_v24  ;;  %v12603_v41 = vcombine.high %v2764_v15, %v2768_v30  ;;  %v2771_v24 = vld [vmem:[#allocation8 + $0xe80] sm:$0xff]  ;;  %v2804_v22 = vld [vmem:[#allocation8 + $0xf88] sm:$0xff] }
 0x2ca   : > { %v2808_v12 = vld [vmem:[#allocation8 + $0xfa8] sm:$0xff] }
 0x2cb   : > { %4251 = vmatpush1.bf16.msra.mxu0 %v12552_v59  ;;  %4353 = vmatpush1.bf16.msra.mxu1 %v12554_v16  ;;  %v12600_v59 = vcombine.low %v2763_v11, %v2767_v10  ;;  %v12602_v16 = vcombine.low %v2764_v15, %v2768_v30  ;;  %v12643_v11 = vcombine.high %v2804_v22, %v2808_v12  ;;  %v2811_v10 = vld [vmem:[#allocation8 + $0xfc0] sm:$0xff] }
 0x2cc   : > { %4252 = vmatprep.subr.bf16.mxu0 %v12561_v6  ;;  %4354 = vmatprep.subr.bf16.mxu1 %v12563_v28  ;;  %v12609_v6 = vcombine.high %v2771_v24, %v2775_v2  ;;  %v12611_v28 = vcombine.high %v2772_v50, %v2776_v4  ;;  %v16104_v15 = vcombine.low %v16051_v55, %v16051_v55  ;;  %v2815_v30 = vld [vmem:[#allocation8 + $0xfe0] sm:$0xff]  ;;  %v2570_v55 = vld [vmem:[#allocation8 + $0x838] sm:$0xff] }
 0x2cf   : > { %4253 = vmatpush1.bf16.msra.mxu0 %v12560_v42  ;;  %4355 = vmatpush1.bf16.msra.mxu1 %v12562_v23  ;;  %v12608_v42 = vcombine.low %v2771_v24, %v2775_v2  ;;  %v12610_v23 = vcombine.low %v2772_v50, %v2776_v4  ;;  %v2565_v2 = vld [vmem:[#allocation8 + $0x810] sm:$0xff]  ;;  %v2877_v50 = vshll.u32 %v16104_v15, 16 }
 0x2d0   : > { %4254 = vmatprep.subr.bf16.mxu0 %v12569_v51  ;;  %4356 = vmatprep.subr.bf16.mxu1 %v12571_v52  ;;  %v12617_v51 = vcombine.high %v2779_v63, %v2783_v62  ;;  %v12619_v52 = vcombine.high %v2780_v46, %v2784_v35  ;;  %v2569_v4 = vld [vmem:[#allocation8 + $0x830] sm:$0xff] }
 0x2d3   : > { %4255 = vmatpush1.bf16.msra.mxu0 %v12568_v54  ;;  %4357 = vmatpush1.bf16.msra.mxu1 %v12570_v19  ;;  %v12616_v54 = vcombine.low %v2779_v63, %v2783_v62  ;;  %v12618_v19 = vcombine.low %v2780_v46, %v2784_v35  ;;  %v12405_v63 = vcombine.high %v2565_v2, %v2569_v4  ;;  %v2879_v35 = vrot.slane %v2877_v50, 1  ;;  %v2609_v50 = vld [vmem:[#allocation8 + $0x970] sm:$0xff] }
 0x2d4   : > { %4256 = vmatprep.subr.bf16.mxu0 %v12577_v39  ;;  %4358 = vmatprep.subr.bf16.mxu1 %v12579_v13  ;;  %v12625_v39 = vcombine.high %v2787_v21, %v2791_v56  ;;  %v12627_v13 = vcombine.high %v2788_v34, %v2792_v29 }
 0x2d7   : > { %4257 = vmatpush1.bf16.msra.mxu0 %v12576_v0  ;;  %4359 = vmatpush1.bf16.msra.mxu1 %v12578_v36  ;;  %v12624_v0 = vcombine.low %v2787_v21, %v2791_v56  ;;  %v12626_v36 = vcombine.low %v2788_v34, %v2792_v29  ;;  %v2902_v56 = vshrl.u32 %v16060_v37, 16  ;;  %v12404_v34 = vcombine.low %v2565_v2, %v2569_v4  ;;  %v2605_v2 = vld [vmem:[#allocation8 + $0x950] sm:$0xff]  ;;  %v2606_v4 = vld [vmem:[#allocation8 + $0x958] sm:$0xff] }
 0x2d8   : > { %4258 = vmatprep.subr.bf16.mxu0 %v12585_v47  ;;  %4360 = vmatprep.subr.bf16.mxu1 %v12587_v31  ;;  %v12633_v47 = vcombine.high %v2795_v32, %v2799_v8  ;;  %v12635_v31 = vcombine.high %v2796_v38, %v2800_v61 }
 0x2db   : > { %4259 = vmatpush1.bf16.msra.mxu0 %v12584_v25  ;;  %4361 = vmatpush1.bf16.msra.mxu1 %v12586_v20  ;;  %v16100_v25 = vcombine.low %v16049_v33, %v16043_v3  ;;  %v12632_v20 = vcombine.low %v2795_v32, %v2799_v8  ;;  %v12640_v3 = vcombine.low %v2803_v7, %v2807_v58  ;;  %v2581_v32 = vld [vmem:[#allocation8 + $0x890] sm:$0xff] }
 0x2dc   : > { %4260 = vmatprep.subr.bf16.mxu0 %v12593_v9  ;;  %4362 = vmatprep.subr.bf16.mxu1 %v12595_v43  ;;  %v12634_v9 = vcombine.low %v2796_v38, %v2800_v61  ;;  %v12641_v43 = vcombine.high %v2803_v7, %v2807_v58  ;;  %v12642_v33 = vcombine.low %v2804_v22, %v2808_v12  ;;  %v2585_v8 = vld [vmem:[#allocation8 + $0x8b0] sm:$0xff]  ;;  %v2582_v38 = vld [vmem:[#allocation8 + $0x898] sm:$0xff]  ;;  %v2899_v7 = vshrl.u32 %v16104_v15, 16 }
 0x2dd   : > { %v2870_v46 = vshrl.u32 %v16100_v25, 16  ;;  %v2586_v61 = vld [vmem:[#allocation8 + $0x8b8] sm:$0xff]  ;;  %v2593_v58 = vld [vmem:[#allocation8 + $0x8f0] sm:$0xff] }
 0x2de   : > { %v2590_v22 = vld [vmem:[#allocation8 + $0x8d8] sm:$0xff] }
 0x2df   : > { %4261 = vmatpush1.bf16.msra.mxu0 %v12592_v5  ;;  %4363 = vmatpush1.bf16.msra.mxu1 %v12594_v1  ;;  %v2812_v5 = vld [vmem:[#allocation8 + $0xfc8] sm:$0xff]  ;;  %v2594_v12 = vld [vmem:[#allocation8 + $0x8f8] sm:$0xff] }
 0x2e0   : > { %4262 = vmatprep.subr.bf16.mxu0 %v12601_v49  ;;  %4364 = vmatprep.subr.bf16.mxu1 %v12603_v41  ;;  %v2816_v1 = vld [vmem:[#allocation8 + $0xfe8] sm:$0xff]  ;;  %v2872_v49 = vshll.u32 %v16100_v25, 16  ;;  %v12649_v41 = vcombine.high %v2811_v10, %v2815_v30 }
 0x2e1   : > { %v12651_v24 = vcombine.high %v2812_v5, %v2816_v1 }
 0x2e3   : > { %4263 = vmatpush1.bf16.msra.mxu0 %v12600_v59  ;;  %4365 = vmatpush1.bf16.msra.mxu1 %v12602_v16  ;;  %v2566_v59 = vld [vmem:[#allocation8 + $0x818] sm:$0xff]  ;;  %v12648_v16 = vcombine.low %v2811_v10, %v2815_v30  ;;  %v12431_v10 = vcombine.high %v2590_v22, %v2594_v12  ;;  %v2597_v30 = vld [vmem:[#allocation8 + $0x910] sm:$0xff] }
 0x2e4   : > { %4264 = vmatprep.subr.bf16.mxu0 %v12609_v6  ;;  %4366 = vmatprep.subr.bf16.mxu1 %v12611_v28  ;;  %v12650_v6 = vcombine.low %v2812_v5, %v2816_v1  ;;  %v2874_v28 = vrot.slane %v2872_v49, 1  ;;  %v12407_v62 = vcombine.high %v2566_v59, %v2570_v55  ;;  %v12406_v29 = vcombine.low %v2566_v59, %v2570_v55  ;;  %v2601_v5 = vld [vmem:[#allocation8 + $0x930] sm:$0xff]  ;;  %v2598_v1 = vld [vmem:[#allocation8 + $0x918] sm:$0xff] }
 0x2e5   : > { %v12430_v49 = vcombine.low %v2590_v22, %v2594_v12  ;;  %v2610_v59 = vld [vmem:[#allocation8 + $0x978] sm:$0xff]  ;;  %v12436_v55 = vcombine.low %v2597_v30, %v2601_v5 }
 0x2e6   : > { %v2875_v21 = vor.u32 %v2874_v28, %v2870_v46  ;;  %v2613_v28 = vld [vmem:[#allocation8 + $0x990] sm:$0xff]  ;;  %v2618_v46 = vld [vmem:[#allocation8 + $0x9b8] sm:$0xff] }
 0x2e7   : > { %4265 = vmatpush1.bf16.msra.mxu0 %v12608_v42  ;;  %4367 = vmatpush1.bf16.msra.mxu1 %v12610_v23  ;;  %v2573_v42 = vld [vmem:[#allocation8 + $0x850] sm:$0xff]  ;;  %v2638_v22 = vld [vmem:[#allocation8 + $0xa58] sm:$0xff] }
 0x2e8   : > { %4266 = vmatprep.subr.bf16.mxu0 %v12617_v51  ;;  %4368 = vmatprep.subr.bf16.mxu1 %v12619_v52  ;;  %v2577_v23 = vld [vmem:[#allocation8 + $0x870] sm:$0xff]  ;;  %v2574_v51 = vld [vmem:[#allocation8 + $0x858] sm:$0xff] }
 0x2e9   : > { %v2578_v52 = vld [vmem:[#allocation8 + $0x878] sm:$0xff] }
 0x2ea   : > { %v2642_v12 = vld [vmem:[#allocation8 + $0xa78] sm:$0xff] }
 0x2eb   : > { %4267 = vmatpush1.bf16.msra.mxu0 %v12616_v54  ;;  %4369 = vmatpush1.bf16.msra.mxu1 %v12618_v19  ;;  %v16111_v54 = vsel %vm574_vm1, %v2875_v21, %v2879_v35  ;;  %v16114_v19 = vor.u32 %v2902_v56, %v16086_v45  ;;  %v12421_v45 = vcombine.high %v2581_v32, %v2585_v8  ;;  %v2625_v21 = vld [vmem:[#allocation8 + $0x9f0] sm:$0xff]  ;;  %v2622_v56 = vld [vmem:[#allocation8 + $0x9d8] sm:$0xff]  ;;  %vm16758_vm1 = vcmask 1046528  }
 0x2ec   : > { %4268 = vmatprep.subr.bf16.mxu0 %v12625_v39  ;;  %4370 = vmatprep.subr.bf16.mxu1 %v12627_v13  ;;  %v12413_v39 = vcombine.high %v2573_v42, %v2577_v23  ;;  %v12415_v13 = vcombine.high %v2574_v51, %v2578_v52  ;;  %vm16759_vm9 = vmmov %vm16758_vm1 }
 0x2ed   : > { %vm16760_vm14 = vmmov %vm16758_vm1 }
 0x2ee   : > { %vm16761_vm10 = vmmov %vm16758_vm1 }
 0x2ef   : > { %4269 = vmatpush1.bf16.msra.mxu0 %v12624_v0  ;;  %4371 = vmatpush1.bf16.msra.mxu1 %v12626_v36  ;;  %v12412_v0 = vcombine.low %v2573_v42, %v2577_v23  ;;  %v12414_v36 = vcombine.low %v2574_v51, %v2578_v52  ;;  %v12446_v42 = vcombine.low %v2606_v4, %v2610_v59  ;;  %v2621_v52 = vld [vmem:[#allocation8 + $0x9d0] sm:$0xff] }
 0x2f0   : > { %4270 = vmatprep.subr.bf16.mxu0 %v12633_v47  ;;  %4372 = vmatprep.subr.bf16.mxu1 %v12635_v31  ;;  %v12423_v47 = vcombine.high %v2582_v38, %v2586_v61  ;;  %v2589_v31 = vld [vmem:[#allocation8 + $0x8d0] sm:$0xff] }
 0x2f3   : > { %4271 = vmatpush1.bf16.msra.mxu0 %v12632_v20  ;;  %4373 = vmatpush1.bf16.msra.mxu1 %v12634_v9  ;;  %v16121_v20 = vor.u32 %v2899_v7, %v2879_v35  ;;  %v12420_v9 = vcombine.low %v2581_v32, %v2585_v8  ;;  %v12444_v35 = vcombine.low %v2605_v2, %v2609_v50  ;;  %v2629_v8 = vld [vmem:[#allocation8 + $0xa10] sm:$0xff] }
 0x2f4   : > { %4272 = vmatprep.subr.bf16.mxu0 %v12641_v43  ;;  %4374 = vmatprep.subr.bf16.mxu1 %v12643_v11  ;;  %v12422_v43 = vcombine.low %v2582_v38, %v2586_v61  ;;  %v12429_v11 = vcombine.high %v2589_v31, %v2593_v58  ;;  %v2633_v38 = vld [vmem:[#allocation8 + $0xa30] sm:$0xff]  ;;  %v2630_v61 = vld [vmem:[#allocation8 + $0xa18] sm:$0xff] }
 0x2f5   : > { %v2637_v7 = vld [vmem:[#allocation8 + $0xa50] sm:$0xff] }
 0x2f7   : > { %4273 = vmatpush1.bf16.msra.mxu0 %v12640_v3  ;;  %4375 = vmatpush1.bf16.msra.mxu1 %v12642_v33  ;;  %v2602_v3 = vld [vmem:[#allocation8 + $0x938] sm:$0xff]  ;;  %v12428_v33 = vcombine.low %v2589_v31, %v2593_v58  ;;  %v2641_v58 = vld [vmem:[#allocation8 + $0xa70] sm:$0xff] }
 0x2f8   : > { %4274 = vmatprep.subr.bf16.mxu0 %v12649_v41  ;;  %4376 = vmatprep.subr.bf16.mxu1 %v12651_v24  ;;  %v12437_v41 = vcombine.high %v2597_v30, %v2601_v5  ;;  %v12439_v24 = vcombine.high %v2598_v1, %v2602_v3  ;;  %v2645_v30 = vld [vmem:[#allocation8 + $0xa90] sm:$0xff] }
 0x2f9   : > { %v2649_v5 = vld [vmem:[#allocation8 + $0xab0] sm:$0xff] }
 0x2fb   : > { %4275 = vmatpush1.bf16.msra.mxu0 %v12648_v16  ;;  %4377 = vmatpush1.bf16.msra.mxu1 %v12650_v6  ;;  %v12438_v16 = vcombine.low %v2598_v1, %v2602_v3  ;;  %v12445_v6 = vcombine.high %v2605_v2, %v2609_v50  ;;  %v2646_v1 = vld [vmem:[#allocation8 + $0xa98] sm:$0xff]  ;;  %v2653_v2 = vld [vmem:[#allocation8 + $0xad0] sm:$0xff] }
 0x2fc   : > { %4397 = vmatprep.subr.bf16.mxu0 %v12405_v63  ;;  %4499 = vmatprep.subr.bf16.mxu1 %v12407_v62  ;;  %v2617_v63 = vld [vmem:[#allocation8 + $0x9b0] sm:$0xff]  ;;  %v2614_v62 = vld [vmem:[#allocation8 + $0x998] sm:$0xff] }
 0x2fd   : > { %v12453_v23 = vcombine.high %v2613_v28, %v2617_v63  ;;  %v12455_v51 = vcombine.high %v2614_v62, %v2618_v46  ;;  %v2650_v3 = vld [vmem:[#allocation8 + $0xab8] sm:$0xff]  ;;  %v2657_v50 = vld [vmem:[#allocation8 + $0xaf0] sm:$0xff] }
 0x2fe   : > { %4277 = vmatmul.mubr.bf16.vlgmr.msra.gmra.mrb[44].mxu0 %v16111_v54  ;;  %4379 = vmatmul.mubr.bf16.vlgmr.msra.gmra.mrb[40].mxu1 %v16111_v54 }
 0x2ff   : > { %4286 = vmatprep.mubr.bf16.mxu0 %v16114_v19  ;;  %4388 = vmatprep.mubr.bf16.mxu1 %v16114_v19 }
 0x300   : > { %4398 = vmatpush1.bf16.msra.mxu0 %v12404_v34  ;;  %4500 = vmatpush1.bf16.msra.mxu1 %v12406_v29  ;;  %v2626_v34 = vld [vmem:[#allocation8 + $0x9f8] sm:$0xff]  ;;  %v12452_v29 = vcombine.low %v2613_v28, %v2617_v63  ;;  %v2661_v28 = vld [vmem:[#allocation8 + $0xb10] sm:$0xff] }
 0x301   : > { %4399 = vmatprep.subr.bf16.mxu0 %v12413_v39  ;;  %4501 = vmatprep.subr.bf16.mxu1 %v12415_v13  ;;  %v12454_v39 = vcombine.low %v2614_v62, %v2618_v46  ;;  %v12461_v13 = vcombine.high %v2621_v52, %v2625_v21  ;;  %v12463_v32 = vcombine.high %v2622_v56, %v2626_v34  ;;  %v2665_v63 = vld [vmem:[#allocation8 + $0xb30] sm:$0xff]  ;;  %v2662_v62 = vld [vmem:[#allocation8 + $0xb18] sm:$0xff] }
 0x302   : > { %v2666_v46 = vld [vmem:[#allocation8 + $0xb38] sm:$0xff] }
 0x304   : > { %4400 = vmatpush1.bf16.msra.mxu0 %v12412_v0  ;;  %4502 = vmatpush1.bf16.msra.mxu1 %v12414_v36  ;;  %v2634_v0 = vld [vmem:[#allocation8 + $0xa38] sm:$0xff]  ;;  %v12460_v36 = vcombine.low %v2621_v52, %v2625_v21  ;;  %v2669_v52 = vld [vmem:[#allocation8 + $0xb50] sm:$0xff] }
 0x305   : > { %4401 = vmatprep.subr.bf16.mxu0 %v12421_v45  ;;  %4503 = vmatprep.subr.bf16.mxu1 %v12423_v47  ;;  %v12462_v45 = vcombine.low %v2622_v56, %v2626_v34  ;;  %v12469_v47 = vcombine.high %v2629_v8, %v2633_v38  ;;  %v12471_v31 = vcombine.high %v2630_v61, %v2634_v0  ;;  %v2673_v21 = vld [vmem:[#allocation8 + $0xb70] sm:$0xff]  ;;  %v2670_v56 = vld [vmem:[#allocation8 + $0xb58] sm:$0xff] }
 0x306   : > { %4287 = vmatmul.mubr.bf16.gmra.mrb[52].mxu0 %v16121_v20  ;;  %4389 = vmatmul.mubr.bf16.gmra.mrb[48].mxu1 %v16121_v20  ;;  %v2674_v34 = vld [vmem:[#allocation8 + $0xb78] sm:$0xff] }
 0x307   : > { %4429 = vmatprep.mubr.bf16.mxu0 %v16063_v17  ;;  %4531 = vmatprep.mubr.bf16.mxu1 %v16063_v17  ;;  %v12447_v17 = vcombine.high %v2606_v4, %v2610_v59  ;;  %v2654_v4 = vld [vmem:[#allocation8 + $0xad8] sm:$0xff] }
 0x308   : > { %4402 = vmatpush1.bf16.msra.mxu0 %v12420_v9  ;;  %4504 = vmatpush1.bf16.msra.mxu1 %v12422_v43  ;;  %v12468_v9 = vcombine.low %v2629_v8, %v2633_v38  ;;  %v12470_v43 = vcombine.low %v2630_v61, %v2634_v0  ;;  %v2658_v59 = vld [vmem:[#allocation8 + $0xaf8] sm:$0xff]  ;;  %v2677_v8 = vld [vmem:[#allocation8 + $0xb90] sm:$0xff] }
 0x309   : > { %4403 = vmatprep.subr.bf16.mxu0 %v12429_v11  ;;  %4505 = vmatprep.subr.bf16.mxu1 %v12431_v10  ;;  %v12477_v11 = vcombine.high %v2637_v7, %v2641_v58  ;;  %v12479_v10 = vcombine.high %v2638_v22, %v2642_v12  ;;  %v2681_v38 = vld [vmem:[#allocation8 + $0xbb0] sm:$0xff]  ;;  %v2678_v61 = vld [vmem:[#allocation8 + $0xb98] sm:$0xff] }
 0x30a   : > { %v2682_v0 = vld [vmem:[#allocation8 + $0xbb8] sm:$0xff] }
 0x30c   : > { %4404 = vmatpush1.bf16.msra.mxu0 %v12428_v33  ;;  %4506 = vmatpush1.bf16.msra.mxu1 %v12430_v49  ;;  %v12476_v33 = vcombine.low %v2637_v7, %v2641_v58  ;;  %v12478_v49 = vcombine.low %v2638_v22, %v2642_v12  ;;  %v2685_v7 = vld [vmem:[#allocation8 + $0xbd0] sm:$0xff]  ;;  %v2686_v22 = vld [vmem:[#allocation8 + $0xbd8] sm:$0xff] }
 0x30d   : > { %4405 = vmatprep.subr.bf16.mxu0 %v12437_v41  ;;  %4507 = vmatprep.subr.bf16.mxu1 %v12439_v24  ;;  %v12485_v41 = vcombine.high %v2645_v30, %v2649_v5  ;;  %v12487_v24 = vcombine.high %v2646_v1, %v2650_v3  ;;  %v2689_v58 = vld [vmem:[#allocation8 + $0xbf0] sm:$0xff]  ;;  %v2690_v12 = vld [vmem:[#allocation8 + $0xbf8] sm:$0xff] }
 0x310   : > { %4406 = vmatpush1.bf16.msra.mxu0 %v12436_v55  ;;  %4508 = vmatpush1.bf16.msra.mxu1 %v12438_v16  ;;  %v12484_v55 = vcombine.low %v2645_v30, %v2649_v5  ;;  %v12486_v16 = vcombine.low %v2646_v1, %v2650_v3  ;;  %v2693_v30 = vld [vmem:[#allocation8 + $0xc10] sm:$0xff]  ;;  %v2694_v1 = vld [vmem:[#allocation8 + $0xc18] sm:$0xff] }
 0x311   : > { %4407 = vmatprep.subr.bf16.mxu0 %v12445_v6  ;;  %4509 = vmatprep.subr.bf16.mxu1 %v12447_v17  ;;  %v12493_v6 = vcombine.high %v2653_v2, %v2657_v50  ;;  %v12495_v17 = vcombine.high %v2654_v4, %v2658_v59  ;;  %v2697_v5 = vld [vmem:[#allocation8 + $0xc30] sm:$0xff]  ;;  %v2698_v3 = vld [vmem:[#allocation8 + $0xc38] sm:$0xff] }
 0x314   : > { %4408 = vmatpush1.bf16.msra.mxu0 %v12444_v35  ;;  %4510 = vmatpush1.bf16.msra.mxu1 %v12446_v42  ;;  %v12492_v35 = vcombine.low %v2653_v2, %v2657_v50  ;;  %v12494_v42 = vcombine.low %v2654_v4, %v2658_v59  ;;  %v2701_v2 = vld [vmem:[#allocation8 + $0xc50] sm:$0xff]  ;;  %v2702_v4 = vld [vmem:[#allocation8 + $0xc58] sm:$0xff] }
 0x315   : > { %4409 = vmatprep.subr.bf16.mxu0 %v12453_v23  ;;  %4511 = vmatprep.subr.bf16.mxu1 %v12455_v51  ;;  %v12501_v23 = vcombine.high %v2661_v28, %v2665_v63  ;;  %v12503_v51 = vcombine.high %v2662_v62, %v2666_v46  ;;  %v2705_v50 = vld [vmem:[#allocation8 + $0xc70] sm:$0xff]  ;;  %v2706_v59 = vld [vmem:[#allocation8 + $0xc78] sm:$0xff] }
 0x318   : > { %4410 = vmatpush1.bf16.msra.mxu0 %v12452_v29  ;;  %4512 = vmatpush1.bf16.msra.mxu1 %v12454_v39  ;;  %v12500_v29 = vcombine.low %v2661_v28, %v2665_v63  ;;  %v12502_v39 = vcombine.low %v2662_v62, %v2666_v46  ;;  %v2709_v28 = vld [vmem:[#allocation8 + $0xc90] sm:$0xff]  ;;  %v2710_v62 = vld [vmem:[#allocation8 + $0xc98] sm:$0xff] }
 0x319   : > { %4411 = vmatprep.subr.bf16.mxu0 %v12461_v13  ;;  %4513 = vmatprep.subr.bf16.mxu1 %v12463_v32  ;;  %v12509_v13 = vcombine.high %v2669_v52, %v2673_v21  ;;  %v12511_v32 = vcombine.high %v2670_v56, %v2674_v34  ;;  %v2713_v63 = vld [vmem:[#allocation8 + $0xcb0] sm:$0xff]  ;;  %v2714_v46 = vld [vmem:[#allocation8 + $0xcb8] sm:$0xff] }
 0x31c   : > { %4412 = vmatpush1.bf16.msra.mxu0 %v12460_v36  ;;  %4514 = vmatpush1.bf16.msra.mxu1 %v12462_v45  ;;  %v12508_v36 = vcombine.low %v2669_v52, %v2673_v21  ;;  %v12510_v45 = vcombine.low %v2670_v56, %v2674_v34  ;;  %v2717_v52 = vld [vmem:[#allocation8 + $0xcd0] sm:$0xff]  ;;  %v2718_v56 = vld [vmem:[#allocation8 + $0xcd8] sm:$0xff] }
 0x31d   : > { %4413 = vmatprep.subr.bf16.mxu0 %v12469_v47  ;;  %4515 = vmatprep.subr.bf16.mxu1 %v12471_v31  ;;  %v12517_v47 = vcombine.high %v2677_v8, %v2681_v38  ;;  %v12519_v31 = vcombine.high %v2678_v61, %v2682_v0  ;;  %v2721_v21 = vld [vmem:[#allocation8 + $0xcf0] sm:$0xff]  ;;  %v2722_v34 = vld [vmem:[#allocation8 + $0xcf8] sm:$0xff] }
 0x320   : > { %4414 = vmatpush1.bf16.msra.mxu0 %v12468_v9  ;;  %4516 = vmatpush1.bf16.msra.mxu1 %v12470_v43  ;;  %v12516_v9 = vcombine.low %v2677_v8, %v2681_v38  ;;  %v12518_v43 = vcombine.low %v2678_v61, %v2682_v0  ;;  %v2726_v8 = vld [vmem:[#allocation8 + $0xd18] sm:$0xff]  ;;  %v12556_v61 = vcombine.low %v2717_v52, %v2721_v21 }
 0x321   : > { %4415 = vmatprep.subr.bf16.mxu0 %v12477_v11  ;;  %4517 = vmatprep.subr.bf16.mxu1 %v12479_v10  ;;  %v12525_v11 = vcombine.high %v2685_v7, %v2689_v58  ;;  %v12527_v10 = vcombine.high %v2686_v22, %v2690_v12  ;;  %v2730_v38 = vld [vmem:[#allocation8 + $0xd38] sm:$0xff]  ;;  %v12558_v0 = vcombine.low %v2718_v56, %v2722_v34 }
 0x324   : > { %4416 = vmatpush1.bf16.msra.mxu0 %v12476_v33  ;;  %4518 = vmatpush1.bf16.msra.mxu1 %v12478_v49  ;;  %v12524_v33 = vcombine.low %v2685_v7, %v2689_v58  ;;  %v12526_v49 = vcombine.low %v2686_v22, %v2690_v12  ;;  %v2734_v7 = vld [vmem:[#allocation8 + $0xd58] sm:$0xff]  ;;  %v12566_v22 = vcombine.low %v2726_v8, %v2730_v38 }
 0x325   : > { %4417 = vmatprep.subr.bf16.mxu0 %v12485_v41  ;;  %4519 = vmatprep.subr.bf16.mxu1 %v12487_v24  ;;  %v12533_v41 = vcombine.high %v2693_v30, %v2697_v5  ;;  %v12535_v24 = vcombine.high %v2694_v1, %v2698_v3  ;;  %v2738_v58 = vld [vmem:[#allocation8 + $0xd78] sm:$0xff] }
 0x328   : > { %4418 = vmatpush1.bf16.msra.mxu0 %v12484_v55  ;;  %4520 = vmatpush1.bf16.msra.mxu1 %v12486_v16  ;;  %v12532_v55 = vcombine.low %v2693_v30, %v2697_v5  ;;  %v12534_v16 = vcombine.low %v2694_v1, %v2698_v3  ;;  %v12574_v5 = vcombine.low %v2734_v7, %v2738_v58 }
 0x329   : > { %4419 = vmatprep.subr.bf16.mxu0 %v12493_v6  ;;  %4521 = vmatprep.subr.bf16.mxu1 %v12495_v17  ;;  %v12541_v6 = vcombine.high %v2701_v2, %v2705_v50  ;;  %v12543_v17 = vcombine.high %v2702_v4, %v2706_v59 }
 0x32c   : > { %4420 = vmatpush1.bf16.msra.mxu0 %v12492_v35  ;;  %4522 = vmatpush1.bf16.msra.mxu1 %v12494_v42  ;;  %v12540_v35 = vcombine.low %v2701_v2, %v2705_v50  ;;  %v12542_v42 = vcombine.low %v2702_v4, %v2706_v59 }
 0x32d   : > { %4421 = vmatprep.subr.bf16.mxu0 %v12501_v23  ;;  %4523 = vmatprep.subr.bf16.mxu1 %v12503_v51  ;;  %v12549_v23 = vcombine.high %v2709_v28, %v2713_v63  ;;  %v12551_v51 = vcombine.high %v2710_v62, %v2714_v46 }
 0x330   : > { %4422 = vmatpush1.bf16.msra.mxu0 %v12500_v29  ;;  %4524 = vmatpush1.bf16.msra.mxu1 %v12502_v39  ;;  %v12550_v29 = vcombine.low %v2710_v62, %v2714_v46  ;;  %v12557_v39 = vcombine.high %v2717_v52, %v2721_v21 }
 0x331   : > { %4423 = vmatprep.subr.bf16.mxu0 %v12509_v13  ;;  %4525 = vmatprep.subr.bf16.mxu1 %v12511_v32  ;;  %v12559_v13 = vcombine.high %v2718_v56, %v2722_v34  ;;  %v2725_v32 = vld [vmem:[#allocation8 + $0xd10] sm:$0xff] }
 0x334   : > { %4424 = vmatpush1.bf16.msra.mxu0 %v12508_v36  ;;  %4526 = vmatpush1.bf16.msra.mxu1 %v12510_v45  ;;  %v12567_v45 = vcombine.high %v2726_v8, %v2730_v38 }
 0x335   : > { %4425 = vmatprep.subr.bf16.mxu0 %v12517_v47  ;;  %4527 = vmatprep.subr.bf16.mxu1 %v12519_v31  ;;  %v2733_v47 = vld [vmem:[#allocation8 + $0xd50] sm:$0xff] }
 0x336   : > { %v2737_v31 = vld [vmem:[#allocation8 + $0xd70] sm:$0xff] }
 0x337   : > { %v12573_v12 = vcombine.high %v2733_v47, %v2737_v31  ;;  %v12572_v30 = vcombine.low %v2733_v47, %v2737_v31 }
 0x338   : > { %4426 = vmatpush1.bf16.msra.mxu0 %v12516_v9  ;;  %4528 = vmatpush1.bf16.msra.mxu1 %v12518_v43  ;;  %v12575_v9 = vcombine.high %v2734_v7, %v2738_v58  ;;  %v2741_v43 = vld [vmem:[#allocation8 + $0xd90] sm:$0xff] }
 0x339   : > { %4427 = vmatprep.subr.bf16.mxu0 %v12525_v11  ;;  %4529 = vmatprep.subr.bf16.mxu1 %v12527_v10  ;;  %v2745_v11 = vld [vmem:[#allocation8 + $0xdb0] sm:$0xff]  ;;  %v2746_v10 = vld [vmem:[#allocation8 + $0xdb8] sm:$0xff] }
 0x33a   : > { %v12581_v1 = vcombine.high %v2741_v43, %v2745_v11  ;;  %v12580_v2 = vcombine.low %v2741_v43, %v2745_v11 }
 0x33c   : > { %4428 = vmatpush1.bf16.msra.mxu0 %v12524_v33  ;;  %4530 = vmatpush1.bf16.msra.mxu1 %v12526_v49  ;;  %v2749_v33 = vld [vmem:[#allocation8 + $0xdd0] sm:$0xff] }
 0x33d   : > { %4448 = vmatprep.subr.bf16.mxu0 %v12533_v41  ;;  %4550 = vmatprep.subr.bf16.mxu1 %v12535_v24  ;;  %v2753_v49 = vld [vmem:[#allocation8 + $0xdf0] sm:$0xff]  ;;  %v2750_v41 = vld [vmem:[#allocation8 + $0xdd8] sm:$0xff] }
 0x33e   : > { %v2754_v24 = vld [vmem:[#allocation8 + $0xdf8] sm:$0xff]  ;;  %v12589_v4 = vcombine.high %v2749_v33, %v2753_v49 }
 0x33f   : > { %4430 = vmatmul.mubr.bf16.vlgmr.msra.gmra.mrb[56].mxu0 %v16066_v18  ;;  %4532 = vmatmul.mubr.bf16.vlgmr.msra.gmra.mrb[52].mxu1 %v16066_v18  ;;  %v12548_v18 = vcombine.low %v2709_v28, %v2713_v63  ;;  %v12591_v59 = vcombine.high %v2750_v41, %v2754_v24  ;;  %v12588_v28 = vcombine.low %v2749_v33, %v2753_v49 }
 0x340   : > { %4439 = vmatprep.mubr.bf16.mxu0 %v16068_v14  ;;  %4449 = vmatpush1.bf16.msra.mxu0 %v12532_v55  ;;  %v2757_v55 = vld [vmem:[#allocation8 + $0xe10] sm:$0xff]  ;;  %v12590_v63 = vcombine.low %v2750_v41, %v2754_v24 }
 0x341   : > { %4541 = vmatprep.mubr.bf16.mxu1 %v16068_v14  ;;  %4551 = vmatpush1.bf16.msra.mxu1 %v12534_v16  ;;  %v2729_v14 = vld [vmem:[#allocation8 + $0xd30] sm:$0xff] }
 0x342   : > { %4450 = vmatprep.subr.bf16.mxu0 %v12541_v6  ;;  %4552 = vmatprep.subr.bf16.mxu1 %v12543_v17  ;;  %v12565_v36 = vcombine.high %v2725_v32, %v2729_v14  ;;  %v2761_v16 = vld [vmem:[#allocation8 + $0xe30] sm:$0xff]  ;;  %v2758_v6 = vld [vmem:[#allocation8 + $0xe18] sm:$0xff] }
 0x343   : > { %v2762_v17 = vld [vmem:[#allocation8 + $0xe38] sm:$0xff]  ;;  %v12597_v62 = vcombine.high %v2757_v55, %v2761_v16  ;;  %v12596_v52 = vcombine.low %v2757_v55, %v2761_v16 }
 0x344   : > { %4451 = vmatpush1.bf16.msra.mxu0 %v12540_v35  ;;  %v12599_v46 = vcombine.high %v2758_v6, %v2762_v17  ;;  %v2765_v35 = vld [vmem:[#allocation8 + $0xe50] sm:$0xff]  ;;  %v12598_v21 = vcombine.low %v2758_v6, %v2762_v17 }
 0x345   : > { %4553 = vmatpush1.bf16.msra.mxu1 %v12542_v42  ;;  %4452 = vmatprep.subr.bf16.mxu0 %v12549_v23  ;;  %v2769_v42 = vld [vmem:[#allocation8 + $0xe70] sm:$0xff]  ;;  %v2766_v23 = vld [vmem:[#allocation8 + $0xe58] sm:$0xff] }
 0x346   : > { %4554 = vmatprep.subr.bf16.mxu1 %v12551_v51  ;;  %v2770_v51 = vld [vmem:[#allocation8 + $0xe78] sm:$0xff]  ;;  %v12605_v56 = vcombine.high %v2765_v35, %v2769_v42 }
 0x347   : > { %4440 = vmatmul.mubr.bf16.gmra.mrb[60].mxu0 %v16088_v44  ;;  %4542 = vmatmul.mubr.bf16.gmra.mrb[56].mxu1 %v16088_v44  ;;  %v12564_v44 = vcombine.low %v2725_v32, %v2729_v14  ;;  %v12607_v34 = vcombine.high %v2766_v23, %v2770_v51  ;;  %v12604_v32 = vcombine.low %v2765_v35, %v2769_v42 }
 0x348   : > { %4453 = vmatpush1.bf16.msra.mxu0 %v12548_v18  ;;  %4480 = vmatprep.mubr.bf16.mxu0 %v16094_v40  ;;  %v2773_v18 = vld [vmem:[#allocation8 + $0xe90] sm:$0xff]  ;;  %v12606_v14 = vcombine.low %v2766_v23, %v2770_v51 }
 0x349   : > { %4555 = vmatpush1.bf16.msra.mxu1 %v12550_v29  ;;  %4582 = vmatprep.mubr.bf16.mxu1 %v16094_v40  ;;  %v2742_v40 = vld [vmem:[#allocation8 + $0xd98] sm:$0xff]  ;;  %v2777_v29 = vld [vmem:[#allocation8 + $0xeb0] sm:$0xff] }
 0x34a   : > { %4454 = vmatprep.subr.bf16.mxu0 %v12557_v39  ;;  %4556 = vmatprep.subr.bf16.mxu1 %v12559_v13  ;;  %v12583_v3 = vcombine.high %v2742_v40, %v2746_v10  ;;  %v12582_v50 = vcombine.low %v2742_v40, %v2746_v10  ;;  %v2774_v39 = vld [vmem:[#allocation8 + $0xe98] sm:$0xff]  ;;  %v12613_v8 = vcombine.high %v2773_v18, %v2777_v29 }
 0x34b   : > { %v2778_v13 = vld [vmem:[#allocation8 + $0xeb8] sm:$0xff]  ;;  %v12612_v47 = vcombine.low %v2773_v18, %v2777_v29 }
 0x34c   : > { %4455 = vmatpush1.bf16.msra.mxu0 %v12556_v61  ;;  %v12615_v38 = vcombine.high %v2774_v39, %v2778_v13  ;;  %v2781_v61 = vld [vmem:[#allocation8 + $0xed0] sm:$0xff]  ;;  %v12614_v31 = vcombine.low %v2774_v39, %v2778_v13 }
 0x34d   : > { %4557 = vmatpush1.bf16.msra.mxu1 %v12558_v0  ;;  %4456 = vmatprep.subr.bf16.mxu0 %v12565_v36  ;;  %v2785_v0 = vld [vmem:[#allocation8 + $0xef0] sm:$0xff]  ;;  %v2782_v36 = vld [vmem:[#allocation8 + $0xed8] sm:$0xff] }
 0x34e   : > { %4558 = vmatprep.subr.bf16.mxu1 %v12567_v45  ;;  %v2786_v45 = vld [vmem:[#allocation8 + $0xef8] sm:$0xff]  ;;  %v12621_v7 = vcombine.high %v2781_v61, %v2785_v0  ;;  %v12620_v43 = vcombine.low %v2781_v61, %v2785_v0 }
 0x34f   : > { %v12623_v58 = vcombine.high %v2782_v36, %v2786_v45  ;;  %v12622_v11 = vcombine.low %v2782_v36, %v2786_v45 }
 0x350   : > { %4457 = vmatpush1.bf16.msra.mxu0 %v12564_v44  ;;  %v2789_v44 = vld [vmem:[#allocation8 + $0xf10] sm:$0xff] }
 0x351   : > { %4559 = vmatpush1.bf16.msra.mxu1 %v12566_v22  ;;  %4458 = vmatprep.subr.bf16.mxu0 %v12573_v12  ;;  %v2793_v22 = vld [vmem:[#allocation8 + $0xf30] sm:$0xff]  ;;  %v2790_v12 = vld [vmem:[#allocation8 + $0xf18] sm:$0xff] }
 0x352   : > { %4560 = vmatprep.subr.bf16.mxu1 %v12575_v9  ;;  %v2794_v9 = vld [vmem:[#allocation8 + $0xf38] sm:$0xff]  ;;  %v12629_v40 = vcombine.high %v2789_v44, %v2793_v22  ;;  %v12628_v33 = vcombine.low %v2789_v44, %v2793_v22 }
 0x353   : > { %v12631_v10 = vcombine.high %v2790_v12, %v2794_v9  ;;  %v12630_v49 = vcombine.low %v2790_v12, %v2794_v9 }
 0x354   : > { %4459 = vmatpush1.bf16.msra.mxu0 %v12572_v30  ;;  %v2797_v30 = vld [vmem:[#allocation8 + $0xf50] sm:$0xff] }
 0x355   : > { %4561 = vmatpush1.bf16.msra.mxu1 %v12574_v5  ;;  %4460 = vmatprep.subr.bf16.mxu0 %v12581_v1  ;;  %v2801_v5 = vld [vmem:[#allocation8 + $0xf70] sm:$0xff]  ;;  %v2798_v1 = vld [vmem:[#allocation8 + $0xf58] sm:$0xff] }
 0x356   : > { %4562 = vmatprep.subr.bf16.mxu1 %v12583_v3  ;;  %v2802_v3 = vld [vmem:[#allocation8 + $0xf78] sm:$0xff]  ;;  %v12637_v41 = vcombine.high %v2797_v30, %v2801_v5  ;;  %v12636_v55 = vcombine.low %v2797_v30, %v2801_v5 }
 0x357   : > { %v12639_v24 = vcombine.high %v2798_v1, %v2802_v3  ;;  %v12638_v16 = vcombine.low %v2798_v1, %v2802_v3  ;;  %v2336_v1 = vld [vmem:[#allocation8 + $0x100] sm:$0xff] }
 0x358   : > { %4461 = vmatpush1.bf16.msra.mxu0 %v12580_v2  ;;  %v2805_v2 = vld [vmem:[#allocation8 + $0xf90] sm:$0xff]  ;;  %v2340_v3 = vld [vmem:[#allocation8 + $0x120] sm:$0xff] }
 0x359   : > { %4563 = vmatpush1.bf16.msra.mxu1 %v12582_v50  ;;  %4462 = vmatprep.subr.bf16.mxu0 %v12589_v4  ;;  %v2809_v50 = vld [vmem:[#allocation8 + $0xfb0] sm:$0xff]  ;;  %v2806_v4 = vld [vmem:[#allocation8 + $0xf98] sm:$0xff] }
 0x35a   : > { %4564 = vmatprep.subr.bf16.mxu1 %v12591_v59  ;;  %v2810_v59 = vld [vmem:[#allocation8 + $0xfb8] sm:$0xff]  ;;  %v12645_v6 = vcombine.high %v2805_v2, %v2809_v50  ;;  %v12644_v35 = vcombine.low %v2805_v2, %v2809_v50  ;;  %v12693_v2 = vcombine.high %v2336_v1, %v2340_v3 }
 0x35b   : > { %v12647_v17 = vcombine.high %v2806_v4, %v2810_v59  ;;  %v12646_v42 = vcombine.low %v2806_v4, %v2810_v59  ;;  %v2344_v4 = vld [vmem:[#allocation8 + $0x140] sm:$0xff] }
 0x35c   : > { %4463 = vmatpush1.bf16.msra.mxu0 %v12588_v28  ;;  %v2813_v28 = vld [vmem:[#allocation8 + $0xfd0] sm:$0xff]  ;;  %v2348_v59 = vld [vmem:[#allocation8 + $0x160] sm:$0xff] }
 0x35d   : > { %4565 = vmatpush1.bf16.msra.mxu1 %v12590_v63  ;;  %4464 = vmatprep.subr.bf16.mxu0 %v12597_v62  ;;  %v2817_v63 = vld [vmem:[#allocation8 + $0xff0] sm:$0xff]  ;;  %v2814_v62 = vld [vmem:[#allocation8 + $0xfd8] sm:$0xff] }
 0x35e   : > { %4566 = vmatprep.subr.bf16.mxu1 %v12599_v46  ;;  %v2818_v46 = vld [vmem:[#allocation8 + $0xff8] sm:$0xff]  ;;  %v12653_v23 = vcombine.high %v2813_v28, %v2817_v63  ;;  %v12652_v18 = vcombine.low %v2813_v28, %v2817_v63  ;;  %v2352_v63 = vld [vmem:[#allocation8 + $0x180] sm:$0xff] }
 0x35f   : > { %v12655_v51 = vcombine.high %v2814_v62, %v2818_v46  ;;  %v12654_v29 = vcombine.low %v2814_v62, %v2818_v46  ;;  %v2356_v62 = vld [vmem:[#allocation8 + $0x1a0] sm:$0xff]  ;;  %v2353_v46 = vld [vmem:[#allocation8 + $0x188] sm:$0xff] }
 0x360   : > { %4465 = vmatpush1.bf16.msra.mxu0 %v12596_v52  ;;  %v2304_v52 = vld [vmem:[#allocation8] sm:$0xff] }
 0x361   : > { %4567 = vmatpush1.bf16.msra.mxu1 %v12598_v21  ;;  %4466 = vmatprep.subr.bf16.mxu0 %v12605_v56  ;;  %v2308_v21 = vld [vmem:[#allocation8 + $0x20] sm:$0xff]  ;;  %v2305_v56 = vld [vmem:[#allocation8 + $0x8] sm:$0xff] }
 0x362   : > { %4568 = vmatprep.subr.bf16.mxu1 %v12607_v34  ;;  %v2309_v34 = vld [vmem:[#allocation8 + $0x28] sm:$0xff]  ;;  %v12661_v39 = vcombine.high %v2304_v52, %v2308_v21  ;;  %v12660_v61 = vcombine.low %v2304_v52, %v2308_v21  ;;  %v2360_v21 = vld [vmem:[#allocation8 + $0x1c0] sm:$0xff] }
 0x363   : > { %v12663_v13 = vcombine.high %v2305_v56, %v2309_v34  ;;  %v12662_v0 = vcombine.low %v2305_v56, %v2309_v34  ;;  %v2364_v56 = vld [vmem:[#allocation8 + $0x1e0] sm:$0xff]  ;;  %v2361_v34 = vld [vmem:[#allocation8 + $0x1c8] sm:$0xff] }
 0x364   : > { %4467 = vmatpush1.bf16.msra.mxu0 %v12604_v32  ;;  %v2312_v32 = vld [vmem:[#allocation8 + $0x40] sm:$0xff] }
 0x365   : > { %4569 = vmatpush1.bf16.msra.mxu1 %v12606_v14  ;;  %4468 = vmatprep.subr.bf16.mxu0 %v12613_v8  ;;  %v2316_v14 = vld [vmem:[#allocation8 + $0x60] sm:$0xff]  ;;  %v2313_v8 = vld [vmem:[#allocation8 + $0x48] sm:$0xff] }
 0x366   : > { %4570 = vmatprep.subr.bf16.mxu1 %v12615_v38  ;;  %v2317_v38 = vld [vmem:[#allocation8 + $0x68] sm:$0xff]  ;;  %v12669_v36 = vcombine.high %v2312_v32, %v2316_v14  ;;  %v12668_v44 = vcombine.low %v2312_v32, %v2316_v14  ;;  %v2368_v14 = vld [vmem:[#allocation8 + $0x200] sm:$0xff] }
 0x367   : > { %v12671_v45 = vcombine.high %v2313_v8, %v2317_v38  ;;  %v12670_v22 = vcombine.low %v2313_v8, %v2317_v38  ;;  %v2372_v8 = vld [vmem:[#allocation8 + $0x220] sm:$0xff]  ;;  %v2369_v38 = vld [vmem:[#allocation8 + $0x208] sm:$0xff] }
 0x368   : > { %4469 = vmatpush1.bf16.msra.mxu0 %v12612_v47  ;;  %v2320_v47 = vld [vmem:[#allocation8 + $0x80] sm:$0xff] }
 0x369   : > { %4571 = vmatpush1.bf16.msra.mxu1 %v12614_v31  ;;  %4470 = vmatprep.subr.bf16.mxu0 %v12621_v7  ;;  %v2324_v31 = vld [vmem:[#allocation8 + $0xa0] sm:$0xff]  ;;  %v2321_v7 = vld [vmem:[#allocation8 + $0x88] sm:$0xff] }
 0x36a   : > { %4572 = vmatprep.subr.bf16.mxu1 %v12623_v58  ;;  %v2325_v58 = vld [vmem:[#allocation8 + $0xa8] sm:$0xff]  ;;  %v12677_v12 = vcombine.high %v2320_v47, %v2324_v31 }
 0x36b   : > { %v12679_v9 = vcombine.high %v2321_v7, %v2325_v58  ;;  %v12678_v30 = vcombine.low %v2321_v7, %v2325_v58  ;;  %v12725_v58 = vcombine.high %v2368_v14, %v2372_v8 }
 0x36c   : > { %4471 = vmatpush1.bf16.msra.mxu0 %v12620_v43  ;;  %v2328_v43 = vld [vmem:[#allocation8 + $0xc0] sm:$0xff] }
 0x36d   : > { %4573 = vmatpush1.bf16.msra.mxu1 %v12622_v11  ;;  %4472 = vmatprep.subr.bf16.mxu0 %v12629_v40  ;;  %v2332_v11 = vld [vmem:[#allocation8 + $0xe0] sm:$0xff]  ;;  %v2329_v40 = vld [vmem:[#allocation8 + $0xc8] sm:$0xff] }
 0x36e   : > { %4574 = vmatprep.subr.bf16.mxu1 %v12631_v10  ;;  %v2333_v10 = vld [vmem:[#allocation8 + $0xe8] sm:$0xff]  ;;  %v12685_v5 = vcombine.high %v2328_v43, %v2332_v11 }
 0x370   : > { %4473 = vmatpush1.bf16.msra.mxu0 %v12628_v33  ;;  %v2337_v33 = vld [vmem:[#allocation8 + $0x108] sm:$0xff] }
 0x371   : > { %4575 = vmatpush1.bf16.msra.mxu1 %v12630_v49  ;;  %4474 = vmatprep.subr.bf16.mxu0 %v12637_v41  ;;  %v2341_v49 = vld [vmem:[#allocation8 + $0x128] sm:$0xff]  ;;  %v12684_v41 = vcombine.low %v2328_v43, %v2332_v11  ;;  %v2380_v43 = vld [vmem:[#allocation8 + $0x260] sm:$0xff] }
 0x372   : > { %4576 = vmatprep.subr.bf16.mxu1 %v12639_v24  ;;  %v12686_v24 = vcombine.low %v2329_v40, %v2333_v10  ;;  %v12695_v50 = vcombine.high %v2337_v33, %v2341_v49 }
 0x374   : > { %4475 = vmatpush1.bf16.msra.mxu0 %v12636_v55  ;;  %v2345_v55 = vld [vmem:[#allocation8 + $0x148] sm:$0xff] }
 0x375   : > { %4577 = vmatpush1.bf16.msra.mxu1 %v12638_v16  ;;  %4476 = vmatprep.subr.bf16.mxu0 %v12645_v6  ;;  %v2349_v16 = vld [vmem:[#allocation8 + $0x168] sm:$0xff]  ;;  %v12694_v6 = vcombine.low %v2337_v33, %v2341_v49  ;;  %v2388_v33 = vld [vmem:[#allocation8 + $0x2a0] sm:$0xff] }
 0x376   : > { %4578 = vmatprep.subr.bf16.mxu1 %v12647_v17  ;;  %v12701_v17 = vcombine.high %v2344_v4, %v2348_v59  ;;  %v12703_v28 = vcombine.high %v2345_v55, %v2349_v16  ;;  %v2385_v49 = vld [vmem:[#allocation8 + $0x288] sm:$0xff] }
 0x378   : > { %4477 = vmatpush1.bf16.msra.mxu0 %v12644_v35  ;;  %v2357_v35 = vld [vmem:[#allocation8 + $0x1a8] sm:$0xff] }
 0x379   : > { %4579 = vmatpush1.bf16.msra.mxu1 %v12646_v42  ;;  %4478 = vmatprep.subr.bf16.mxu0 %v12653_v23  ;;  %v12700_v42 = vcombine.low %v2344_v4, %v2348_v59  ;;  %v12702_v23 = vcombine.low %v2345_v55, %v2349_v16  ;;  %v12711_v52 = vcombine.high %v2353_v46, %v2357_v35  ;;  %v2392_v59 = vld [vmem:[#allocation8 + $0x2c0] sm:$0xff]  ;;  %v2393_v16 = vld [vmem:[#allocation8 + $0x2c8] sm:$0xff] }
 0x37a   : > { %4580 = vmatprep.subr.bf16.mxu1 %v12655_v51  ;;  %v12709_v51 = vcombine.high %v2352_v63, %v2356_v62  ;;  %v2396_v55 = vld [vmem:[#allocation8 + $0x2e0] sm:$0xff] }
 0x37c   : > { %4479 = vmatpush1.bf16.msra.mxu0 %v12652_v18  ;;  %v2365_v18 = vld [vmem:[#allocation8 + $0x1e8] sm:$0xff] }
 0x37d   : > { %4581 = vmatpush1.bf16.msra.mxu1 %v12654_v29  ;;  %5899 = vmatprep.subr.bf16.mxu0 %v12661_v39  ;;  %v12708_v29 = vcombine.low %v2352_v63, %v2356_v62  ;;  %v12710_v39 = vcombine.low %v2353_v46, %v2357_v35  ;;  %v12719_v32 = vcombine.high %v2361_v34, %v2365_v18  ;;  %v2400_v62 = vld [vmem:[#allocation8 + $0x300] sm:$0xff]  ;;  %v2401_v35 = vld [vmem:[#allocation8 + $0x308] sm:$0xff] }
 0x37e   : > { %6001 = vmatprep.subr.bf16.mxu1 %v12663_v13  ;;  %v12717_v13 = vcombine.high %v2360_v21, %v2364_v56  ;;  %v2404_v46 = vld [vmem:[#allocation8 + $0x320] sm:$0xff] }
 0x37f   : > { %4481 = vmatmul.mubr.bf16.vlgmr.msra.gmra.mrb[56].mxu0 %v16111_v54 }
 0x380   : > { %4583 = vmatmul.mubr.bf16.vlgmr.msra.gmra.mrb[52].mxu1 %v16111_v54  ;;  %4490 = vmatprep.mubr.bf16.mxu0 %v16114_v19  ;;  %v12676_v54 = vcombine.low %v2320_v47, %v2324_v31  ;;  %v12718_v47 = vcombine.low %v2361_v34, %v2365_v18  ;;  %v2412_v34 = vld [vmem:[#allocation8 + $0x360] sm:$0xff]  ;;  %v2409_v18 = vld [vmem:[#allocation8 + $0x348] sm:$0xff] }
 0x381   : > { %4592 = vmatprep.mubr.bf16.mxu1 %v16114_v19  ;;  %5900 = vmatpush1.bf16.msra.mxu0 %v12660_v61  ;;  %v12687_v19 = vcombine.high %v2329_v40, %v2333_v10  ;;  %v2373_v61 = vld [vmem:[#allocation8 + $0x228] sm:$0xff] }
 0x382   : > { %6002 = vmatpush1.bf16.msra.mxu1 %v12662_v0  ;;  %5901 = vmatprep.subr.bf16.mxu0 %v12669_v36  ;;  %v2377_v10 = vld [vmem:[#allocation8 + $0x248] sm:$0xff] }
 0x383   : > { %6003 = vmatprep.subr.bf16.mxu1 %v12671_v45  ;;  %v12716_v45 = vcombine.low %v2360_v21, %v2364_v56  ;;  %v2408_v56 = vld [vmem:[#allocation8 + $0x340] sm:$0xff] }
 0x385   : > { %5902 = vmatpush1.bf16.msra.mxu0 %v12668_v44 }
 0x386   : > { %6004 = vmatpush1.bf16.msra.mxu1 %v12670_v22  ;;  %5903 = vmatprep.subr.bf16.mxu0 %v12677_v12  ;;  %v12727_v12 = vcombine.high %v2369_v38, %v2373_v61 }
 0x387   : > { %4491 = vmatmul.mubr.bf16.gmra.mrb[64].mxu0 %v16121_v20  ;;  %6005 = vmatprep.subr.bf16.mxu1 %v12679_v9  ;;  %v2376_v9 = vld [vmem:[#allocation8 + $0x240] sm:$0xff] }
 0x388   : > { %4593 = vmatmul.mubr.bf16.gmra.mrb[60].mxu1 %v16121_v20  ;;  %5931 = vmatprep.mubr.bf16.mxu0 %v16035_v27  ;;  %v12692_v20 = vcombine.low %v2336_v1, %v2340_v3  ;;  %v2384_v3 = vld [vmem:[#allocation8 + $0x280] sm:$0xff] }
 0x389   : > { %5904 = vmatpush1.bf16.msra.mxu0 %v12676_v54  ;;  %6033 = vmatprep.mubr.bf16.mxu1 %v16035_v27  ;;  %v2381_v54 = vld [vmem:[#allocation8 + $0x268] sm:$0xff] }
 0x38a   : > { %6006 = vmatpush1.bf16.msra.mxu1 %v12678_v30  ;;  %5905 = vmatprep.subr.bf16.mxu0 %v12685_v5  ;;  %v12724_v30 = vcombine.low %v2368_v14, %v2372_v8  ;;  %v12726_v5 = vcombine.low %v2369_v38, %v2373_v61  ;;  %v12735_v1 = vcombine.high %v2377_v10, %v2381_v54  ;;  %v2416_v8 = vld [vmem:[#allocation8 + $0x380] sm:$0xff]  ;;  %v2417_v61 = vld [vmem:[#allocation8 + $0x388] sm:$0xff] }
 0x38b   : > { %6007 = vmatprep.subr.bf16.mxu1 %v12687_v19  ;;  %v12733_v19 = vcombine.high %v2376_v9, %v2380_v43  ;;  %v2420_v38 = vld [vmem:[#allocation8 + $0x3a0] sm:$0xff] }
 0x38d   : > { %5906 = vmatpush1.bf16.msra.mxu0 %v12684_v41  ;;  %v2389_v41 = vld [vmem:[#allocation8 + $0x2a8] sm:$0xff] }
 0x38e   : > { %6008 = vmatpush1.bf16.msra.mxu1 %v12686_v24  ;;  %5907 = vmatprep.subr.bf16.mxu0 %v12693_v2  ;;  %v12732_v24 = vcombine.low %v2376_v9, %v2380_v43  ;;  %v12734_v2 = vcombine.low %v2377_v10, %v2381_v54  ;;  %v12743_v4 = vcombine.high %v2385_v49, %v2389_v41  ;;  %v2428_v9 = vld [vmem:[#allocation8 + $0x3e0] sm:$0xff]  ;;  %v2425_v43 = vld [vmem:[#allocation8 + $0x3c8] sm:$0xff] }
 0x38f   : > { %6009 = vmatprep.subr.bf16.mxu1 %v12695_v50  ;;  %v12741_v50 = vcombine.high %v2384_v3, %v2388_v33 }
 0x391   : > { %5908 = vmatpush1.bf16.msra.mxu0 %v12692_v20  ;;  %v2397_v20 = vld [vmem:[#allocation8 + $0x2e8] sm:$0xff] }
 0x392   : > { %6010 = vmatpush1.bf16.msra.mxu1 %v12694_v6  ;;  %5909 = vmatprep.subr.bf16.mxu0 %v12701_v17  ;;  %v12740_v6 = vcombine.low %v2384_v3, %v2388_v33  ;;  %v12742_v17 = vcombine.low %v2385_v49, %v2389_v41  ;;  %v12751_v63 = vcombine.high %v2393_v16, %v2397_v20  ;;  %v2437_v3 = vld [vmem:[#allocation8 + $0x428] sm:$0xff] }
 0x393   : > { %6011 = vmatprep.subr.bf16.mxu1 %v12703_v28  ;;  %v12749_v28 = vcombine.high %v2392_v59, %v2396_v55 }
 0x395   : > { %5910 = vmatpush1.bf16.msra.mxu0 %v12700_v42  ;;  %v2405_v42 = vld [vmem:[#allocation8 + $0x328] sm:$0xff] }
 0x396   : > { %6012 = vmatpush1.bf16.msra.mxu1 %v12702_v23  ;;  %5911 = vmatprep.subr.bf16.mxu0 %v12709_v51  ;;  %v12748_v23 = vcombine.low %v2392_v59, %v2396_v55  ;;  %v12750_v51 = vcombine.low %v2393_v16, %v2397_v20  ;;  %v12759_v21 = vcombine.high %v2401_v35, %v2405_v42  ;;  %v2441_v59 = vld [vmem:[#allocation8 + $0x448] sm:$0xff] }
 0x397   : > { %6013 = vmatprep.subr.bf16.mxu1 %v12711_v52  ;;  %v12757_v52 = vcombine.high %v2400_v62, %v2404_v46  ;;  %v2445_v55 = vld [vmem:[#allocation8 + $0x468] sm:$0xff] }
 0x399   : > { %5912 = vmatpush1.bf16.msra.mxu0 %v12708_v29  ;;  %v16143_v0 = vpop.f32.mrb[48].mxu0  ;;  %v16145_v36 = vpop.f32.mrb[44].mxu1  ;;  %v2413_v29 = vld [vmem:[#allocation8 + $0x368] sm:$0xff] }
 0x39a   : > { %6014 = vmatpush1.bf16.msra.mxu1 %v12710_v39  ;;  %5913 = vmatprep.subr.bf16.mxu0 %v12717_v13  ;;  %v16147_v31 = vpop.f32.mrb[49].mxu0  ;;  %v16149_v7 = vpop.f32.mrb[45].mxu1  ;;  %v12756_v39 = vcombine.low %v2400_v62, %v2404_v46  ;;  %v12758_v13 = vcombine.low %v2401_v35, %v2405_v42  ;;  %v12767_v14 = vcombine.high %v2409_v18, %v2413_v29  ;;  %v2452_v62 = vld [vmem:[#allocation8 + $0x4a0] sm:$0xff]  ;;  %v2449_v46 = vld [vmem:[#allocation8 + $0x488] sm:$0xff] }
 0x39b   : > { %6015 = vmatprep.subr.bf16.mxu1 %v12719_v32  ;;  %v4241_v44 = vpop.f32.mrb[50].mxu0  ;;  %v4343_v22 = vpop.f32.mrb[46].mxu1  ;;  %v12765_v32 = vcombine.high %v2408_v56, %v2412_v34  ;;  %v2453_v35 = vld [vmem:[#allocation8 + $0x4a8] sm:$0xff] }
 0x39c   : > { %v4242_v11 = vpop.f32.mrb[51].mxu0  ;;  %v4344_v40 = vpop.f32.mrb[47].mxu1  ;;  %v12773_v44 = vcombine.high %v2416_v8, %v2420_v38 }
 0x39d   : > { %5914 = vmatpush1.bf16.msra.mxu0 %v12716_v45  ;;  %v2421_v45 = vld [vmem:[#allocation8 + $0x3a8] sm:$0xff]  ;;  %v12772_v40 = vcombine.low %v2416_v8, %v2420_v38  ;;  %v2464_v8 = vld [vmem:[#allocation8 + $0x500] sm:$0xff] }
 0x39e   : > { %6016 = vmatpush1.bf16.msra.mxu1 %v12718_v47  ;;  %5915 = vmatprep.subr.bf16.mxu0 %v12725_v58  ;;  %v12764_v47 = vcombine.low %v2408_v56, %v2412_v34  ;;  %v12766_v58 = vcombine.low %v2409_v18, %v2413_v29  ;;  %v12775_v22 = vcombine.high %v2417_v61, %v2421_v45  ;;  %v2429_v11 = vld [vmem:[#allocation8 + $0x3e8] sm:$0xff]  ;;  %v2460_v56 = vld [vmem:[#allocation8 + $0x4e0] sm:$0xff] }
 0x39f   : > { %6017 = vmatprep.subr.bf16.mxu1 %v12727_v12  ;;  %v2424_v12 = vld [vmem:[#allocation8 + $0x3c0] sm:$0xff]  ;;  %v12774_v10 = vcombine.low %v2417_v61, %v2421_v45  ;;  %v12782_v49 = vcombine.low %v2425_v43, %v2429_v11  ;;  %v2457_v34 = vld [vmem:[#allocation8 + $0x4c8] sm:$0xff] }
 0x3a0   : > { %v12781_v54 = vcombine.high %v2424_v12, %v2428_v9  ;;  %v12780_v33 = vcombine.low %v2424_v12, %v2428_v9  ;;  %v2461_v18 = vld [vmem:[#allocation8 + $0x4e8] sm:$0xff]  ;;  %v2468_v38 = vld [vmem:[#allocation8 + $0x520] sm:$0xff] }
 0x3a1   : > { %5916 = vmatpush1.bf16.msra.mxu0 %v12724_v30  ;;  %v12783_v30 = vcombine.high %v2425_v43, %v2429_v11  ;;  %v2465_v61 = vld [vmem:[#allocation8 + $0x508] sm:$0xff]  ;;  %v2472_v12 = vld [vmem:[#allocation8 + $0x540] sm:$0xff] }
 0x3a2   : > { %6018 = vmatpush1.bf16.msra.mxu1 %v12726_v5  ;;  %5917 = vmatprep.subr.bf16.mxu0 %v12733_v19  ;;  %v2432_v5 = vld [vmem:[#allocation8 + $0x400] sm:$0xff]  ;;  %v2469_v45 = vld [vmem:[#allocation8 + $0x528] sm:$0xff] }
 0x3a3   : > { %6019 = vmatprep.subr.bf16.mxu1 %v12735_v1  ;;  %v2436_v19 = vld [vmem:[#allocation8 + $0x420] sm:$0xff]  ;;  %v2433_v1 = vld [vmem:[#allocation8 + $0x408] sm:$0xff] }
 0x3a4   : > { %v12789_v41 = vcombine.high %v2432_v5, %v2436_v19  ;;  %v12788_v16 = vcombine.low %v2432_v5, %v2436_v19  ;;  %v12790_v20 = vcombine.low %v2433_v1, %v2437_v3  ;;  %v2476_v9 = vld [vmem:[#allocation8 + $0x560] sm:$0xff]  ;;  %v2473_v43 = vld [vmem:[#allocation8 + $0x548] sm:$0xff] }
 0x3a5   : > { %5918 = vmatpush1.bf16.msra.mxu0 %v12732_v24  ;;  %v12791_v24 = vcombine.high %v2433_v1, %v2437_v3  ;;  %v2477_v11 = vld [vmem:[#allocation8 + $0x568] sm:$0xff]  ;;  %v2480_v5 = vld [vmem:[#allocation8 + $0x580] sm:$0xff] }
 0x3a6   : > { %6020 = vmatpush1.bf16.msra.mxu1 %v12734_v2  ;;  %5919 = vmatprep.subr.bf16.mxu0 %v12741_v50  ;;  %v2302_v2 = vld [vmem:[#allocation2 + $0x20] sm:$0x33]  ;;  %v2440_v50 = vld [vmem:[#allocation8 + $0x440] sm:$0xff] }
 0x3a7   : > { %6021 = vmatprep.subr.bf16.mxu1 %v12743_v4  ;;  %v2444_v4 = vld [vmem:[#allocation8 + $0x460] sm:$0xff]  ;;  %v16157_v29 = vcombine.low %v2302_v2, %v2302_v2  ;;  %v2481_v1 = vld [vmem:[#allocation8 + $0x588] sm:$0xff] }
 0x3a8   : > { %v12796_v42 = vcombine.low %v2440_v50, %v2444_v4  ;;  %v2484_v19 = vld [vmem:[#allocation8 + $0x5a0] sm:$0xff]  ;;  %v2485_v3 = vld [vmem:[#allocation8 + $0x5a8] sm:$0xff] }
 0x3a9   : > { %5920 = vmatpush1.bf16.msra.mxu0 %v12740_v6  ;;  %v16151_v6 = vcombine.high %v2302_v2, %v2302_v2  ;;  %v2488_v2 = vld [vmem:[#allocation8 + $0x5c0] sm:$0xff] }
 0x3aa   : > { %6022 = vmatpush1.bf16.msra.mxu1 %v12742_v17  ;;  %5921 = vmatprep.subr.bf16.mxu0 %v12749_v28  ;;  %v12797_v17 = vcombine.high %v2440_v50, %v2444_v4  ;;  %v12799_v28 = vcombine.high %v2441_v59, %v2445_v55  ;;  %v2492_v50 = vld [vmem:[#allocation8 + $0x5e0] sm:$0xff]  ;;  %v2489_v4 = vld [vmem:[#allocation8 + $0x5c8] sm:$0xff] }
 0x3ab   : > { %6023 = vmatprep.subr.bf16.mxu1 %v12751_v63  ;;  %v2448_v63 = vld [vmem:[#allocation8 + $0x480] sm:$0xff] }
 0x3ad   : > { %5922 = vmatpush1.bf16.msra.mxu0 %v12748_v23  ;;  %v12798_v23 = vcombine.low %v2441_v59, %v2445_v55  ;;  %v2493_v59 = vld [vmem:[#allocation8 + $0x5e8] sm:$0xff]  ;;  %v12836_v55 = vcombine.low %v2480_v5, %v2484_v19 }
 0x3ae   : > { %6024 = vmatpush1.bf16.msra.mxu1 %v12750_v51  ;;  %5923 = vmatprep.subr.bf16.mxu0 %v12757_v52  ;;  %v12805_v51 = vcombine.high %v2448_v63, %v2452_v62  ;;  %v12807_v52 = vcombine.high %v2449_v46, %v2453_v35 }
 0x3af   : > { %6025 = vmatprep.subr.bf16.mxu1 %v12759_v21  ;;  %v2456_v21 = vld [vmem:[#allocation8 + $0x4c0] sm:$0xff] }
 0x3b1   : > { %5924 = vmatpush1.bf16.msra.mxu0 %v12756_v39  ;;  %v12804_v39 = vcombine.low %v2448_v63, %v2452_v62  ;;  %v2500_v63 = vld [vmem:[#allocation8 + $0x620] sm:$0xff] }
 0x3b2   : > { %6026 = vmatpush1.bf16.msra.mxu1 %v12758_v13  ;;  %5925 = vmatprep.subr.bf16.mxu0 %v12765_v32  ;;  %v12806_v13 = vcombine.low %v2449_v46, %v2453_v35  ;;  %v12813_v32 = vcombine.high %v2456_v21, %v2460_v56  ;;  %v2497_v35 = vld [vmem:[#allocation8 + $0x608] sm:$0xff] }
 0x3b3   : > { %6027 = vmatprep.subr.bf16.mxu1 %v12767_v14  ;;  %v12815_v14 = vcombine.high %v2457_v34, %v2461_v18 }
 0x3b5   : > { %5926 = vmatpush1.bf16.msra.mxu0 %v12764_v47  ;;  %v12812_v47 = vcombine.low %v2456_v21, %v2460_v56  ;;  %v12844_v56 = vcombine.low %v2488_v2, %v2492_v50 }
 0x3b6   : > { %6028 = vmatpush1.bf16.msra.mxu1 %v12766_v58  ;;  %5927 = vmatprep.subr.bf16.mxu0 %v12773_v44  ;;  %v12814_v58 = vcombine.low %v2457_v34, %v2461_v18  ;;  %v12821_v44 = vcombine.high %v2464_v8, %v2468_v38  ;;  %v12846_v34 = vcombine.low %v2489_v4, %v2493_v59 }
 0x3b7   : > { %6029 = vmatprep.subr.bf16.mxu1 %v12775_v22  ;;  %v12823_v22 = vcombine.high %v2465_v61, %v2469_v45 }
 0x3b9   : > { %5928 = vmatpush1.bf16.msra.mxu0 %v12772_v40  ;;  %v12820_v40 = vcombine.low %v2464_v8, %v2468_v38  ;;  %v2504_v38 = vld [vmem:[#allocation8 + $0x640] sm:$0xff] }
 0x3ba   : > { %6030 = vmatpush1.bf16.msra.mxu1 %v12774_v10  ;;  %5929 = vmatprep.subr.bf16.mxu0 %v12781_v54  ;;  %v12822_v10 = vcombine.low %v2465_v61, %v2469_v45  ;;  %v12829_v54 = vcombine.high %v2472_v12, %v2476_v9  ;;  %v2508_v61 = vld [vmem:[#allocation8 + $0x660] sm:$0xff]  ;;  %v2505_v45 = vld [vmem:[#allocation8 + $0x648] sm:$0xff] }
 0x3bb   : > { %6031 = vmatprep.subr.bf16.mxu1 %v12783_v30  ;;  %v12831_v30 = vcombine.high %v2473_v43, %v2477_v11 }
 0x3bd   : > { %5930 = vmatpush1.bf16.msra.mxu0 %v12780_v33  ;;  %v12828_v33 = vcombine.low %v2472_v12, %v2476_v9  ;;  %v2516_v12 = vld [vmem:[#allocation8 + $0x6a0] sm:$0xff]  ;;  %v2513_v9 = vld [vmem:[#allocation8 + $0x688] sm:$0xff] }
 0x3be   : > { %6032 = vmatpush1.bf16.msra.mxu1 %v12782_v49  ;;  %5950 = vmatprep.subr.bf16.mxu0 %v12789_v41  ;;  %v12830_v49 = vcombine.low %v2473_v43, %v2477_v11  ;;  %v12837_v41 = vcombine.high %v2480_v5, %v2484_v19  ;;  %v2517_v43 = vld [vmem:[#allocation8 + $0x6a8] sm:$0xff]  ;;  %v12860_v11 = vcombine.low %v2504_v38, %v2508_v61  ;;  %v2524_v5 = vld [vmem:[#allocation8 + $0x6e0] sm:$0xff] }
 0x3bf   : > { %6052 = vmatprep.subr.bf16.mxu1 %v12791_v24  ;;  %v12839_v24 = vcombine.high %v2481_v1, %v2485_v3  ;;  %v2521_v19 = vld [vmem:[#allocation8 + $0x6c8] sm:$0xff] }
 0x3c0   : > { %5932 = vmatmul.mubr.bf16.vlgmr.msra.gmra.mrb[44].mxu0 %v16033_v60 }
 0x3c1   : > { %6034 = vmatmul.mubr.bf16.vlgmr.msra.gmra.mrb[40].mxu1 %v16033_v60  ;;  %5941 = vmatprep.mubr.bf16.mxu0 %v16151_v6 }
 0x3c2   : > { %5951 = vmatpush1.bf16.msra.mxu0 %v12788_v16  ;;  %6043 = vmatprep.mubr.bf16.mxu1 %v16151_v6  ;;  %v12838_v16 = vcombine.low %v2481_v1, %v2485_v3  ;;  %v2525_v1 = vld [vmem:[#allocation8 + $0x6e8] sm:$0xff] }
 0x3c3   : > { %6053 = vmatpush1.bf16.msra.mxu1 %v12790_v20  ;;  %5952 = vmatprep.subr.bf16.mxu0 %v12797_v17  ;;  %v12845_v20 = vcombine.high %v2488_v2, %v2492_v50  ;;  %v12847_v17 = vcombine.high %v2489_v4, %v2493_v59  ;;  %v2532_v2 = vld [vmem:[#allocation8 + $0x720] sm:$0xff]  ;;  %v2529_v50 = vld [vmem:[#allocation8 + $0x708] sm:$0xff] }
 0x3c4   : > { %6054 = vmatprep.subr.bf16.mxu1 %v12799_v28  ;;  %v2496_v28 = vld [vmem:[#allocation8 + $0x600] sm:$0xff]  ;;  %v2533_v4 = vld [vmem:[#allocation8 + $0x728] sm:$0xff] }
 0x3c6   : > { %5953 = vmatpush1.bf16.msra.mxu0 %v12796_v42  ;;  %v2501_v42 = vld [vmem:[#allocation8 + $0x628] sm:$0xff] }
 0x3c7   : > { %6055 = vmatpush1.bf16.msra.mxu1 %v12798_v23  ;;  %5954 = vmatprep.subr.bf16.mxu0 %v12805_v51 }
 0x3c8   : > { %5942 = vmatmul.mubr.bf16.gmra.mrb[68].mxu0 %v16157_v29  ;;  %6056 = vmatprep.subr.bf16.mxu1 %v12807_v52 }
 0x3c9   : > { %6044 = vmatmul.mubr.bf16.gmra.mrb[64].mxu1 %v16157_v29  ;;  %5982 = vmatprep.mubr.bf16.mxu0 %v16055_v26 }
 0x3ca   : > { %5955 = vmatpush1.bf16.msra.mxu0 %v12804_v39  ;;  %6084 = vmatprep.mubr.bf16.mxu1 %v16055_v26 }
 0x3cb   : > { %6057 = vmatpush1.bf16.msra.mxu1 %v12806_v13  ;;  %5956 = vmatprep.subr.bf16.mxu0 %v12813_v32 }
 0x3cc   : > { %6058 = vmatprep.subr.bf16.mxu1 %v12815_v14  ;;  %v12853_v14 = vcombine.high %v2496_v28, %v2500_v63 }
 0x3ce   : > { %5957 = vmatpush1.bf16.msra.mxu0 %v12812_v47  ;;  %v2509_v47 = vld [vmem:[#allocation8 + $0x668] sm:$0xff] }
 0x3cf   : > { %6059 = vmatpush1.bf16.msra.mxu1 %v12814_v58  ;;  %5958 = vmatprep.subr.bf16.mxu0 %v12821_v44  ;;  %v12852_v58 = vcombine.low %v2496_v28, %v2500_v63  ;;  %v12861_v44 = vcombine.high %v2504_v38, %v2508_v61  ;;  %v2540_v28 = vld [vmem:[#allocation8 + $0x760] sm:$0xff]  ;;  %v2537_v63 = vld [vmem:[#allocation8 + $0x748] sm:$0xff] }
 0x3d0   : > { %6060 = vmatprep.subr.bf16.mxu1 %v12823_v22  ;;  %v2512_v22 = vld [vmem:[#allocation8 + $0x680] sm:$0xff]  ;;  %v2553_v61 = vld [vmem:[#allocation8 + $0x7c8] sm:$0xff] }
 0x3d1   : > { %v12868_v3 = vcombine.low %v2512_v22, %v2516_v12  ;;  %v2556_v38 = vld [vmem:[#allocation8 + $0x7e0] sm:$0xff] }
 0x3d2   : > { %5959 = vmatpush1.bf16.msra.mxu0 %v12820_v40  ;;  %v12862_v40 = vcombine.low %v2505_v45, %v2509_v47 }
 0x3d3   : > { %6061 = vmatpush1.bf16.msra.mxu1 %v12822_v10  ;;  %5960 = vmatprep.subr.bf16.mxu0 %v12829_v54  ;;  %v12869_v10 = vcombine.high %v2512_v22, %v2516_v12  ;;  %v12871_v54 = vcombine.high %v2513_v9, %v2517_v43  ;;  %v2310_v22 = vld [vmem:[#allocation8 + $0x30] sm:$0xff]  ;;  %v2307_v12 = vld [vmem:[#allocation8 + $0x18] sm:$0xff] }
 0x3d4   : > { %6062 = vmatprep.subr.bf16.mxu1 %v12831_v30  ;;  %v2520_v30 = vld [vmem:[#allocation8 + $0x6c0] sm:$0xff] }
 0x3d5   : > { %v12876_v59 = vcombine.low %v2520_v30, %v2524_v5 }
 0x3d6   : > { %5961 = vmatpush1.bf16.msra.mxu0 %v12828_v33  ;;  %v12870_v33 = vcombine.low %v2513_v9, %v2517_v43  ;;  %v2311_v9 = vld [vmem:[#allocation8 + $0x38] sm:$0xff] }
 0x3d7   : > { %6063 = vmatpush1.bf16.msra.mxu1 %v12830_v49  ;;  %5962 = vmatprep.subr.bf16.mxu0 %v12837_v41  ;;  %v12877_v49 = vcombine.high %v2520_v30, %v2524_v5  ;;  %v12879_v41 = vcombine.high %v2521_v19, %v2525_v1  ;;  %v2314_v30 = vld [vmem:[#allocation8 + $0x50] sm:$0xff] }
 0x3d8   : > { %6064 = vmatprep.subr.bf16.mxu1 %v12839_v24  ;;  %v2528_v24 = vld [vmem:[#allocation8 + $0x700] sm:$0xff]  ;;  %v2318_v5 = vld [vmem:[#allocation8 + $0x70] sm:$0xff] }
 0x3d9   : > { %v4288_v62 = vpop.f32.mrb[52].mxu0  ;;  %v4390_v46 = vpop.f32.mrb[48].mxu1 }
 0x3da   : > { %5963 = vmatpush1.bf16.msra.mxu0 %v12836_v55  ;;  %v16164_v23 = vadd.f32 %v4288_v62, %v16143_v0  ;;  %v16167_v51 = vadd.f32 %v4390_v46, %v16145_v36  ;;  %v4290_v52 = vpop.f32.mrb[53].mxu0  ;;  %v4392_v21 = vpop.f32.mrb[49].mxu1  ;;  %v12855_v36 = vcombine.high %v2497_v35, %v2501_v42  ;;  %v12878_v55 = vcombine.low %v2521_v19, %v2525_v1  ;;  %v2541_v62 = vld [vmem:[#allocation8 + $0x768] sm:$0xff]  ;;  %v2315_v19 = vld [vmem:[#allocation8 + $0x58] sm:$0xff] }
 0x3db   : > { %6065 = vmatpush1.bf16.msra.mxu1 %v12838_v16  ;;  %v16170_v18 = vadd.f32 %v4290_v52, %v16147_v31  ;;  %v16173_v39 = vadd.f32 %v4392_v21, %v16149_v7  ;;  %5964 = vmatprep.subr.bf16.mxu0 %v12845_v20  ;;  %v4292_v13 = vpop.f32.mrb[54].mxu0  ;;  %v4394_v32 = vpop.f32.mrb[50].mxu1  ;;  %v12854_v31 = vcombine.low %v2497_v35, %v2501_v42  ;;  %v2544_v21 = vld [vmem:[#allocation8 + $0x780] sm:$0xff]  ;;  %v2319_v1 = vld [vmem:[#allocation8 + $0x78] sm:$0xff] }
 0x3dc   : > { %6066 = vmatprep.subr.bf16.mxu1 %v12847_v17  ;;  %v4293_v0 = vpop.f32.mrb[55].mxu0  ;;  %v4395_v8 = vpop.f32.mrb[51].mxu1  ;;  %v12863_v7 = vcombine.high %v2505_v45, %v2509_v47  ;;  %v12885_v16 = vcombine.high %v2528_v24, %v2532_v2  ;;  %v12887_v20 = vcombine.high %v2529_v50, %v2533_v4  ;;  %v2536_v17 = vld [vmem:[#allocation8 + $0x740] sm:$0xff]  ;;  %v12884_v46 = vcombine.low %v2528_v24, %v2532_v2  ;;  %v2549_v13 = vld [vmem:[#allocation8 + $0x7a8] sm:$0xff]  ;;  %v2322_v2 = vld [vmem:[#allocation8 + $0x90] sm:$0xff] }
 0x3dd   : > { %v12886_v35 = vcombine.low %v2529_v50, %v2533_v4  ;;  %v12893_v42 = vcombine.high %v2536_v17, %v2540_v28  ;;  %v12895_v52 = vcombine.high %v2537_v63, %v2541_v62  ;;  %v12892_v32 = vcombine.low %v2536_v17, %v2540_v28  ;;  %v2557_v45 = vld [vmem:[#allocation8 + $0x7e8] sm:$0xff]  ;;  %v2326_v50 = vld [vmem:[#allocation8 + $0xb0] sm:$0xff]  ;;  %v2323_v4 = vld [vmem:[#allocation8 + $0x98] sm:$0xff] }
 0x3de   : > { %5965 = vmatpush1.bf16.msra.mxu0 %v12844_v56  ;;  %v2548_v56 = vld [vmem:[#allocation8 + $0x7a0] sm:$0xff]  ;;  %v12675_v24 = vcombine.high %v2315_v19, %v2319_v1  ;;  %v2330_v28 = vld [vmem:[#allocation8 + $0xd0] sm:$0xff] }
 0x3df   : > { %6067 = vmatpush1.bf16.msra.mxu1 %v12846_v34  ;;  %5966 = vmatprep.subr.bf16.mxu0 %v12853_v14  ;;  %v2545_v34 = vld [vmem:[#allocation8 + $0x788] sm:$0xff]  ;;  %v12894_v14 = vcombine.low %v2537_v63, %v2541_v62  ;;  %v12901_v0 = vcombine.high %v2544_v21, %v2548_v56  ;;  %v12900_v47 = vcombine.low %v2544_v21, %v2548_v56  ;;  %v2334_v63 = vld [vmem:[#allocation8 + $0xf0] sm:$0xff]  ;;  %v2331_v62 = vld [vmem:[#allocation8 + $0xd8] sm:$0xff] }
 0x3e0   : > { %6068 = vmatprep.subr.bf16.mxu1 %v12855_v36  ;;  %v12903_v8 = vcombine.high %v2545_v34, %v2549_v13  ;;  %v2552_v36 = vld [vmem:[#allocation8 + $0x7c0] sm:$0xff]  ;;  %v12689_v21 = vcombine.high %v2330_v28, %v2334_v63 }
 0x3e1   : > { %v12908_v43 = vcombine.low %v2552_v36, %v2556_v38 }
 0x3e2   : > { %5967 = vmatpush1.bf16.msra.mxu0 %v12852_v58  ;;  %v12902_v58 = vcombine.low %v2545_v34, %v2549_v13  ;;  %v2338_v34 = vld [vmem:[#allocation8 + $0x110] sm:$0xff] }
 0x3e3   : > { %6069 = vmatpush1.bf16.msra.mxu1 %v12854_v31  ;;  %5968 = vmatprep.subr.bf16.mxu0 %v12861_v44  ;;  %v12909_v31 = vcombine.high %v2552_v36, %v2556_v38  ;;  %v12911_v44 = vcombine.high %v2553_v61, %v2557_v45  ;;  %v2342_v13 = vld [vmem:[#allocation8 + $0x130] sm:$0xff] }
 0x3e4   : > { %6070 = vmatprep.subr.bf16.mxu1 %v12863_v7  ;;  %v2306_v7 = vld [vmem:[#allocation8 + $0x10] sm:$0xff]  ;;  %v12697_v36 = vcombine.high %v2338_v34, %v2342_v13 }
 0x3e6   : > { %5969 = vmatpush1.bf16.msra.mxu0 %v12860_v11  ;;  %v12910_v11 = vcombine.low %v2553_v61, %v2557_v45  ;;  %v2346_v61 = vld [vmem:[#allocation8 + $0x150] sm:$0xff] }
 0x3e7   : > { %6071 = vmatpush1.bf16.msra.mxu1 %v12862_v40  ;;  %5970 = vmatprep.subr.bf16.mxu0 %v12869_v10  ;;  %v12665_v40 = vcombine.high %v2306_v7, %v2310_v22  ;;  %v12667_v10 = vcombine.high %v2307_v12, %v2311_v9  ;;  %v2350_v45 = vld [vmem:[#allocation8 + $0x170] sm:$0xff] }
 0x3e8   : > { %6072 = vmatprep.subr.bf16.mxu1 %v12871_v54  ;;  %v2303_v54 = vld [vmem:[#allocation2 + $0x28] sm:$0x33] }
 0x3ea   : > { %5971 = vmatpush1.bf16.msra.mxu0 %v12868_v3  ;;  %v12664_v3 = vcombine.low %v2306_v7, %v2310_v22  ;;  %v12705_v7 = vcombine.high %v2346_v61, %v2350_v45 }
 0x3eb   : > { %6073 = vmatpush1.bf16.msra.mxu1 %v12870_v33  ;;  %5972 = vmatprep.subr.bf16.mxu0 %v12877_v49  ;;  %v12666_v33 = vcombine.low %v2307_v12, %v2311_v9  ;;  %v16175_v49 = vcombine.high %v2303_v54, %v2303_v54  ;;  %v2358_v12 = vld [vmem:[#allocation8 + $0x1b0] sm:$0xff]  ;;  %v2355_v9 = vld [vmem:[#allocation8 + $0x198] sm:$0xff] }
 0x3ec   : > { %6074 = vmatprep.subr.bf16.mxu1 %v12879_v41  ;;  %v12673_v41 = vcombine.high %v2314_v30, %v2318_v5 }
 0x3ee   : > { %5973 = vmatpush1.bf16.msra.mxu0 %v12876_v59  ;;  %v2327_v59 = vld [vmem:[#allocation8 + $0xb8] sm:$0xff] }
 0x3ef   : > { %6075 = vmatpush1.bf16.msra.mxu1 %v12878_v55  ;;  %5974 = vmatprep.subr.bf16.mxu0 %v12885_v16  ;;  %v12672_v55 = vcombine.low %v2314_v30, %v2318_v5  ;;  %v12674_v16 = vcombine.low %v2315_v19, %v2319_v1  ;;  %v12683_v17 = vcombine.high %v2323_v4, %v2327_v59  ;;  %v2362_v30 = vld [vmem:[#allocation8 + $0x1d0] sm:$0xff]  ;;  %v2363_v19 = vld [vmem:[#allocation8 + $0x1d8] sm:$0xff] }
 0x3f0   : > { %6076 = vmatprep.subr.bf16.mxu1 %v12887_v20  ;;  %v12681_v20 = vcombine.high %v2322_v2, %v2326_v50  ;;  %v2366_v5 = vld [vmem:[#allocation8 + $0x1f0] sm:$0xff]  ;;  %v2367_v1 = vld [vmem:[#allocation8 + $0x1f8] sm:$0xff] }
 0x3f2   : > { %5975 = vmatpush1.bf16.msra.mxu0 %v12884_v46  ;;  %v2335_v46 = vld [vmem:[#allocation8 + $0xf8] sm:$0xff] }
 0x3f3   : > { %6077 = vmatpush1.bf16.msra.mxu1 %v12886_v35  ;;  %5976 = vmatprep.subr.bf16.mxu0 %v12893_v42  ;;  %v16181_v35 = vcombine.low %v2303_v54, %v2303_v54  ;;  %v12680_v42 = vcombine.low %v2322_v2, %v2326_v50  ;;  %v12691_v56 = vcombine.high %v2331_v62, %v2335_v46  ;;  %v2370_v2 = vld [vmem:[#allocation8 + $0x210] sm:$0xff] }
 0x3f4   : > { %6078 = vmatprep.subr.bf16.mxu1 %v12895_v52  ;;  %v12682_v52 = vcombine.low %v2323_v4, %v2327_v59  ;;  %v2374_v50 = vld [vmem:[#allocation8 + $0x230] sm:$0xff] }
 0x3f6   : > { %5977 = vmatpush1.bf16.msra.mxu0 %v12892_v32  ;;  %v2339_v32 = vld [vmem:[#allocation8 + $0x118] sm:$0xff] }
 0x3f7   : > { %6079 = vmatpush1.bf16.msra.mxu1 %v12894_v14  ;;  %5978 = vmatprep.subr.bf16.mxu0 %v12901_v0  ;;  %v2343_v14 = vld [vmem:[#allocation8 + $0x138] sm:$0xff]  ;;  %v12688_v0 = vcombine.low %v2330_v28, %v2334_v63  ;;  %v12720_v28 = vcombine.low %v2362_v30, %v2366_v5  ;;  %v12722_v63 = vcombine.low %v2363_v19, %v2367_v1 }
 0x3f8   : > { %6080 = vmatprep.subr.bf16.mxu1 %v12903_v8  ;;  %v12690_v8 = vcombine.low %v2331_v62, %v2335_v46  ;;  %v12699_v38 = vcombine.high %v2339_v32, %v2343_v14 }
 0x3fa   : > { %5979 = vmatpush1.bf16.msra.mxu0 %v12900_v47  ;;  %v2347_v47 = vld [vmem:[#allocation8 + $0x158] sm:$0xff] }
 0x3fb   : > { %6081 = vmatpush1.bf16.msra.mxu1 %v12902_v58  ;;  %5980 = vmatprep.subr.bf16.mxu0 %v12909_v31  ;;  %v2351_v58 = vld [vmem:[#allocation8 + $0x178] sm:$0xff]  ;;  %v12696_v31 = vcombine.low %v2338_v34, %v2342_v13  ;;  %v2378_v34 = vld [vmem:[#allocation8 + $0x250] sm:$0xff] }
 0x3fc   : > { %6082 = vmatprep.subr.bf16.mxu1 %v12911_v44  ;;  %v12698_v44 = vcombine.low %v2339_v32, %v2343_v14  ;;  %v12707_v22 = vcombine.high %v2347_v47, %v2351_v58  ;;  %v2382_v13 = vld [vmem:[#allocation8 + $0x270] sm:$0xff]  ;;  %v2379_v32 = vld [vmem:[#allocation8 + $0x258] sm:$0xff] }
 0x3fd   : > { %v2383_v14 = vld [vmem:[#allocation8 + $0x278] sm:$0xff] }
 0x3fe   : > { %5981 = vmatpush1.bf16.msra.mxu0 %v12908_v43  ;;  %v2359_v43 = vld [vmem:[#allocation8 + $0x1b8] sm:$0xff] }
 0x3ff   : > { %6083 = vmatpush1.bf16.msra.mxu1 %v12910_v11  ;;  %6103 = vmatprep.subr.bf16.mxu0 %v12665_v40  ;;  %v12704_v11 = vcombine.low %v2346_v61, %v2350_v45  ;;  %v12706_v40 = vcombine.low %v2347_v47, %v2351_v58  ;;  %v12715_v54 = vcombine.high %v2355_v9, %v2359_v43  ;;  %v2386_v61 = vld [vmem:[#allocation8 + $0x290] sm:$0xff]  ;;  %v2387_v47 = vld [vmem:[#allocation8 + $0x298] sm:$0xff] }
 0x400   : > { %6205 = vmatprep.subr.bf16.mxu1 %v12667_v10  ;;  %v2390_v45 = vld [vmem:[#allocation8 + $0x2b0] sm:$0xff]  ;;  %v2391_v58 = vld [vmem:[#allocation8 + $0x2b8] sm:$0xff] }
 0x401   : > { %5983 = vmatmul.mubr.bf16.vlgmr.msra.gmra.mrb[44].mxu0 %v16100_v25 }
 0x402   : > { %6085 = vmatmul.mubr.bf16.vlgmr.msra.gmra.mrb[40].mxu1 %v16100_v25  ;;  %5992 = vmatprep.mubr.bf16.mxu0 %v16175_v49 }
 0x403   : > { %6094 = vmatprep.mubr.bf16.mxu1 %v16175_v49  ;;  %6104 = vmatpush1.bf16.msra.mxu0 %v12664_v3 }
 0x404   : > { %6206 = vmatpush1.bf16.msra.mxu1 %v12666_v33  ;;  %6105 = vmatprep.subr.bf16.mxu0 %v12673_v41  ;;  %v12714_v33 = vcombine.low %v2355_v9, %v2359_v43  ;;  %v12721_v41 = vcombine.high %v2362_v30, %v2366_v5  ;;  %v2395_v9 = vld [vmem:[#allocation8 + $0x2d8] sm:$0xff]  ;;  %v2402_v30 = vld [vmem:[#allocation8 + $0x310] sm:$0xff] }
 0x405   : > { %6207 = vmatprep.subr.bf16.mxu1 %v12675_v24  ;;  %v12723_v24 = vcombine.high %v2363_v19, %v2367_v1  ;;  %v2399_v43 = vld [vmem:[#allocation8 + $0x2f8] sm:$0xff]  ;;  %v2406_v5 = vld [vmem:[#allocation8 + $0x330] sm:$0xff] }
 0x406   : > { %v2403_v19 = vld [vmem:[#allocation8 + $0x318] sm:$0xff] }
 0x407   : > { %6106 = vmatpush1.bf16.msra.mxu0 %v12672_v55  ;;  %v2371_v55 = vld [vmem:[#allocation8 + $0x218] sm:$0xff] }
 0x408   : > { %6208 = vmatpush1.bf16.msra.mxu1 %v12674_v16  ;;  %6107 = vmatprep.subr.bf16.mxu0 %v12681_v20  ;;  %v2375_v16 = vld [vmem:[#allocation8 + $0x238] sm:$0xff] }
 0x409   : > { %5993 = vmatmul.mubr.bf16.gmra.mrb[72].mxu0 %v16181_v35  ;;  %6209 = vmatprep.subr.bf16.mxu1 %v12683_v17  ;;  %v2407_v1 = vld [vmem:[#allocation8 + $0x338] sm:$0xff] }
 0x40a   : > { %6095 = vmatmul.mubr.bf16.gmra.mrb[68].mxu1 %v16181_v35  ;;  %6135 = vmatprep.mubr.bf16.mxu0 %v16035_v27 }
 0x40b   : > { %6108 = vmatpush1.bf16.msra.mxu0 %v12680_v42  ;;  %6237 = vmatprep.mubr.bf16.mxu1 %v16035_v27  ;;  %v2354_v27 = vld [vmem:[#allocation8 + $0x190] sm:$0xff]  ;;  %v12729_v42 = vcombine.high %v2370_v2, %v2374_v50 }
 0x40c   : > { %6210 = vmatpush1.bf16.msra.mxu1 %v12682_v52  ;;  %6109 = vmatprep.subr.bf16.mxu0 %v12689_v21  ;;  %v12713_v10 = vcombine.high %v2354_v27, %v2358_v12  ;;  %v12712_v3 = vcombine.low %v2354_v27, %v2358_v12  ;;  %v2394_v27 = vld [vmem:[#allocation8 + $0x2d0] sm:$0xff] }
 0x40d   : > { %6211 = vmatprep.subr.bf16.mxu1 %v12691_v56  ;;  %v12731_v56 = vcombine.high %v2371_v55, %v2375_v16  ;;  %v2398_v12 = vld [vmem:[#allocation8 + $0x2f0] sm:$0xff] }
 0x40f   : > { %6110 = vmatpush1.bf16.msra.mxu0 %v12688_v0  ;;  %v12728_v0 = vcombine.low %v2370_v2, %v2374_v50  ;;  %v2410_v2 = vld [vmem:[#allocation8 + $0x350] sm:$0xff] }
 0x410   : > { %6212 = vmatpush1.bf16.msra.mxu1 %v12690_v8  ;;  %6111 = vmatprep.subr.bf16.mxu0 %v12697_v36  ;;  %v12730_v8 = vcombine.low %v2371_v55, %v2375_v16  ;;  %v12737_v36 = vcombine.high %v2378_v34, %v2382_v13  ;;  %v2414_v50 = vld [vmem:[#allocation8 + $0x370] sm:$0xff]  ;;  %v2411_v55 = vld [vmem:[#allocation8 + $0x358] sm:$0xff] }
 0x411   : > { %6213 = vmatprep.subr.bf16.mxu1 %v12699_v38  ;;  %v12739_v38 = vcombine.high %v2379_v32, %v2383_v14  ;;  %v2415_v16 = vld [vmem:[#allocation8 + $0x378] sm:$0xff] }
 0x413   : > { %6112 = vmatpush1.bf16.msra.mxu0 %v12696_v31  ;;  %v12736_v31 = vcombine.low %v2378_v34, %v2382_v13  ;;  %v12768_v34 = vcombine.low %v2410_v2, %v2414_v50  ;;  %v12770_v13 = vcombine.low %v2411_v55, %v2415_v16 }
 0x414   : > { %6214 = vmatpush1.bf16.msra.mxu1 %v12698_v44  ;;  %6113 = vmatprep.subr.bf16.mxu0 %v12705_v7  ;;  %v12738_v44 = vcombine.low %v2379_v32, %v2383_v14  ;;  %v12745_v7 = vcombine.high %v2386_v61, %v2390_v45 }
 0x415   : > { %6215 = vmatprep.subr.bf16.mxu1 %v12707_v22  ;;  %v12747_v22 = vcombine.high %v2387_v47, %v2391_v58 }
 0x417   : > { %6114 = vmatpush1.bf16.msra.mxu0 %v12704_v11  ;;  %v12744_v11 = vcombine.low %v2386_v61, %v2390_v45 }
 0x418   : > { %6216 = vmatpush1.bf16.msra.mxu1 %v12706_v40  ;;  %6115 = vmatprep.subr.bf16.mxu0 %v12713_v10  ;;  %v12746_v40 = vcombine.low %v2387_v47, %v2391_v58  ;;  %v12753_v10 = vcombine.high %v2394_v27, %v2398_v12 }
 0x419   : > { %6217 = vmatprep.subr.bf16.mxu1 %v12715_v54  ;;  %v12755_v54 = vcombine.high %v2395_v9, %v2399_v43 }
 0x41a   : > { %v16187_v4 = vpop.f32.mrb[60].mxu0  ;;  %v16189_v59 = vpop.f32.mrb[56].mxu1 }
 0x41b   : > { %6116 = vmatpush1.bf16.msra.mxu0 %v12712_v3  ;;  %v16191_v20 = vpop.f32.mrb[61].mxu0  ;;  %v16193_v17 = vpop.f32.mrb[57].mxu1  ;;  %v12752_v3 = vcombine.low %v2394_v27, %v2398_v12 }
 0x41c   : > { %6218 = vmatpush1.bf16.msra.mxu1 %v12714_v33  ;;  %6117 = vmatprep.subr.bf16.mxu0 %v12721_v41  ;;  %v4445_v62 = vpop.f32.mrb[62].mxu0  ;;  %v4547_v46 = vpop.f32.mrb[58].mxu1  ;;  %v12754_v33 = vcombine.low %v2395_v9, %v2399_v43  ;;  %v12761_v41 = vcombine.high %v2402_v30, %v2406_v5 }
 0x41d   : > { %6219 = vmatprep.subr.bf16.mxu1 %v12723_v24  ;;  %v4446_v52 = vpop.f32.mrb[63].mxu0  ;;  %v4548_v21 = vpop.f32.mrb[59].mxu1  ;;  %v12763_v24 = vcombine.high %v2403_v19, %v2407_v1  ;;  %v12769_v62 = vcombine.high %v2410_v2, %v2414_v50  ;;  %v12771_v46 = vcombine.high %v2411_v55, %v2415_v16 }
 0x41e   : > { %v2422_v52 = vld [vmem:[#allocation8 + $0x3b0] sm:$0xff]  ;;  %v2419_v21 = vld [vmem:[#allocation8 + $0x398] sm:$0xff] }
 0x41f   : > { %6118 = vmatpush1.bf16.msra.mxu0 %v12720_v28  ;;  %v12760_v28 = vcombine.low %v2402_v30, %v2406_v5 }
 0x420   : > { %6220 = vmatpush1.bf16.msra.mxu1 %v12722_v63  ;;  %6119 = vmatprep.subr.bf16.mxu0 %v12729_v42  ;;  %v12762_v63 = vcombine.low %v2403_v19, %v2407_v1  ;;  %v2418_v42 = vld [vmem:[#allocation8 + $0x390] sm:$0xff] }
 0x421   : > { %6221 = vmatprep.subr.bf16.mxu1 %v12731_v56  ;;  %v2423_v56 = vld [vmem:[#allocation8 + $0x3b8] sm:$0xff]  ;;  %v12777_v32 = vcombine.high %v2418_v42, %v2422_v52  ;;  %v12776_v61 = vcombine.low %v2418_v42, %v2422_v52 }
 0x422   : > { %v12779_v14 = vcombine.high %v2419_v21, %v2423_v56  ;;  %v12778_v45 = vcombine.low %v2419_v21, %v2423_v56  ;;  %v2466_v21 = vld [vmem:[#allocation8 + $0x510] sm:$0xff] }
 0x423   : > { %6120 = vmatpush1.bf16.msra.mxu0 %v12728_v0  ;;  %v2426_v0 = vld [vmem:[#allocation8 + $0x3d0] sm:$0xff] }
 0x424   : > { %6222 = vmatpush1.bf16.msra.mxu1 %v12730_v8  ;;  %6121 = vmatprep.subr.bf16.mxu0 %v12737_v36  ;;  %v2430_v8 = vld [vmem:[#allocation8 + $0x3f0] sm:$0xff]  ;;  %v2427_v36 = vld [vmem:[#allocation8 + $0x3d8] sm:$0xff] }
 0x425   : > { %6223 = vmatprep.subr.bf16.mxu1 %v12739_v38  ;;  %v2431_v38 = vld [vmem:[#allocation8 + $0x3f8] sm:$0xff]  ;;  %v12785_v47 = vcombine.high %v2426_v0, %v2430_v8  ;;  %v12784_v27 = vcombine.low %v2426_v0, %v2430_v8  ;;  %v2470_v56 = vld [vmem:[#allocation8 + $0x530] sm:$0xff] }
 0x426   : > { %v12787_v58 = vcombine.high %v2427_v36, %v2431_v38  ;;  %v12786_v12 = vcombine.low %v2427_v36, %v2431_v38  ;;  %v12825_v0 = vcombine.high %v2466_v21, %v2470_v56  ;;  %v2474_v36 = vld [vmem:[#allocation8 + $0x550] sm:$0xff] }
 0x427   : > { %6122 = vmatpush1.bf16.msra.mxu0 %v12736_v31  ;;  %v2434_v31 = vld [vmem:[#allocation8 + $0x410] sm:$0xff] }
 0x428   : > { %6224 = vmatpush1.bf16.msra.mxu1 %v12738_v44  ;;  %6123 = vmatprep.subr.bf16.mxu0 %v12745_v7  ;;  %v2438_v44 = vld [vmem:[#allocation8 + $0x430] sm:$0xff]  ;;  %v2435_v7 = vld [vmem:[#allocation8 + $0x418] sm:$0xff] }
 0x429   : > { %6225 = vmatprep.subr.bf16.mxu1 %v12747_v22  ;;  %v2439_v22 = vld [vmem:[#allocation8 + $0x438] sm:$0xff]  ;;  %v12793_v9 = vcombine.high %v2434_v31, %v2438_v44  ;;  %v12792_v30 = vcombine.low %v2434_v31, %v2438_v44  ;;  %v2478_v38 = vld [vmem:[#allocation8 + $0x570] sm:$0xff] }
 0x42a   : > { %v12795_v43 = vcombine.high %v2435_v7, %v2439_v22  ;;  %v12794_v5 = vcombine.low %v2435_v7, %v2439_v22  ;;  %v2486_v44 = vld [vmem:[#allocation8 + $0x5b0] sm:$0xff]  ;;  %v2483_v7 = vld [vmem:[#allocation8 + $0x598] sm:$0xff] }
 0x42b   : > { %6124 = vmatpush1.bf16.msra.mxu0 %v12744_v11  ;;  %v2442_v11 = vld [vmem:[#allocation8 + $0x450] sm:$0xff]  ;;  %v2487_v22 = vld [vmem:[#allocation8 + $0x5b8] sm:$0xff] }
 0x42c   : > { %6226 = vmatpush1.bf16.msra.mxu1 %v12746_v40  ;;  %6125 = vmatprep.subr.bf16.mxu0 %v12753_v10  ;;  %v2446_v40 = vld [vmem:[#allocation8 + $0x470] sm:$0xff]  ;;  %v2443_v10 = vld [vmem:[#allocation8 + $0x458] sm:$0xff] }
 0x42d   : > { %6227 = vmatprep.subr.bf16.mxu1 %v12755_v54  ;;  %v2447_v54 = vld [vmem:[#allocation8 + $0x478] sm:$0xff]  ;;  %v12801_v19 = vcombine.high %v2442_v11, %v2446_v40  ;;  %v12800_v2 = vcombine.low %v2442_v11, %v2446_v40  ;;  %v2490_v11 = vld [vmem:[#allocation8 + $0x5d0] sm:$0xff] }
 0x42e   : > { %v12803_v1 = vcombine.high %v2443_v10, %v2447_v54  ;;  %v12802_v50 = vcombine.low %v2443_v10, %v2447_v54  ;;  %v2494_v40 = vld [vmem:[#allocation8 + $0x5f0] sm:$0xff]  ;;  %v2491_v10 = vld [vmem:[#allocation8 + $0x5d8] sm:$0xff] }
 0x42f   : > { %6126 = vmatpush1.bf16.msra.mxu0 %v12752_v3  ;;  %v2450_v3 = vld [vmem:[#allocation8 + $0x490] sm:$0xff]  ;;  %v2495_v54 = vld [vmem:[#allocation8 + $0x5f8] sm:$0xff] }
 0x430   : > { %6228 = vmatpush1.bf16.msra.mxu1 %v12754_v33  ;;  %6127 = vmatprep.subr.bf16.mxu0 %v12761_v41  ;;  %v2454_v33 = vld [vmem:[#allocation8 + $0x4b0] sm:$0xff]  ;;  %v2451_v41 = vld [vmem:[#allocation8 + $0x498] sm:$0xff] }
 0x431   : > { %6229 = vmatprep.subr.bf16.mxu1 %v12763_v24  ;;  %v2455_v24 = vld [vmem:[#allocation8 + $0x4b8] sm:$0xff]  ;;  %v12809_v55 = vcombine.high %v2450_v3, %v2454_v33 }
 0x432   : > { %v12811_v16 = vcombine.high %v2451_v41, %v2455_v24  ;;  %v12810_v42 = vcombine.low %v2451_v41, %v2455_v24  ;;  %v2502_v41 = vld [vmem:[#allocation8 + $0x630] sm:$0xff] }
 0x433   : > { %6128 = vmatpush1.bf16.msra.mxu0 %v12760_v28  ;;  %v2458_v28 = vld [vmem:[#allocation8 + $0x4d0] sm:$0xff] }
 0x434   : > { %6230 = vmatpush1.bf16.msra.mxu1 %v12762_v63  ;;  %6129 = vmatprep.subr.bf16.mxu0 %v12769_v62  ;;  %v2462_v63 = vld [vmem:[#allocation8 + $0x4f0] sm:$0xff]  ;;  %v2459_v62 = vld [vmem:[#allocation8 + $0x4d8] sm:$0xff] }
 0x435   : > { %6231 = vmatprep.subr.bf16.mxu1 %v12771_v46  ;;  %v2463_v46 = vld [vmem:[#allocation8 + $0x4f8] sm:$0xff]  ;;  %v12817_v52 = vcombine.high %v2458_v28, %v2462_v63 }
 0x437   : > { %6130 = vmatpush1.bf16.msra.mxu0 %v12768_v34  ;;  %v2467_v34 = vld [vmem:[#allocation8 + $0x518] sm:$0xff] }
 0x438   : > { %6232 = vmatpush1.bf16.msra.mxu1 %v12770_v13  ;;  %6131 = vmatprep.subr.bf16.mxu0 %v12777_v32  ;;  %v2471_v13 = vld [vmem:[#allocation8 + $0x538] sm:$0xff]  ;;  %v12816_v32 = vcombine.low %v2458_v28, %v2462_v63 }
 0x439   : > { %6233 = vmatprep.subr.bf16.mxu1 %v12779_v14  ;;  %v12818_v14 = vcombine.low %v2459_v62, %v2463_v46  ;;  %v12827_v8 = vcombine.high %v2467_v34, %v2471_v13 }
 0x43b   : > { %6132 = vmatpush1.bf16.msra.mxu0 %v12776_v61  ;;  %v2475_v61 = vld [vmem:[#allocation8 + $0x558] sm:$0xff] }
 0x43c   : > { %6234 = vmatpush1.bf16.msra.mxu1 %v12778_v45  ;;  %6133 = vmatprep.subr.bf16.mxu0 %v12785_v47  ;;  %v2479_v45 = vld [vmem:[#allocation8 + $0x578] sm:$0xff]  ;;  %v12826_v47 = vcombine.low %v2467_v34, %v2471_v13  ;;  %v2510_v13 = vld [vmem:[#allocation8 + $0x670] sm:$0xff] }
 0x43d   : > { %6235 = vmatprep.subr.bf16.mxu1 %v12787_v58  ;;  %v12833_v58 = vcombine.high %v2474_v36, %v2478_v38  ;;  %v12835_v31 = vcombine.high %v2475_v61, %v2479_v45 }
 0x43f   : > { %6134 = vmatpush1.bf16.msra.mxu0 %v12784_v27  ;;  %v12832_v27 = vcombine.low %v2474_v36, %v2478_v38  ;;  %v2514_v36 = vld [vmem:[#allocation8 + $0x690] sm:$0xff] }
 0x440   : > { %6236 = vmatpush1.bf16.msra.mxu1 %v12786_v12  ;;  %6154 = vmatprep.subr.bf16.mxu0 %v12793_v9  ;;  %v12834_v12 = vcombine.low %v2475_v61, %v2479_v45  ;;  %v2518_v38 = vld [vmem:[#allocation8 + $0x6b0] sm:$0xff]  ;;  %v2515_v61 = vld [vmem:[#allocation8 + $0x698] sm:$0xff] }
 0x441   : > { %6256 = vmatprep.subr.bf16.mxu1 %v12795_v43  ;;  %v12843_v43 = vcombine.high %v2483_v7, %v2487_v22  ;;  %v2519_v45 = vld [vmem:[#allocation8 + $0x6b8] sm:$0xff] }
 0x442   : > { %6136 = vmatmul.mubr.bf16.vlgmr.msra.gmra.mrb[56].mxu0 %v16033_v60 }
 0x443   : > { %6238 = vmatmul.mubr.bf16.vlgmr.msra.gmra.mrb[52].mxu1 %v16033_v60  ;;  %6145 = vmatprep.mubr.bf16.mxu0 %v16151_v6  ;;  %v12808_v60 = vcombine.low %v2450_v3, %v2454_v33  ;;  %v12851_v3 = vcombine.high %v2491_v10, %v2495_v54  ;;  %v2498_v33 = vld [vmem:[#allocation8 + $0x610] sm:$0xff] }
 0x444   : > { %6155 = vmatpush1.bf16.msra.mxu0 %v12792_v30  ;;  %6247 = vmatprep.mubr.bf16.mxu1 %v16151_v6  ;;  %v12819_v6 = vcombine.high %v2459_v62, %v2463_v46  ;;  %v12848_v46 = vcombine.low %v2490_v11, %v2494_v40 }
 0x445   : > { %6257 = vmatpush1.bf16.msra.mxu1 %v12794_v5  ;;  %6156 = vmatprep.subr.bf16.mxu0 %v12801_v19  ;;  %v12842_v5 = vcombine.low %v2483_v7, %v2487_v22  ;;  %v12849_v19 = vcombine.high %v2490_v11, %v2494_v40  ;;  %v2523_v7 = vld [vmem:[#allocation8 + $0x6d8] sm:$0xff]  ;;  %v2530_v11 = vld [vmem:[#allocation8 + $0x710] sm:$0xff] }
 0x446   : > { %6258 = vmatprep.subr.bf16.mxu1 %v12803_v1  ;;  %v2527_v22 = vld [vmem:[#allocation8 + $0x6f8] sm:$0xff]  ;;  %v2534_v40 = vld [vmem:[#allocation8 + $0x730] sm:$0xff] }
 0x448   : > { %6157 = vmatpush1.bf16.msra.mxu0 %v12800_v2 }
 0x449   : > { %6259 = vmatpush1.bf16.msra.mxu1 %v12802_v50  ;;  %6158 = vmatprep.subr.bf16.mxu0 %v12809_v55  ;;  %v2499_v55 = vld [vmem:[#allocation8 + $0x618] sm:$0xff] }
 0x44a   : > { %6146 = vmatmul.mubr.bf16.gmra.mrb[76].mxu0 %v16157_v29  ;;  %6260 = vmatprep.subr.bf16.mxu1 %v12811_v16  ;;  %v2503_v16 = vld [vmem:[#allocation8 + $0x638] sm:$0xff] }
 0x44b   : > { %6248 = vmatmul.mubr.bf16.gmra.mrb[72].mxu1 %v16157_v29  ;;  %6186 = vmatprep.mubr.bf16.mxu0 %v16055_v26  ;;  %v12824_v29 = vcombine.low %v2466_v21, %v2470_v56  ;;  %v12857_v21 = vcombine.high %v2498_v33, %v2502_v41  ;;  %v12859_v34 = vcombine.high %v2499_v55, %v2503_v16 }
 0x44c   : > { %6159 = vmatpush1.bf16.msra.mxu0 %v12808_v60  ;;  %6288 = vmatprep.mubr.bf16.mxu1 %v16055_v26  ;;  %v2482_v26 = vld [vmem:[#allocation8 + $0x590] sm:$0xff] }
 0x44d   : > { %6261 = vmatpush1.bf16.msra.mxu1 %v12810_v42  ;;  %6160 = vmatprep.subr.bf16.mxu0 %v12817_v52  ;;  %v12841_v9 = vcombine.high %v2482_v26, %v2486_v44  ;;  %v12840_v30 = vcombine.low %v2482_v26, %v2486_v44  ;;  %v2522_v26 = vld [vmem:[#allocation8 + $0x6d0] sm:$0xff] }
 0x44e   : > { %6262 = vmatprep.subr.bf16.mxu1 %v12819_v6  ;;  %v2526_v44 = vld [vmem:[#allocation8 + $0x6f0] sm:$0xff] }
 0x450   : > { %6161 = vmatpush1.bf16.msra.mxu0 %v12816_v32  ;;  %v2507_v32 = vld [vmem:[#allocation8 + $0x658] sm:$0xff] }
 0x451   : > { %6263 = vmatpush1.bf16.msra.mxu1 %v12818_v14  ;;  %6162 = vmatprep.subr.bf16.mxu0 %v12825_v0  ;;  %v12856_v14 = vcombine.low %v2498_v33, %v2502_v41  ;;  %v12858_v0 = vcombine.low %v2499_v55, %v2503_v16  ;;  %v2542_v33 = vld [vmem:[#allocation8 + $0x770] sm:$0xff]  ;;  %v2539_v41 = vld [vmem:[#allocation8 + $0x758] sm:$0xff] }
 0x452   : > { %6264 = vmatprep.subr.bf16.mxu1 %v12827_v8 }
 0x454   : > { %6163 = vmatpush1.bf16.msra.mxu0 %v12824_v29 }
 0x455   : > { %6265 = vmatpush1.bf16.msra.mxu1 %v12826_v47  ;;  %6164 = vmatprep.subr.bf16.mxu0 %v12833_v58  ;;  %v12873_v58 = vcombine.high %v2514_v36, %v2518_v38 }
 0x456   : > { %6266 = vmatprep.subr.bf16.mxu1 %v12835_v31  ;;  %v12875_v31 = vcombine.high %v2515_v61, %v2519_v45 }
 0x458   : > { %6165 = vmatpush1.bf16.msra.mxu0 %v12832_v27  ;;  %v12872_v27 = vcombine.low %v2514_v36, %v2518_v38  ;;  %v6310_v36 = vld [vmem:[#allocation8 + $0x1000] sm:$0xff] }
 0x459   : > { %6267 = vmatpush1.bf16.msra.mxu1 %v12834_v12  ;;  %6166 = vmatprep.subr.bf16.mxu0 %v12841_v9  ;;  %v12874_v12 = vcombine.low %v2515_v61, %v2519_v45  ;;  %v12881_v9 = vcombine.high %v2522_v26, %v2526_v44  ;;  %v6314_v38 = vld [vmem:[#allocation8 + $0x1020] sm:$0xff]  ;;  %v6311_v61 = vld [vmem:[#allocation8 + $0x1008] sm:$0xff] }
 0x45a   : > { %6268 = vmatprep.subr.bf16.mxu1 %v12843_v43  ;;  %v4492_v1 = vpop.f32.mrb[64].mxu0  ;;  %v12883_v43 = vcombine.high %v2523_v7, %v2527_v22  ;;  %v6315_v45 = vld [vmem:[#allocation8 + $0x1028] sm:$0xff] }
 0x45b   : > { %v16204_v24 = vadd.f32 %v4492_v1, %v16187_v4  ;;  %v4594_v2 = vpop.f32.mrb[60].mxu1  ;;  %v4494_v50 = vpop.f32.mrb[65].mxu0  ;;  %v12850_v4 = vcombine.low %v2491_v10, %v2495_v54  ;;  %v2531_v10 = vld [vmem:[#allocation8 + $0x718] sm:$0xff] }
 0x45c   : > { %6167 = vmatpush1.bf16.msra.mxu0 %v12840_v30  ;;  %v16207_v28 = vadd.f32 %v4594_v2, %v16189_v59  ;;  %v16210_v63 = vadd.f32 %v4494_v50, %v16191_v20  ;;  %v4596_v62 = vpop.f32.mrb[61].mxu1  ;;  %v4496_v60 = vpop.f32.mrb[66].mxu0  ;;  %v2506_v59 = vld [vmem:[#allocation8 + $0x650] sm:$0xff]  ;;  %v2511_v20 = vld [vmem:[#allocation8 + $0x678] sm:$0xff]  ;;  %v12880_v30 = vcombine.low %v2522_v26, %v2526_v44  ;;  %v12888_v50 = vcombine.low %v2530_v11, %v2534_v40  ;;  %v6318_v26 = vld [vmem:[#allocation8 + $0x1040] sm:$0xff] }
 0x45d   : > { %6269 = vmatpush1.bf16.msra.mxu1 %v12842_v5  ;;  %v16213_v42 = vadd.f32 %v4596_v62, %v16193_v17  ;;  %6168 = vmatprep.subr.bf16.mxu0 %v12849_v19  ;;  %v4598_v52 = vpop.f32.mrb[62].mxu1  ;;  %v4497_v6 = vpop.f32.mrb[67].mxu0  ;;  %v12865_v8 = vcombine.high %v2506_v59, %v2510_v13  ;;  %v12867_v17 = vcombine.high %v2507_v32, %v2511_v20  ;;  %v2535_v54 = vld [vmem:[#allocation8 + $0x738] sm:$0xff]  ;;  %v2550_v60 = vld [vmem:[#allocation8 + $0x7b0] sm:$0xff]  ;;  %v6322_v44 = vld [vmem:[#allocation8 + $0x1060] sm:$0xff] }
 0x45e   : > { %6270 = vmatprep.subr.bf16.mxu1 %v12851_v3  ;;  %v4599_v56 = vpop.f32.mrb[63].mxu1  ;;  %v12864_v29 = vcombine.low %v2506_v59, %v2510_v13  ;;  %v12866_v47 = vcombine.low %v2507_v32, %v2511_v20  ;;  %v12882_v5 = vcombine.low %v2523_v7, %v2527_v22  ;;  %v12889_v19 = vcombine.high %v2530_v11, %v2534_v40  ;;  %v2538_v3 = vld [vmem:[#allocation8 + $0x750] sm:$0xff]  ;;  %v2543_v2 = vld [vmem:[#allocation8 + $0x778] sm:$0xff]  ;;  %v6319_v7 = vld [vmem:[#allocation8 + $0x1048] sm:$0xff] }
 0x45f   : > { %v12891_v1 = vcombine.high %v2531_v10, %v2535_v54  ;;  %v12890_v55 = vcombine.low %v2531_v10, %v2535_v54  ;;  %v12897_v16 = vcombine.high %v2538_v3, %v2542_v33  ;;  %v12899_v62 = vcombine.high %v2539_v41, %v2543_v2  ;;  %v2551_v52 = vld [vmem:[#allocation8 + $0x7b8] sm:$0xff]  ;;  %v2554_v59 = vld [vmem:[#allocation8 + $0x7d0] sm:$0xff]  ;;  %v6323_v22 = vld [vmem:[#allocation8 + $0x1068] sm:$0xff] }
 0x460   : > { %6169 = vmatpush1.bf16.msra.mxu0 %v12848_v46  ;;  %v2546_v46 = vld [vmem:[#allocation8 + $0x790] sm:$0xff]  ;;  %v12896_v6 = vcombine.low %v2538_v3, %v2542_v33  ;;  %v2555_v32 = vld [vmem:[#allocation8 + $0x7d8] sm:$0xff]  ;;  %v6326_v11 = vld [vmem:[#allocation8 + $0x1080] sm:$0xff]  ;;  %v12930_v3 = vcombine.low %v6319_v7, %v6323_v22 }
 0x461   : > { %6271 = vmatpush1.bf16.msra.mxu1 %v12850_v4  ;;  %6170 = vmatprep.subr.bf16.mxu0 %v12857_v21  ;;  %v2547_v4 = vld [vmem:[#allocation8 + $0x798] sm:$0xff]  ;;  %v12898_v21 = vcombine.low %v2539_v41, %v2543_v2  ;;  %v12905_v56 = vcombine.high %v2546_v46, %v2550_v60  ;;  %v2558_v13 = vld [vmem:[#allocation8 + $0x7f0] sm:$0xff]  ;;  %v6330_v40 = vld [vmem:[#allocation8 + $0x10a0] sm:$0xff]  ;;  %v16226_v41 = vrot.slane %v16041_v57, 1 }
 0x462   : > { %6272 = vmatprep.subr.bf16.mxu1 %v12859_v34  ;;  %v12907_v34 = vcombine.high %v2547_v4, %v2551_v52  ;;  %v2559_v20 = vld [vmem:[#allocation8 + $0x7f8] sm:$0xff]  ;;  %v6327_v10 = vld [vmem:[#allocation8 + $0x1088] sm:$0xff]  ;;  %v12937_v33 = vcombine.high %v6326_v11, %v6330_v40  ;;  %v6334_v2 = vld [vmem:[#allocation8 + $0x10c0] sm:$0xff] }
 0x463   : > { %v6331_v54 = vld [vmem:[#allocation8 + $0x10a8] sm:$0xff] }
 0x464   : > { %6171 = vmatpush1.bf16.msra.mxu0 %v12856_v14  ;;  %v12904_v14 = vcombine.low %v2546_v46, %v2550_v60  ;;  %v12938_v46 = vcombine.low %v6327_v10, %v6331_v54 }
 0x465   : > { %6273 = vmatpush1.bf16.msra.mxu1 %v12858_v0  ;;  %6172 = vmatprep.subr.bf16.mxu0 %v12865_v8  ;;  %v12906_v0 = vcombine.low %v2547_v4, %v2551_v52  ;;  %v12913_v8 = vcombine.high %v2554_v59, %v2558_v13  ;;  %v6342_v52 = vld [vmem:[#allocation8 + $0x1100] sm:$0xff] }
 0x466   : > { %6274 = vmatprep.subr.bf16.mxu1 %v12867_v17  ;;  %v12915_v17 = vcombine.high %v2555_v32, %v2559_v20 }
 0x468   : > { %6173 = vmatpush1.bf16.msra.mxu0 %v12864_v29  ;;  %v12912_v29 = vcombine.low %v2554_v59, %v2558_v13 }
 0x469   : > { %6275 = vmatpush1.bf16.msra.mxu1 %v12866_v47  ;;  %6174 = vmatprep.subr.bf16.mxu0 %v12873_v58  ;;  %v12914_v47 = vcombine.low %v2555_v32, %v2559_v20  ;;  %v12921_v58 = vcombine.high %v6310_v36, %v6314_v38  ;;  %v6350_v20 = vld [vmem:[#allocation8 + $0x1140] sm:$0xff] }
 0x46a   : > { %6276 = vmatprep.subr.bf16.mxu1 %v12875_v31  ;;  %v12923_v31 = vcombine.high %v6311_v61, %v6315_v45 }
 0x46c   : > { %6175 = vmatpush1.bf16.msra.mxu0 %v12872_v27  ;;  %v12920_v27 = vcombine.low %v6310_v36, %v6314_v38 }
 0x46d   : > { %6277 = vmatpush1.bf16.msra.mxu1 %v12874_v12  ;;  %6176 = vmatprep.subr.bf16.mxu0 %v12881_v9  ;;  %v12922_v12 = vcombine.low %v6311_v61, %v6315_v45  ;;  %v12929_v9 = vcombine.high %v6318_v26, %v6322_v44  ;;  %v6358_v61 = vld [vmem:[#allocation8 + $0x1180] sm:$0xff] }
 0x46e   : > { %6278 = vmatprep.subr.bf16.mxu1 %v12883_v43  ;;  %v12931_v43 = vcombine.high %v6319_v7, %v6323_v22  ;;  %v6362_v45 = vld [vmem:[#allocation8 + $0x11a0] sm:$0xff] }
 0x46f   : > { %v6366_v7 = vld [vmem:[#allocation8 + $0x11c0] sm:$0xff] }
 0x470   : > { %6177 = vmatpush1.bf16.msra.mxu0 %v12880_v30  ;;  %v16218_v30 = vld [vmem:[#allocation2] sm:$0xee]  ;;  %v6370_v22 = vld [vmem:[#allocation8 + $0x11e0] sm:$0xff] }
 0x471   : > { %6279 = vmatpush1.bf16.msra.mxu1 %v12882_v5  ;;  %6178 = vmatprep.subr.bf16.mxu0 %v12889_v19  ;;  %v12928_v5 = vcombine.low %v6318_v26, %v6322_v44  ;;  %v16221_v19 = vld [vmem:[#allocation2 + $0x10] sm:$0xff]  ;;  %v12969_v26 = vcombine.high %v6358_v61, %v6362_v45 }
 0x472   : > { %6280 = vmatprep.subr.bf16.mxu1 %v12891_v1  ;;  %v12917_v1 = vcombine.high %v16218_v30, %v16221_v19 }
 0x474   : > { %6179 = vmatpush1.bf16.msra.mxu0 %v12888_v50  ;;  %v6338_v50 = vld [vmem:[#allocation8 + $0x10e0] sm:$0xff] }
 0x475   : > { %6281 = vmatpush1.bf16.msra.mxu1 %v12890_v55  ;;  %6180 = vmatprep.subr.bf16.mxu0 %v12897_v16  ;;  %v6335_v55 = vld [vmem:[#allocation8 + $0x10c8] sm:$0xff]  ;;  %v12936_v16 = vcombine.low %v6326_v11, %v6330_v40  ;;  %v12945_v60 = vcombine.high %v6334_v2, %v6338_v50  ;;  %v12977_v11 = vcombine.high %v6366_v7, %v6370_v22 }
 0x476   : > { %6282 = vmatprep.subr.bf16.mxu1 %v12899_v62  ;;  %v6579_v62 = vrot.slane %v12917_v1, 1 }
 0x478   : > { %6181 = vmatpush1.bf16.msra.mxu0 %v12896_v6  ;;  %v16231_v4 = vsel %vm16758_vm1, %v6579_v62, %v16226_v41  ;;  %v6346_v6 = vld [vmem:[#allocation8 + $0x1120] sm:$0xff] }
 0x479   : > { %6283 = vmatpush1.bf16.msra.mxu1 %v12898_v21  ;;  %6182 = vmatprep.subr.bf16.mxu0 %v12905_v56  ;;  %v6343_v21 = vld [vmem:[#allocation8 + $0x1108] sm:$0xff]  ;;  %v12953_v13 = vcombine.high %v6342_v52, %v6346_v6 }
 0x47a   : > { %6284 = vmatprep.subr.bf16.mxu1 %v12907_v34  ;;  %v6347_v56 = vld [vmem:[#allocation8 + $0x1128] sm:$0xff]  ;;  %v12944_v34 = vcombine.low %v6334_v2, %v6338_v50 }
 0x47b   : > { %v12955_v32 = vcombine.high %v6343_v21, %v6347_v56  ;;  %v6379_v2 = vld [vmem:[#allocation8 + $0x1228] sm:$0xff] }
 0x47c   : > { %6183 = vmatpush1.bf16.msra.mxu0 %v12904_v14  ;;  %v6354_v14 = vld [vmem:[#allocation8 + $0x1160] sm:$0xff] }
 0x47d   : > { %6285 = vmatpush1.bf16.msra.mxu1 %v12906_v0  ;;  %6184 = vmatprep.subr.bf16.mxu0 %v12913_v8  ;;  %v6351_v0 = vld [vmem:[#allocation8 + $0x1148] sm:$0xff]  ;;  %v12961_v36 = vcombine.high %v6350_v20, %v6354_v14 }
 0x47e   : > { %6286 = vmatprep.subr.bf16.mxu1 %v12915_v17  ;;  %v6355_v8 = vld [vmem:[#allocation8 + $0x1168] sm:$0xff]  ;;  %v12954_v17 = vcombine.low %v6343_v21, %v6347_v56  ;;  %v6386_v56 = vld [vmem:[#allocation8 + $0x1260] sm:$0xff] }
 0x47f   : > { %v12963_v38 = vcombine.high %v6351_v0, %v6355_v8 }
 0x480   : > { %6185 = vmatpush1.bf16.msra.mxu0 %v12912_v29  ;;  %v6359_v29 = vld [vmem:[#allocation8 + $0x1188] sm:$0xff] }
 0x481   : > { %6287 = vmatpush1.bf16.msra.mxu1 %v12914_v47  ;;  %7876 = vmatprep.subr.bf16.mxu0 %v12921_v58  ;;  %v6363_v47 = vld [vmem:[#allocation8 + $0x11a8] sm:$0xff]  ;;  %v12960_v58 = vcombine.low %v6350_v20, %v6354_v14  ;;  %v6390_v20 = vld [vmem:[#allocation8 + $0x1280] sm:$0xff] }
 0x482   : > { %7978 = vmatprep.subr.bf16.mxu1 %v12923_v31  ;;  %v12962_v31 = vcombine.low %v6351_v0, %v6355_v8  ;;  %v12971_v44 = vcombine.high %v6359_v29, %v6363_v47  ;;  %v6394_v14 = vld [vmem:[#allocation8 + $0x12a0] sm:$0xff]  ;;  %v6391_v0 = vld [vmem:[#allocation8 + $0x1288] sm:$0xff] }
 0x483   : > { %6187 = vmatmul.mubr.bf16.vlgmr.msra.gmra.mrb[56].mxu0 %v16100_v25  ;;  %v6395_v8 = vld [vmem:[#allocation8 + $0x12a8] sm:$0xff] }
 0x484   : > { %6289 = vmatmul.mubr.bf16.vlgmr.msra.gmra.mrb[52].mxu1 %v16100_v25  ;;  %6196 = vmatprep.mubr.bf16.mxu0 %v16175_v49  ;;  %v12939_v25 = vcombine.high %v6327_v10, %v6331_v54  ;;  %v6374_v54 = vld [vmem:[#allocation8 + $0x1200] sm:$0xff] }
 0x485   : > { %6298 = vmatprep.mubr.bf16.mxu1 %v16175_v49  ;;  %7877 = vmatpush1.bf16.msra.mxu0 %v12920_v27  ;;  %v6339_v49 = vld [vmem:[#allocation8 + $0x10e8] sm:$0xff] }
 0x486   : > { %7979 = vmatpush1.bf16.msra.mxu1 %v12922_v12  ;;  %7878 = vmatprep.subr.bf16.mxu0 %v12929_v9  ;;  %v12947_v57 = vcombine.high %v6335_v55, %v6339_v49  ;;  %v12946_v59 = vcombine.low %v6335_v55, %v6339_v49  ;;  %v6367_v27 = vld [vmem:[#allocation8 + $0x11c8] sm:$0xff]  ;;  %v12968_v9 = vcombine.low %v6358_v61, %v6362_v45  ;;  %v6398_v61 = vld [vmem:[#allocation8 + $0x12c0] sm:$0xff] }
 0x487   : > { %7980 = vmatprep.subr.bf16.mxu1 %v12931_v43  ;;  %v6371_v12 = vld [vmem:[#allocation8 + $0x11e8] sm:$0xff]  ;;  %v12970_v43 = vcombine.low %v6359_v29, %v6363_v47  ;;  %v6402_v45 = vld [vmem:[#allocation8 + $0x12e0] sm:$0xff] }
 0x488   : > { %v12979_v10 = vcombine.high %v6367_v27, %v6371_v12  ;;  %v6399_v29 = vld [vmem:[#allocation8 + $0x12c8] sm:$0xff] }
 0x489   : > { %7879 = vmatpush1.bf16.msra.mxu0 %v12928_v5  ;;  %v6378_v5 = vld [vmem:[#allocation8 + $0x1220] sm:$0xff]  ;;  %v6403_v47 = vld [vmem:[#allocation8 + $0x12e8] sm:$0xff] }
 0x48a   : > { %7981 = vmatpush1.bf16.msra.mxu1 %v12930_v3  ;;  %7880 = vmatprep.subr.bf16.mxu0 %v12937_v33 }
 0x48b   : > { %6197 = vmatmul.mubr.bf16.gmra.mrb[80].mxu0 %v16181_v35  ;;  %7982 = vmatprep.subr.bf16.mxu1 %v12939_v25  ;;  %v6375_v25 = vld [vmem:[#allocation8 + $0x1208] sm:$0xff] }
 0x48c   : > { %6299 = vmatmul.mubr.bf16.gmra.mrb[76].mxu1 %v16181_v35  ;;  %7908 = vmatprep.mubr.bf16.mxu0 %v16231_v4  ;;  %v12952_v35 = vcombine.low %v6342_v52, %v6346_v6  ;;  %v12985_v52 = vcombine.high %v6374_v54, %v6378_v5  ;;  %v12987_v21 = vcombine.high %v6375_v25, %v6379_v2 }
 0x48d   : > { %7881 = vmatpush1.bf16.msra.mxu0 %v12936_v16  ;;  %8010 = vmatprep.mubr.bf16.mxu1 %v16231_v4  ;;  %v12976_v16 = vcombine.low %v6366_v7, %v6370_v22  ;;  %v6406_v7 = vld [vmem:[#allocation8 + $0x1300] sm:$0xff] }
 0x48e   : > { %7983 = vmatpush1.bf16.msra.mxu1 %v12938_v46  ;;  %7882 = vmatprep.subr.bf16.mxu0 %v12945_v60  ;;  %v6410_v22 = vld [vmem:[#allocation8 + $0x1320] sm:$0xff] }
 0x48f   : > { %7984 = vmatprep.subr.bf16.mxu1 %v12947_v57 }
 0x491   : > { %7883 = vmatpush1.bf16.msra.mxu0 %v12944_v34  ;;  %v6383_v34 = vld [vmem:[#allocation8 + $0x1248] sm:$0xff] }
 0x492   : > { %7985 = vmatpush1.bf16.msra.mxu1 %v12946_v59  ;;  %7884 = vmatprep.subr.bf16.mxu0 %v12953_v13  ;;  %v12984_v59 = vcombine.low %v6374_v54, %v6378_v5  ;;  %v12986_v13 = vcombine.low %v6375_v25, %v6379_v2  ;;  %v6418_v54 = vld [vmem:[#allocation8 + $0x1360] sm:$0xff]  ;;  %v6415_v5 = vld [vmem:[#allocation8 + $0x1348] sm:$0xff] }
 0x493   : > { %7986 = vmatprep.subr.bf16.mxu1 %v12955_v32 }
 0x495   : > { %7885 = vmatpush1.bf16.msra.mxu0 %v12952_v35 }
 0x496   : > { %7987 = vmatpush1.bf16.msra.mxu1 %v12954_v17  ;;  %7886 = vmatprep.subr.bf16.mxu0 %v12961_v36  ;;  %v13001_v36 = vcombine.high %v6390_v20, %v6394_v14 }
 0x497   : > { %7988 = vmatprep.subr.bf16.mxu1 %v12963_v38  ;;  %v13003_v38 = vcombine.high %v6391_v0, %v6395_v8 }
 0x499   : > { %7887 = vmatpush1.bf16.msra.mxu0 %v12960_v58  ;;  %v13000_v58 = vcombine.low %v6390_v20, %v6394_v14  ;;  %v6438_v20 = vld [vmem:[#allocation8 + $0x1400] sm:$0xff] }
 0x49a   : > { %7989 = vmatpush1.bf16.msra.mxu1 %v12962_v31  ;;  %7888 = vmatprep.subr.bf16.mxu0 %v12969_v26  ;;  %v13002_v31 = vcombine.low %v6391_v0, %v6395_v8  ;;  %v13009_v26 = vcombine.high %v6398_v61, %v6402_v45  ;;  %v6442_v14 = vld [vmem:[#allocation8 + $0x1420] sm:$0xff]  ;;  %v6439_v0 = vld [vmem:[#allocation8 + $0x1408] sm:$0xff] }
 0x49b   : > { %7990 = vmatprep.subr.bf16.mxu1 %v12971_v44  ;;  %v5943_v40 = vpop.f32.mrb[68].mxu0  ;;  %v13011_v44 = vcombine.high %v6399_v29, %v6403_v47  ;;  %v6443_v8 = vld [vmem:[#allocation8 + $0x1428] sm:$0xff] }
 0x49c   : > { %v16237_v1 = vadd.f32 %v5943_v40, %v16164_v23  ;;  %v6045_v3 = vpop.f32.mrb[64].mxu1  ;;  %v5945_v33 = vpop.f32.mrb[69].mxu0  ;;  %v12978_v23 = vcombine.low %v6367_v27, %v6371_v12  ;;  %v6407_v27 = vld [vmem:[#allocation8 + $0x1308] sm:$0xff] }
 0x49d   : > { %7889 = vmatpush1.bf16.msra.mxu0 %v12968_v9  ;;  %v16240_v50 = vadd.f32 %v6045_v3, %v16167_v51  ;;  %v16243_v55 = vadd.f32 %v5945_v33, %v16170_v18  ;;  %v6047_v49 = vpop.f32.mrb[65].mxu1  ;;  %v5947_v62 = vpop.f32.mrb[70].mxu0  ;;  %v6382_v51 = vld [vmem:[#allocation8 + $0x1240] sm:$0xff]  ;;  %v6387_v18 = vld [vmem:[#allocation8 + $0x1268] sm:$0xff]  ;;  %v13008_v9 = vcombine.low %v6398_v61, %v6402_v45  ;;  %v13016_v33 = vcombine.low %v6406_v7, %v6410_v22 }
 0x49e   : > { %7991 = vmatpush1.bf16.msra.mxu1 %v12970_v43  ;;  %v16246_v46 = vadd.f32 %v6047_v49, %v16173_v39  ;;  %7890 = vmatprep.subr.bf16.mxu0 %v12977_v11  ;;  %v6049_v60 = vpop.f32.mrb[66].mxu1  ;;  %v5948_v57 = vpop.f32.mrb[71].mxu0  ;;  %v12993_v32 = vcombine.high %v6382_v51, %v6386_v56  ;;  %v12995_v39 = vcombine.high %v6383_v34, %v6387_v18  ;;  %v6411_v12 = vld [vmem:[#allocation8 + $0x1328] sm:$0xff]  ;;  %v6426_v62 = vld [vmem:[#allocation8 + $0x13a0] sm:$0xff]  ;;  %v16251_v61 = vrot.slane %v16039_v48, 1 }
 0x49f   : > { %7992 = vmatprep.subr.bf16.mxu1 %v12979_v10  ;;  %v6050_v6 = vpop.f32.mrb[67].mxu1  ;;  %v12992_v35 = vcombine.low %v6382_v51, %v6386_v56  ;;  %v12994_v17 = vcombine.low %v6383_v34, %v6387_v18  ;;  %v13010_v43 = vcombine.low %v6399_v29, %v6403_v47  ;;  %v13017_v11 = vcombine.high %v6406_v7, %v6410_v22  ;;  %v6414_v10 = vld [vmem:[#allocation8 + $0x1340] sm:$0xff]  ;;  %v6419_v3 = vld [vmem:[#allocation8 + $0x1368] sm:$0xff] }
 0x4a0   : > { %v13019_v40 = vcombine.high %v6407_v27, %v6411_v12  ;;  %v13018_v25 = vcombine.low %v6407_v27, %v6411_v12  ;;  %v13025_v2 = vcombine.high %v6414_v10, %v6418_v54  ;;  %v13027_v49 = vcombine.high %v6415_v5, %v6419_v3  ;;  %v6427_v60 = vld [vmem:[#allocation8 + $0x13a8] sm:$0xff]  ;;  %v6430_v51 = vld [vmem:[#allocation8 + $0x13c0] sm:$0xff] }
 0x4a1   : > { %7891 = vmatpush1.bf16.msra.mxu0 %v12976_v16  ;;  %v6422_v16 = vld [vmem:[#allocation8 + $0x1380] sm:$0xff]  ;;  %v13024_v57 = vcombine.low %v6414_v10, %v6418_v54  ;;  %v6431_v34 = vld [vmem:[#allocation8 + $0x13c8] sm:$0xff]  ;;  %v13051_v45 = vcombine.high %v6439_v0, %v6443_v8 }
 0x4a2   : > { %7993 = vmatpush1.bf16.msra.mxu1 %v12978_v23  ;;  %7892 = vmatprep.subr.bf16.mxu0 %v12985_v52  ;;  %v6423_v23 = vld [vmem:[#allocation8 + $0x1388] sm:$0xff]  ;;  %v13026_v52 = vcombine.low %v6415_v5, %v6419_v3  ;;  %v13033_v6 = vcombine.high %v6422_v16, %v6426_v62  ;;  %v6434_v56 = vld [vmem:[#allocation8 + $0x13e0] sm:$0xff] }
 0x4a3   : > { %7994 = vmatprep.subr.bf16.mxu1 %v12987_v21  ;;  %v13035_v21 = vcombine.high %v6423_v23, %v6427_v60  ;;  %v6435_v18 = vld [vmem:[#allocation8 + $0x13e8] sm:$0xff]  ;;  %v6446_v29 = vld [vmem:[#allocation8 + $0x1440] sm:$0xff] }
 0x4a4   : > { %v6450_v47 = vld [vmem:[#allocation8 + $0x1460] sm:$0xff]  ;;  %v6455_v12 = vld [vmem:[#allocation8 + $0x1488] sm:$0xff] }
 0x4a5   : > { %7893 = vmatpush1.bf16.msra.mxu0 %v12984_v59  ;;  %v13032_v59 = vcombine.low %v6422_v16, %v6426_v62  ;;  %v13057_v7 = vcombine.high %v6446_v29, %v6450_v47  ;;  %v6454_v22 = vld [vmem:[#allocation8 + $0x1480] sm:$0xff]  ;;  %v6467_v16 = vld [vmem:[#allocation8 + $0x14e8] sm:$0xff] }
 0x4a6   : > { %7995 = vmatpush1.bf16.msra.mxu1 %v12986_v13  ;;  %7894 = vmatprep.subr.bf16.mxu0 %v12993_v32  ;;  %v13034_v13 = vcombine.low %v6423_v23, %v6427_v60  ;;  %v13041_v32 = vcombine.high %v6430_v51, %v6434_v56  ;;  %v6458_v27 = vld [vmem:[#allocation8 + $0x14a0] sm:$0xff] }
 0x4a7   : > { %7996 = vmatprep.subr.bf16.mxu1 %v12995_v39  ;;  %v13043_v39 = vcombine.high %v6431_v34, %v6435_v18  ;;  %v13065_v5 = vcombine.high %v6454_v22, %v6458_v27  ;;  %v13064_v62 = vcombine.low %v6454_v22, %v6458_v27 }
 0x4a9   : > { %7895 = vmatpush1.bf16.msra.mxu0 %v12992_v35  ;;  %v12916_v35 = vcombine.low %v16218_v30, %v16221_v19  ;;  %v13050_v19 = vcombine.low %v6439_v0, %v6443_v8 }
 0x4aa   : > { %7997 = vmatpush1.bf16.msra.mxu1 %v12994_v17  ;;  %7896 = vmatprep.subr.bf16.mxu0 %v13001_v36  ;;  %v13040_v17 = vcombine.low %v6430_v51, %v6434_v56  ;;  %v13042_v36 = vcombine.low %v6431_v34, %v6435_v18  ;;  %v6471_v51 = vld [vmem:[#allocation8 + $0x1508] sm:$0xff] }
 0x4ab   : > { %7998 = vmatprep.subr.bf16.mxu1 %v13003_v38  ;;  %v13049_v38 = vcombine.high %v6438_v20, %v6442_v14  ;;  %v6475_v56 = vld [vmem:[#allocation8 + $0x1528] sm:$0xff] }
 0x4ac   : > { %v13082_v8 = vcombine.low %v6471_v51, %v6475_v56 }
 0x4ad   : > { %7897 = vmatpush1.bf16.msra.mxu0 %v13000_v58  ;;  %v6576_v58 = vrot.slane %v12916_v35, 1 }
 0x4ae   : > { %7999 = vmatpush1.bf16.msra.mxu1 %v13002_v31  ;;  %7898 = vmatprep.subr.bf16.mxu0 %v13009_v26  ;;  %v6447_v31 = vld [vmem:[#allocation8 + $0x1448] sm:$0xff] }
 0x4af   : > { %8000 = vmatprep.subr.bf16.mxu1 %v13011_v44  ;;  %v6451_v26 = vld [vmem:[#allocation8 + $0x1468] sm:$0xff]  ;;  %v13048_v44 = vcombine.low %v6438_v20, %v6442_v14  ;;  %v16255_v30 = vsel %vm16759_vm9, %v6576_v58, %v16251_v61 }
 0x4b0   : > { %v13059_v48 = vcombine.high %v6447_v31, %v6451_v26  ;;  %v13058_v54 = vcombine.low %v6447_v31, %v6451_v26  ;;  %v6479_v20 = vld [vmem:[#allocation8 + $0x1548] sm:$0xff] }
 0x4b1   : > { %7899 = vmatpush1.bf16.msra.mxu0 %v13008_v9  ;;  %v6459_v9 = vld [vmem:[#allocation8 + $0x14a8] sm:$0xff] }
 0x4b2   : > { %8001 = vmatpush1.bf16.msra.mxu1 %v13010_v43  ;;  %7900 = vmatprep.subr.bf16.mxu0 %v13017_v11  ;;  %v16260_v43 = vld [vmem:[#allocation2 + $0x8] sm:$0xee]  ;;  %v13056_v11 = vcombine.low %v6446_v29, %v6450_v47  ;;  %v13067_v3 = vcombine.high %v6455_v12, %v6459_v9  ;;  %v13066_v60 = vcombine.low %v6455_v12, %v6459_v9  ;;  %v6483_v14 = vld [vmem:[#allocation8 + $0x1568] sm:$0xff] }
 0x4b3   : > { %8002 = vmatprep.subr.bf16.mxu1 %v13019_v40  ;;  %v16263_v40 = vld [vmem:[#allocation2 + $0x18] sm:$0xff]  ;;  %v6491_v29 = vld [vmem:[#allocation8 + $0x15a8] sm:$0xff]  ;;  %v13090_v58 = vcombine.low %v6479_v20, %v6483_v14 }
 0x4b4   : > { %v12919_v10 = vcombine.high %v16260_v43, %v16263_v40 }
 0x4b5   : > { %7901 = vmatpush1.bf16.msra.mxu0 %v13016_v33  ;;  %v16268_v33 = vrot.slane %v16060_v37, 1 }
 0x4b6   : > { %8003 = vmatpush1.bf16.msra.mxu1 %v13018_v25  ;;  %7902 = vmatprep.subr.bf16.mxu0 %v13025_v2  ;;  %v6462_v25 = vld [vmem:[#allocation8 + $0x14c0] sm:$0xff]  ;;  %v6585_v23 = vrot.slane %v12919_v10, 1 }
 0x4b7   : > { %8004 = vmatprep.subr.bf16.mxu1 %v13027_v49  ;;  %v6466_v2 = vld [vmem:[#allocation8 + $0x14e0] sm:$0xff]  ;;  %v6463_v49 = vld [vmem:[#allocation8 + $0x14c8] sm:$0xff] }
 0x4b8   : > { %v13075_v37 = vcombine.high %v6463_v49, %v6467_v16  ;;  %v13072_v34 = vcombine.low %v6462_v25, %v6466_v2  ;;  %v13074_v18 = vcombine.low %v6463_v49, %v6467_v16  ;;  %v6502_v10 = vld [vmem:[#allocation8 + $0x1600] sm:$0xff]  ;;  %v6507_v49 = vld [vmem:[#allocation8 + $0x1628] sm:$0xff] }
 0x4b9   : > { %7903 = vmatpush1.bf16.msra.mxu0 %v13024_v57  ;;  %v13073_v57 = vcombine.high %v6462_v25, %v6466_v2  ;;  %v6503_v2 = vld [vmem:[#allocation8 + $0x1608] sm:$0xff] }
 0x4ba   : > { %8005 = vmatpush1.bf16.msra.mxu1 %v13026_v52  ;;  %7904 = vmatprep.subr.bf16.mxu0 %v13033_v6  ;;  %v16273_v52 = vsel %vm16760_vm14, %v6585_v23, %v16268_v33  ;;  %v6470_v6 = vld [vmem:[#allocation8 + $0x1500] sm:$0xff] }
 0x4bb   : > { %8006 = vmatprep.subr.bf16.mxu1 %v13035_v21  ;;  %v6474_v21 = vld [vmem:[#allocation8 + $0x1520] sm:$0xff] }
 0x4bc   : > { %v13080_v0 = vcombine.low %v6470_v6, %v6474_v21 }
 0x4bd   : > { %7905 = vmatpush1.bf16.msra.mxu0 %v13032_v59  ;;  %v13081_v59 = vcombine.high %v6470_v6, %v6474_v21 }
 0x4be   : > { %8007 = vmatpush1.bf16.msra.mxu1 %v13034_v13  ;;  %7906 = vmatprep.subr.bf16.mxu0 %v13041_v32  ;;  %v13083_v13 = vcombine.high %v6471_v51, %v6475_v56  ;;  %v6478_v32 = vld [vmem:[#allocation8 + $0x1540] sm:$0xff] }
 0x4bf   : > { %8008 = vmatprep.subr.bf16.mxu1 %v13043_v39  ;;  %v6482_v39 = vld [vmem:[#allocation8 + $0x1560] sm:$0xff] }
 0x4c0   : > { %v13089_v35 = vcombine.high %v6478_v32, %v6482_v39  ;;  %v13088_v47 = vcombine.low %v6478_v32, %v6482_v39  ;;  %v13114_v32 = vcombine.low %v6503_v2, %v6507_v49 }
 0x4c1   : > { %7907 = vmatpush1.bf16.msra.mxu0 %v13040_v17  ;;  %v13091_v17 = vcombine.high %v6479_v20, %v6483_v14  ;;  %v6518_v20 = vld [vmem:[#allocation8 + $0x1680] sm:$0xff] }
 0x4c2   : > { %8009 = vmatpush1.bf16.msra.mxu1 %v13042_v36  ;;  %7927 = vmatprep.subr.bf16.mxu0 %v13049_v38  ;;  %v6486_v36 = vld [vmem:[#allocation8 + $0x1580] sm:$0xff] }
 0x4c3   : > { %8029 = vmatprep.subr.bf16.mxu1 %v13051_v45  ;;  %v6490_v38 = vld [vmem:[#allocation8 + $0x15a0] sm:$0xff]  ;;  %v6487_v45 = vld [vmem:[#allocation8 + $0x1588] sm:$0xff] }
 0x4c4   : > { %7909 = vmatmul.mubr.bf16.vlgmr.msra.gmra.mrb[44].mxu0 %v16255_v30  ;;  %v13097_v31 = vcombine.high %v6486_v36, %v6490_v38  ;;  %v13099_v26 = vcombine.high %v6487_v45, %v6491_v29  ;;  %v13096_v22 = vcombine.low %v6486_v36, %v6490_v38  ;;  %v13098_v27 = vcombine.low %v6487_v45, %v6491_v29  ;;  %v6522_v14 = vld [vmem:[#allocation8 + $0x16a0] sm:$0xff] }
 0x4c5   : > { %8011 = vmatmul.mubr.bf16.vlgmr.msra.gmra.mrb[40].mxu1 %v16255_v30  ;;  %7918 = vmatprep.mubr.bf16.mxu0 %v16226_v41  ;;  %v13129_v36 = vcombine.high %v6518_v20, %v6522_v14  ;;  %v6526_v45 = vld [vmem:[#allocation8 + $0x16c0] sm:$0xff] }
 0x4c6   : > { %7928 = vmatpush1.bf16.msra.mxu0 %v13048_v44  ;;  %8020 = vmatprep.mubr.bf16.mxu1 %v16226_v41  ;;  %v6494_v44 = vld [vmem:[#allocation8 + $0x15c0] sm:$0xff] }
 0x4c7   : > { %8030 = vmatpush1.bf16.msra.mxu1 %v13050_v19  ;;  %7929 = vmatprep.subr.bf16.mxu0 %v13057_v7  ;;  %v6498_v19 = vld [vmem:[#allocation8 + $0x15e0] sm:$0xff]  ;;  %v6495_v7 = vld [vmem:[#allocation8 + $0x15c8] sm:$0xff] }
 0x4c8   : > { %8031 = vmatprep.subr.bf16.mxu1 %v13059_v48  ;;  %v6499_v48 = vld [vmem:[#allocation8 + $0x15e8] sm:$0xff]  ;;  %v13105_v12 = vcombine.high %v6494_v44, %v6498_v19  ;;  %v6530_v29 = vld [vmem:[#allocation8 + $0x16e0] sm:$0xff] }
 0x4ca   : > { %7930 = vmatpush1.bf16.msra.mxu0 %v13056_v11  ;;  %v13107_v11 = vcombine.high %v6495_v7, %v6499_v48 }
 0x4cb   : > { %8032 = vmatpush1.bf16.msra.mxu1 %v13058_v54  ;;  %7931 = vmatprep.subr.bf16.mxu0 %v13065_v5  ;;  %v6506_v54 = vld [vmem:[#allocation8 + $0x1620] sm:$0xff] }
 0x4cc   : > { %7919 = vmatmul.mubr.bf16.gmra.mrb[84].mxu0 %v16251_v61  ;;  %8033 = vmatprep.subr.bf16.mxu1 %v13067_v3  ;;  %v13113_v51 = vcombine.high %v6502_v10, %v6506_v54 }
 0x4cd   : > { %8021 = vmatmul.mubr.bf16.gmra.mrb[80].mxu1 %v16251_v61  ;;  %7959 = vmatprep.mubr.bf16.mxu0 %v16273_v52 }
 0x4ce   : > { %7932 = vmatpush1.bf16.msra.mxu0 %v13064_v62  ;;  %8061 = vmatprep.mubr.bf16.mxu1 %v16273_v52 }
 0x4cf   : > { %8034 = vmatpush1.bf16.msra.mxu1 %v13066_v60  ;;  %7933 = vmatprep.subr.bf16.mxu0 %v13073_v57  ;;  %v13104_v60 = vcombine.low %v6494_v44, %v6498_v19  ;;  %v13137_v44 = vcombine.high %v6526_v45, %v6530_v29 }
 0x4d0   : > { %8035 = vmatprep.subr.bf16.mxu1 %v13075_v37 }
 0x4d2   : > { %7934 = vmatpush1.bf16.msra.mxu0 %v13072_v34  ;;  %v13115_v34 = vcombine.high %v6503_v2, %v6507_v49  ;;  %v6547_v2 = vld [vmem:[#allocation8 + $0x1768] sm:$0xff] }
 0x4d3   : > { %8036 = vmatpush1.bf16.msra.mxu1 %v13074_v18  ;;  %7935 = vmatprep.subr.bf16.mxu0 %v13081_v59  ;;  %v6514_v18 = vld [vmem:[#allocation8 + $0x1660] sm:$0xff]  ;;  %v6511_v59 = vld [vmem:[#allocation8 + $0x1648] sm:$0xff] }
 0x4d4   : > { %8037 = vmatprep.subr.bf16.mxu1 %v13083_v13  ;;  %v13112_v13 = vcombine.low %v6502_v10, %v6506_v54  ;;  %v6542_v54 = vld [vmem:[#allocation8 + $0x1740] sm:$0xff] }
 0x4d6   : > { %7936 = vmatpush1.bf16.msra.mxu0 %v13080_v0  ;;  %v6519_v0 = vld [vmem:[#allocation8 + $0x1688] sm:$0xff] }
 0x4d7   : > { %8038 = vmatpush1.bf16.msra.mxu1 %v13082_v8  ;;  %7937 = vmatprep.subr.bf16.mxu0 %v13089_v35  ;;  %v6523_v8 = vld [vmem:[#allocation8 + $0x16a8] sm:$0xff] }
 0x4d8   : > { %8039 = vmatprep.subr.bf16.mxu1 %v13091_v17  ;;  %v13131_v38 = vcombine.high %v6519_v0, %v6523_v8 }
 0x4da   : > { %7938 = vmatpush1.bf16.msra.mxu0 %v13088_v47  ;;  %v6527_v47 = vld [vmem:[#allocation8 + $0x16c8] sm:$0xff] }
 0x4db   : > { %8040 = vmatpush1.bf16.msra.mxu1 %v13090_v58  ;;  %7939 = vmatprep.subr.bf16.mxu0 %v13097_v31  ;;  %v6531_v58 = vld [vmem:[#allocation8 + $0x16e8] sm:$0xff]  ;;  %v13128_v31 = vcombine.low %v6518_v20, %v6522_v14 }
 0x4dc   : > { %8041 = vmatprep.subr.bf16.mxu1 %v13099_v26  ;;  %v5994_v9 = vpop.f32.mrb[72].mxu0  ;;  %v13130_v26 = vcombine.low %v6519_v0, %v6523_v8  ;;  %v13139_v19 = vcombine.high %v6527_v47, %v6531_v58  ;;  %v6312_v0 = vld [vmem:[#allocation8 + $0x1010] sm:$0xff] }
 0x4dd   : > { %v16279_v5 = vadd.f32 %v5994_v9, %v16237_v1  ;;  %v6096_v3 = vpop.f32.mrb[68].mxu1  ;;  %v5996_v25 = vpop.f32.mrb[73].mxu0  ;;  %v13106_v1 = vcombine.low %v6495_v7, %v6499_v48  ;;  %v6534_v7 = vld [vmem:[#allocation8 + $0x1700] sm:$0xff]  ;;  %v13138_v9 = vcombine.low %v6527_v47, %v6531_v58  ;;  %v6316_v8 = vld [vmem:[#allocation8 + $0x1030] sm:$0xff]  ;;  %v16293_v47 = vrot.slane %v16104_v15, 1 }
 0x4de   : > { %7940 = vmatpush1.bf16.msra.mxu0 %v13096_v22  ;;  %v16282_v16 = vadd.f32 %v6096_v3, %v16240_v50  ;;  %v16285_v62 = vadd.f32 %v5996_v25, %v16243_v55  ;;  %v6098_v23 = vpop.f32.mrb[69].mxu1  ;;  %v5998_v57 = vpop.f32.mrb[74].mxu0  ;;  %v6510_v50 = vld [vmem:[#allocation8 + $0x1640] sm:$0xff]  ;;  %v6515_v55 = vld [vmem:[#allocation8 + $0x1668] sm:$0xff] }
 0x4df   : > { %8042 = vmatpush1.bf16.msra.mxu1 %v13098_v27  ;;  %v16288_v37 = vadd.f32 %v6098_v23, %v16246_v46  ;;  %7941 = vmatprep.subr.bf16.mxu0 %v13105_v12  ;;  %v6100_v6 = vpop.f32.mrb[70].mxu1  ;;  %v5999_v21 = vpop.f32.mrb[75].mxu0  ;;  %v13121_v39 = vcombine.high %v6510_v50, %v6514_v18  ;;  %v13123_v46 = vcombine.high %v6511_v59, %v6515_v55  ;;  %v6538_v48 = vld [vmem:[#allocation8 + $0x1720] sm:$0xff]  ;;  %v6535_v22 = vld [vmem:[#allocation8 + $0x1708] sm:$0xff] }
 0x4e0   : > { %8043 = vmatprep.subr.bf16.mxu1 %v13107_v11  ;;  %v6101_v56 = vpop.f32.mrb[71].mxu1  ;;  %v13120_v35 = vcombine.low %v6510_v50, %v6514_v18  ;;  %v13122_v17 = vcombine.low %v6511_v59, %v6515_v55  ;;  %v6539_v27 = vld [vmem:[#allocation8 + $0x1728] sm:$0xff]  ;;  %v13136_v12 = vcombine.low %v6526_v45, %v6530_v29  ;;  %v13145_v11 = vcombine.high %v6534_v7, %v6538_v48  ;;  %v6546_v3 = vld [vmem:[#allocation8 + $0x1760] sm:$0xff] }
 0x4e1   : > { %v13147_v10 = vcombine.high %v6535_v22, %v6539_v27  ;;  %v6543_v25 = vld [vmem:[#allocation8 + $0x1748] sm:$0xff]  ;;  %v13144_v49 = vcombine.low %v6534_v7, %v6538_v48  ;;  %v13146_v23 = vcombine.low %v6535_v22, %v6539_v27  ;;  %v6554_v6 = vld [vmem:[#allocation8 + $0x17a0] sm:$0xff]  ;;  %v13152_v56 = vcombine.low %v6542_v54, %v6546_v3  ;;  %v6325_v7 = vld [vmem:[#allocation8 + $0x1078] sm:$0xff] }
 0x4e2   : > { %7942 = vmatpush1.bf16.msra.mxu0 %v13104_v60  ;;  %v13153_v60 = vcombine.high %v6542_v54, %v6546_v3  ;;  %v13155_v57 = vcombine.high %v6543_v25, %v6547_v2  ;;  %v6551_v21 = vld [vmem:[#allocation8 + $0x1788] sm:$0xff]  ;;  %v6558_v59 = vld [vmem:[#allocation8 + $0x17c0] sm:$0xff]  ;;  %v12925_v29 = vcombine.high %v6312_v0, %v6316_v8  ;;  %v12924_v48 = vcombine.low %v6312_v0, %v6316_v8  ;;  %v6328_v27 = vld [vmem:[#allocation8 + $0x1090] sm:$0xff] }
 0x4e3   : > { %8044 = vmatpush1.bf16.msra.mxu1 %v13106_v1  ;;  %7943 = vmatprep.subr.bf16.mxu0 %v13113_v51  ;;  %v6550_v1 = vld [vmem:[#allocation8 + $0x1780] sm:$0xff]  ;;  %v6555_v51 = vld [vmem:[#allocation8 + $0x17a8] sm:$0xff] }
 0x4e4   : > { %8045 = vmatprep.subr.bf16.mxu1 %v13115_v34  ;;  %v13154_v34 = vcombine.low %v6543_v25, %v6547_v2  ;;  %v13161_v50 = vcombine.high %v6550_v1, %v6554_v6  ;;  %v13163_v18 = vcombine.high %v6551_v21, %v6555_v51  ;;  %v6562_v55 = vld [vmem:[#allocation8 + $0x17e0] sm:$0xff]  ;;  %v6336_v2 = vld [vmem:[#allocation8 + $0x10d0] sm:$0xff] }
 0x4e5   : > { %v13169_v20 = vcombine.high %v6558_v59, %v6562_v55 }
 0x4e6   : > { %7944 = vmatpush1.bf16.msra.mxu0 %v13112_v13  ;;  %v6559_v13 = vld [vmem:[#allocation8 + $0x17c8] sm:$0xff] }
 0x4e7   : > { %8046 = vmatpush1.bf16.msra.mxu1 %v13114_v32  ;;  %7945 = vmatprep.subr.bf16.mxu0 %v13121_v39  ;;  %v6563_v32 = vld [vmem:[#allocation8 + $0x17e8] sm:$0xff]  ;;  %v13160_v39 = vcombine.low %v6550_v1, %v6554_v6 }
 0x4e8   : > { %8047 = vmatprep.subr.bf16.mxu1 %v13123_v46  ;;  %v13162_v46 = vcombine.low %v6551_v21, %v6555_v51  ;;  %v13171_v14 = vcombine.high %v6559_v13, %v6563_v32  ;;  %v13170_v45 = vcombine.low %v6559_v13, %v6563_v32  ;;  %v6344_v51 = vld [vmem:[#allocation8 + $0x1110] sm:$0xff] }
 0x4e9   : > { %v6352_v32 = vld [vmem:[#allocation8 + $0x1150] sm:$0xff] }
 0x4ea   : > { %7946 = vmatpush1.bf16.msra.mxu0 %v13120_v35  ;;  %v6313_v35 = vld [vmem:[#allocation8 + $0x1018] sm:$0xff] }
 0x4eb   : > { %8048 = vmatpush1.bf16.msra.mxu1 %v13122_v17  ;;  %7947 = vmatprep.subr.bf16.mxu0 %v13129_v36  ;;  %v6317_v17 = vld [vmem:[#allocation8 + $0x1038] sm:$0xff]  ;;  %v12918_v36 = vcombine.low %v16260_v43, %v16263_v40 }
 0x4ec   : > { %8049 = vmatprep.subr.bf16.mxu1 %v13131_v38  ;;  %v13168_v38 = vcombine.low %v6558_v59, %v6562_v55  ;;  %v12927_v58 = vcombine.high %v6313_v35, %v6317_v17  ;;  %v12926_v40 = vcombine.low %v6313_v35, %v6317_v17  ;;  %v6364_v17 = vld [vmem:[#allocation8 + $0x11b0] sm:$0xff] }
 0x4ee   : > { %7948 = vmatpush1.bf16.msra.mxu0 %v13128_v31  ;;  %v6320_v31 = vld [vmem:[#allocation8 + $0x1050] sm:$0xff] }
 0x4ef   : > { %8050 = vmatpush1.bf16.msra.mxu1 %v13130_v26  ;;  %7949 = vmatprep.subr.bf16.mxu0 %v13137_v44  ;;  %v6324_v26 = vld [vmem:[#allocation8 + $0x1070] sm:$0xff]  ;;  %v6582_v44 = vrot.slane %v12918_v36, 1  ;;  %v6361_v36 = vld [vmem:[#allocation8 + $0x1198] sm:$0xff] }
 0x4f0   : > { %8051 = vmatprep.subr.bf16.mxu1 %v13139_v19  ;;  %v6321_v19 = vld [vmem:[#allocation8 + $0x1058] sm:$0xff]  ;;  %v12933_v22 = vcombine.high %v6320_v31, %v6324_v26 }
 0x4f1   : > { %v16297_v43 = vsel %vm16761_vm10, %v6582_v44, %v16293_v47  ;;  %v12935_v15 = vcombine.high %v6321_v19, %v6325_v7  ;;  %v12934_v54 = vcombine.low %v6321_v19, %v6325_v7  ;;  %v6372_v44 = vld [vmem:[#allocation8 + $0x11f0] sm:$0xff]  ;;  %v6369_v19 = vld [vmem:[#allocation8 + $0x11d8] sm:$0xff] }
 0x4f2   : > { %7950 = vmatpush1.bf16.msra.mxu0 %v13136_v12  ;;  %v6332_v12 = vld [vmem:[#allocation8 + $0x10b0] sm:$0xff]  ;;  %v6373_v7 = vld [vmem:[#allocation8 + $0x11f8] sm:$0xff] }
 0x4f3   : > { %8052 = vmatpush1.bf16.msra.mxu1 %v13138_v9  ;;  %7951 = vmatprep.subr.bf16.mxu0 %v13145_v11  ;;  %v6329_v9 = vld [vmem:[#allocation8 + $0x1098] sm:$0xff]  ;;  %v12941_v3 = vcombine.high %v6328_v27, %v6332_v12 }
 0x4f4   : > { %8053 = vmatprep.subr.bf16.mxu1 %v13147_v10  ;;  %v6333_v11 = vld [vmem:[#allocation8 + $0x10b8] sm:$0xff]  ;;  %v12932_v10 = vcombine.low %v6320_v31, %v6324_v26  ;;  %v6368_v26 = vld [vmem:[#allocation8 + $0x11d0] sm:$0xff] }
 0x4f5   : > { %v12943_v25 = vcombine.high %v6329_v9, %v6333_v11  ;;  %v12942_v1 = vcombine.low %v6329_v9, %v6333_v11  ;;  %v6380_v9 = vld [vmem:[#allocation8 + $0x1230] sm:$0xff] }
 0x4f6   : > { %7952 = vmatpush1.bf16.msra.mxu0 %v13144_v49  ;;  %v6340_v49 = vld [vmem:[#allocation8 + $0x10f0] sm:$0xff] }
 0x4f7   : > { %8054 = vmatpush1.bf16.msra.mxu1 %v13146_v23  ;;  %7953 = vmatprep.subr.bf16.mxu0 %v13153_v60  ;;  %v6337_v23 = vld [vmem:[#allocation8 + $0x10d8] sm:$0xff]  ;;  %v12949_v6 = vcombine.high %v6336_v2, %v6340_v49 }
 0x4f8   : > { %8055 = vmatprep.subr.bf16.mxu1 %v13155_v57  ;;  %v6341_v60 = vld [vmem:[#allocation8 + $0x10f8] sm:$0xff]  ;;  %v12940_v57 = vcombine.low %v6328_v27, %v6332_v12  ;;  %v12983_v27 = vcombine.high %v6369_v19, %v6373_v7  ;;  %v6376_v12 = vld [vmem:[#allocation8 + $0x1210] sm:$0xff] }
 0x4f9   : > { %v12951_v21 = vcombine.high %v6337_v23, %v6341_v60  ;;  %v12950_v59 = vcombine.low %v6337_v23, %v6341_v60  ;;  %v12980_v60 = vcombine.low %v6368_v26, %v6372_v44 }
 0x4fa   : > { %7954 = vmatpush1.bf16.msra.mxu0 %v13152_v56  ;;  %v6348_v56 = vld [vmem:[#allocation8 + $0x1130] sm:$0xff] }
 0x4fb   : > { %8056 = vmatpush1.bf16.msra.mxu1 %v13154_v34  ;;  %7955 = vmatprep.subr.bf16.mxu0 %v13161_v50  ;;  %v6345_v34 = vld [vmem:[#allocation8 + $0x1118] sm:$0xff]  ;;  %v12957_v55 = vcombine.high %v6344_v51, %v6348_v56 }
 0x4fc   : > { %8057 = vmatprep.subr.bf16.mxu1 %v13163_v18  ;;  %v6349_v50 = vld [vmem:[#allocation8 + $0x1138] sm:$0xff]  ;;  %v12948_v18 = vcombine.low %v6336_v2, %v6340_v49 }
 0x4fd   : > { %v12959_v13 = vcombine.high %v6345_v34, %v6349_v50  ;;  %v12958_v0 = vcombine.low %v6345_v34, %v6349_v50  ;;  %v6388_v50 = vld [vmem:[#allocation8 + $0x1270] sm:$0xff] }
 0x4fe   : > { %7956 = vmatpush1.bf16.msra.mxu0 %v13160_v39  ;;  %v6356_v39 = vld [vmem:[#allocation8 + $0x1170] sm:$0xff] }
 0x4ff   : > { %8058 = vmatpush1.bf16.msra.mxu1 %v13162_v46  ;;  %7957 = vmatprep.subr.bf16.mxu0 %v13169_v20  ;;  %v6353_v46 = vld [vmem:[#allocation8 + $0x1158] sm:$0xff]  ;;  %v12965_v8 = vcombine.high %v6352_v32, %v6356_v39 }
 0x500   : > { %8059 = vmatprep.subr.bf16.mxu1 %v13171_v14  ;;  %v6357_v20 = vld [vmem:[#allocation8 + $0x1178] sm:$0xff]  ;;  %v12956_v14 = vcombine.low %v6344_v51, %v6348_v56  ;;  %v12989_v51 = vcombine.high %v6376_v12, %v6380_v9 }
 0x501   : > { %v12967_v35 = vcombine.high %v6353_v46, %v6357_v20 }
 0x502   : > { %7958 = vmatpush1.bf16.msra.mxu0 %v13168_v38  ;;  %v6365_v38 = vld [vmem:[#allocation8 + $0x11b8] sm:$0xff] }
 0x503   : > { %8060 = vmatpush1.bf16.msra.mxu1 %v13170_v45  ;;  %8080 = vmatprep.subr.bf16.mxu0 %v12925_v29  ;;  %v12964_v45 = vcombine.low %v6352_v32, %v6356_v39  ;;  %v12966_v29 = vcombine.low %v6353_v46, %v6357_v20  ;;  %v12975_v31 = vcombine.high %v6361_v36, %v6365_v38  ;;  %v6392_v32 = vld [vmem:[#allocation8 + $0x1290] sm:$0xff]  ;;  %v6393_v46 = vld [vmem:[#allocation8 + $0x1298] sm:$0xff] }
 0x504   : > { %8182 = vmatprep.subr.bf16.mxu1 %v12927_v58  ;;  %v6396_v39 = vld [vmem:[#allocation8 + $0x12b0] sm:$0xff]  ;;  %v6397_v20 = vld [vmem:[#allocation8 + $0x12b8] sm:$0xff] }
 0x505   : > { %7960 = vmatmul.mubr.bf16.vlgmr.msra.gmra.mrb[44].mxu0 %v16297_v43 }
 0x506   : > { %8062 = vmatmul.mubr.bf16.vlgmr.msra.gmra.mrb[40].mxu1 %v16297_v43  ;;  %7969 = vmatprep.mubr.bf16.mxu0 %v16268_v33 }
 0x507   : > { %8071 = vmatprep.mubr.bf16.mxu1 %v16268_v33  ;;  %8081 = vmatpush1.bf16.msra.mxu0 %v12924_v48 }
 0x508   : > { %8183 = vmatpush1.bf16.msra.mxu1 %v12926_v40  ;;  %8082 = vmatprep.subr.bf16.mxu0 %v12933_v22  ;;  %v12974_v40 = vcombine.low %v6361_v36, %v6365_v38  ;;  %v12981_v22 = vcombine.high %v6368_v26, %v6372_v44  ;;  %v6401_v36 = vld [vmem:[#allocation8 + $0x12d8] sm:$0xff]  ;;  %v6408_v26 = vld [vmem:[#allocation8 + $0x1310] sm:$0xff] }
 0x509   : > { %8184 = vmatprep.subr.bf16.mxu1 %v12935_v15  ;;  %v6405_v38 = vld [vmem:[#allocation8 + $0x12f8] sm:$0xff]  ;;  %v6412_v44 = vld [vmem:[#allocation8 + $0x1330] sm:$0xff] }
 0x50b   : > { %8083 = vmatpush1.bf16.msra.mxu0 %v12932_v10 }
 0x50c   : > { %8185 = vmatpush1.bf16.msra.mxu1 %v12934_v54  ;;  %8084 = vmatprep.subr.bf16.mxu0 %v12941_v3  ;;  %v6377_v3 = vld [vmem:[#allocation8 + $0x1218] sm:$0xff] }
 0x50d   : > { %7970 = vmatmul.mubr.bf16.gmra.mrb[88].mxu0 %v16293_v47  ;;  %8186 = vmatprep.subr.bf16.mxu1 %v12943_v25  ;;  %v6381_v25 = vld [vmem:[#allocation8 + $0x1238] sm:$0xff] }
 0x50e   : > { %8072 = vmatmul.mubr.bf16.gmra.mrb[84].mxu1 %v16293_v47  ;;  %8112 = vmatprep.mubr.bf16.mxu0 %v16231_v4  ;;  %v12991_v34 = vcombine.high %v6377_v3, %v6381_v25 }
 0x50f   : > { %8085 = vmatpush1.bf16.msra.mxu0 %v12940_v57  ;;  %8214 = vmatprep.mubr.bf16.mxu1 %v16231_v4  ;;  %v6360_v4 = vld [vmem:[#allocation8 + $0x1190] sm:$0xff] }
 0x510   : > { %8187 = vmatpush1.bf16.msra.mxu1 %v12942_v1  ;;  %8086 = vmatprep.subr.bf16.mxu0 %v12949_v6  ;;  %v12973_v58 = vcombine.high %v6360_v4, %v6364_v17  ;;  %v12972_v48 = vcombine.low %v6360_v4, %v6364_v17  ;;  %v6400_v4 = vld [vmem:[#allocation8 + $0x12d0] sm:$0xff] }
 0x511   : > { %8188 = vmatprep.subr.bf16.mxu1 %v12951_v21  ;;  %v6404_v17 = vld [vmem:[#allocation8 + $0x12f0] sm:$0xff] }
 0x513   : > { %8087 = vmatpush1.bf16.msra.mxu0 %v12948_v18  ;;  %v6385_v18 = vld [vmem:[#allocation8 + $0x1258] sm:$0xff] }
 0x514   : > { %8189 = vmatpush1.bf16.msra.mxu1 %v12950_v59  ;;  %8088 = vmatprep.subr.bf16.mxu0 %v12957_v55  ;;  %v12988_v59 = vcombine.low %v6376_v12, %v6380_v9  ;;  %v12990_v55 = vcombine.low %v6377_v3, %v6381_v25  ;;  %v6420_v12 = vld [vmem:[#allocation8 + $0x1370] sm:$0xff]  ;;  %v6417_v9 = vld [vmem:[#allocation8 + $0x1358] sm:$0xff] }
 0x515   : > { %8190 = vmatprep.subr.bf16.mxu1 %v12959_v13 }
 0x517   : > { %8089 = vmatpush1.bf16.msra.mxu0 %v12956_v14 }
 0x518   : > { %8191 = vmatpush1.bf16.msra.mxu1 %v12958_v0  ;;  %8090 = vmatprep.subr.bf16.mxu0 %v12965_v8  ;;  %v13005_v8 = vcombine.high %v6392_v32, %v6396_v39 }
 0x519   : > { %8192 = vmatprep.subr.bf16.mxu1 %v12967_v35  ;;  %v13007_v35 = vcombine.high %v6393_v46, %v6397_v20 }
 0x51b   : > { %8091 = vmatpush1.bf16.msra.mxu0 %v12964_v45  ;;  %v13004_v45 = vcombine.low %v6392_v32, %v6396_v39  ;;  %v6440_v32 = vld [vmem:[#allocation8 + $0x1410] sm:$0xff] }
 0x51c   : > { %8193 = vmatpush1.bf16.msra.mxu1 %v12966_v29  ;;  %8092 = vmatprep.subr.bf16.mxu0 %v12973_v58  ;;  %v13006_v29 = vcombine.low %v6393_v46, %v6397_v20  ;;  %v13013_v58 = vcombine.high %v6400_v4, %v6404_v17  ;;  %v6444_v39 = vld [vmem:[#allocation8 + $0x1430] sm:$0xff]  ;;  %v6441_v46 = vld [vmem:[#allocation8 + $0x1418] sm:$0xff] }
 0x51d   : > { %8194 = vmatprep.subr.bf16.mxu1 %v12975_v31  ;;  %v6147_v15 = vpop.f32.mrb[76].mxu0  ;;  %v13015_v31 = vcombine.high %v6401_v36, %v6405_v38  ;;  %v6445_v20 = vld [vmem:[#allocation8 + $0x1438] sm:$0xff] }
 0x51e   : > { %v16308_v11 = vadd.f32 %v6147_v15, %v16204_v24  ;;  %v6249_v10 = vpop.f32.mrb[72].mxu1  ;;  %v6149_v54 = vpop.f32.mrb[77].mxu0  ;;  %v12982_v24 = vcombine.low %v6369_v19, %v6373_v7  ;;  %v6409_v19 = vld [vmem:[#allocation8 + $0x1318] sm:$0xff] }
 0x51f   : > { %8093 = vmatpush1.bf16.msra.mxu0 %v12972_v48  ;;  %v16311_v2 = vadd.f32 %v6249_v10, %v16207_v28  ;;  %v16314_v49 = vadd.f32 %v6149_v54, %v16210_v63  ;;  %v6251_v23 = vpop.f32.mrb[73].mxu1  ;;  %v6151_v57 = vpop.f32.mrb[78].mxu0  ;;  %v6384_v28 = vld [vmem:[#allocation8 + $0x1250] sm:$0xff]  ;;  %v6389_v63 = vld [vmem:[#allocation8 + $0x1278] sm:$0xff]  ;;  %v13012_v48 = vcombine.low %v6400_v4, %v6404_v17  ;;  %v13020_v54 = vcombine.low %v6408_v26, %v6412_v44 }
 0x520   : > { %8195 = vmatpush1.bf16.msra.mxu1 %v12974_v40  ;;  %v16317_v1 = vadd.f32 %v6251_v23, %v16213_v42  ;;  %8094 = vmatprep.subr.bf16.mxu0 %v12981_v22  ;;  %v6253_v6 = vpop.f32.mrb[74].mxu1  ;;  %v6152_v21 = vpop.f32.mrb[79].mxu0  ;;  %v12997_v13 = vcombine.high %v6384_v28, %v6388_v50  ;;  %v12999_v42 = vcombine.high %v6385_v18, %v6389_v63  ;;  %v6413_v7 = vld [vmem:[#allocation8 + $0x1338] sm:$0xff]  ;;  %v6428_v57 = vld [vmem:[#allocation8 + $0x13b0] sm:$0xff] }
 0x521   : > { %8196 = vmatprep.subr.bf16.mxu1 %v12983_v27  ;;  %v6254_v56 = vpop.f32.mrb[75].mxu1  ;;  %v12996_v14 = vcombine.low %v6384_v28, %v6388_v50  ;;  %v12998_v0 = vcombine.low %v6385_v18, %v6389_v63  ;;  %v13014_v40 = vcombine.low %v6401_v36, %v6405_v38  ;;  %v13021_v22 = vcombine.high %v6408_v26, %v6412_v44  ;;  %v6416_v27 = vld [vmem:[#allocation8 + $0x1350] sm:$0xff]  ;;  %v6421_v10 = vld [vmem:[#allocation8 + $0x1378] sm:$0xff] }
 0x522   : > { %v13023_v15 = vcombine.high %v6409_v19, %v6413_v7  ;;  %v13022_v3 = vcombine.low %v6409_v19, %v6413_v7  ;;  %v13029_v25 = vcombine.high %v6416_v27, %v6420_v12  ;;  %v13031_v23 = vcombine.high %v6417_v9, %v6421_v10  ;;  %v6429_v6 = vld [vmem:[#allocation8 + $0x13b8] sm:$0xff]  ;;  %v6432_v28 = vld [vmem:[#allocation8 + $0x13d0] sm:$0xff] }
 0x523   : > { %8095 = vmatpush1.bf16.msra.mxu0 %v12980_v60  ;;  %v6424_v60 = vld [vmem:[#allocation8 + $0x1390] sm:$0xff]  ;;  %v13028_v21 = vcombine.low %v6416_v27, %v6420_v12  ;;  %v6433_v18 = vld [vmem:[#allocation8 + $0x13d8] sm:$0xff] }
 0x524   : > { %8197 = vmatpush1.bf16.msra.mxu1 %v12982_v24  ;;  %8096 = vmatprep.subr.bf16.mxu0 %v12989_v51  ;;  %v6425_v24 = vld [vmem:[#allocation8 + $0x1398] sm:$0xff]  ;;  %v13030_v51 = vcombine.low %v6417_v9, %v6421_v10  ;;  %v13037_v56 = vcombine.high %v6424_v60, %v6428_v57  ;;  %v6436_v50 = vld [vmem:[#allocation8 + $0x13f0] sm:$0xff] }
 0x525   : > { %8198 = vmatprep.subr.bf16.mxu1 %v12991_v34  ;;  %v13039_v34 = vcombine.high %v6425_v24, %v6429_v6  ;;  %v6437_v63 = vld [vmem:[#allocation8 + $0x13f8] sm:$0xff]  ;;  %v6448_v4 = vld [vmem:[#allocation8 + $0x1450] sm:$0xff] }
 0x526   : > { %v6452_v17 = vld [vmem:[#allocation8 + $0x1470] sm:$0xff]  ;;  %v6449_v36 = vld [vmem:[#allocation8 + $0x1458] sm:$0xff] }
 0x527   : > { %8097 = vmatpush1.bf16.msra.mxu0 %v12988_v59  ;;  %v13036_v59 = vcombine.low %v6424_v60, %v6428_v57  ;;  %v6453_v38 = vld [vmem:[#allocation8 + $0x1478] sm:$0xff]  ;;  %v6456_v26 = vld [vmem:[#allocation8 + $0x1490] sm:$0xff] }
 0x528   : > { %8199 = vmatpush1.bf16.msra.mxu1 %v12990_v55  ;;  %8098 = vmatprep.subr.bf16.mxu0 %v12997_v13  ;;  %v13038_v55 = vcombine.low %v6425_v24, %v6429_v6  ;;  %v13045_v13 = vcombine.high %v6432_v28, %v6436_v50  ;;  %v6460_v44 = vld [vmem:[#allocation8 + $0x14b0] sm:$0xff]  ;;  %v6457_v19 = vld [vmem:[#allocation8 + $0x1498] sm:$0xff] }
 0x529   : > { %8200 = vmatprep.subr.bf16.mxu1 %v12999_v42  ;;  %v13047_v42 = vcombine.high %v6433_v18, %v6437_v63  ;;  %v6461_v7 = vld [vmem:[#allocation8 + $0x14b8] sm:$0xff]  ;;  %v6464_v27 = vld [vmem:[#allocation8 + $0x14d0] sm:$0xff] }
 0x52a   : > { %v6468_v12 = vld [vmem:[#allocation8 + $0x14f0] sm:$0xff]  ;;  %v6465_v9 = vld [vmem:[#allocation8 + $0x14d8] sm:$0xff] }
 0x52b   : > { %8099 = vmatpush1.bf16.msra.mxu0 %v12996_v14  ;;  %v13044_v14 = vcombine.low %v6432_v28, %v6436_v50  ;;  %v6469_v10 = vld [vmem:[#allocation8 + $0x14f8] sm:$0xff]  ;;  %v13076_v24 = vcombine.low %v6464_v27, %v6468_v12 }
 0x52c   : > { %8201 = vmatpush1.bf16.msra.mxu1 %v12998_v0  ;;  %8100 = vmatprep.subr.bf16.mxu0 %v13005_v8  ;;  %v13046_v0 = vcombine.low %v6433_v18, %v6437_v63  ;;  %v13053_v8 = vcombine.high %v6440_v32, %v6444_v39  ;;  %v6473_v60 = vld [vmem:[#allocation8 + $0x1518] sm:$0xff]  ;;  %v13078_v6 = vcombine.low %v6465_v9, %v6469_v10 }
 0x52d   : > { %8202 = vmatprep.subr.bf16.mxu1 %v13007_v35  ;;  %v13055_v35 = vcombine.high %v6441_v46, %v6445_v20  ;;  %v6477_v57 = vld [vmem:[#allocation8 + $0x1538] sm:$0xff] }
 0x52e   : > { %v6481_v28 = vld [vmem:[#allocation8 + $0x1558] sm:$0xff]  ;;  %v13086_v18 = vcombine.low %v6473_v60, %v6477_v57 }
 0x52f   : > { %8101 = vmatpush1.bf16.msra.mxu0 %v13004_v45  ;;  %v13052_v45 = vcombine.low %v6440_v32, %v6444_v39  ;;  %v6485_v50 = vld [vmem:[#allocation8 + $0x1578] sm:$0xff] }
 0x530   : > { %8203 = vmatpush1.bf16.msra.mxu1 %v13006_v29  ;;  %8102 = vmatprep.subr.bf16.mxu0 %v13013_v58  ;;  %v13054_v29 = vcombine.low %v6441_v46, %v6445_v20  ;;  %v13061_v58 = vcombine.high %v6448_v4, %v6452_v17  ;;  %v13094_v39 = vcombine.low %v6481_v28, %v6485_v50 }
 0x531   : > { %8204 = vmatprep.subr.bf16.mxu1 %v13015_v31  ;;  %v13063_v31 = vcombine.high %v6449_v36, %v6453_v38 }
 0x533   : > { %8103 = vmatpush1.bf16.msra.mxu0 %v13012_v48  ;;  %v13060_v48 = vcombine.low %v6448_v4, %v6452_v17 }
 0x534   : > { %8205 = vmatpush1.bf16.msra.mxu1 %v13014_v40  ;;  %8104 = vmatprep.subr.bf16.mxu0 %v13021_v22  ;;  %v13062_v40 = vcombine.low %v6449_v36, %v6453_v38  ;;  %v13069_v22 = vcombine.high %v6456_v26, %v6460_v44 }
 0x535   : > { %8206 = vmatprep.subr.bf16.mxu1 %v13023_v15  ;;  %v13071_v15 = vcombine.high %v6457_v19, %v6461_v7 }
 0x537   : > { %8105 = vmatpush1.bf16.msra.mxu0 %v13020_v54  ;;  %v13070_v54 = vcombine.low %v6457_v19, %v6461_v7  ;;  %v6505_v19 = vld [vmem:[#allocation8 + $0x1618] sm:$0xff] }
 0x538   : > { %8207 = vmatpush1.bf16.msra.mxu1 %v13022_v3  ;;  %8106 = vmatprep.subr.bf16.mxu0 %v13029_v25  ;;  %v13077_v3 = vcombine.high %v6464_v27, %v6468_v12  ;;  %v6472_v25 = vld [vmem:[#allocation8 + $0x1510] sm:$0xff]  ;;  %v6509_v7 = vld [vmem:[#allocation8 + $0x1638] sm:$0xff] }
 0x539   : > { %8208 = vmatprep.subr.bf16.mxu1 %v13031_v23  ;;  %v6476_v23 = vld [vmem:[#allocation8 + $0x1530] sm:$0xff] }
 0x53b   : > { %8107 = vmatpush1.bf16.msra.mxu0 %v13028_v21  ;;  %v13085_v21 = vcombine.high %v6472_v25, %v6476_v23 }
 0x53c   : > { %8209 = vmatpush1.bf16.msra.mxu1 %v13030_v51  ;;  %8108 = vmatprep.subr.bf16.mxu0 %v13037_v56  ;;  %v13087_v51 = vcombine.high %v6473_v60, %v6477_v57  ;;  %v6480_v56 = vld [vmem:[#allocation8 + $0x1550] sm:$0xff]  ;;  %v13118_v60 = vcombine.low %v6505_v19, %v6509_v7 }
 0x53d   : > { %8210 = vmatprep.subr.bf16.mxu1 %v13039_v34  ;;  %v6484_v34 = vld [vmem:[#allocation8 + $0x1570] sm:$0xff] }
 0x53e   : > { %v13093_v63 = vcombine.high %v6480_v56, %v6484_v34  ;;  %v13092_v32 = vcombine.low %v6480_v56, %v6484_v34 }
 0x53f   : > { %8109 = vmatpush1.bf16.msra.mxu0 %v13036_v59  ;;  %v13095_v59 = vcombine.high %v6481_v28, %v6485_v50 }
 0x540   : > { %8211 = vmatpush1.bf16.msra.mxu1 %v13038_v55  ;;  %8110 = vmatprep.subr.bf16.mxu0 %v13045_v13  ;;  %v6492_v55 = vld [vmem:[#allocation8 + $0x15b0] sm:$0xff]  ;;  %v6489_v13 = vld [vmem:[#allocation8 + $0x1598] sm:$0xff] }
 0x541   : > { %8212 = vmatprep.subr.bf16.mxu1 %v13047_v42  ;;  %v6493_v42 = vld [vmem:[#allocation8 + $0x15b8] sm:$0xff] }
 0x542   : > { %v13103_v20 = vcombine.high %v6489_v13, %v6493_v42  ;;  %v13102_v17 = vcombine.low %v6489_v13, %v6493_v42 }
 0x543   : > { %8111 = vmatpush1.bf16.msra.mxu0 %v13044_v14  ;;  %v6496_v14 = vld [vmem:[#allocation8 + $0x15d0] sm:$0xff] }
 0x544   : > { %8213 = vmatpush1.bf16.msra.mxu1 %v13046_v0  ;;  %8131 = vmatprep.subr.bf16.mxu0 %v13053_v8  ;;  %v6500_v0 = vld [vmem:[#allocation8 + $0x15f0] sm:$0xff]  ;;  %v6497_v8 = vld [vmem:[#allocation8 + $0x15d8] sm:$0xff] }
 0x545   : > { %8233 = vmatprep.subr.bf16.mxu1 %v13055_v35  ;;  %v6501_v35 = vld [vmem:[#allocation8 + $0x15f8] sm:$0xff]  ;;  %v13109_v36 = vcombine.high %v6496_v14, %v6500_v0 }
 0x546   : > { %8113 = vmatmul.mubr.bf16.vlgmr.msra.gmra.mrb[56].mxu0 %v16255_v30 }
 0x547   : > { %8215 = vmatmul.mubr.bf16.vlgmr.msra.gmra.mrb[52].mxu1 %v16255_v30  ;;  %8122 = vmatprep.mubr.bf16.mxu0 %v16226_v41  ;;  %v13068_v30 = vcombine.low %v6456_v26, %v6460_v44 }
 0x548   : > { %8132 = vmatpush1.bf16.msra.mxu0 %v13052_v45  ;;  %8224 = vmatprep.mubr.bf16.mxu1 %v16226_v41  ;;  %v13079_v41 = vcombine.high %v6465_v9, %v6469_v10  ;;  %v13111_v45 = vcombine.high %v6497_v8, %v6501_v35 }
 0x549   : > { %8234 = vmatpush1.bf16.msra.mxu1 %v13054_v29  ;;  %8133 = vmatprep.subr.bf16.mxu0 %v13061_v58  ;;  %v6504_v29 = vld [vmem:[#allocation8 + $0x1610] sm:$0xff] }
 0x54a   : > { %8235 = vmatprep.subr.bf16.mxu1 %v13063_v31  ;;  %v6508_v58 = vld [vmem:[#allocation8 + $0x1630] sm:$0xff] }
 0x54c   : > { %8134 = vmatpush1.bf16.msra.mxu0 %v13060_v48 }
 0x54d   : > { %8236 = vmatpush1.bf16.msra.mxu1 %v13062_v40  ;;  %8135 = vmatprep.subr.bf16.mxu0 %v13069_v22 }
 0x54e   : > { %8123 = vmatmul.mubr.bf16.gmra.mrb[92].mxu0 %v16251_v61  ;;  %8237 = vmatprep.subr.bf16.mxu1 %v13071_v15  ;;  %v13108_v15 = vcombine.low %v6496_v14, %v6500_v0 }
 0x54f   : > { %8225 = vmatmul.mubr.bf16.gmra.mrb[88].mxu1 %v16251_v61  ;;  %8163 = vmatprep.mubr.bf16.mxu0 %v16273_v52  ;;  %v13084_v61 = vcombine.low %v6472_v25, %v6476_v23  ;;  %v6513_v25 = vld [vmem:[#allocation8 + $0x1658] sm:$0xff]  ;;  %v13116_v23 = vcombine.low %v6504_v29, %v6508_v58 }
 0x550   : > { %8136 = vmatpush1.bf16.msra.mxu0 %v13068_v30  ;;  %8265 = vmatprep.mubr.bf16.mxu1 %v16273_v52  ;;  %v6488_v52 = vld [vmem:[#allocation8 + $0x1590] sm:$0xff]  ;;  %v13117_v30 = vcombine.high %v6504_v29, %v6508_v58 }
 0x551   : > { %8238 = vmatpush1.bf16.msra.mxu1 %v13070_v54  ;;  %8137 = vmatprep.subr.bf16.mxu0 %v13077_v3  ;;  %v13101_v46 = vcombine.high %v6488_v52, %v6492_v55  ;;  %v13100_v4 = vcombine.low %v6488_v52, %v6492_v55  ;;  %v13119_v3 = vcombine.high %v6505_v19, %v6509_v7  ;;  %v6556_v19 = vld [vmem:[#allocation8 + $0x17b0] sm:$0xff]  ;;  %v6553_v7 = vld [vmem:[#allocation8 + $0x1798] sm:$0xff] }
 0x552   : > { %8239 = vmatprep.subr.bf16.mxu1 %v13079_v41  ;;  %v6516_v41 = vld [vmem:[#allocation8 + $0x1670] sm:$0xff] }
 0x554   : > { %8138 = vmatpush1.bf16.msra.mxu0 %v13076_v24  ;;  %v6520_v24 = vld [vmem:[#allocation8 + $0x1690] sm:$0xff] }
 0x555   : > { %8240 = vmatpush1.bf16.msra.mxu1 %v13078_v6  ;;  %8139 = vmatprep.subr.bf16.mxu0 %v13085_v21  ;;  %v6524_v6 = vld [vmem:[#allocation8 + $0x16b0] sm:$0xff]  ;;  %v6521_v21 = vld [vmem:[#allocation8 + $0x1698] sm:$0xff] }
 0x556   : > { %8241 = vmatprep.subr.bf16.mxu1 %v13087_v51  ;;  %v6525_v51 = vld [vmem:[#allocation8 + $0x16b8] sm:$0xff]  ;;  %v13133_v28 = vcombine.high %v6520_v24, %v6524_v6  ;;  %v13132_v52 = vcombine.low %v6520_v24, %v6524_v6 }
 0x557   : > { %v13135_v50 = vcombine.high %v6521_v21, %v6525_v51  ;;  %v13134_v55 = vcombine.low %v6521_v21, %v6525_v51 }
 0x558   : > { %8140 = vmatpush1.bf16.msra.mxu0 %v13084_v61  ;;  %v6528_v61 = vld [vmem:[#allocation8 + $0x16d0] sm:$0xff] }
 0x559   : > { %8242 = vmatpush1.bf16.msra.mxu1 %v13086_v18  ;;  %8141 = vmatprep.subr.bf16.mxu0 %v13093_v63  ;;  %v6532_v18 = vld [vmem:[#allocation8 + $0x16f0] sm:$0xff]  ;;  %v6529_v63 = vld [vmem:[#allocation8 + $0x16d8] sm:$0xff] }
 0x55a   : > { %8243 = vmatprep.subr.bf16.mxu1 %v13095_v59  ;;  %v6533_v59 = vld [vmem:[#allocation8 + $0x16f8] sm:$0xff]  ;;  %v13141_v13 = vcombine.high %v6528_v61, %v6532_v18  ;;  %v13140_v14 = vcombine.low %v6528_v61, %v6532_v18  ;;  %v14303_v61 = vld [vmem:[#allocation11 + $0xc0] sm:$0xff]  }
 0x55b   : > { %v13143_v42 = vcombine.high %v6529_v63, %v6533_v59  ;;  %v13142_v0 = vcombine.low %v6529_v63, %v6533_v59  ;;  %v14304_v18 = vld [vmem:[#allocation11] sm:$0xff]   ;;  %v14306_v59 = vld [vmem:[#allocation11 + $0x48] sm:$0xff]  }
 0x55c   : > { %8142 = vmatpush1.bf16.msra.mxu0 %v13092_v32  ;;  %v6536_v32 = vld [vmem:[#allocation8 + $0x1710] sm:$0xff]  ;;  %v14305_v63 = vld [vmem:[#allocation11 + $0x80] sm:$0xff]  }
 0x55d   : > { %8244 = vmatpush1.bf16.msra.mxu1 %v13094_v39  ;;  %8143 = vmatprep.subr.bf16.mxu0 %v13101_v46  ;;  %v6540_v39 = vld [vmem:[#allocation8 + $0x1730] sm:$0xff]  ;;  %v6537_v46 = vld [vmem:[#allocation8 + $0x1718] sm:$0xff] }
 0x55e   : > { %8245 = vmatprep.subr.bf16.mxu1 %v13103_v20  ;;  %v6198_v38 = vpop.f32.mrb[80].mxu0  ;;  %v6541_v20 = vld [vmem:[#allocation8 + $0x1738] sm:$0xff] }
 0x55f   : > { %v16328_v31 = vadd.f32 %v6198_v38, %v16308_v11  ;;  %v6300_v26 = vpop.f32.mrb[76].mxu1  ;;  %v6200_v44 = vpop.f32.mrb[81].mxu0  ;;  %v13110_v11 = vcombine.low %v6497_v8, %v6501_v35  ;;  %v13149_v8 = vcombine.high %v6536_v32, %v6540_v39  ;;  %v13151_v35 = vcombine.high %v6537_v46, %v6541_v20  ;;  %v6549_v38 = vld [vmem:[#allocation8 + $0x1778] sm:$0xff] }
 0x560   : > { %8144 = vmatpush1.bf16.msra.mxu0 %v13100_v4  ;;  %v16331_v48 = vadd.f32 %v6300_v26, %v16311_v2  ;;  %v16334_v40 = vadd.f32 %v6200_v44, %v16314_v49  ;;  %v6302_v22 = vpop.f32.mrb[77].mxu1  ;;  %v6202_v27 = vpop.f32.mrb[82].mxu0  ;;  %v6512_v2 = vld [vmem:[#allocation8 + $0x1650] sm:$0xff]  ;;  %v6517_v49 = vld [vmem:[#allocation8 + $0x1678] sm:$0xff]  ;;  %v13150_v29 = vcombine.low %v6537_v46, %v6541_v20  ;;  %v14314_v46 = vld [vmem:[#allocation11 + $0x58] sm:$0xff]  }
 0x561   : > { %8246 = vmatpush1.bf16.msra.mxu1 %v13102_v17  ;;  %v16337_v12 = vadd.f32 %v6302_v22, %v16317_v1  ;;  %8145 = vmatprep.subr.bf16.mxu0 %v13109_v36  ;;  %v6304_v9 = vpop.f32.mrb[78].mxu1  ;;  %v6203_v10 = vpop.f32.mrb[83].mxu0  ;;  %v13125_v57 = vcombine.high %v6512_v2, %v6516_v41  ;;  %v13127_v1 = vcombine.high %v6513_v25, %v6517_v49  ;;  %v6544_v4 = vld [vmem:[#allocation8 + $0x1750] sm:$0xff]  ;;  %v6545_v36 = vld [vmem:[#allocation8 + $0x1758] sm:$0xff] }
 0x562   : > { %8247 = vmatprep.subr.bf16.mxu1 %v13111_v45  ;;  %v6305_v54 = vpop.f32.mrb[79].mxu1  ;;  %v13124_v56 = vcombine.low %v6512_v2, %v6516_v41  ;;  %v13126_v34 = vcombine.low %v6513_v25, %v6517_v49  ;;  %v6548_v17 = vld [vmem:[#allocation8 + $0x1770] sm:$0xff]  ;;  %v13148_v45 = vcombine.low %v6536_v32, %v6540_v39  ;;  %v13159_v26 = vcombine.high %v6545_v36, %v6549_v38  ;;  %v6557_v22 = vld [vmem:[#allocation8 + $0x17b8] sm:$0xff] }
 0x563   : > { %v13157_v58 = vcombine.high %v6544_v4, %v6548_v17  ;;  %v6552_v44 = vld [vmem:[#allocation8 + $0x1790] sm:$0xff]  ;;  %v13158_v27 = vcombine.low %v6545_v36, %v6549_v38  ;;  %v13167_v9 = vcombine.high %v6553_v7, %v6557_v22  ;;  %v6561_v54 = vld [vmem:[#allocation8 + $0x17d8] sm:$0xff]  ;;  %v13166_v41 = vcombine.low %v6553_v7, %v6557_v22  ;;  %v14321_v36 = vld [vmem:[#allocation11 + $0xa0] sm:$0xff]  }
 0x564   : > { %8146 = vmatpush1.bf16.msra.mxu0 %v13108_v15  ;;  %v13156_v15 = vcombine.low %v6544_v4, %v6548_v17  ;;  %v6560_v10 = vld [vmem:[#allocation8 + $0x17d0] sm:$0xff]  ;;  %v13164_v2 = vcombine.low %v6552_v44, %v6556_v19  ;;  %v14311_v32 = vld [vmem:[#allocation11 + $0xd0] sm:$0xff]   ;;  %v14319_v4 = vld [vmem:[#allocation11 + $0xe0] sm:$0xff]   ;;  %v16764_v22 = vsub.s32 1, %v15704_v53 }
 0x565   : > { %8248 = vmatpush1.bf16.msra.mxu1 %v13110_v11  ;;  %8147 = vmatprep.subr.bf16.mxu0 %v13117_v30  ;;  %v13165_v11 = vcombine.high %v6552_v44, %v6556_v19  ;;  %v6564_v30 = vld [vmem:[#allocation8 + $0x17f0] sm:$0xff]  ;;  %v14312_v39 = vld [vmem:[#allocation11 + $0x10] sm:$0xff]   ;;  %v14320_v17 = vld [vmem:[#allocation11 + $0x20] sm:$0xff]   ;;  %v16763_v19 = vsub.s32 2, %v15704_v53 }
 0x566   : > { %8249 = vmatprep.subr.bf16.mxu1 %v13119_v3  ;;  %v6565_v3 = vld [vmem:[#allocation8 + $0x17f8] sm:$0xff]  ;;  %v13173_v25 = vcombine.high %v6560_v10, %v6564_v30  ;;  %v16360_v38 = vld [vmem:[#allocation9] sm:$0xff] }
 0x567   : > { %v13175_v49 = vcombine.high %v6561_v54, %v6565_v3  ;;  %v14313_v20 = vld [vmem:[#allocation11 + $0x90] sm:$0xff]   ;;  %v16376_v7 = vrot.slane %v16360_v38, %v16763_v19 }
 0x568   : > { %8148 = vmatpush1.bf16.msra.mxu0 %v13116_v23  ;;  %v13172_v23 = vcombine.low %v6560_v10, %v6564_v30 }
 0x569   : > { %8250 = vmatpush1.bf16.msra.mxu1 %v13118_v60  ;;  %8149 = vmatprep.subr.bf16.mxu0 %v13125_v57  ;;  %v13174_v60 = vcombine.low %v6561_v54, %v6565_v3 }
 0x56a   : > { %8251 = vmatprep.subr.bf16.mxu1 %v13127_v1 }
 0x56c   : > { %8150 = vmatpush1.bf16.msra.mxu0 %v13124_v56 }
 0x56d   : > { %8252 = vmatpush1.bf16.msra.mxu1 %v13126_v34  ;;  %8151 = vmatprep.subr.bf16.mxu0 %v13133_v28  ;;  %v8412_v34 = vld [vmem:[#allocation12] sm:$0xf] }
 0x56e   : > { %8253 = vmatprep.subr.bf16.mxu1 %v13135_v50  ;;  %v8411_v28 = vld [vmem:[%s518_s24] sm:$0x1] }
 0x56f   : > { %v14302_v50 = vld [vmem:[#allocation11 + $0x40] sm:$0xff]  }
 0x570   : > { %8152 = vmatpush1.bf16.msra.mxu0 %v13132_v52  ;;  %v14307_v52 = vld [vmem:[#allocation11 + $0xc8] sm:$0xff]  }
 0x571   : > { %8254 = vmatpush1.bf16.msra.mxu1 %v13134_v55  ;;  %8153 = vmatprep.subr.bf16.mxu0 %v13141_v13  ;;  %v14308_v55 = vld [vmem:[#allocation11 + $0x8] sm:$0xff]   ;;  %v14310_v13 = vld [vmem:[#allocation11 + $0x50] sm:$0xff]  }
 0x572   : > { %8255 = vmatprep.subr.bf16.mxu1 %v13143_v42  ;;  %v14309_v42 = vld [vmem:[#allocation11 + $0x88] sm:$0xff]  }
 0x574   : > { %8154 = vmatpush1.bf16.msra.mxu0 %v13140_v14  ;;  %v14315_v14 = vld [vmem:[#allocation11 + $0xd8] sm:$0xff]  }
 0x575   : > { %8256 = vmatpush1.bf16.msra.mxu1 %v13142_v0  ;;  %8155 = vmatprep.subr.bf16.mxu0 %v13149_v8  ;;  %v14316_v0 = vld [vmem:[#allocation11 + $0x18] sm:$0xff]   ;;  %v14318_v8 = vld [vmem:[#allocation11 + $0x60] sm:$0xff]  }
 0x576   : > { %8257 = vmatprep.subr.bf16.mxu1 %v13151_v35  ;;  %v14317_v35 = vld [vmem:[#allocation11 + $0x98] sm:$0xff]  }
 0x578   : > { %8156 = vmatpush1.bf16.msra.mxu0 %v13148_v45 }
 0x579   : > { %8258 = vmatpush1.bf16.msra.mxu1 %v13150_v29  ;;  %8157 = vmatprep.subr.bf16.mxu0 %v13157_v58  ;;  %v16762_v29 = vsub.s32 0, %v15704_v53 }
 0x57a   : > { %8259 = vmatprep.subr.bf16.mxu1 %v13159_v26 }
 0x57b   : > { %v16367_v58 = vrot.slane %v16360_v38, %v16762_v29 }
 0x57c   : > { %8158 = vmatpush1.bf16.msra.mxu0 %v13156_v15  ;;  %v16381_v15 = vrot.slane %v16360_v38, %v16764_v22 }
 0x57d   : > { %8260 = vmatpush1.bf16.msra.mxu1 %v13158_v27  ;;  %8159 = vmatprep.subr.bf16.mxu0 %v13165_v11 }
 0x57e   : > { %8261 = vmatprep.subr.bf16.mxu1 %v13167_v9  ;;  %v16765_v9 = vsub.s32 3, %v15704_v53 }
 0x580   : > { %8160 = vmatpush1.bf16.msra.mxu0 %v13164_v2  ;;  %v16388_v10 = vrot.slane %v16360_v38, %v16765_v9 }
 0x581   : > { %8262 = vmatpush1.bf16.msra.mxu1 %v13166_v41  ;;  %8161 = vmatprep.subr.bf16.mxu0 %v13173_v25 }
 0x582   : > { %8263 = vmatprep.subr.bf16.mxu1 %v13175_v49 }
 0x584   : > { %8162 = vmatpush1.bf16.msra.mxu0 %v13172_v23 }
 0x585   : > { %8264 = vmatpush1.bf16.msra.mxu1 %v13174_v60 }
 0x586   : > { %13520 = vmatprep.subr.bf16.mxu1 %v14302_v50 }
 0x587   : > { %8164 = vmatmul.mubr.bf16.vlgmr.msra.gmra.mrb[56].mxu0 %v16297_v43 }
 0x588   : > { %8266 = vmatmul.mubr.bf16.vlgmr.msra.gmra.mrb[52].mxu1 %v16297_v43  ;;  %8173 = vmatprep.mubr.bf16.mxu0 %v16268_v33 }
 0x589   : > { %8275 = vmatprep.mubr.bf16.mxu1 %v16268_v33  ;;  %v14982_v33 = vmov 0.0   ;;  %13521 = vmatpush3.bf16.msra.mxu1 %v14304_v18 }
 0x58a   : > { %13969 = vmatprep.subr.bf16.mxu0 %v14982_v33  ;;  %13522 = vmatprep.subr.bf16.mxu1 %v14306_v59 }
 0x58d   : > { %13523 = vmatpush3.bf16.msra.mxu1 %v14308_v55 }
 0x58e   : > { %13524 = vmatprep.subr.bf16.mxu1 %v14310_v13  ;;  %v14323_v13 = vld [vmem:[#allocation11 + $0xe8] sm:$0xff]  }
 0x58f   : > { %8174 = vmatmul.mubr.bf16.gmra.mrb[96].mxu0 %v16293_v47 }
 0x590   : > { %8276 = vmatmul.mubr.bf16.gmra.mrb[92].mxu1 %v16293_v47  ;;  %v8419_v47 = vsel %vm8417_vm13, %v8412_v34, 0  ;;  %13971 = vmatprep.mubr.msk.bf16.mxu0 %vm14983_vm7, %v14982_v33 }
 0x591   : > { %13970 = vmatpush3.bf16.msra.mxu0 %v8419_v47  ;;  %13525 = vmatpush3.bf16.msra.mxu1 %v14312_v39  ;;  %v14329_v39 = vld [vmem:[#allocation11 + $0xb0] sm:$0xff]  }
 0x592   : > { %13542 = vmatprep.subr.bf16.mxu0 %v14303_v61  ;;  %13526 = vmatprep.subr.bf16.mxu1 %v14314_v46  ;;  %v14330_v46 = vld [vmem:[#allocation11 + $0x78] sm:$0xff]  }
 0x595   : > { %13527 = vmatpush3.bf16.msra.mxu1 %v14316_v0  ;;  %v14333_v0 = vld [vmem:[#allocation11 + $0xb8] sm:$0xff]  }
 0x596   : > { %13528 = vmatprep.subr.bf16.mxu1 %v14318_v8  ;;  %v14334_v8 = vld [vmem:[#allocation11 + $0x140] sm:$0xff]  }
 0x597   : > { %13972 = vmatmul.mubr.msk.bf16.vlgmr.msra.gmra.mrb[100].mxu0 %vm8413_vm2, %v8411_v28 }
 0x598   : > { %13543 = vmatpush3.bf16.msra.mxu0 %v14305_v63 }
 0x599   : > { %13544 = vmatprep.subr.bf16.mxu0 %v14307_v52  ;;  %13529 = vmatpush3.bf16.msra.mxu1 %v14320_v17 }
 0x59c   : > { %13545 = vmatpush3.bf16.msra.mxu0 %v14309_v42  ;;  %v14325_v42 = vld [vmem:[#allocation11 + $0xa8] sm:$0xff]  }
 0x59d   : > { %13546 = vmatprep.subr.bf16.mxu0 %v14311_v32  ;;  %v14327_v32 = vld [vmem:[#allocation11 + $0xf0] sm:$0xff]  }
 0x59f   : > { %v16345_v57 = vpop.f32.mrb[84].mxu0 }
 0x5a0   : > { %v16347_v1 = vpop.f32.mrb[80].mxu1  ;;  %v16349_v24 = vpop.f32.mrb[85].mxu0  ;;  %13547 = vmatpush3.bf16.msra.mxu0 %v14313_v20  ;;  %v14331_v20 = vld [vmem:[#allocation11 + $0xf8] sm:$0xff]  }
 0x5a1   : > { %v16351_v6 = vpop.f32.mrb[81].mxu1  ;;  %v7924_v21 = vpop.f32.mrb[86].mxu0  ;;  %13548 = vmatprep.subr.bf16.mxu0 %v14315_v14  ;;  %v14332_v14 = vld [vmem:[#allocation11 + $0x38] sm:$0xff]  }
 0x5a2   : > { %v8026_v51 = vpop.f32.mrb[82].mxu1  ;;  %v7925_v56 = vpop.f32.mrb[87].mxu0 }
 0x5a3   : > { %v8027_v43 = vpop.f32.mrb[83].mxu1 }
 0x5a4   : > { %13549 = vmatpush3.bf16.msra.mxu0 %v14317_v35  ;;  %v14335_v35 = vld [vmem:[#allocation11 + $0x1c0] sm:$0xff]  }
 0x5a5   : > { %13550 = vmatprep.subr.bf16.mxu0 %v14319_v4 }
 0x5a8   : > { %13551 = vmatpush3.bf16.msra.mxu0 %v14321_v36 }
 0x5a9   : > { %13552 = vmatprep.subr.bf16.mxu0 %v14323_v13 }
 0x5ac   : > { %13553 = vmatpush3.bf16.msra.mxu0 %v14325_v42 }
 0x5ad   : > { %13554 = vmatprep.subr.bf16.mxu0 %v14327_v32 }
 0x5b0   : > { %13555 = vmatpush3.bf16.msra.mxu0 %v14329_v39 }
 0x5b1   : > { %13556 = vmatprep.subr.bf16.mxu0 %v14331_v20 }
 0x5b4   : > { %13557 = vmatpush3.bf16.msra.mxu0 %v14333_v0 }
 0x5b5   : > { %13586 = vmatprep.subr.bf16.mxu0 %v14335_v35 }
 0x5d8   : > { %v16362_v45 = vpop.f32.mrb[44].mxu0 }
 0x5d9   : > { %v16369_v26 = vpop.f32.mrb[40].mxu1  ;;  %v16371_v44 = vpop.f32.mrb[45].mxu0 }
 0x5da   : > { %v16383_v27 = vpop.f32.mrb[41].mxu1  ;;  %v7965_v11 = vpop.f32.mrb[46].mxu0 }
 0x5db   : > { %v16391_v30 = vadd.f32 %v16367_v58, %v7965_v11  ;;  %v8067_v54 = vpop.f32.mrb[42].mxu1  ;;  %v7967_v3 = vpop.f32.mrb[47].mxu0 }
 0x5dc   : > { %v16394_v2 = vadd.f32 %v16376_v7, %v8067_v54  ;;  %v16397_v41 = vadd.f32 %v16381_v15, %v7967_v3  ;;  %v8069_v25 = vpop.f32.mrb[43].mxu1  ;;  %v8350_v54 = vadd.f32 %v16367_v58, %v16362_v45  ;;  %v8352_v3 = vadd.f32 %v16376_v7, %v16369_v26 }
 0x5dd   : > { %v16400_v49 = vadd.f32 %v16388_v10, %v8069_v25  ;;  %v8351_v25 = vadd.f32 %v16381_v15, %v16371_v44  ;;  %v16768_v45 = vsub.s32 5, %v15704_v53  ;;  %v16769_v26 = vsub.s32 7, %v15704_v53 }
 0x5df   : > { %v16456_v44 = vrot.slane %v16360_v38, %v16769_v26 }
 0x5e0   : > { %v7971_v23 = vpop.f32.mrb[88].mxu0 }
 0x5e1   : > { %v7972_v60 = vadd.f32 %v7971_v23, %v16345_v57  ;;  %v8073_v21 = vpop.f32.mrb[84].mxu1  ;;  %v7973_v51 = vpop.f32.mrb[89].mxu0  ;;  %v8353_v23 = vadd.f32 %v16388_v10, %v16383_v27 }
 0x5e2   : > { %v8074_v56 = vadd.f32 %v8073_v21, %v16347_v1  ;;  %v7974_v43 = vadd.f32 %v7973_v51, %v16349_v24  ;;  %v8075_v34 = vpop.f32.mrb[85].mxu1  ;;  %v7975_v47 = vpop.f32.mrb[90].mxu0  ;;  %v16767_v51 = vsub.s32 6, %v15704_v53 }
 0x5e3   : > { %v8300_v28 = vadd.f32 %v7972_v60, %v16279_v5  ;;  %v8076_v50 = vadd.f32 %v8075_v34, %v16351_v6  ;;  %v8077_v61 = vpop.f32.mrb[86].mxu1  ;;  %v7976_v18 = vpop.f32.mrb[91].mxu0  ;;  %v14322_v6 = vld [vmem:[#allocation11 + $0x68] sm:$0xff]   ;;  %v16766_v60 = vsub.s32 4, %v15704_v53  ;;  %v8382_v34 = vmax.f32 %v16391_v30, 0.0 }
 0x5e4   : > { %v8302_v63 = vadd.f32 %v8074_v56, %v16282_v16  ;;  %v8301_v59 = vadd.f32 %v7974_v43, %v16285_v62  ;;  %v8078_v52 = vpop.f32.mrb[87].mxu1  ;;  %v14324_v16 = vld [vmem:[#allocation11 + $0x28] sm:$0xff]   ;;  %v14326_v62 = vld [vmem:[#allocation11 + $0x70] sm:$0xff]   ;;  %13530 = vmatprep.subr.bf16.mxu1 %v14322_v6  ;;  %v16446_v56 = vrot.slane %v16360_v38, %v16767_v51  ;;  %v8377_v43 = vmax.f32 %v8353_v23, 0.0 }
 0x5e5   : > { %v16410_v57 = vadd.f32 %v16367_v58, %v8300_v28  ;;  %v8303_v1 = vadd.f32 %v8076_v50, %v16288_v37  ;;  %13531 = vmatpush3.bf16.msra.mxu1 %v14324_v16  ;;  %v14328_v37 = vld [vmem:[#allocation11 + $0x30] sm:$0xff]   ;;  %v16441_v21 = vrot.slane %v16360_v38, %v16766_v60  ;;  %v16451_v58 = vrot.slane %v16360_v38, %v16768_v45 }
 0x5e6   : > { %v16414_v24 = vadd.f32 %v16376_v7, %v8302_v63  ;;  %v16417_v55 = vadd.f32 %v16381_v15, %v8301_v59  ;;  %13532 = vmatprep.subr.bf16.mxu1 %v14326_v62  ;;  %v8374_v7 = vmax.f32 %v8350_v54, 0.0  ;;  %v8376_v15 = vmax.f32 %v8352_v3, 0.0 }
 0x5e7   : > { %v16420_v5 = vadd.f32 %v16388_v10, %v8303_v1  ;;  %v8375_v10 = vmax.f32 %v8351_v25, 0.0  ;;  %v8384_v61 = vmax.f32 %v16394_v2, 0.0  ;;  %v8383_v18 = vmax.f32 %v16397_v41, 0.0 }
 0x5e8   : > { %v8385_v52 = vmax.f32 %v16400_v49, 0.0 }
 0x5e9   : > { %13533 = vmatpush3.bf16.msra.mxu1 %v14328_v37 }
 0x5ea   : > { %13534 = vmatprep.subr.bf16.mxu1 %v14330_v46 }
 0x5ed   : > { %13535 = vmatpush3.bf16.msra.mxu1 %v14332_v14 }
 0x5ee   : > { %13564 = vmatprep.subr.bf16.mxu1 %v14334_v8 }
 0x621   : > { %v16422_v4 = vpop.f32.mrb[92].mxu0 }
 0x622   : > { %v16424_v17 = vpop.f32.mrb[88].mxu1  ;;  %v16426_v36 = vpop.f32.mrb[93].mxu0 }
 0x623   : > { %v16428_v29 = vpop.f32.mrb[89].mxu1  ;;  %v8128_v19 = vpop.f32.mrb[94].mxu0 }
 0x624   : > { %v8230_v22 = vpop.f32.mrb[90].mxu1  ;;  %v8129_v11 = vpop.f32.mrb[95].mxu0 }
 0x625   : > { %v8231_v9 = vpop.f32.mrb[91].mxu1 }
 0x65a   : > { %v8165_v27 = vpop.f32.mrb[56].mxu0 }
 0x65b   : > { %v8354_v47 = vadd.f32 %v16441_v21, %v8165_v27  ;;  %v8267_v28 = vpop.f32.mrb[52].mxu1  ;;  %v8167_v50 = vpop.f32.mrb[57].mxu0 }
 0x65c   : > { %v8356_v53 = vadd.f32 %v16446_v56, %v8267_v28  ;;  %v8355_v38 = vadd.f32 %v16451_v58, %v8167_v50  ;;  %v8269_v63 = vpop.f32.mrb[53].mxu1  ;;  %v8169_v59 = vpop.f32.mrb[58].mxu0 }
 0x65d   : > { %v8378_v1 = vmax.f32 %v8354_v47, 0.0  ;;  %v8357_v6 = vadd.f32 %v16456_v44, %v8269_v63  ;;  %v8362_v30 = vadd.f32 %v16441_v21, %v8169_v59  ;;  %v8271_v13 = vpop.f32.mrb[54].mxu1  ;;  %v8171_v16 = vpop.f32.mrb[59].mxu0  ;;  %v14337_v59 = vld [vmem:[#allocation11 + $0x180] sm:$0xff]  }
 0x65e   : > { %v8380_v42 = vmax.f32 %v8356_v53, 0.0  ;;  %v8379_v62 = vmax.f32 %v8355_v38, 0.0  ;;  %v8364_v2 = vadd.f32 %v16446_v56, %v8271_v13  ;;  %v8363_v41 = vadd.f32 %v16451_v58, %v8171_v16  ;;  %v8273_v32 = vpop.f32.mrb[55].mxu1  ;;  %v14336_v53 = vld [vmem:[#allocation11 + $0x100] sm:$0xff]  }
 0x65f   : > { %v8398_v37 = vmax.f32 %v8374_v7, %v8378_v1  ;;  %v8381_v39 = vmax.f32 %v8357_v6, 0.0  ;;  %v8386_v46 = vmax.f32 %v8362_v30, 0.0  ;;  %v8365_v20 = vadd.f32 %v16456_v44, %v8273_v32  ;;  %v14338_v30 = vld [vmem:[#allocation11 + $0x148] sm:$0xff]   ;;  %v14342_v32 = vld [vmem:[#allocation11 + $0x150] sm:$0xff]  }
 0x660   : > { %v8400_v49 = vmax.f32 %v8376_v15, %v8380_v42  ;;  %v8399_v14 = vmax.f32 %v8375_v10, %v8379_v62  ;;  %v8388_v0 = vmax.f32 %v8364_v2, 0.0  ;;  %v8387_v8 = vmax.f32 %v8363_v41, 0.0  ;;  %v14339_v42 = vld [vmem:[#allocation11 + $0x1c8] sm:$0xff]  }
 0x661   : > { %v8466_v35 = vrot.slane %v8398_v37, 1  ;;  %v8401_v19 = vmax.f32 %v8377_v43, %v8381_v39  ;;  %v16470_v22 = vmax.f32 %v8382_v34, %v8386_v46  ;;  %v8389_v11 = vmax.f32 %v8365_v20, 0.0  ;;  %v14340_v2 = vld [vmem:[#allocation11 + $0x108] sm:$0xff]  }
 0x662   : > { %v8468_v9 = vrot.slane %v8400_v49, 1  ;;  %v8467_v54 = vrot.slane %v8399_v14, 1  ;;  %v16472_v3 = vmax.f32 %v8384_v61, %v8388_v0  ;;  %v16474_v25 = vmax.f32 %v8383_v18, %v8387_v8  ;;  %v8175_v23 = vpop.f32.mrb[96].mxu0  ;;  %v14341_v41 = vld [vmem:[#allocation11 + $0x188] sm:$0xff]   ;;  %v14346_v8 = vld [vmem:[#allocation11 + $0x158] sm:$0xff]  }
 0x663   : > { %v8474_v60 = vmax.f32 %v8398_v37, %v8466_v35  ;;  %v8469_v51 = vrot.slane %v8401_v19, 1  ;;  %v16476_v45 = vmax.f32 %v8385_v52, %v8389_v11  ;;  %v8277_v26 = vpop.f32.mrb[92].mxu1  ;;  %v8177_v7 = vpop.f32.mrb[97].mxu0  ;;  %v8176_v63 = vadd.f32 %v8175_v23, %v16422_v4  ;;  %v14349_v11 = vld [vmem:[#allocation11 + $0x198] sm:$0xff]  }
 0x664   : > { %v8476_v15 = vmax.f32 %v8400_v49, %v8468_v9  ;;  %v8475_v27 = vmax.f32 %v8399_v14, %v8467_v54  ;;  %v8279_v10 = vpop.f32.mrb[93].mxu1  ;;  %v8179_v43 = vpop.f32.mrb[98].mxu0  ;;  %v8278_v1 = vadd.f32 %v8277_v26, %v16424_v17  ;;  %v8178_v6 = vadd.f32 %v8177_v7, %v16426_v36  ;;  %v14344_v49 = vld [vmem:[#allocation11 + $0x110] sm:$0xff]   ;;  %v14350_v9 = vld [vmem:[#allocation11 + $0x160] sm:$0xff]   ;;  %v14356_v7 = vld [vmem:[#allocation11 + $0x128] sm:$0xff]  }
 0x665   : > { %v8477_v34 = vmax.f32 %v8401_v19, %v8469_v51  ;;  %v8281_v47 = vpop.f32.mrb[94].mxu1  ;;  %v8180_v28 = vpop.f32.mrb[99].mxu0  ;;  %v16480_v18 = vpack.c.bf16 %v8474_v60, %v8474_v60  ;;  %v8304_v13 = vadd.f32 %v8176_v63, %v16328_v31  ;;  %v8280_v16 = vadd.f32 %v8279_v10, %v16428_v29  ;;  %v14351_v60 = vld [vmem:[#allocation11 + $0x1e0] sm:$0xff]   ;;  %v14359_v10 = vld [vmem:[#allocation11 + $0x1f0] sm:$0xff]  }
 0x666   : > { %v16478_v50 = vpack.c.bf16 %v8475_v27, %v8475_v27  ;;  %v8282_v61 = vpop.f32.mrb[95].mxu1  ;;  %v16485_v52 = vpack.c.bf16 %v8476_v15, %v8476_v15  ;;  %v8306_v62 = vadd.f32 %v8278_v1, %v16331_v48  ;;  %v8305_v17 = vadd.f32 %v8178_v6, %v16334_v40  ;;  %v14343_v40 = vld [vmem:[#allocation11 + $0x1d0] sm:$0xff]   ;;  %v14352_v51 = vld [vmem:[#allocation11 + $0x120] sm:$0xff]   ;;  %v14357_v15 = vld [vmem:[#allocation11 + $0x1a8] sm:$0xff]  }
 0x667   : > { %v16482_v38 = vpack.c.bf16 %v8477_v34, %v8477_v34  ;;  %v8370_v31 = vadd.f32 %v16441_v21, %v8304_v13  ;;  %v8307_v29 = vadd.f32 %v8280_v16, %v16337_v12  ;;  %v8390_v39 = vmax.f32 %v16410_v57, 0.0  ;;  %v14347_v57 = vld [vmem:[#allocation11 + $0x1d8] sm:$0xff]   ;;  %v14353_v26 = vld [vmem:[#allocation11 + $0x1a0] sm:$0xff]   ;;  %v14358_v27 = vld [vmem:[#allocation11 + $0x170] sm:$0xff]  }
 0x668   : > { %8770 = vmatprep.mubr.bf16.mxu1 %v16478_v50  ;;  %v8889_v4 = vrot.slane %v16478_v50, 1  ;;  %v8372_v37 = vadd.f32 %v16446_v56, %v8306_v62  ;;  %v8371_v48 = vadd.f32 %v16451_v58, %v8305_v17  ;;  %v8392_v21 = vmax.f32 %v16414_v24, 0.0  ;;  %v14345_v58 = vld [vmem:[#allocation11 + $0x190] sm:$0xff]   ;;  %v14348_v24 = vld [vmem:[#allocation11 + $0x118] sm:$0xff]   ;;  %v14366_v63 = vld [vmem:[#allocation11 + $0x240] sm:$0xff]  }
 0x669   : > { %8810 = vmatprep.mubr.bf16.mxu0 %v16482_v38  ;;  %8771 = vmatmul.mubr.bf16.vlgmr.msra.gmra.mrb[96].mxu1 %v16480_v18  ;;  %v8891_v36 = vrot.slane %v16482_v38, 1  ;;  %v8394_v46 = vmax.f32 %v8370_v31, 0.0  ;;  %v8373_v20 = vadd.f32 %v16456_v44, %v8307_v29  ;;  %v8391_v44 = vmax.f32 %v16417_v55, 0.0  ;;  %v14354_v55 = vld [vmem:[#allocation11 + $0x168] sm:$0xff]   ;;  %v14360_v43 = vld [vmem:[#allocation11 + $0x130] sm:$0xff]   ;;  %v14362_v47 = vld [vmem:[#allocation11 + $0x178] sm:$0xff]  }
 0x66a   : > { %8811 = vmatmul.mubr.bf16.vlgmr.msra.gmra.mrb[104].mxu0 %v16485_v52  ;;  %13565 = vmatpush3.bf16.msra.mxu1 %v14336_v53  ;;  %v8396_v12 = vmax.f32 %v8372_v37, 0.0  ;;  %v8395_v0 = vmax.f32 %v8371_v48, 0.0  ;;  %v8393_v19 = vmax.f32 %v16420_v5, 0.0  ;;  %v14355_v5 = vld [vmem:[#allocation11 + $0x1e8] sm:$0xff]   ;;  %v14361_v34 = vld [vmem:[#allocation11 + $0x1b0] sm:$0xff]   ;;  %v14363_v28 = vld [vmem:[#allocation11 + $0x1f8] sm:$0xff]  }
 0x66b   : > { %13587 = vmatpush3.bf16.msra.mxu0 %v14337_v59  ;;  %9120 = vmatprep.mubr.bf16.mxu1 %v8889_v4  ;;  %v16506_v14 = vmax.f32 %v8390_v39, %v8394_v46  ;;  %v8397_v56 = vmax.f32 %v8373_v20, 0.0  ;;  %v14364_v61 = vld [vmem:[#allocation11 + $0x138] sm:$0xff]   ;;  %v14367_v59 = vld [vmem:[#allocation11 + $0x2c0] sm:$0xff]   ;;  %v8888_v6 = vrot.slane %v16480_v18, 1  ;;  %v8890_v13 = vrot.slane %v16485_v52, 1  ;;  %v14370_v16 = vld [vmem:[#allocation11 + $0x248] sm:$0xff]  }
 0x66c   : > { %9160 = vmatprep.mubr.bf16.mxu0 %v8891_v36  ;;  %13566 = vmatprep.subr.bf16.mxu1 %v14338_v30  ;;  %v16508_v35 = vmax.f32 %v8392_v21, %v8396_v12  ;;  %v16512_v54 = vmax.f32 %v8391_v44, %v8395_v0  ;;  %v14365_v53 = vld [vmem:[#allocation11 + $0x1b8] sm:$0xff]   ;;  %v14368_v1 = vld [vmem:[#allocation11 + $0x200] sm:$0xff]   ;;  %v9235_v4 = vrot.slane %v16478_v50, 2  ;;  %v9237_v62 = vrot.slane %v16482_v38, 2  ;;  %v14372_v17 = vld [vmem:[#allocation11 + $0x208] sm:$0xff]  }
 0x66d   : > { %13588 = vmatprep.subr.bf16.mxu0 %v14339_v42  ;;  %v16514_v23 = vmax.f32 %v8393_v19, %v8397_v56  ;;  %v14369_v30 = vld [vmem:[#allocation11 + $0x280] sm:$0xff]   ;;  %v14371_v42 = vld [vmem:[#allocation11 + $0x2c8] sm:$0xff]   ;;  %v14375_v31 = vld [vmem:[#allocation11 + $0x2d0] sm:$0xff]  }
 0x66e   : > { %13567 = vmatpush3.bf16.msra.mxu1 %v14340_v2  ;;  %v14373_v36 = vld [vmem:[#allocation11 + $0x288] sm:$0xff]   ;;  %v14374_v2 = vld [vmem:[#allocation11 + $0x250] sm:$0xff]   ;;  %v14379_v37 = vld [vmem:[#allocation11 + $0x2d8] sm:$0xff]  }
 0x66f   : > { %13589 = vmatpush3.bf16.msra.mxu0 %v14341_v41  ;;  %13568 = vmatprep.subr.bf16.mxu1 %v14342_v32  ;;  %v14376_v29 = vld [vmem:[#allocation11 + $0x210] sm:$0xff]   ;;  %v14378_v32 = vld [vmem:[#allocation11 + $0x258] sm:$0xff]   ;;  %v14382_v39 = vld [vmem:[#allocation11 + $0x260] sm:$0xff]  }
 0x670   : > { %13590 = vmatprep.subr.bf16.mxu0 %v14343_v40  ;;  %v14377_v41 = vld [vmem:[#allocation11 + $0x290] sm:$0xff]   ;;  %v14380_v48 = vld [vmem:[#allocation11 + $0x218] sm:$0xff]   ;;  %v14383_v46 = vld [vmem:[#allocation11 + $0x2e0] sm:$0xff]  }
 0x671   : > { %v14381_v40 = vld [vmem:[#allocation11 + $0x298] sm:$0xff]   ;;  %v14384_v20 = vld [vmem:[#allocation11 + $0x220] sm:$0xff]   ;;  %v14386_v12 = vld [vmem:[#allocation11 + $0x268] sm:$0xff]  }
 0x672   : > { %13569 = vmatpush3.bf16.msra.mxu1 %v14344_v49  ;;  %v14385_v21 = vld [vmem:[#allocation11 + $0x2a0] sm:$0xff]   ;;  %v14387_v49 = vld [vmem:[#allocation11 + $0x2e8] sm:$0xff]  }
 0x673   : > { %13591 = vmatpush3.bf16.msra.mxu0 %v14345_v58  ;;  %13570 = vmatprep.subr.bf16.mxu1 %v14346_v8  ;;  %v14388_v0 = vld [vmem:[#allocation11 + $0x228] sm:$0xff]   ;;  %v14390_v58 = vld [vmem:[#allocation11 + $0x270] sm:$0xff]   ;;  %v16520_v8 = vpop.f32.mrb[100].mxu0 }
 0x674   : > { %13592 = vmatprep.subr.bf16.mxu0 %v14347_v57  ;;  %v14389_v56 = vld [vmem:[#allocation11 + $0x2a8] sm:$0xff]   ;;  %v14391_v57 = vld [vmem:[#allocation11 + $0x2f0] sm:$0xff]   ;;  %v13973_v44 = vpop.f32.mrb[101].mxu0 }
 0x675   : > { %v8458_v19 = vpop.f32.mrb[102].mxu0  ;;  %v9580_v44 = vrot.slane %v16480_v18, 3 }
 0x676   : > { %13571 = vmatpush3.bf16.msra.mxu1 %v14348_v24  ;;  %v14392_v24 = vld [vmem:[#allocation11 + $0x230] sm:$0xff]   ;;  %v14433_v19 = vld [vmem:[#allocation11 + $0x480] sm:$0xff]  }
 0x677   : > { %13593 = vmatpush3.bf16.msra.mxu0 %v14349_v11  ;;  %13572 = vmatprep.subr.bf16.mxu1 %v14350_v9  ;;  %v13974_v11 = vpop.f32.mrb[103].mxu0  ;;  %v14393_v9 = vld [vmem:[#allocation11 + $0x2b0] sm:$0xff]  }
 0x678   : > { %13594 = vmatprep.subr.bf16.mxu0 %v14351_v60  ;;  %v14394_v60 = vld [vmem:[#allocation11 + $0x278] sm:$0xff]   ;;  %v14434_v11 = vld [vmem:[#allocation11 + $0x448] sm:$0xff]  }
 0x67a   : > { %13573 = vmatpush3.bf16.msra.mxu1 %v14352_v51  ;;  %v14395_v51 = vld [vmem:[#allocation11 + $0x2f8] sm:$0xff]  }
 0x67b   : > { %13595 = vmatpush3.bf16.msra.mxu0 %v14353_v26  ;;  %13574 = vmatprep.subr.bf16.mxu1 %v14354_v55  ;;  %v14396_v26 = vld [vmem:[#allocation11 + $0x238] sm:$0xff]  }
 0x67c   : > { %13596 = vmatprep.subr.bf16.mxu0 %v14355_v5  ;;  %v14397_v55 = vld [vmem:[#allocation11 + $0x2b8] sm:$0xff]   ;;  %v14398_v5 = vld [vmem:[#allocation11 + $0x340] sm:$0xff]  }
 0x67e   : > { %13575 = vmatpush3.bf16.msra.mxu1 %v14356_v7  ;;  %v14399_v7 = vld [vmem:[#allocation11 + $0x3c0] sm:$0xff]  }
 0x67f   : > { %13597 = vmatpush3.bf16.msra.mxu0 %v14357_v15  ;;  %13576 = vmatprep.subr.bf16.mxu1 %v14358_v27  ;;  %v14400_v15 = vld [vmem:[#allocation11 + $0x300] sm:$0xff]   ;;  %v9234_v27 = vrot.slane %v16480_v18, 2  ;;  %v14438_v18 = vld [vmem:[#allocation11 + $0x450] sm:$0xff]  }
 0x680   : > { %13598 = vmatprep.subr.bf16.mxu0 %v14359_v10  ;;  %v14401_v10 = vld [vmem:[#allocation11 + $0x380] sm:$0xff]  }
 0x682   : > { %13577 = vmatpush3.bf16.msra.mxu1 %v14360_v43  ;;  %v9236_v43 = vrot.slane %v16485_v52, 2 }
 0x683   : > { %13599 = vmatpush3.bf16.msra.mxu0 %v14361_v34  ;;  %13578 = vmatprep.subr.bf16.mxu1 %v14362_v47  ;;  %v14402_v34 = vld [vmem:[#allocation11 + $0x348] sm:$0xff]   ;;  %v9581_v47 = vrot.slane %v16478_v50, 3  ;;  %v14410_v50 = vld [vmem:[#allocation11 + $0x358] sm:$0xff]  }
 0x684   : > { %13600 = vmatprep.subr.bf16.mxu0 %v14363_v28  ;;  %v14403_v28 = vld [vmem:[#allocation11 + $0x3c8] sm:$0xff]  }
 0x686   : > { %13579 = vmatpush3.bf16.msra.mxu1 %v14364_v61  ;;  %v9583_v61 = vrot.slane %v16482_v38, 3  ;;  %v14413_v38 = vld [vmem:[#allocation11 + $0x398] sm:$0xff]  }
 0x687   : > { %13601 = vmatpush3.bf16.msra.mxu0 %v14365_v53  ;;  %13608 = vmatprep.subr.bf16.mxu1 %v14366_v63  ;;  %v14404_v53 = vld [vmem:[#allocation11 + $0x308] sm:$0xff]  }
 0x688   : > { %13630 = vmatprep.subr.bf16.mxu0 %v14367_v59  ;;  %v14405_v63 = vld [vmem:[#allocation11 + $0x388] sm:$0xff]   ;;  %v14406_v59 = vld [vmem:[#allocation11 + $0x350] sm:$0xff]  }
 0x689   : > { %9121 = vmatmul.mubr.bf16.vlgmr.msra.gmra.mrb[100].mxu1 %v8888_v6  ;;  %v14408_v6 = vld [vmem:[#allocation11 + $0x310] sm:$0xff]  }
 0x68a   : > { %9161 = vmatmul.mubr.bf16.vlgmr.msra.gmra.mrb[108].mxu0 %v8890_v13  ;;  %13609 = vmatpush3.bf16.msra.mxu1 %v14368_v1  ;;  %v14407_v1 = vld [vmem:[#allocation11 + $0x3d0] sm:$0xff]   ;;  %v14411_v13 = vld [vmem:[#allocation11 + $0x3d8] sm:$0xff]  }
 0x68b   : > { %9466 = vmatprep.mubr.bf16.mxu1 %v9235_v4  ;;  %13631 = vmatpush3.bf16.msra.mxu0 %v14369_v30  ;;  %v14409_v30 = vld [vmem:[#allocation11 + $0x390] sm:$0xff]   ;;  %v14414_v4 = vld [vmem:[#allocation11 + $0x360] sm:$0xff]  }
 0x68c   : > { %9506 = vmatprep.mubr.bf16.mxu0 %v9237_v62  ;;  %13610 = vmatprep.subr.bf16.mxu1 %v14370_v16  ;;  %v14412_v16 = vld [vmem:[#allocation11 + $0x318] sm:$0xff]   ;;  %v14416_v62 = vld [vmem:[#allocation11 + $0x320] sm:$0xff]  }
 0x68d   : > { %13632 = vmatprep.subr.bf16.mxu0 %v14371_v42  ;;  %v14415_v42 = vld [vmem:[#allocation11 + $0x3e0] sm:$0xff]  }
 0x68e   : > { %13611 = vmatpush3.bf16.msra.mxu1 %v14372_v17  ;;  %v14417_v17 = vld [vmem:[#allocation11 + $0x3a0] sm:$0xff]  }
 0x68f   : > { %13633 = vmatpush3.bf16.msra.mxu0 %v14373_v36  ;;  %13612 = vmatprep.subr.bf16.mxu1 %v14374_v2  ;;  %v14418_v36 = vld [vmem:[#allocation11 + $0x368] sm:$0xff]  }
 0x690   : > { %13634 = vmatprep.subr.bf16.mxu0 %v14375_v31  ;;  %v14419_v2 = vld [vmem:[#allocation11 + $0x3e8] sm:$0xff]  }
 0x691   : > { %v14420_v31 = vld [vmem:[#allocation11 + $0x328] sm:$0xff]  }
 0x692   : > { %13613 = vmatpush3.bf16.msra.mxu1 %v14376_v29  ;;  %v14421_v29 = vld [vmem:[#allocation11 + $0x3a8] sm:$0xff]  }
 0x693   : > { %13635 = vmatpush3.bf16.msra.mxu0 %v14377_v41  ;;  %13614 = vmatprep.subr.bf16.mxu1 %v14378_v32  ;;  %v14422_v41 = vld [vmem:[#allocation11 + $0x370] sm:$0xff]  }
 0x694   : > { %13636 = vmatprep.subr.bf16.mxu0 %v14379_v37  ;;  %v14423_v32 = vld [vmem:[#allocation11 + $0x3f0] sm:$0xff]  }
 0x695   : > { %v14424_v37 = vld [vmem:[#allocation11 + $0x330] sm:$0xff]  }
 0x696   : > { %13615 = vmatpush3.bf16.msra.mxu1 %v14380_v48  ;;  %v14425_v48 = vld [vmem:[#allocation11 + $0x3b0] sm:$0xff]  }
 0x697   : > { %13637 = vmatpush3.bf16.msra.mxu0 %v14381_v40  ;;  %13616 = vmatprep.subr.bf16.mxu1 %v14382_v39  ;;  %v14426_v40 = vld [vmem:[#allocation11 + $0x378] sm:$0xff]  }
 0x698   : > { %13638 = vmatprep.subr.bf16.mxu0 %v14383_v46  ;;  %v14427_v39 = vld [vmem:[#allocation11 + $0x3f8] sm:$0xff]   ;;  %v9866_v46 = vrot.slane %v16474_v25, 1 }
 0x69a   : > { %13617 = vmatpush3.bf16.msra.mxu1 %v14384_v20  ;;  %v9868_v20 = vrot.slane %v16476_v45, 1 }
 0x69b   : > { %13639 = vmatpush3.bf16.msra.mxu0 %v14385_v21  ;;  %13618 = vmatprep.subr.bf16.mxu1 %v14386_v12  ;;  %v14428_v21 = vld [vmem:[#allocation11 + $0x338] sm:$0xff]  }
 0x69c   : > { %13640 = vmatprep.subr.bf16.mxu0 %v14387_v49  ;;  %v14429_v12 = vld [vmem:[#allocation11 + $0x3b8] sm:$0xff]   ;;  %v14430_v49 = vld [vmem:[#allocation11 + $0x440] sm:$0xff]  }
 0x69e   : > { %13619 = vmatpush3.bf16.msra.mxu1 %v14388_v0  ;;  %v14431_v0 = vld [vmem:[#allocation11 + $0x4c0] sm:$0xff]  }
 0x69f   : > { %13641 = vmatpush3.bf16.msra.mxu0 %v14389_v56  ;;  %13620 = vmatprep.subr.bf16.mxu1 %v14390_v58  ;;  %v9874_v56 = vmax.f32 %v16474_v25, %v9866_v46  ;;  %v9876_v58 = vmax.f32 %v16476_v45, %v9868_v20  ;;  %v14436_v25 = vld [vmem:[#allocation11 + $0x408] sm:$0xff]   ;;  %v14470_v46 = vld [vmem:[#allocation11 + $0x550] sm:$0xff]  }
 0x6a0   : > { %13642 = vmatprep.subr.bf16.mxu0 %v14391_v57  ;;  %v14432_v57 = vld [vmem:[#allocation11 + $0x400] sm:$0xff]   ;;  %v14437_v45 = vld [vmem:[#allocation11 + $0x488] sm:$0xff]   ;;  %v14471_v20 = vld [vmem:[#allocation11 + $0x5d0] sm:$0xff]  }
 0x6a2   : > { %13621 = vmatpush3.bf16.msra.mxu1 %v14392_v24  ;;  %v9582_v24 = vrot.slane %v16485_v52, 3  ;;  %v14439_v52 = vld [vmem:[#allocation11 + $0x4d0] sm:$0xff]  }
 0x6a3   : > { %13643 = vmatpush3.bf16.msra.mxu0 %v14393_v9  ;;  %13622 = vmatprep.subr.bf16.mxu1 %v14394_v60  ;;  %v16532_v9 = vpack.c.bf16 %v9874_v56, %v9874_v56  ;;  %v14435_v60 = vld [vmem:[#allocation11 + $0x4c8] sm:$0xff]   ;;  %v14476_v56 = vld [vmem:[#allocation11 + $0x518] sm:$0xff]  }
 0x6a4   : > { %13644 = vmatprep.subr.bf16.mxu0 %v14395_v51  ;;  %v16534_v51 = vpack.c.bf16 %v9876_v58, %v9876_v58  ;;  %v14477_v58 = vld [vmem:[#allocation11 + $0x598] sm:$0xff]  }
 0x6a6   : > { %13623 = vmatpush3.bf16.msra.mxu1 %v14396_v26  ;;  %v14440_v26 = vld [vmem:[#allocation11 + $0x410] sm:$0xff]  }
 0x6a7   : > { %13645 = vmatpush3.bf16.msra.mxu0 %v14397_v55  ;;  %13652 = vmatprep.subr.bf16.mxu1 %v14398_v5  ;;  %v14441_v55 = vld [vmem:[#allocation11 + $0x490] sm:$0xff]   ;;  %v14442_v5 = vld [vmem:[#allocation11 + $0x458] sm:$0xff]  }
 0x6a8   : > { %13674 = vmatprep.subr.bf16.mxu0 %v14399_v7  ;;  %v14443_v7 = vld [vmem:[#allocation11 + $0x4d8] sm:$0xff]  }
 0x6a9   : > { %9467 = vmatmul.mubr.bf16.vlgmr.msra.gmra.mrb[104].mxu1 %v9234_v27  ;;  %v14445_v27 = vld [vmem:[#allocation11 + $0x498] sm:$0xff]  }
 0x6aa   : > { %9507 = vmatmul.mubr.bf16.vlgmr.msra.gmra.mrb[112].mxu0 %v9236_v43  ;;  %13653 = vmatpush3.bf16.msra.mxu1 %v14400_v15  ;;  %v14444_v15 = vld [vmem:[#allocation11 + $0x418] sm:$0xff]   ;;  %v14447_v43 = vld [vmem:[#allocation11 + $0x4e0] sm:$0xff]  }
 0x6ab   : > { %9812 = vmatprep.mubr.bf16.mxu1 %v9581_v47  ;;  %13675 = vmatpush3.bf16.msra.mxu0 %v14401_v10  ;;  %v14446_v10 = vld [vmem:[#allocation11 + $0x460] sm:$0xff]  }
 0x6ac   : > { %9852 = vmatprep.mubr.bf16.mxu0 %v9583_v61  ;;  %13654 = vmatprep.subr.bf16.mxu1 %v14402_v34  ;;  %v14448_v34 = vld [vmem:[#allocation11 + $0x420] sm:$0xff]   ;;  %v14451_v61 = vld [vmem:[#allocation11 + $0x4e8] sm:$0xff]  }
 0x6ad   : > { %13676 = vmatprep.subr.bf16.mxu0 %v14403_v28  ;;  %v14449_v47 = vld [vmem:[#allocation11 + $0x4a0] sm:$0xff]   ;;  %v14450_v28 = vld [vmem:[#allocation11 + $0x468] sm:$0xff]  }
 0x6ae   : > { %13655 = vmatpush3.bf16.msra.mxu1 %v14404_v53  ;;  %v14452_v53 = vld [vmem:[#allocation11 + $0x428] sm:$0xff]  }
 0x6af   : > { %13677 = vmatpush3.bf16.msra.mxu0 %v14405_v63  ;;  %13656 = vmatprep.subr.bf16.mxu1 %v14406_v59  ;;  %v14453_v63 = vld [vmem:[#allocation11 + $0x4a8] sm:$0xff]   ;;  %v14454_v59 = vld [vmem:[#allocation11 + $0x470] sm:$0xff]  }
 0x6b0   : > { %13678 = vmatprep.subr.bf16.mxu0 %v14407_v1  ;;  %v14455_v1 = vld [vmem:[#allocation11 + $0x4f0] sm:$0xff]  }
 0x6b2   : > { %13657 = vmatpush3.bf16.msra.mxu1 %v14408_v6  ;;  %v14456_v6 = vld [vmem:[#allocation11 + $0x430] sm:$0xff]  }
 0x6b3   : > { %13679 = vmatpush3.bf16.msra.mxu0 %v14409_v30  ;;  %13658 = vmatprep.subr.bf16.mxu1 %v14410_v50  ;;  %v9865_v30 = vrot.slane %v16470_v22, 1  ;;  %v14457_v50 = vld [vmem:[#allocation11 + $0x4b0] sm:$0xff]  }
 0x6b4   : > { %13680 = vmatprep.subr.bf16.mxu0 %v14411_v13  ;;  %v14458_v13 = vld [vmem:[#allocation11 + $0x478] sm:$0xff]  }
 0x6b6   : > { %13659 = vmatpush3.bf16.msra.mxu1 %v14412_v16  ;;  %v9867_v16 = vrot.slane %v16472_v3, 1 }
 0x6b7   : > { %13681 = vmatpush3.bf16.msra.mxu0 %v14413_v38  ;;  %13660 = vmatprep.subr.bf16.mxu1 %v14414_v4  ;;  %v14459_v38 = vld [vmem:[#allocation11 + $0x4f8] sm:$0xff]  }
 0x6b8   : > { %13682 = vmatprep.subr.bf16.mxu0 %v14415_v42  ;;  %v14460_v4 = vld [vmem:[#allocation11 + $0x438] sm:$0xff]   ;;  %v9873_v42 = vmax.f32 %v16470_v22, %v9865_v30  ;;  %v10289_v22 = vrot.slane %v16532_v9, 1  ;;  %v14501_v30 = vld [vmem:[#allocation11 + $0x688] sm:$0xff]  }
 0x6ba   : > { %13661 = vmatpush3.bf16.msra.mxu1 %v14416_v62  ;;  %v14461_v62 = vld [vmem:[#allocation11 + $0x4b8] sm:$0xff]  }
 0x6bb   : > { %13683 = vmatpush3.bf16.msra.mxu0 %v14417_v17  ;;  %13662 = vmatprep.subr.bf16.mxu1 %v14418_v36  ;;  %v14462_v17 = vld [vmem:[#allocation11 + $0x540] sm:$0xff]   ;;  %v9875_v36 = vmax.f32 %v16472_v3, %v9867_v16  ;;  %v10291_v3 = vrot.slane %v16534_v51, 1  ;;  %v14504_v16 = vld [vmem:[#allocation11 + $0x610] sm:$0xff]  }
 0x6bc   : > { %13684 = vmatprep.subr.bf16.mxu0 %v14419_v2  ;;  %v14463_v2 = vld [vmem:[#allocation11 + $0x5c0] sm:$0xff]  }
 0x6be   : > { %13663 = vmatpush3.bf16.msra.mxu1 %v14420_v31  ;;  %v14464_v31 = vld [vmem:[#allocation11 + $0x500] sm:$0xff]  }
 0x6bf   : > { %13685 = vmatpush3.bf16.msra.mxu0 %v14421_v29  ;;  %13664 = vmatprep.subr.bf16.mxu1 %v14422_v41  ;;  %v16542_v29 = vpack.c.bf16 %v9873_v42, %v9873_v42  ;;  %v14465_v41 = vld [vmem:[#allocation11 + $0x580] sm:$0xff]   ;;  %v14507_v42 = vld [vmem:[#allocation11 + $0x6d8] sm:$0xff]  }
 0x6c0   : > { %13686 = vmatprep.subr.bf16.mxu0 %v14423_v32  ;;  %v16544_v32 = vpack.c.bf16 %v9875_v36, %v9875_v36  ;;  %v14510_v36 = vld [vmem:[#allocation11 + $0x660] sm:$0xff]  }
 0x6c2   : > { %13665 = vmatpush3.bf16.msra.mxu1 %v14424_v37  ;;  %v14466_v37 = vld [vmem:[#allocation11 + $0x548] sm:$0xff]  }
 0x6c3   : > { %13687 = vmatpush3.bf16.msra.mxu0 %v14425_v48  ;;  %13666 = vmatprep.subr.bf16.mxu1 %v14426_v40  ;;  %v14467_v48 = vld [vmem:[#allocation11 + $0x5c8] sm:$0xff]  }
 0x6c4   : > { %13688 = vmatprep.subr.bf16.mxu0 %v14427_v39  ;;  %v14468_v40 = vld [vmem:[#allocation11 + $0x508] sm:$0xff]  }
 0x6c5   : > { %v14469_v39 = vld [vmem:[#allocation11 + $0x588] sm:$0xff]  }
 0x6c6   : > { %13667 = vmatpush3.bf16.msra.mxu1 %v14428_v21  ;;  %v14472_v21 = vld [vmem:[#allocation11 + $0x510] sm:$0xff]  }
 0x6c7   : > { %13689 = vmatpush3.bf16.msra.mxu0 %v14429_v12  ;;  %13696 = vmatprep.subr.bf16.mxu1 %v14430_v49  ;;  %v14473_v12 = vld [vmem:[#allocation11 + $0x590] sm:$0xff]   ;;  %v14474_v49 = vld [vmem:[#allocation11 + $0x558] sm:$0xff]  }
 0x6c8   : > { %13718 = vmatprep.subr.bf16.mxu0 %v14431_v0  ;;  %v14475_v0 = vld [vmem:[#allocation11 + $0x5d8] sm:$0xff]  }
 0x6c9   : > { %9813 = vmatmul.mubr.bf16.vlgmr.msra.gmra.mrb[108].mxu1 %v9580_v44  ;;  %v14479_v44 = vld [vmem:[#allocation11 + $0x5e0] sm:$0xff]  }
 0x6ca   : > { %9853 = vmatmul.mubr.bf16.vlgmr.msra.gmra.mrb[116].mxu0 %v9582_v24  ;;  %13697 = vmatpush3.bf16.msra.mxu1 %v14432_v57  ;;  %v14478_v57 = vld [vmem:[#allocation11 + $0x560] sm:$0xff]  }
 0x6cb   : > { %10170 = vmatprep.mubr.bf16.mxu1 %v16532_v9  ;;  %13719 = vmatpush3.bf16.msra.mxu0 %v14433_v19  ;;  %v14480_v19 = vld [vmem:[#allocation11 + $0x520] sm:$0xff]  }
 0x6cc   : > { %10210 = vmatprep.mubr.bf16.mxu0 %v16534_v51  ;;  %13698 = vmatprep.subr.bf16.mxu1 %v14434_v11  ;;  %v14481_v24 = vld [vmem:[#allocation11 + $0x5a0] sm:$0xff]   ;;  %v14482_v11 = vld [vmem:[#allocation11 + $0x568] sm:$0xff]  }
 0x6cd   : > { %13720 = vmatprep.subr.bf16.mxu0 %v14435_v60  ;;  %v14483_v60 = vld [vmem:[#allocation11 + $0x5e8] sm:$0xff]  }
 0x6ce   : > { %13699 = vmatpush3.bf16.msra.mxu1 %v14436_v25  ;;  %v14484_v25 = vld [vmem:[#allocation11 + $0x528] sm:$0xff]  }
 0x6cf   : > { %13721 = vmatpush3.bf16.msra.mxu0 %v14437_v45  ;;  %13700 = vmatprep.subr.bf16.mxu1 %v14438_v18  ;;  %v14485_v45 = vld [vmem:[#allocation11 + $0x5a8] sm:$0xff]   ;;  %v14486_v18 = vld [vmem:[#allocation11 + $0x570] sm:$0xff]  }
 0x6d0   : > { %13722 = vmatprep.subr.bf16.mxu0 %v14439_v52  ;;  %v14487_v52 = vld [vmem:[#allocation11 + $0x5f0] sm:$0xff]  }
 0x6d2   : > { %13701 = vmatpush3.bf16.msra.mxu1 %v14440_v26  ;;  %v14488_v26 = vld [vmem:[#allocation11 + $0x530] sm:$0xff]  }
 0x6d3   : > { %13723 = vmatpush3.bf16.msra.mxu0 %v14441_v55  ;;  %13702 = vmatprep.subr.bf16.mxu1 %v14442_v5  ;;  %v14489_v55 = vld [vmem:[#allocation11 + $0x5b0] sm:$0xff]   ;;  %v14490_v5 = vld [vmem:[#allocation11 + $0x578] sm:$0xff]  }
 0x6d4   : > { %13724 = vmatprep.subr.bf16.mxu0 %v14443_v7  ;;  %v14491_v7 = vld [vmem:[#allocation11 + $0x5f8] sm:$0xff]  }
 0x6d6   : > { %13703 = vmatpush3.bf16.msra.mxu1 %v14444_v15  ;;  %v14492_v15 = vld [vmem:[#allocation11 + $0x538] sm:$0xff]  }
 0x6d7   : > { %13725 = vmatpush3.bf16.msra.mxu0 %v14445_v27  ;;  %13704 = vmatprep.subr.bf16.mxu1 %v14446_v10  ;;  %v14493_v27 = vld [vmem:[#allocation11 + $0x5b8] sm:$0xff]   ;;  %v14494_v10 = vld [vmem:[#allocation11 + $0x640] sm:$0xff]  }
 0x6d8   : > { %13726 = vmatprep.subr.bf16.mxu0 %v14447_v43  ;;  %v14495_v43 = vld [vmem:[#allocation11 + $0x6c0] sm:$0xff]  }
 0x6da   : > { %13705 = vmatpush3.bf16.msra.mxu1 %v14448_v34  ;;  %v14496_v34 = vld [vmem:[#allocation11 + $0x600] sm:$0xff]  }
 0x6db   : > { %13727 = vmatpush3.bf16.msra.mxu0 %v14449_v47  ;;  %13706 = vmatprep.subr.bf16.mxu1 %v14450_v28  ;;  %v10288_v47 = vrot.slane %v16542_v29, 1  ;;  %v14497_v28 = vld [vmem:[#allocation11 + $0x680] sm:$0xff]  }
 0x6dc   : > { %13728 = vmatprep.subr.bf16.mxu0 %v14451_v61  ;;  %v10290_v61 = vrot.slane %v16544_v32, 1 }
 0x6de   : > { %13707 = vmatpush3.bf16.msra.mxu1 %v14452_v53  ;;  %v14498_v53 = vld [vmem:[#allocation11 + $0x648] sm:$0xff]  }
 0x6df   : > { %13729 = vmatpush3.bf16.msra.mxu0 %v14453_v63  ;;  %13708 = vmatprep.subr.bf16.mxu1 %v14454_v59  ;;  %v10635_v63 = vrot.slane %v16532_v9, 2  ;;  %v14499_v59 = vld [vmem:[#allocation11 + $0x6c8] sm:$0xff]  }
 0x6e0   : > { %13730 = vmatprep.subr.bf16.mxu0 %v14455_v1  ;;  %v10637_v1 = vrot.slane %v16534_v51, 2 }
 0x6e2   : > { %13709 = vmatpush3.bf16.msra.mxu1 %v14456_v6  ;;  %v14500_v6 = vld [vmem:[#allocation11 + $0x608] sm:$0xff]  }
 0x6e3   : > { %13731 = vmatpush3.bf16.msra.mxu0 %v14457_v50  ;;  %13710 = vmatprep.subr.bf16.mxu1 %v14458_v13  ;;  %v14502_v50 = vld [vmem:[#allocation11 + $0x650] sm:$0xff]  }
 0x6e4   : > { %13732 = vmatprep.subr.bf16.mxu0 %v14459_v38  ;;  %v14503_v13 = vld [vmem:[#allocation11 + $0x6d0] sm:$0xff]  }
 0x6e5   : > { %v14505_v38 = vld [vmem:[#allocation11 + $0x690] sm:$0xff]  }
 0x6e6   : > { %13711 = vmatpush3.bf16.msra.mxu1 %v14460_v4  ;;  %v14506_v4 = vld [vmem:[#allocation11 + $0x658] sm:$0xff]  }
 0x6e7   : > { %13733 = vmatpush3.bf16.msra.mxu0 %v14461_v62  ;;  %13740 = vmatprep.subr.bf16.mxu1 %v14462_v17  ;;  %v14508_v62 = vld [vmem:[#allocation11 + $0x618] sm:$0xff]  }
 0x6e8   : > { %13762 = vmatprep.subr.bf16.mxu0 %v14463_v2  ;;  %v14509_v17 = vld [vmem:[#allocation11 + $0x698] sm:$0xff]   ;;  %v14511_v2 = vld [vmem:[#allocation11 + $0x6e0] sm:$0xff]  }
 0x6e9   : > { %10171 = vmatmul.mubr.bf16.vlgmr.msra.gmra.mrb[112].mxu1 %v16542_v29 }
 0x6ea   : > { %10211 = vmatmul.mubr.bf16.vlgmr.msra.gmra.mrb[120].mxu0 %v16544_v32  ;;  %13741 = vmatpush3.bf16.msra.mxu1 %v14464_v31  ;;  %v14512_v31 = vld [vmem:[#allocation11 + $0x620] sm:$0xff]  }
 0x6eb   : > { %10520 = vmatprep.mubr.bf16.mxu1 %v10289_v22  ;;  %13763 = vmatpush3.bf16.msra.mxu0 %v14465_v41  ;;  %v14513_v41 = vld [vmem:[#allocation11 + $0x6a0] sm:$0xff]   ;;  %v14515_v22 = vld [vmem:[#allocation11 + $0x6e8] sm:$0xff]  }
 0x6ec   : > { %10560 = vmatprep.mubr.bf16.mxu0 %v10291_v3  ;;  %13742 = vmatprep.subr.bf16.mxu1 %v14466_v37  ;;  %v14514_v37 = vld [vmem:[#allocation11 + $0x668] sm:$0xff]  }
 0x6ed   : > { %13764 = vmatprep.subr.bf16.mxu0 %v14467_v48  ;;  %v14516_v48 = vld [vmem:[#allocation11 + $0x628] sm:$0xff]  }
 0x6ee   : > { %13743 = vmatpush3.bf16.msra.mxu1 %v14468_v40  ;;  %v14517_v3 = vld [vmem:[#allocation11 + $0x6a8] sm:$0xff]   ;;  %v14518_v40 = vld [vmem:[#allocation11 + $0x670] sm:$0xff]  }
 0x6ef   : > { %13765 = vmatpush3.bf16.msra.mxu0 %v14469_v39  ;;  %13744 = vmatprep.subr.bf16.mxu1 %v14470_v46  ;;  %v14519_v39 = vld [vmem:[#allocation11 + $0x6f0] sm:$0xff]  }
 0x6f0   : > { %13766 = vmatprep.subr.bf16.mxu0 %v14471_v20  ;;  %v14520_v46 = vld [vmem:[#allocation11 + $0x630] sm:$0xff]  }
 0x6f1   : > { %v14521_v20 = vld [vmem:[#allocation11 + $0x6b0] sm:$0xff]  }
 0x6f2   : > { %13745 = vmatpush3.bf16.msra.mxu1 %v14472_v21  ;;  %v14522_v21 = vld [vmem:[#allocation11 + $0x678] sm:$0xff]  }
 0x6f3   : > { %13767 = vmatpush3.bf16.msra.mxu0 %v14473_v12  ;;  %13746 = vmatprep.subr.bf16.mxu1 %v14474_v49  ;;  %v14523_v12 = vld [vmem:[#allocation11 + $0x6f8] sm:$0xff]  }
 0x6f4   : > { %13768 = vmatprep.subr.bf16.mxu0 %v14475_v0  ;;  %v14524_v49 = vld [vmem:[#allocation11 + $0x638] sm:$0xff]  }
 0x6f5   : > { %v14525_v0 = vld [vmem:[#allocation11 + $0x6b8] sm:$0xff]  }
 0x6f6   : > { %13747 = vmatpush3.bf16.msra.mxu1 %v14476_v56  ;;  %v14526_v56 = vld [vmem:[#allocation11 + $0x740] sm:$0xff]  }
 0x6f7   : > { %13769 = vmatpush3.bf16.msra.mxu0 %v14477_v58  ;;  %13748 = vmatprep.subr.bf16.mxu1 %v14478_v57  ;;  %v14527_v58 = vld [vmem:[#allocation11 + $0x7c0] sm:$0xff]  }
 0x6f8   : > { %13770 = vmatprep.subr.bf16.mxu0 %v14479_v44  ;;  %v14528_v57 = vld [vmem:[#allocation11 + $0x700] sm:$0xff]   ;;  %v10634_v44 = vrot.slane %v16542_v29, 2 }
 0x6fa   : > { %13749 = vmatpush3.bf16.msra.mxu1 %v14480_v19  ;;  %v14529_v19 = vld [vmem:[#allocation11 + $0x780] sm:$0xff]  }
 0x6fb   : > { %13771 = vmatpush3.bf16.msra.mxu0 %v14481_v24  ;;  %13750 = vmatprep.subr.bf16.mxu1 %v14482_v11  ;;  %v10636_v24 = vrot.slane %v16544_v32, 2  ;;  %v14530_v11 = vld [vmem:[#allocation11 + $0x748] sm:$0xff]  }
 0x6fc   : > { %13772 = vmatprep.subr.bf16.mxu0 %v14483_v60  ;;  %v10981_v60 = vrot.slane %v16532_v9, 3  ;;  %v14538_v9 = vld [vmem:[#allocation11 + $0x758] sm:$0xff]  }
 0x6fe   : > { %13751 = vmatpush3.bf16.msra.mxu1 %v14484_v25  ;;  %v14531_v25 = vld [vmem:[#allocation11 + $0x7c8] sm:$0xff]  }
 0x6ff   : > { %13773 = vmatpush3.bf16.msra.mxu0 %v14485_v45  ;;  %13752 = vmatprep.subr.bf16.mxu1 %v14486_v18  ;;  %v10983_v45 = vrot.slane %v16534_v51, 3  ;;  %v14532_v18 = vld [vmem:[#allocation11 + $0x708] sm:$0xff]   ;;  %v14541_v51 = vld [vmem:[#allocation11 + $0x798] sm:$0xff]  }
 0x700   : > { %13774 = vmatprep.subr.bf16.mxu0 %v14487_v52  ;;  %v14533_v52 = vld [vmem:[#allocation11 + $0x788] sm:$0xff]  }
 0x702   : > { %13753 = vmatpush3.bf16.msra.mxu1 %v14488_v26  ;;  %v14534_v26 = vld [vmem:[#allocation11 + $0x750] sm:$0xff]  }
 0x703   : > { %13775 = vmatpush3.bf16.msra.mxu0 %v14489_v55  ;;  %13754 = vmatprep.subr.bf16.mxu1 %v14490_v5  ;;  %v14535_v55 = vld [vmem:[#allocation11 + $0x7d0] sm:$0xff]  }
 0x704   : > { %13776 = vmatprep.subr.bf16.mxu0 %v14491_v7  ;;  %v14536_v5 = vld [vmem:[#allocation11 + $0x710] sm:$0xff]  }
 0x705   : > { %v14537_v7 = vld [vmem:[#allocation11 + $0x790] sm:$0xff]  }
 0x706   : > { %13755 = vmatpush3.bf16.msra.mxu1 %v14492_v15  ;;  %v14539_v15 = vld [vmem:[#allocation11 + $0x7d8] sm:$0xff]  }
 0x707   : > { %13777 = vmatpush3.bf16.msra.mxu0 %v14493_v27  ;;  %13784 = vmatprep.subr.bf16.mxu1 %v14494_v10  ;;  %v14540_v27 = vld [vmem:[#allocation11 + $0x718] sm:$0xff]   ;;  %v14542_v10 = vld [vmem:[#allocation11 + $0x760] sm:$0xff]  }
 0x708   : > { %13806 = vmatprep.subr.bf16.mxu0 %v14495_v43  ;;  %v14543_v43 = vld [vmem:[#allocation11 + $0x7e0] sm:$0xff]  }
 0x709   : > { %10521 = vmatmul.mubr.bf16.vlgmr.msra.gmra.mrb[116].mxu1 %v10288_v47  ;;  %v14545_v47 = vld [vmem:[#allocation11 + $0x7a0] sm:$0xff]  }
 0x70a   : > { %10561 = vmatmul.mubr.bf16.vlgmr.msra.gmra.mrb[124].mxu0 %v10290_v61  ;;  %13785 = vmatpush3.bf16.msra.mxu1 %v14496_v34  ;;  %v14544_v34 = vld [vmem:[#allocation11 + $0x720] sm:$0xff]   ;;  %v14547_v61 = vld [vmem:[#allocation11 + $0x7e8] sm:$0xff]  }
 0x70b   : > { %10866 = vmatprep.mubr.bf16.mxu1 %v10635_v63  ;;  %13807 = vmatpush3.bf16.msra.mxu0 %v14497_v28  ;;  %v14546_v28 = vld [vmem:[#allocation11 + $0x768] sm:$0xff]  }
 0x70c   : > { %10906 = vmatprep.mubr.bf16.mxu0 %v10637_v1  ;;  %13786 = vmatprep.subr.bf16.mxu1 %v14498_v53  ;;  %v14548_v53 = vld [vmem:[#allocation11 + $0x728] sm:$0xff]  }
 0x70d   : > { %13808 = vmatprep.subr.bf16.mxu0 %v14499_v59  ;;  %v14549_v63 = vld [vmem:[#allocation11 + $0x7a8] sm:$0xff]   ;;  %v14550_v59 = vld [vmem:[#allocation11 + $0x770] sm:$0xff]  }
 0x70e   : > { %13787 = vmatpush3.bf16.msra.mxu1 %v14500_v6  ;;  %v14551_v6 = vld [vmem:[#allocation11 + $0x7f0] sm:$0xff]  }
 0x70f   : > { %13809 = vmatpush3.bf16.msra.mxu0 %v14501_v30  ;;  %13788 = vmatprep.subr.bf16.mxu1 %v14502_v50 }
 0x710   : > { %13810 = vmatprep.subr.bf16.mxu0 %v14503_v13  ;;  %v8410_v13 = vld [vmem:[#allocation14] sm:$0x1] }
 0x712   : > { %13789 = vmatpush3.bf16.msra.mxu1 %v14504_v16 }
 0x713   : > { %13811 = vmatpush3.bf16.msra.mxu0 %v14505_v38  ;;  %13790 = vmatprep.subr.bf16.mxu1 %v14506_v4 }
 0x714   : > { %13812 = vmatprep.subr.bf16.mxu0 %v14507_v42  ;;  %v14552_v42 = vld [vmem:[#allocation11 + $0x730] sm:$0xff]  }
 0x716   : > { %13791 = vmatpush3.bf16.msra.mxu1 %v14508_v62 }
 0x717   : > { %13813 = vmatpush3.bf16.msra.mxu0 %v14509_v17  ;;  %13792 = vmatprep.subr.bf16.mxu1 %v14510_v36 }
 0x718   : > { %13814 = vmatprep.subr.bf16.mxu0 %v14511_v2  ;;  %v14553_v2 = vld [vmem:[#allocation11 + $0x7b0] sm:$0xff]  }
 0x71a   : > { %13793 = vmatpush3.bf16.msra.mxu1 %v14512_v31  ;;  %v14554_v31 = vld [vmem:[#allocation11 + $0x778] sm:$0xff]  }
 0x71b   : > { %13815 = vmatpush3.bf16.msra.mxu0 %v14513_v41  ;;  %13794 = vmatprep.subr.bf16.mxu1 %v14514_v37  ;;  %v14555_v37 = vld [vmem:[#allocation11 + $0x7f8] sm:$0xff]  }
 0x71c   : > { %13816 = vmatprep.subr.bf16.mxu0 %v14515_v22  ;;  %v8461_v22 = vadd.f32 %v16520_v8, %v8410_v13 }
 0x71e   : > { %13795 = vmatpush3.bf16.msra.mxu1 %v14516_v48 }
 0x71f   : > { %13817 = vmatpush3.bf16.msra.mxu0 %v14517_v3  ;;  %13796 = vmatprep.subr.bf16.mxu1 %v14518_v40  ;;  %v11266_v3 = vrot.slane %v16512_v54, 1  ;;  %v14556_v40 = vld [vmem:[#allocation11 + $0x738] sm:$0xff]  }
 0x720   : > { %13818 = vmatprep.subr.bf16.mxu0 %v14519_v39  ;;  %v11268_v39 = vrot.slane %v16514_v23, 1 }
 0x722   : > { %13797 = vmatpush3.bf16.msra.mxu1 %v14520_v46  ;;  %v11276_v8 = vmax.f32 %v16514_v23, %v11268_v39  ;;  %v14565_v23 = vld [vmem:[#allocation11 + $0x888] sm:$0xff]   ;;  %v14593_v39 = vld [vmem:[#allocation11 + $0x980] sm:$0xff]  }
 0x723   : > { %13819 = vmatpush3.bf16.msra.mxu0 %v14521_v20  ;;  %13798 = vmatprep.subr.bf16.mxu1 %v14522_v21  ;;  %v14557_v20 = vld [vmem:[#allocation11 + $0x7b8] sm:$0xff]   ;;  %v14558_v21 = vld [vmem:[#allocation11 + $0x840] sm:$0xff]  }
 0x724   : > { %13820 = vmatprep.subr.bf16.mxu0 %v14523_v12  ;;  %v14559_v12 = vld [vmem:[#allocation11 + $0x8c0] sm:$0xff]  }
 0x726   : > { %13799 = vmatpush3.bf16.msra.mxu1 %v14524_v49  ;;  %v11274_v49 = vmax.f32 %v16512_v54, %v11266_v3  ;;  %v16569_v54 = vpack.c.bf16 %v11276_v8, %v11276_v8  ;;  %v14592_v3 = vld [vmem:[#allocation11 + $0x900] sm:$0xff]   ;;  %v14599_v8 = vld [vmem:[#allocation11 + $0x9d0] sm:$0xff]  }
 0x727   : > { %13821 = vmatpush3.bf16.msra.mxu0 %v14525_v0  ;;  %13828 = vmatprep.subr.bf16.mxu1 %v14526_v56  ;;  %v14560_v0 = vld [vmem:[#allocation11 + $0x800] sm:$0xff]   ;;  %v10980_v56 = vrot.slane %v16542_v29, 3  ;;  %v14566_v29 = vld [vmem:[#allocation11 + $0x850] sm:$0xff]  }
 0x728   : > { %13850 = vmatprep.subr.bf16.mxu0 %v14527_v58  ;;  %v14561_v58 = vld [vmem:[#allocation11 + $0x880] sm:$0xff]  }
 0x729   : > { %10867 = vmatmul.mubr.bf16.vlgmr.msra.gmra.mrb[120].mxu1 %v10634_v44  ;;  %v14562_v44 = vld [vmem:[#allocation11 + $0x848] sm:$0xff]  }
 0x72a   : > { %10907 = vmatmul.mubr.bf16.vlgmr.msra.gmra.mrb[128].mxu0 %v10636_v24  ;;  %13829 = vmatpush3.bf16.msra.mxu1 %v14528_v57  ;;  %v10982_v57 = vrot.slane %v16544_v32, 3  ;;  %v14563_v24 = vld [vmem:[#allocation11 + $0x8c8] sm:$0xff]   ;;  %v14567_v32 = vld [vmem:[#allocation11 + $0x8d0] sm:$0xff]  }
 0x72b   : > { %11212 = vmatprep.mubr.bf16.mxu1 %v10981_v60  ;;  %13851 = vmatpush3.bf16.msra.mxu0 %v14529_v19  ;;  %v16567_v19 = vpack.c.bf16 %v11274_v49, %v11274_v49  ;;  %v14568_v60 = vld [vmem:[#allocation11 + $0x810] sm:$0xff]   ;;  %v14597_v49 = vld [vmem:[#allocation11 + $0x988] sm:$0xff]  }
 0x72c   : > { %11252 = vmatprep.mubr.bf16.mxu0 %v10983_v45  ;;  %13830 = vmatprep.subr.bf16.mxu1 %v14530_v11  ;;  %v14564_v11 = vld [vmem:[#allocation11 + $0x808] sm:$0xff]   ;;  %v14570_v45 = vld [vmem:[#allocation11 + $0x858] sm:$0xff]  }
 0x72d   : > { %13852 = vmatprep.subr.bf16.mxu0 %v14531_v25  ;;  %v14569_v25 = vld [vmem:[#allocation11 + $0x890] sm:$0xff]  }
 0x72e   : > { %13831 = vmatpush3.bf16.msra.mxu1 %v14532_v18  ;;  %v14571_v18 = vld [vmem:[#allocation11 + $0x8d8] sm:$0xff]  }
 0x72f   : > { %13853 = vmatpush3.bf16.msra.mxu0 %v14533_v52  ;;  %13832 = vmatprep.subr.bf16.mxu1 %v14534_v26  ;;  %v14572_v52 = vld [vmem:[#allocation11 + $0x818] sm:$0xff]  }
 0x730   : > { %13854 = vmatprep.subr.bf16.mxu0 %v14535_v55  ;;  %v14573_v26 = vld [vmem:[#allocation11 + $0x898] sm:$0xff]   ;;  %v14574_v55 = vld [vmem:[#allocation11 + $0x860] sm:$0xff]  }
 0x732   : > { %13833 = vmatpush3.bf16.msra.mxu1 %v14536_v5  ;;  %v14575_v5 = vld [vmem:[#allocation11 + $0x8e0] sm:$0xff]  }
 0x733   : > { %13855 = vmatpush3.bf16.msra.mxu0 %v14537_v7  ;;  %13834 = vmatprep.subr.bf16.mxu1 %v14538_v9  ;;  %v14576_v7 = vld [vmem:[#allocation11 + $0x820] sm:$0xff]  }
 0x734   : > { %13856 = vmatprep.subr.bf16.mxu0 %v14539_v15  ;;  %v14577_v9 = vld [vmem:[#allocation11 + $0x8a0] sm:$0xff]   ;;  %v14578_v15 = vld [vmem:[#allocation11 + $0x868] sm:$0xff]  }
 0x736   : > { %13835 = vmatpush3.bf16.msra.mxu1 %v14540_v27  ;;  %v14579_v27 = vld [vmem:[#allocation11 + $0x8e8] sm:$0xff]  }
 0x737   : > { %13857 = vmatpush3.bf16.msra.mxu0 %v14541_v51  ;;  %13836 = vmatprep.subr.bf16.mxu1 %v14542_v10  ;;  %v14580_v51 = vld [vmem:[#allocation11 + $0x828] sm:$0xff]  }
 0x738   : > { %13858 = vmatprep.subr.bf16.mxu0 %v14543_v43  ;;  %v14581_v10 = vld [vmem:[#allocation11 + $0x8a8] sm:$0xff]   ;;  %v14582_v43 = vld [vmem:[#allocation11 + $0x870] sm:$0xff]  }
 0x73a   : > { %13837 = vmatpush3.bf16.msra.mxu1 %v14544_v34 }
 0x73b   : > { %13859 = vmatpush3.bf16.msra.mxu0 %v14545_v47  ;;  %13838 = vmatprep.subr.bf16.mxu1 %v14546_v28  ;;  %v14583_v47 = vld [vmem:[#allocation11 + $0x8f0] sm:$0xff]  }
 0x73c   : > { %v13536_v1 = vpop.f32.mrb[96].mxu1  ;;  %13860 = vmatprep.subr.bf16.mxu0 %v14547_v61 }
 0x73d   : > { %v13558_v30 = vpop.f32.mrb[104].mxu0  ;;  %v13537_v50 = vpop.f32.mrb[97].mxu1 }
 0x73e   : > { %v13538_v16 = vadd.f32 %v13537_v50, %v13536_v1  ;;  %v13559_v38 = vpop.f32.mrb[105].mxu0  ;;  %13839 = vmatpush3.bf16.msra.mxu1 %v14548_v53  ;;  %v13539_v4 = vpop.f32.mrb[98].mxu1  ;;  %v14584_v1 = vld [vmem:[#allocation11 + $0x830] sm:$0xff]  }
 0x73f   : > { %v13560_v62 = vadd.f32 %v13559_v38, %v13558_v30  ;;  %13861 = vmatpush3.bf16.msra.mxu0 %v14549_v63  ;;  %v13561_v17 = vpop.f32.mrb[106].mxu0  ;;  %v13540_v36 = vpop.f32.mrb[99].mxu1  ;;  %13840 = vmatprep.subr.bf16.mxu1 %v14550_v59  ;;  %v14586_v38 = vld [vmem:[#allocation11 + $0x878] sm:$0xff]   ;;  %v11267_v4 = vrot.slane %v16508_v35, 1 }
 0x740   : > { %v13562_v41 = vpop.f32.mrb[107].mxu0  ;;  %13862 = vmatprep.subr.bf16.mxu0 %v14551_v6  ;;  %v11265_v6 = vrot.slane %v16506_v14, 1  ;;  %v14588_v36 = vld [vmem:[#allocation11 + $0x838] sm:$0xff]  }
 0x741   : > { %v8813_v48 = vadd.f32 %v13560_v62, %v13538_v16  ;;  %v14585_v16 = vld [vmem:[#allocation11 + $0x8b0] sm:$0xff]   ;;  %v14587_v62 = vld [vmem:[#allocation11 + $0x8f8] sm:$0xff]  }
 0x742   : > { %13841 = vmatpush3.bf16.msra.mxu1 %v14552_v42  ;;  %v11273_v41 = vmax.f32 %v16506_v14, %v11265_v6  ;;  %v11689_v14 = vrot.slane %v16567_v19, 1 }
 0x743   : > { %v16561_v46 = vadd.f32 %v8813_v48, %v8461_v22  ;;  %13863 = vmatpush3.bf16.msra.mxu0 %v14553_v2  ;;  %13842 = vmatprep.subr.bf16.mxu1 %v14554_v31  ;;  %v14589_v31 = vld [vmem:[#allocation11 + $0x8b8] sm:$0xff]   ;;  %v11275_v22 = vmax.f32 %v16508_v35, %v11267_v4  ;;  %v14591_v48 = vld [vmem:[#allocation11 + $0x9c0] sm:$0xff]   ;;  %v11691_v35 = vrot.slane %v16569_v54, 1 }
 0x744   : > { %13864 = vmatprep.subr.bf16.mxu0 %v14555_v37  ;;  %v14590_v37 = vld [vmem:[#allocation11 + $0x940] sm:$0xff]  }
 0x746   : > { %13843 = vmatpush3.bf16.msra.mxu1 %v14556_v40  ;;  %v16580_v40 = vpack.c.bf16 %v11273_v41, %v11273_v41 }
 0x747   : > { %13865 = vmatpush3.bf16.msra.mxu0 %v14557_v20  ;;  %13872 = vmatprep.subr.bf16.mxu1 %v14558_v21  ;;  %v16582_v20 = vpack.c.bf16 %v11275_v22, %v11275_v22  ;;  %v14595_v21 = vld [vmem:[#allocation11 + $0x9c8] sm:$0xff]  }
 0x748   : > { %13894 = vmatprep.subr.bf16.mxu0 %v14559_v12  ;;  %v14596_v12 = vld [vmem:[#allocation11 + $0x908] sm:$0xff]   ;;  %v11688_v6 = vrot.slane %v16580_v40, 1 }
 0x749   : > { %11213 = vmatmul.mubr.bf16.vlgmr.msra.gmra.mrb[124].mxu1 %v10980_v56  ;;  %v14600_v56 = vld [vmem:[#allocation11 + $0x910] sm:$0xff]  }
 0x74a   : > { %11253 = vmatmul.mubr.bf16.vlgmr.msra.gmra.mrb[132].mxu0 %v10982_v57  ;;  %13873 = vmatpush3.bf16.msra.mxu1 %v14560_v0  ;;  %v14598_v0 = vld [vmem:[#allocation11 + $0x950] sm:$0xff]   ;;  %v14602_v57 = vld [vmem:[#allocation11 + $0x958] sm:$0xff]  }
 0x74b   : > { %11570 = vmatprep.mubr.bf16.mxu1 %v16567_v19  ;;  %13895 = vmatpush3.bf16.msra.mxu0 %v14561_v58  ;;  %v14601_v58 = vld [vmem:[#allocation11 + $0x990] sm:$0xff]   ;;  %v14604_v19 = vld [vmem:[#allocation11 + $0x918] sm:$0xff]  }
 0x74c   : > { %11610 = vmatprep.mubr.bf16.mxu0 %v16569_v54  ;;  %13874 = vmatprep.subr.bf16.mxu1 %v14562_v44  ;;  %v14603_v44 = vld [vmem:[#allocation11 + $0x9d8] sm:$0xff]   ;;  %v14606_v54 = vld [vmem:[#allocation11 + $0x960] sm:$0xff]  }
 0x74d   : > { %13896 = vmatprep.subr.bf16.mxu0 %v14563_v24  ;;  %v14605_v24 = vld [vmem:[#allocation11 + $0x998] sm:$0xff]  }
 0x74e   : > { %13875 = vmatpush3.bf16.msra.mxu1 %v14564_v11  ;;  %v14607_v11 = vld [vmem:[#allocation11 + $0x9e0] sm:$0xff]  }
 0x74f   : > { %13897 = vmatpush3.bf16.msra.mxu0 %v14565_v23  ;;  %13876 = vmatprep.subr.bf16.mxu1 %v14566_v29  ;;  %v14608_v23 = vld [vmem:[#allocation11 + $0x920] sm:$0xff]  }
 0x750   : > { %13898 = vmatprep.subr.bf16.mxu0 %v14567_v32  ;;  %v14609_v29 = vld [vmem:[#allocation11 + $0x9a0] sm:$0xff]   ;;  %v14610_v32 = vld [vmem:[#allocation11 + $0x968] sm:$0xff]  }
 0x752   : > { %13877 = vmatpush3.bf16.msra.mxu1 %v14568_v60  ;;  %v14611_v60 = vld [vmem:[#allocation11 + $0x9e8] sm:$0xff]  }
 0x753   : > { %13899 = vmatpush3.bf16.msra.mxu0 %v14569_v25  ;;  %13878 = vmatprep.subr.bf16.mxu1 %v14570_v45  ;;  %v14612_v25 = vld [vmem:[#allocation11 + $0x928] sm:$0xff]  }
 0x754   : > { %13900 = vmatprep.subr.bf16.mxu0 %v14571_v18  ;;  %v14613_v45 = vld [vmem:[#allocation11 + $0x9a8] sm:$0xff]   ;;  %v14614_v18 = vld [vmem:[#allocation11 + $0x970] sm:$0xff]  }
 0x756   : > { %13879 = vmatpush3.bf16.msra.mxu1 %v14572_v52 }
 0x757   : > { %13901 = vmatpush3.bf16.msra.mxu0 %v14573_v26  ;;  %13880 = vmatprep.subr.bf16.mxu1 %v14574_v55  ;;  %v14615_v26 = vld [vmem:[#allocation11 + $0x9f0] sm:$0xff]  }
 0x758   : > { %13902 = vmatprep.subr.bf16.mxu0 %v14575_v5 }
 0x75a   : > { %13881 = vmatpush3.bf16.msra.mxu1 %v14576_v7 }
 0x75b   : > { %13903 = vmatpush3.bf16.msra.mxu0 %v14577_v9  ;;  %13882 = vmatprep.subr.bf16.mxu1 %v14578_v15 }
 0x75c   : > { %v13580_v34 = vpop.f32.mrb[100].mxu1  ;;  %13904 = vmatprep.subr.bf16.mxu0 %v14579_v27  ;;  %v14616_v27 = vld [vmem:[#allocation11 + $0x930] sm:$0xff]  }
 0x75d   : > { %v13602_v28 = vpop.f32.mrb[108].mxu0  ;;  %v13581_v61 = vpop.f32.mrb[101].mxu1 }
 0x75e   : > { %v13582_v53 = vadd.f32 %v13581_v61, %v13580_v34  ;;  %v13603_v63 = vpop.f32.mrb[109].mxu0  ;;  %v13583_v59 = vpop.f32.mrb[102].mxu1  ;;  %13883 = vmatpush3.bf16.msra.mxu1 %v14580_v51  ;;  %v14617_v34 = vld [vmem:[#allocation11 + $0x9b0] sm:$0xff]   ;;  %v14619_v61 = vld [vmem:[#allocation11 + $0x9f8] sm:$0xff]  }
 0x75f   : > { %v13604_v30 = vadd.f32 %v13603_v63, %v13602_v28  ;;  %v13605_v50 = vpop.f32.mrb[110].mxu0  ;;  %13905 = vmatpush3.bf16.msra.mxu0 %v14581_v10  ;;  %v13584_v13 = vpop.f32.mrb[103].mxu1  ;;  %13884 = vmatprep.subr.bf16.mxu1 %v14582_v43  ;;  %v14620_v63 = vld [vmem:[#allocation11 + $0x938] sm:$0xff]  }
 0x760   : > { %v13606_v42 = vpop.f32.mrb[111].mxu0  ;;  %13906 = vmatprep.subr.bf16.mxu0 %v14583_v47  ;;  %v14618_v47 = vld [vmem:[#allocation11 + $0x978] sm:$0xff]  }
 0x761   : > { %v9163_v17 = vadd.f32 %v13604_v30, %v13582_v53  ;;  %v11690_v30 = vrot.slane %v16582_v20, 1 }
 0x762   : > { %13885 = vmatpush3.bf16.msra.mxu1 %v14584_v1  ;;  %v14621_v1 = vld [vmem:[#allocation11 + $0x9b8] sm:$0xff]  }
 0x763   : > { %v16576_v2 = vadd.f32 %v9163_v17, %v16561_v46  ;;  %13907 = vmatpush3.bf16.msra.mxu0 %v14585_v16  ;;  %13886 = vmatprep.subr.bf16.mxu1 %v14586_v38  ;;  %v14594_v46 = vld [vmem:[#allocation11 + $0x948] sm:$0xff]  }
 0x764   : > { %13908 = vmatprep.subr.bf16.mxu0 %v14587_v62 }
 0x766   : > { %13887 = vmatpush3.bf16.msra.mxu1 %v14588_v36 }
 0x767   : > { %13909 = vmatpush3.bf16.msra.mxu0 %v14589_v31  ;;  %13916 = vmatprep.subr.bf16.mxu1 %v14590_v37 }
 0x768   : > { %13938 = vmatprep.subr.bf16.mxu0 %v14591_v48 }
 0x769   : > { %11571 = vmatmul.mubr.bf16.vlgmr.msra.gmra.mrb[128].mxu1 %v16580_v40 }
 0x76a   : > { %11611 = vmatmul.mubr.bf16.vlgmr.msra.gmra.mrb[136].mxu0 %v16582_v20  ;;  %13917 = vmatpush3.bf16.msra.mxu1 %v14592_v3 }
 0x76b   : > { %11920 = vmatprep.mubr.bf16.mxu1 %v11689_v14  ;;  %13939 = vmatpush3.bf16.msra.mxu0 %v14593_v39 }
 0x76c   : > { %11960 = vmatprep.mubr.bf16.mxu0 %v11691_v35  ;;  %13918 = vmatprep.subr.bf16.mxu1 %v14594_v46 }
 0x76d   : > { %13940 = vmatprep.subr.bf16.mxu0 %v14595_v21 }
 0x76e   : > { %13919 = vmatpush3.bf16.msra.mxu1 %v14596_v12 }
 0x76f   : > { %13941 = vmatpush3.bf16.msra.mxu0 %v14597_v49  ;;  %13920 = vmatprep.subr.bf16.mxu1 %v14598_v0  ;;  %v14622_v49 = vld [vmem:[#allocation15] sm:$0xff]   ;;  %v14623_v0 = vld [vmem:[#allocation15 + $0x8] sm:$0xff]  }
 0x770   : > { %13942 = vmatprep.subr.bf16.mxu0 %v14599_v8  ;;  %v14624_v8 = vld [vmem:[#allocation15 + $0x10] sm:$0xff]  }
 0x772   : > { %13921 = vmatpush3.bf16.msra.mxu1 %v14600_v56  ;;  %v14625_v56 = vld [vmem:[#allocation15 + $0x18] sm:$0xff]  }
 0x773   : > { %13943 = vmatpush3.bf16.msra.mxu0 %v14601_v58  ;;  %13922 = vmatprep.subr.bf16.mxu1 %v14602_v57  ;;  %v14626_v58 = vld [vmem:[#allocation15 + $0x20] sm:$0xff]  }
 0x774   : > { %13944 = vmatprep.subr.bf16.mxu0 %v14603_v44 }
 0x776   : > { %13923 = vmatpush3.bf16.msra.mxu1 %v14604_v19 }
 0x777   : > { %13945 = vmatpush3.bf16.msra.mxu0 %v14605_v24  ;;  %13924 = vmatprep.subr.bf16.mxu1 %v14606_v54 }
 0x778   : > { %13946 = vmatprep.subr.bf16.mxu0 %v14607_v11 }
 0x77a   : > { %13925 = vmatpush3.bf16.msra.mxu1 %v14608_v23 }
 0x77b   : > { %13947 = vmatpush3.bf16.msra.mxu0 %v14609_v29  ;;  %13926 = vmatprep.subr.bf16.mxu1 %v14610_v32 }
 0x77c   : > { %v13624_v52 = vpop.f32.mrb[104].mxu1  ;;  %13948 = vmatprep.subr.bf16.mxu0 %v14611_v60 }
 0x77d   : > { %v13646_v55 = vpop.f32.mrb[112].mxu0  ;;  %v13625_v5 = vpop.f32.mrb[105].mxu1 }
 0x77e   : > { %v13626_v7 = vadd.f32 %v13625_v5, %v13624_v52  ;;  %v13647_v9 = vpop.f32.mrb[113].mxu0  ;;  %v13627_v15 = vpop.f32.mrb[106].mxu1  ;;  %13927 = vmatpush3.bf16.msra.mxu1 %v14612_v25  ;;  %v14628_v52 = vld [vmem:[#allocation15 + $0x30] sm:$0xff]  }
 0x77f   : > { %v13648_v51 = vadd.f32 %v13647_v9, %v13646_v55  ;;  %v13649_v10 = vpop.f32.mrb[114].mxu0  ;;  %13949 = vmatpush3.bf16.msra.mxu0 %v14613_v45  ;;  %v13628_v43 = vpop.f32.mrb[107].mxu1  ;;  %13928 = vmatprep.subr.bf16.mxu1 %v14614_v18  ;;  %v14627_v18 = vld [vmem:[#allocation15 + $0x28] sm:$0xff]  }
 0x780   : > { %v13650_v28 = vpop.f32.mrb[115].mxu0  ;;  %13950 = vmatprep.subr.bf16.mxu0 %v14615_v26  ;;  %v14629_v26 = vld [vmem:[#allocation15 + $0x38] sm:$0xff]  }
 0x781   : > { %v9509_v53 = vadd.f32 %v13648_v51, %v13626_v7 }
 0x782   : > { %13929 = vmatpush3.bf16.msra.mxu1 %v14616_v27 }
 0x783   : > { %v9514_v59 = vadd.f32 %v9509_v53, %v16576_v2  ;;  %13951 = vmatpush3.bf16.msra.mxu0 %v14617_v34  ;;  %13930 = vmatprep.subr.bf16.mxu1 %v14618_v47 }
 0x784   : > { %13952 = vmatprep.subr.bf16.mxu0 %v14619_v61 }
 0x786   : > { %13931 = vmatpush3.bf16.msra.mxu1 %v14620_v63 }
 0x787   : > { %13953 = vmatpush3.bf16.msra.mxu0 %v14621_v1  ;;  %13975 = vmatprep.subr.bf16.mxu1 %v14982_v33 }
 0x789   : > { %11921 = vmatmul.mubr.bf16.vlgmr.msra.gmra.mrb[132].mxu1 %v11688_v6 }
 0x78a   : > { %11961 = vmatmul.mubr.bf16.vlgmr.msra.gmra.mrb[140].mxu0 %v11690_v30  ;;  %13991 = vmatprep.mubr.msk.bf16.mxu1 %vm14983_vm7, %v14982_v33 }
 0x78b   : > { %13976 = vmatpush3.bf16.msra.mxu1 %v14622_v49 }
 0x78c   : > { %13977 = vmatprep.subr.bf16.mxu1 %v14982_v33 }
 0x78f   : > { %13978 = vmatpush3.bf16.msra.mxu1 %v14623_v0 }
 0x790   : > { %13979 = vmatprep.subr.bf16.mxu1 %v14982_v33 }
 0x793   : > { %13980 = vmatpush3.bf16.msra.mxu1 %v14624_v8 }
 0x794   : > { %13981 = vmatprep.subr.bf16.mxu1 %v14982_v33 }
 0x797   : > { %13982 = vmatpush3.bf16.msra.mxu1 %v14625_v56 }
 0x798   : > { %13983 = vmatprep.subr.bf16.mxu1 %v14982_v33 }
 0x79b   : > { %13984 = vmatpush3.bf16.msra.mxu1 %v14626_v58 }
 0x79c   : > { %v13668_v50 = vpop.f32.mrb[108].mxu1  ;;  %13985 = vmatprep.subr.bf16.mxu1 %v14982_v33 }
 0x79d   : > { %v13690_v13 = vpop.f32.mrb[116].mxu0  ;;  %v13669_v16 = vpop.f32.mrb[109].mxu1 }
 0x79e   : > { %v13670_v38 = vadd.f32 %v13669_v16, %v13668_v50  ;;  %v13691_v4 = vpop.f32.mrb[117].mxu0  ;;  %v13671_v42 = vpop.f32.mrb[110].mxu1 }
 0x79f   : > { %v13692_v62 = vadd.f32 %v13691_v4, %v13690_v13  ;;  %v13693_v17 = vpop.f32.mrb[118].mxu0  ;;  %v13672_v36 = vpop.f32.mrb[111].mxu1  ;;  %13986 = vmatpush3.bf16.msra.mxu1 %v14627_v18 }
 0x7a0   : > { %v13694_v2 = vpop.f32.mrb[119].mxu0  ;;  %13987 = vmatprep.subr.bf16.mxu1 %v14982_v33 }
 0x7a1   : > { %v9855_v31 = vadd.f32 %v13692_v62, %v13670_v38 }
 0x7a3   : > { %v9860_v41 = vadd.f32 %v9855_v31, %v9514_v59  ;;  %13988 = vmatpush3.bf16.msra.mxu1 %v14628_v52 }
 0x7a4   : > { %13989 = vmatprep.subr.bf16.mxu1 %v14982_v33 }
 0x7a7   : > { %13990 = vmatpush3.bf16.msra.mxu1 %v14629_v26 }
 0x7bc   : > { %v13712_v37 = vpop.f32.mrb[112].mxu1 }
 0x7bd   : > { %v13734_v22 = vpop.f32.mrb[120].mxu0  ;;  %v13713_v48 = vpop.f32.mrb[113].mxu1 }
 0x7be   : > { %v13714_v3 = vadd.f32 %v13713_v48, %v13712_v37  ;;  %v13735_v40 = vpop.f32.mrb[121].mxu0  ;;  %v13715_v39 = vpop.f32.mrb[114].mxu1 }
 0x7bf   : > { %v13736_v20 = vadd.f32 %v13735_v40, %v13734_v22  ;;  %v13737_v46 = vpop.f32.mrb[122].mxu0  ;;  %v13716_v14 = vpop.f32.mrb[115].mxu1 }
 0x7c0   : > { %v13738_v21 = vpop.f32.mrb[123].mxu0 }
 0x7c1   : > { %v10213_v35 = vadd.f32 %v13736_v20, %v13714_v3 }
 0x7c3   : > { %v10218_v12 = vadd.f32 %v10213_v35, %v9860_v41 }
 0x7dc   : > { %v13756_v57 = vpop.f32.mrb[116].mxu1 }
 0x7dd   : > { %v13778_v44 = vpop.f32.mrb[124].mxu0  ;;  %v13757_v19 = vpop.f32.mrb[117].mxu1 }
 0x7de   : > { %v13758_v24 = vadd.f32 %v13757_v19, %v13756_v57  ;;  %v13779_v54 = vpop.f32.mrb[125].mxu0  ;;  %v13759_v11 = vpop.f32.mrb[118].mxu1 }
 0x7df   : > { %v13780_v23 = vadd.f32 %v13779_v54, %v13778_v44  ;;  %v13781_v29 = vpop.f32.mrb[126].mxu0  ;;  %v13760_v32 = vpop.f32.mrb[119].mxu1  ;;  %v11987_v44 = vld [vmem:[#allocation17] sm:$0x1] }
 0x7e0   : > { %v13782_v60 = vpop.f32.mrb[127].mxu0 }
 0x7e1   : > { %v10563_v25 = vadd.f32 %v13780_v23, %v13758_v24 }
 0x7e3   : > { %v10568_v45 = vadd.f32 %v10563_v25, %v10218_v12 }
 0x7fc   : > { %v13800_v55 = vpop.f32.mrb[120].mxu1 }
 0x7fd   : > { %v13822_v5 = vpop.f32.mrb[128].mxu0  ;;  %v13801_v7 = vpop.f32.mrb[121].mxu1 }
 0x7fe   : > { %v13802_v9 = vadd.f32 %v13801_v7, %v13800_v55  ;;  %v13823_v15 = vpop.f32.mrb[129].mxu0  ;;  %v13803_v27 = vpop.f32.mrb[122].mxu1 }
 0x7ff   : > { %v13824_v51 = vadd.f32 %v13823_v15, %v13822_v5  ;;  %v13825_v10 = vpop.f32.mrb[130].mxu0  ;;  %v13804_v43 = vpop.f32.mrb[123].mxu1 }
 0x800   : > { %v13826_v34 = vpop.f32.mrb[131].mxu0 }
 0x801   : > { %v10909_v47 = vadd.f32 %v13824_v51, %v13802_v9 }
 0x803   : > { %v10914_v28 = vadd.f32 %v10909_v47, %v10568_v45 }
 0x81c   : > { %v13844_v61 = vpop.f32.mrb[124].mxu1 }
 0x81d   : > { %v13866_v53 = vpop.f32.mrb[132].mxu0  ;;  %v13845_v63 = vpop.f32.mrb[125].mxu1 }
 0x81e   : > { %v13846_v59 = vadd.f32 %v13845_v63, %v13844_v61  ;;  %v13867_v1 = vpop.f32.mrb[133].mxu0  ;;  %v13847_v6 = vpop.f32.mrb[126].mxu1 }
 0x81f   : > { %v13868_v33 = vadd.f32 %v13867_v1, %v13866_v53  ;;  %v13869_v30 = vpop.f32.mrb[134].mxu0  ;;  %v13848_v50 = vpop.f32.mrb[127].mxu1 }
 0x820   : > { %v13870_v13 = vpop.f32.mrb[135].mxu0 }
 0x821   : > { %v11255_v16 = vadd.f32 %v13868_v33, %v13846_v59 }
 0x823   : > { %v11260_v38 = vadd.f32 %v11255_v16, %v10914_v28 }
 0x83c   : > { %v13888_v4 = vpop.f32.mrb[128].mxu1 }
 0x83d   : > { %v13910_v42 = vpop.f32.mrb[136].mxu0  ;;  %v13889_v62 = vpop.f32.mrb[129].mxu1 }
 0x83e   : > { %v13890_v17 = vadd.f32 %v13889_v62, %v13888_v4  ;;  %v13911_v36 = vpop.f32.mrb[137].mxu0  ;;  %v13891_v2 = vpop.f32.mrb[130].mxu1 }
 0x83f   : > { %v13912_v31 = vadd.f32 %v13911_v36, %v13910_v42  ;;  %v13913_v41 = vpop.f32.mrb[138].mxu0  ;;  %v13892_v37 = vpop.f32.mrb[131].mxu1 }
 0x840   : > { %v13914_v22 = vpop.f32.mrb[139].mxu0 }
 0x841   : > { %v11613_v48 = vadd.f32 %v13912_v31, %v13890_v17 }
 0x843   : > { %v11618_v3 = vadd.f32 %v11613_v48, %v11260_v38 }
 0x85c   : > { %v13932_v40 = vpop.f32.mrb[132].mxu1 }
 0x85d   : > { %v13954_v39 = vpop.f32.mrb[140].mxu0  ;;  %v13933_v20 = vpop.f32.mrb[133].mxu1 }
 0x85e   : > { %v13934_v46 = vadd.f32 %v13933_v20, %v13932_v40  ;;  %v13955_v14 = vpop.f32.mrb[141].mxu0  ;;  %v13935_v21 = vpop.f32.mrb[134].mxu1 }
 0x85f   : > { %v13956_v35 = vadd.f32 %v13955_v14, %v13954_v39  ;;  %v13957_v12 = vpop.f32.mrb[142].mxu0  ;;  %v13936_v49 = vpop.f32.mrb[135].mxu1 }
 0x860   : > { %v13958_v0 = vpop.f32.mrb[143].mxu0 }
 0x861   : > { %v11963_v8 = vadd.f32 %v13956_v35, %v13934_v46 }
 0x863   : > { %v11968_v56 = vadd.f32 %v11963_v8, %v11618_v3 }
 0x865   : > { %v11969_v58 = vmax.f32 %v11968_v56, 0.0 }
 0x867   : > { %v11970_v57 = vpack.c.bf16 %v11969_v58, %v11969_v58 }
 0x869   : > { %13992 = vmatmul.mubr.bf16.vlgmr.msra.gmra.mrb[136].mxu1 %v11970_v57 }
 0x93c   : > { %v12070_v19 = vpop.f32.mrb[136].mxu1 }
 0x93d   : > { %v12071_v24 = vadd.f32 %v12070_v19, %v11987_v44  ;;  %v13993_v54 = vpop.f32.mrb[137].mxu1 }
 0x93e   : > { %v12073_v11 = vpop.f32.mrb[138].mxu1 }
 0x93f   : > { %12076 = vst [vmem:[%s510_s17] sm:$0x1] %v12071_v24  ;;  %v13994_v23 = vpop.f32.mrb[139].mxu1 }
 0x940   : > { %14897 = shalt.err (!%p14894_p9)
}
 0x941   : > { %s14898_s29 = scalar_lea.hbm %s16606_s30, 16  ;;  %s14902_s7 = scalar_lea.hbm %s16659_s11, 32 }
 0x942   : > { %p14899_p12 = scmp.ne.s32.totalorder %s16606_s30, %s14898_s29  ;;  %p14903_p3 = scmp.lt.u32.totalorder %s16606_s30, %s16659_s11 }
 0x943   : > { %p14904_p4 = scmp.lt.u32.totalorder %s14902_s7, %s14898_s29  ;;  %p14906_p8 = scmp.lt.u32.totalorder %s14898_s29, %s16606_s30 }
 0x944   : > { %p14900_p10 = pnand %p14899_p12, %p16770_p11 }
 0x945   : > { %p14905_p7 = por %p14904_p4, %p14903_p3 }
 0x946   : > { %p14901_p2 = pneg %p14900_p10 }
 0x947   : > { %p14907_p13 = por %p14906_p8, %p14905_p7 }
 0x949   : > { %p14908_p1 = pnand %p14907_p13, %p14901_p2 }
 0x94b   : > { %14911 = shalt.err (!%p14908_p1)
}
 0x94c   : > { %14180 = dma.vmem_to_hbm [thread:$0]  (%p16770_p11), %s16608_s9, 16, %s16606_s30, %s12078_s16  }
 0x94d PF: > { %s16771_s26 = sld [smem:[#allocation25_spill]]  ;;  %s16772_s24 = sld [smem:[#allocation29_spill]] }
 0x94e   : > { %p14232_p0 = scmp.ge.s32.totalorder %s14966_s20, 2 }
 0x953   : > { %s12102_s3 = sand.u32 1, %s16771_s26   ;;  %p16773_p6 = scmp.ne.s32.totalorder %s16772_s24, 0 }
 0x954   : > { %s12103_s23 = scalar_lea.sflag [#allocation5], %s12102_s3 }
 0x955   : > { %p14211_p5 = pnand %p14232_p0, %p16773_p6 }
 0x957   : > { %14949 = dma.done.wait (!%p14211_p5), %s12103_s23, 16  }
 0x958   : > { %14951 = vsyncadd (!%p14211_p5), %s12103_s23, 4294967280  ;;  %s16774_s20 = sld [smem:[#allocation27_spill]]  ;;  %s16775_s28 = sld [smem:[#allocation26_spill]] }
 0x959   : > { %s16776_s19 = sld [smem:[#allocation28_spill]]  ;;  %s16777_s17 = smov %s14958_s18 }
 0x95e   : > { %p26_p9 = scmp.ge.s32.totalorder %s16774_s20, 4   ;;  %s16778_s18 = smov %s16775_s28 }
 0x960   :  { %28 = sbr.rel (!%p26_p9) target bundleno = 13 (0xd), region = 152 }
 0x967   :  { %12107 = vsyncpa [#allocation4], 1 }
 0x968   :  { %12109 = vsyncpa [#allocation4 + $0x1], 1 }
 0x969   :  { %12110 = vsyncpa [#allocation7], 1 }
 0x96a   :  { %12111 = vsyncpa [#allocation10], 1 }
 0x96b   :  { %12112 = vsyncpa [#allocation13], 1 }
 0x96c   :  { %12113 = vsyncpa [#allocation16], 1 }
 0x96d   :  { %12114 = vsyncpa [#allocation5], 1 }
 0x96e   :  { %12116 = vsyncpa [#allocation5 + $0x1], 1 }

</bundles_post_ra>
